<compile_context>
chip_gen: v6e
topology: v6e:2x2x1
jax: 0.10.0
libtpu: 0.0.40
codegen_flags: <defaults>
</compile_context>

<pallas_src>
import functools
import random

import jax
import jax.numpy as jnp
from jax.experimental import pallas as pl
from jax.experimental.pallas import tpu as pltpu

C, H, W = 128, 28, 28
HW = H * W

random.seed(0)  # deterministic stand-in for the module's random shift choice
SHIFT_DIRECTION = (random.random() > 0.5) * 2 - 1  # == +1 with seed 0


def _kernel(slab_ref, wa_ref, wb_ref, w1_ref, out_ref, *, shift):
    # slab_ref: (256, 840) bf16.  Rows [0:128] = slab_hi, [128:256] = slab_lo
    #           (hi/lo bf16 split of the f32 input); lane = n_pad*28 + m where
    #           n is the convolved axis (zero-padded by one row on each side).
    # wa_ref  : (3, 128, 256) bf16.  Per-tap [W2k_hi | W2k_hi]  (C_out x 2*C_in).
    # wb_ref  : (3, 128, 128) bf16.  Per-tap  W2k_lo            (C_out x   C_in).
    # w1_ref  : (128, 2) f32.  Column 0 = "self" coeff, column 1 = "rolled"
    #           coeff (already ordered for the shift direction by the wrapper).
    # out_ref : (128, 784) f32.  Row = C_out, lane = n*28 + m  (final layout).

    # 3-tap channel-mixing conv, accumulated straight into out_ref (VMEM).
    # Each tap is a 3-pass bf16 product with ~f32 accuracy:
    #   W_hi@S_hi + W_hi@S_lo   (one K=256 MXU matmul)
    # + W_lo@S_hi               (one K=128 MXU matmul);  lo*lo (~2^-16) dropped.
    for k in range(3):
        rhs = slab_ref[:, pl.ds(k * W, HW)]          # (256, 784) bf16 tap window
        contrib = jnp.dot(wa_ref[k], rhs, preferred_element_type=jnp.float32)
        contrib = contrib + jnp.dot(wb_ref[k], rhs[:C, :],
                                    preferred_element_type=jnp.float32)
        if k == 0:
            out_ref[...] = contrib
        else:
            out_ref[...] += contrib

    # Epilogue: y = conv * w1[:,0] + roll_n(conv, shift) * w1[:,1].
    # A cyclic roll by +/-1 along n is a cyclic lane roll by +/-28 in the
    # (n*28 + m) layout; use the non-negative equivalent modulo 784.
    acc = out_ref[...]
    rolled = pltpu.roll(acc, (shift * W) % HW, axis=1)
    out_ref[...] = acc * w1_ref[:, 0:1] + rolled * w1_ref[:, 1:2]


@functools.partial(jax.jit, static_argnums=3)
def forward(x, w1, w2, shift):
    # ---- layout glue (fused by XLA under jit): no arithmetic beyond casts ---
    # x[0] is (C_in, m, n) with n the convolved axis.  The module's output has
    # spatial axes swapped (n before m), so one channel-major spatial swap is
    # semantically unavoidable; do it on the input so conv taps are contiguous
    # 28-lane-offset windows of a single slab.
    xf32 = x[0].astype(jnp.float32)
    xt = jnp.swapaxes(xf32, 1, 2)                    # (C_in, n, m)
    # The final torch.roll along the output's last axis (m) commutes with the
    # conv/scale (nothing mixes along m), so fold it into the input here.
    xr = jnp.roll(xt, shift, axis=2)
    xp = jnp.pad(xr, ((0, 0), (1, 1), (0, 0)))       # (C_in, 30, 28) pad conv axis
    xfl = xp.reshape(C, (H + 2) * W)                 # (128, 840)
    s_hi = xfl.astype(jnp.bfloat16)
    s_lo = (xfl - s_hi.astype(jnp.float32)).astype(jnp.bfloat16)
    slab = jnp.concatenate([s_hi, s_lo], axis=0)     # (256, 840) bf16

    # Weights: pre-split and pre-stack (tiny; negligible wrapper cost).
    w2f = w2.astype(jnp.float32)                     # (C_out, 3, C_in)
    w2_hi = w2f.astype(jnp.bfloat16)
    w2_lo = (w2f - w2_hi.astype(jnp.float32)).astype(jnp.bfloat16)
    wa = jnp.transpose(jnp.concatenate([w2_hi, w2_hi], axis=2), (1, 0, 2))  # (3,128,256)
    wb = jnp.transpose(w2_lo, (1, 0, 2))                                     # (3,128,128)

    w1f = w1.astype(jnp.float32)                     # (128, 2)
    # Order the two coefficients as [self, rolled] for the chosen shift:
    #   shift=+1: y[n] = conv[n]*W1[:,0] + conv[(n-1)%28]*W1[:,1]
    #   shift=-1: y[n] = conv[n]*W1[:,1] + conv[(n+1)%28]*W1[:,0]
    w1sel = w1f if shift == 1 else w1f[:, ::-1]

    bytes_accessed = (slab.size * 2 + wa.size * 2 + wb.size * 2
                      + w1sel.size * 4 + C * HW * 4)
    out = pl.pallas_call(
        functools.partial(_kernel, shift=shift),
        out_shape=jax.ShapeDtypeStruct((C, HW), jnp.float32),
        in_specs=[pl.BlockSpec(memory_space=pltpu.MemorySpace.VMEM)] * 4,
        out_specs=pl.BlockSpec(memory_space=pltpu.MemorySpace.VMEM),
        cost_estimate=pl.CostEstimate(
            flops=2 * C * (3 * C) * HW * 3,          # 3 taps x (K=256 + K=128)
            transcendentals=0,
            bytes_accessed=bytes_accessed),
    )(slab, wa, wb, w1sel)

    # (C_out, n*28+m) is already the final layout: just reshape.
    return out.reshape(1, C, H, W)


def reference(x, w1, w2, shift):
    """Faithful JAX translation of the PyTorch forward (validation only)."""
    hp = jax.lax.Precision.HIGHEST
    t3 = jnp.transpose(x, (0, 3, 1, 2))                 # einsum 'ikjl->ilkj'
    t3 = t3.reshape(1, 1, 28, 3584)
    p = jnp.pad(t3, ((0, 0), (0, 0), (1, 1), (0, 0)))   # unfold padding (1,0)
    cols = jnp.stack([p[0, 0, k:k + 28, :] for k in range(3)], axis=0)
    t3 = cols.reshape(1, 3, 28, 128, 28)
    t4 = jnp.einsum('lknjm,ikj->linm', t3, w2, precision=hp)
    t5 = jnp.einsum('kiml,ij->kimjl', t4, w1, precision=hp)
    t6 = t5.reshape(1, 128, 56, 28)
    t6 = jnp.roll(t6, shift, axis=2)
    t6 = t6.reshape(1, 128, 28, 2, 28)
    t6 = jnp.sum(t6, axis=3)
    return jnp.roll(t6, shift, axis=3)


if __name__ == "__main__":
    key = jax.random.PRNGKey(0)
    kx, k1, k2 = jax.random.split(key, 3)
    # Shapes are dictated by the module (reshape constants / weight shapes).
    x = jax.random.normal(kx, (1, C, H, W), dtype=jnp.float32)
    w1 = jax.random.normal(k1, (128, 2), dtype=jnp.float32)       # weights[0]
    w2 = jax.random.normal(k2, (128, 3, 128), dtype=jnp.float32)  # weights[1]

    # Validate the module's shift first, then the opposite direction too
    # (review correctness concern: the shift=-1 path was previously untested).
    for shift in (SHIFT_DIRECTION, -SHIFT_DIRECTION):
        y = jax.block_until_ready(forward(x, w1, w2, shift))
        y_ref = jax.block_until_ready(reference(x, w1, w2, shift))
        err = float(jnp.max(jnp.abs(y - y_ref)))
        scale = float(jnp.max(jnp.abs(y_ref))) + 1e-6
        assert y.shape == (1, 128, 28, 28), y.shape
        assert err <= 1e-3 * scale, (shift, err, scale)

    print("KERNEL_OK")
</pallas_src>

<mosaic_0001>
module attributes {stable_mosaic.version = 11 : i64} {
  func.func @_kernel(%arg0: memref<256x840xbf16, #tpu.memory_space<vmem>>, %arg1: memref<3x128x256xbf16, #tpu.memory_space<vmem>>, %arg2: memref<3x128x128xbf16, #tpu.memory_space<vmem>>, %arg3: memref<128x2xf32, #tpu.memory_space<vmem>>, %arg4: memref<128x784xf32, #tpu.memory_space<vmem>>) attributes {dimension_semantics = [], scalar_prefetch = 0 : i64, scratch_operands = 0 : i64, tpu.core_type = #tpu.core_type<tc>} {
    %c0 = arith.constant 0 : index
    %c0_0 = arith.constant 0 : index
    %0 = vector.load %arg0[%c0, %c0_0] : memref<256x840xbf16, #tpu.memory_space<vmem>>, vector<256x784xbf16>
    %c0_1 = arith.constant 0 : index
    %c0_2 = arith.constant 0 : index
    %c0_3 = arith.constant 0 : index
    %1 = vector.load %arg1[%c0_1, %c0_2, %c0_3] : memref<3x128x256xbf16, #tpu.memory_space<vmem>>, vector<1x128x256xbf16>
    %2 = vector.shape_cast %1 : vector<1x128x256xbf16> to vector<128x256xbf16>
    %cst = arith.constant dense<0.000000e+00> : vector<128x784xf32>
    %3 = tpu.matmul %2, %0, %cst {dimension_numbers = #tpu.dot_dimension_numbers<[1], [0], [0], [1], [0, 0, 1, 1], [], []>} : vector<128x256xbf16>, vector<256x784xbf16>, vector<128x784xf32> -> vector<128x784xf32>
    %c0_4 = arith.constant 0 : index
    %c0_5 = arith.constant 0 : index
    %c0_6 = arith.constant 0 : index
    %4 = vector.load %arg2[%c0_4, %c0_5, %c0_6] : memref<3x128x128xbf16, #tpu.memory_space<vmem>>, vector<1x128x128xbf16>
    %5 = vector.shape_cast %4 : vector<1x128x128xbf16> to vector<128x128xbf16>
    %6 = vector.extract_strided_slice %0 {offsets = [0, 0], sizes = [128, 784], strides = [1, 1]} : vector<256x784xbf16> to vector<128x784xbf16>
    %cst_7 = arith.constant dense<0.000000e+00> : vector<128x784xf32>
    %7 = tpu.matmul %5, %6, %cst_7 {dimension_numbers = #tpu.dot_dimension_numbers<[1], [0], [0], [1], [0, 0, 1, 1], [], []>} : vector<128x128xbf16>, vector<128x784xbf16>, vector<128x784xf32> -> vector<128x784xf32>
    %8 = arith.addf %3, %7 : vector<128x784xf32>
    %c0_8 = arith.constant 0 : index
    %c0_9 = arith.constant 0 : index
    %9 = vector.load %arg4[%c0_8, %c0_9] : memref<128x784xf32, #tpu.memory_space<vmem>>, vector<128x784xf32>
    tpu.vector_store %arg4[%c0_8, %c0_9], %8 {strides = array<i32>} : memref<128x784xf32, #tpu.memory_space<vmem>>, vector<128x784xf32>,
    %c0_10 = arith.constant 0 : index
    %c28 = arith.constant 28 : index
    %10 = vector.load %arg0[%c0_10, %c28] : memref<256x840xbf16, #tpu.memory_space<vmem>>, vector<256x784xbf16>
    %c1 = arith.constant 1 : index
    %c0_11 = arith.constant 0 : index
    %c0_12 = arith.constant 0 : index
    %11 = vector.load %arg1[%c1, %c0_11, %c0_12] : memref<3x128x256xbf16, #tpu.memory_space<vmem>>, vector<1x128x256xbf16>
    %12 = vector.shape_cast %11 : vector<1x128x256xbf16> to vector<128x256xbf16>
    %cst_13 = arith.constant dense<0.000000e+00> : vector<128x784xf32>
    %13 = tpu.matmul %12, %10, %cst_13 {dimension_numbers = #tpu.dot_dimension_numbers<[1], [0], [0], [1], [0, 0, 1, 1], [], []>} : vector<128x256xbf16>, vector<256x784xbf16>, vector<128x784xf32> -> vector<128x784xf32>
    %c1_14 = arith.constant 1 : index
    %c0_15 = arith.constant 0 : index
    %c0_16 = arith.constant 0 : index
    %14 = vector.load %arg2[%c1_14, %c0_15, %c0_16] : memref<3x128x128xbf16, #tpu.memory_space<vmem>>, vector<1x128x128xbf16>
    %15 = vector.shape_cast %14 : vector<1x128x128xbf16> to vector<128x128xbf16>
    %16 = vector.extract_strided_slice %10 {offsets = [0, 0], sizes = [128, 784], strides = [1, 1]} : vector<256x784xbf16> to vector<128x784xbf16>
    %cst_17 = arith.constant dense<0.000000e+00> : vector<128x784xf32>
    %17 = tpu.matmul %15, %16, %cst_17 {dimension_numbers = #tpu.dot_dimension_numbers<[1], [0], [0], [1], [0, 0, 1, 1], [], []>} : vector<128x128xbf16>, vector<128x784xbf16>, vector<128x784xf32> -> vector<128x784xf32>
    %18 = arith.addf %13, %17 : vector<128x784xf32>
    %c0_18 = arith.constant 0 : index
    %c0_19 = arith.constant 0 : index
    %19 = vector.load %arg4[%c0_18, %c0_19] : memref<128x784xf32, #tpu.memory_space<vmem>>, vector<128x784xf32>
    %20 = arith.addf %19, %18 : vector<128x784xf32>
    %c0_20 = arith.constant 0 : index
    %c0_21 = arith.constant 0 : index
    %21 = vector.load %arg4[%c0_20, %c0_21] : memref<128x784xf32, #tpu.memory_space<vmem>>, vector<128x784xf32>
    tpu.vector_store %arg4[%c0_20, %c0_21], %20 {strides = array<i32>} : memref<128x784xf32, #tpu.memory_space<vmem>>, vector<128x784xf32>,
    %c0_22 = arith.constant 0 : index
    %c56 = arith.constant 56 : index
    %22 = vector.load %arg0[%c0_22, %c56] : memref<256x840xbf16, #tpu.memory_space<vmem>>, vector<256x784xbf16>
    %c2 = arith.constant 2 : index
    %c0_23 = arith.constant 0 : index
    %c0_24 = arith.constant 0 : index
    %23 = vector.load %arg1[%c2, %c0_23, %c0_24] : memref<3x128x256xbf16, #tpu.memory_space<vmem>>, vector<1x128x256xbf16>
    %24 = vector.shape_cast %23 : vector<1x128x256xbf16> to vector<128x256xbf16>
    %cst_25 = arith.constant dense<0.000000e+00> : vector<128x784xf32>
    %25 = tpu.matmul %24, %22, %cst_25 {dimension_numbers = #tpu.dot_dimension_numbers<[1], [0], [0], [1], [0, 0, 1, 1], [], []>} : vector<128x256xbf16>, vector<256x784xbf16>, vector<128x784xf32> -> vector<128x784xf32>
    %c2_26 = arith.constant 2 : index
    %c0_27 = arith.constant 0 : index
    %c0_28 = arith.constant 0 : index
    %26 = vector.load %arg2[%c2_26, %c0_27, %c0_28] : memref<3x128x128xbf16, #tpu.memory_space<vmem>>, vector<1x128x128xbf16>
    %27 = vector.shape_cast %26 : vector<1x128x128xbf16> to vector<128x128xbf16>
    %28 = vector.extract_strided_slice %22 {offsets = [0, 0], sizes = [128, 784], strides = [1, 1]} : vector<256x784xbf16> to vector<128x784xbf16>
    %cst_29 = arith.constant dense<0.000000e+00> : vector<128x784xf32>
    %29 = tpu.matmul %27, %28, %cst_29 {dimension_numbers = #tpu.dot_dimension_numbers<[1], [0], [0], [1], [0, 0, 1, 1], [], []>} : vector<128x128xbf16>, vector<128x784xbf16>, vector<128x784xf32> -> vector<128x784xf32>
    %30 = arith.addf %25, %29 : vector<128x784xf32>
    %c0_30 = arith.constant 0 : index
    %c0_31 = arith.constant 0 : index
    %31 = vector.load %arg4[%c0_30, %c0_31] : memref<128x784xf32, #tpu.memory_space<vmem>>, vector<128x784xf32>
    %32 = arith.addf %31, %30 : vector<128x784xf32>
    %c0_32 = arith.constant 0 : index
    %c0_33 = arith.constant 0 : index
    %33 = vector.load %arg4[%c0_32, %c0_33] : memref<128x784xf32, #tpu.memory_space<vmem>>, vector<128x784xf32>
    tpu.vector_store %arg4[%c0_32, %c0_33], %32 {strides = array<i32>} : memref<128x784xf32, #tpu.memory_space<vmem>>, vector<128x784xf32>,
    %c0_34 = arith.constant 0 : index
    %c0_35 = arith.constant 0 : index
    %34 = vector.load %arg4[%c0_34, %c0_35] : memref<128x784xf32, #tpu.memory_space<vmem>>, vector<128x784xf32>
    %c28_i32 = arith.constant 28 : i32
    %35 = tpu.dynamic_rotate %34 by %c28_i32 dim 1 : vector<128x784xf32>, i32 -> vector<128x784xf32>
    %c0_36 = arith.constant 0 : index
    %c0_37 = arith.constant 0 : index
    %36 = vector.load %arg3[%c0_36, %c0_37] : memref<128x2xf32, #tpu.memory_space<vmem>>, vector<128x1xf32>
    %37 = vector.broadcast %36 : vector<128x1xf32> to vector<128x784xf32>
    %38 = arith.mulf %34, %37 : vector<128x784xf32>
    %c0_38 = arith.constant 0 : index
    %c1_39 = arith.constant 1 : index
    %39 = vector.load %arg3[%c0_38, %c1_39] : memref<128x2xf32, #tpu.memory_space<vmem>>, vector<128x1xf32>
    %40 = vector.broadcast %39 : vector<128x1xf32> to vector<128x784xf32>
    %41 = arith.mulf %35, %40 : vector<128x784xf32>
    %42 = arith.addf %38, %41 : vector<128x784xf32>
    %c0_40 = arith.constant 0 : index
    %c0_41 = arith.constant 0 : index
    %43 = vector.load %arg4[%c0_40, %c0_41] : memref<128x784xf32, #tpu.memory_space<vmem>>, vector<128x784xf32>
    tpu.vector_store %arg4[%c0_40, %c0_41], %42 {strides = array<i32>} : memref<128x784xf32, #tpu.memory_space<vmem>>, vector<128x784xf32>,
    return
  }
}

</mosaic_0001>

<bundles_post_ra>
// kernel: forward.1
= control target key start
LH: loop header
LB: loop body
LE: loop exit
PB: predicated region body
PF: predicated region fallthrough
CT: control target
= control target key end

     0   :  { %v18360_v1 = vmov 0   ;;  %s9641_s19 = smov 100   ;;  %vm2421_vm0 = vcmask 818176   ;;  %s9642_s10 = smov 72   ;;  %vm1760_vm1 = vcmask 130048   ;;  %vm4816_vm2 = vcmask 588800   ;;  %s18355_s0 = inlined_call_operand.vmem [shape: bf16[256,840], index: 0, kind: input, shape index: {}]   ;;  %s18356_s2 = inlined_call_operand.vmem [shape: bf16[3,128,128], index: 2, kind: input, shape index: {}]   ;;  %s18357_s1 = inlined_call_operand.vmem [shape: bf16[3,128,256], index: 1, kind: input, shape index: {}]   ;;  %s18358_s4 = inlined_call_operand.vmem [shape: f32[128,784], index: 4, kind: output, shape index: {}]   ;;  %s18359_s3 = inlined_call_operand.vmem [shape: f32[128,2], index: 3, kind: input, shape index: {}]  }
   0x1   :  { %v9674_v0 = vld [vmem:[%s18355_s0 + $0x8] ss:$28 sps:$4 sm:$0xff]   ;;  %546 = vmatprep.mubr.bf16.mxu0 %v18360_v1  ;;  %659 = vmatprep.mubr.bf16.mxu1 %v18360_v1  ;;  %v9690_v3 = vld [vmem:[%s18355_s0] ss:$28 sps:$4 sm:$0xff]   ;;  %v9707_v6 = vld [vmem:[%s18355_s0 + $0x194] ss:$28 sps:$4 sm:$0xff]  }
   0x2   :  { %v9681_v2 = vld [vmem:[%s18355_s0 + $0xc] ss:$28 sps:$4 sm:$0xff]   ;;  %9157 = vset.pattern.permute.xlu0 %v18360_v1  ;;  %9158 = vset.pattern.permute.xlu1 %v18360_v1  ;;  %v9695_v4 = vld [vmem:[%s18355_s0 + $0x4] ss:$28 sps:$4 sm:$0xff]   ;;  %v9725_v9 = vld [vmem:[%s18355_s0 + $0x154] ss:$28 sps:$4 sm:$0xff]  }
   0x3   :  { %2313 = vrot.lane.b32.xlu1 %v9674_v0, %s9641_s19  ;;  %v9700_v5 = vld [vmem:[%s18355_s0 + $0x18c] ss:$28 sps:$4 sm:$0xff]   ;;  %2309 = vrot.lane.b32.xlu0 %v9690_v3, %s9641_s19  ;;  %v9733_v10 = vld [vmem:[%s18355_s0 + $0x15c] ss:$28 sps:$4 sm:$0xff]   ;;  %s9644_s14 = smov 16   ;;  %s9645_s9 = smov 12  }
   0x4   :  { %v9712_v7 = vld [vmem:[%s18355_s0 + $0x188] ss:$28 sps:$4 sm:$0xff]   ;;  %514 = vmatprep.subr.bf16.mxu0 %v9700_v5  ;;  %v9718_v8 = vld [vmem:[%s18355_s0 + $0x190] ss:$28 sps:$4 sm:$0xff]   ;;  %627 = vmatprep.subr.bf16.mxu1 %v9707_v6  ;;  %v9743_v12 = vld [vmem:[%s18355_s0 + $0x158] ss:$28 sps:$4 sm:$0xff]  }
   0x5   :  { %515 = vmatpush1.bf16.msra.mxu0 %v9712_v7  ;;  %628 = vmatpush1.bf16.msra.mxu1 %v9718_v8  ;;  %v9738_v11 = vld [vmem:[%s18355_s0 + $0x150] ss:$28 sps:$4 sm:$0xff]   ;;  %v9757_v14 = vld [vmem:[%s18355_s0 + $0x11c] ss:$28 sps:$4 sm:$0xff]   ;;  %v9763_v15 = vld [vmem:[%s18355_s0 + $0x124] ss:$28 sps:$4 sm:$0xff]  }
   0x6   :  { %516 = vmatprep.subr.bf16.mxu0 %v9725_v9  ;;  %v9751_v13 = vld [vmem:[%s18355_s0 + $0x10] ss:$28 sps:$4 sm:$0xff]   ;;  %629 = vmatprep.subr.bf16.mxu1 %v9733_v10  ;;  %v9770_v16 = vld [vmem:[%s18355_s0 + $0x118] ss:$28 sps:$4 sm:$0xff]   ;;  %v9775_v17 = vld [vmem:[%s18355_s0 + $0x120] ss:$28 sps:$4 sm:$0xff]  }
   0x7   :  { %2315 = vrot.lane.b32.xlu1 %v9681_v2, %s9641_s19  ;;  %2311 = vrot.lane.b32.xlu0 %v9695_v4, %s9641_s19  ;;  %v9780_v18 = vld [vmem:[%s18355_s0 + $0x14] ss:$28 sps:$4 sm:$0xff]   ;;  %v9793_v20 = vld [vmem:[%s18355_s0 + $0xe4] ss:$28 sps:$4 sm:$0xff]   ;;  %vm6769_vm3 = vcmask 1047680   ;;  %vm7890_vm4 = vcmask 97280  }
   0x8   :  { %v9188_v19 = vld [vmem:[%s18355_s0 + $0x18] ss:$28 sps:$4 sm:$0xff]   ;;  %v9799_v21 = vld [vmem:[%s18355_s0 + $0xec] ss:$28 sps:$4 sm:$0xff]   ;;  %v9806_v22 = vld [vmem:[%s18355_s0 + $0xe0] ss:$28 sps:$4 sm:$0xff]  }
   0x9   :  { %517 = vmatpush1.bf16.msra.mxu0 %v9738_v11  ;;  %630 = vmatpush1.bf16.msra.mxu1 %v9743_v12  ;;  %v9811_v23 = vld [vmem:[%s18355_s0 + $0xe8] ss:$28 sps:$4 sm:$0xff]   ;;  %v9818_v24 = vld [vmem:[%s18355_s0 + $0x38] ss:$28 sps:$4 sm:$0xff]   ;;  %v9848_v29 = vld [vmem:[%s18355_s0 + $0xb0] ss:$28 sps:$4 sm:$0xff]  }
   0xa   :  { %518 = vmatprep.subr.bf16.mxu0 %v9757_v14  ;;  %631 = vmatprep.subr.bf16.mxu1 %v9763_v15  ;;  %v9823_v25 = vld [vmem:[%s18355_s0 + $0x3c] ss:$28 sps:$4 sm:$0xff]   ;;  %v9828_v26 = vld [vmem:[%s18355_s0 + $0xac] ss:$28 sps:$4 sm:$0xff]   ;;  %v9836_v27 = vld [vmem:[%s18355_s0 + $0xb4] ss:$28 sps:$4 sm:$0xff]  }
   0xb   :  { %2317 = vrot.lane.b32.xlu0 %v9751_v13, %s9641_s19  ;;  %2319 = vrot.lane.b32.xlu1 %v9780_v18, %s9641_s19  ;;  %v9843_v28 = vld [vmem:[%s18355_s0 + $0xa8] ss:$28 sps:$4 sm:$0xff]   ;;  %v9856_v30 = vld [vmem:[%s18355_s0 + $0x40] ss:$28 sps:$4 sm:$0xff]  }
   0xc   :  { %v9861_v31 = vld [vmem:[%s18355_s0 + $0x44] ss:$28 sps:$4 sm:$0xff]   ;;  %v9866_v32 = vld [vmem:[%s18355_s0 + $0x74] ss:$28 sps:$4 sm:$0xff]   ;;  %v9874_v33 = vld [vmem:[%s18355_s0 + $0x7c] ss:$28 sps:$4 sm:$0xff]  }
   0xd   :  { %519 = vmatpush1.bf16.msra.mxu0 %v9770_v16  ;;  %632 = vmatpush1.bf16.msra.mxu1 %v9775_v17  ;;  %v9881_v34 = vld [vmem:[%s18355_s0 + $0x70] ss:$28 sps:$4 sm:$0xff]   ;;  %v9886_v35 = vld [vmem:[%s18355_s0 + $0x78] ss:$28 sps:$4 sm:$0xff]   ;;  %v9894_v36 = vld [vmem:[%s18355_s0 + $0x48] ss:$28 sps:$4 sm:$0xff]  }
   0xe   :  { %520 = vmatprep.subr.bf16.mxu0 %v9793_v20  ;;  %633 = vmatprep.subr.bf16.mxu1 %v9799_v21  ;;  %v9899_v37 = vld [vmem:[%s18355_s0 + $0x4c] ss:$28 sps:$4 sm:$0xff]   ;;  %v9919_v39 = vld [vmem:[%s18355_s0 + $0x19c] ss:$28 sps:$4 sm:$0xff]   ;;  %v9930_v41 = vld [vmem:[%s18356_s2] sm:$0xff]  }
   0xf   :  { %2321 = vrot.lane.b32.xlu0 %v9188_v19, %s9641_s19  ;;  %2323 = vrot.lane.b32.xlu1 %v9818_v24, %s9641_s19  ;;  %v9216_v38 = vld [vmem:[%s18355_s0 + $0x50] ss:$28 sps:$4 sm:$0xff]   ;;  %v9218_v40 = vld [vmem:[%s18355_s0 + $0x1a0] ss:$28 sps:$4 sm:$0xff]  }
  0x10   :  { %v9938_v42 = vld [vmem:[%s18355_s0 + $0x80] ss:$28 sps:$4 sm:$0xff]   ;;  %v9944_v43 = vld [vmem:[%s18355_s0 + $0x198] ss:$28 sps:$4 sm:$0xff]   ;;  %v9227_v45 = vld [vmem:[%s18355_s0 + $0x168] ss:$28 sps:$4 sm:$0xff]  }
  0x11   :  { %521 = vmatpush1.bf16.msra.mxu0 %v9806_v22  ;;  %634 = vmatpush1.bf16.msra.mxu1 %v9811_v23  ;;  %v9952_v44 = vld [vmem:[%s18355_s0 + $0x84] ss:$28 sps:$4 sm:$0xff]   ;;  %v9973_v48 = vld [vmem:[%s18356_s2 + $0x8] sm:$0xff]   ;;  %v9241_v53 = vld [vmem:[%s18355_s0 + $0xf8] ss:$28 sps:$4 sm:$0xff]  }
  0x12   :  { %522 = vmatprep.subr.bf16.mxu0 %v9828_v26  ;;  %635 = vmatprep.subr.bf16.mxu1 %v9836_v27  ;;  %v9225_v46 = vld [vmem:[%s18355_s0 + $0x88] ss:$28 sps:$4 sm:$0xff]   ;;  %v9978_v49 = vld [vmem:[%s18355_s0 + $0x160] ss:$28 sps:$4 sm:$0xff]   ;;  %v9232_v50 = vld [vmem:[%s18355_s0 + $0x130] ss:$28 sps:$4 sm:$0xff]  }
  0x13   :  { %2325 = vrot.lane.b32.xlu0 %v9823_v25, %s9641_s19  ;;  %2327 = vrot.lane.b32.xlu1 %v9856_v30, %s9641_s19  ;;  %v9967_v47 = vld [vmem:[%s18355_s0 + $0x164] ss:$28 sps:$4 sm:$0xff]   ;;  %v9990_v51 = vld [vmem:[%s18355_s0 + $0x12c] ss:$28 sps:$4 sm:$0xff]  }
  0x14   :  { %v10000_v52 = vld [vmem:[%s18355_s0 + $0x128] ss:$28 sps:$4 sm:$0xff]   ;;  %v10015_v54 = vld [vmem:[%s18356_s2 + $0x10] sm:$0xff]   ;;  %v9246_v56 = vld [vmem:[%s18355_s0 + $0xc0] ss:$28 sps:$4 sm:$0xff]  }
  0x15   :  { %523 = vmatpush1.bf16.msra.mxu0 %v9843_v28  ;;  %636 = vmatpush1.bf16.msra.mxu1 %v9848_v29  ;;  %v9244_v55 = vld [vmem:[%s18355_s0 + $0xf4] ss:$28 sps:$4 sm:$0xff]   ;;  %v9235_v58 = vld [vmem:[%s18355_s0 + $0xbc] ss:$28 sps:$4 sm:$0xff]   ;;  %v9249_v61 = vld [vmem:[%s18355_s0 + $0x88] ss:$28 sps:$4 sm:$0xff]  }
  0x16   :  { %524 = vmatprep.subr.bf16.mxu0 %v9866_v32  ;;  %637 = vmatprep.subr.bf16.mxu1 %v9874_v33  ;;  %v9233_v57 = vld [vmem:[%s18355_s0 + $0xb8] ss:$28 sps:$4 sm:$0xff]   ;;  %v9239_v59 = vld [vmem:[%s18355_s0 + $0xc0] ss:$28 sps:$4 sm:$0xff]   ;;  %v9242_v60 = vld [vmem:[%s18355_s0 + $0xf0] ss:$28 sps:$4 sm:$0xff]  }
  0x17   :  { %2329 = vrot.lane.b32.xlu0 %v9861_v31, %s9641_s19  ;;  %2331 = vrot.lane.b32.xlu1 %v9894_v36, %s9641_s19  ;;  %v10054_v62 = vld [vmem:[%s18356_s2 + $0x18] sm:$0xff]   ;;  %v9251_v63 = vld [vmem:[%s18355_s0 + $0x50] ss:$28 sps:$4 sm:$0xff]  }
  0x18   :  { %v10097_v19 = vld [vmem:[%s18356_s2 + $0x28] sm:$0xff]  }
  0x19   :  { %525 = vmatpush1.bf16.msra.mxu0 %v9881_v34  ;;  %638 = vmatpush1.bf16.msra.mxu1 %v9886_v35 }
  0x1a   :  { %526 = vmatprep.subr.bf16.mxu0 %v9823_v25  ;;  %639 = vmatprep.subr.bf16.mxu1 %v9861_v31 }
  0x1b   :  { %2333 = vrot.lane.b32.xlu0 %v9899_v37, %s9641_s19  ;;  %2335 = vrot.lane.b32.xlu1 %v9216_v38, %s9641_s19  ;;  %v10332_v38 = vld [vmem:[%s18355_s0 + $0x200] ss:$28 sps:$4 sm:$0xff]  }
  0x1d   :  { %527 = vmatpush1.bf16.msra.mxu0 %v9818_v24  ;;  %640 = vmatpush1.bf16.msra.mxu1 %v9856_v30 }
  0x1e   :  { %528 = vmatprep.subr.bf16.mxu0 %v9695_v4  ;;  %641 = vmatprep.subr.bf16.mxu1 %v9681_v2  ;;  %v10077_v2 = vld [vmem:[%s18356_s2 + $0x20] sm:$0xff]  }
  0x1f   :  { %2337 = vrot.lane.b32.xlu0 %v9881_v34, %s9641_s19  ;;  %2339 = vrot.lane.b32.xlu1 %v9866_v32, %s9641_s19 }
  0x21   :  { %529 = vmatpush1.bf16.msra.mxu0 %v9690_v3  ;;  %642 = vmatpush1.bf16.msra.mxu1 %v9674_v0  ;;  %v9254_v0 = vld [vmem:[%s18355_s0 + $0x18] ss:$28 sps:$4 sm:$0xff]  }
  0x22   :  { %740 = vmatprep.subr.bf16.mxu0 %v9919_v39  ;;  %9055 = vmatprep.subr.bf16.mxu1 %v9218_v40  ;;  %v9247_v3 = vld [vmem:[%s18355_s0 + $0xf8] ss:$28 sps:$4 sm:$0xff]  }
  0x23   :  { %2341 = vrot.lane.b32.xlu0 %v9886_v35, %s9641_s19  ;;  %2343 = vrot.lane.b32.xlu1 %v9874_v33, %s9641_s19 }
  0x24   :  { %547 = vmatmul.mubr.bf16.vlgmr.msra.gmra.mxu0 %v9930_v41  ;;  %660 = vmatmul.mubr.bf16.vlgmr.msra.gmra.mxu1 %v9930_v41 }
  0x25   :  { %9056 = vmatpush3.bf16.msra.mxu1 %v9218_v40  ;;  %741 = vmatpush1.bf16.msra.mxu0 %v9944_v43  ;;  %v10345_v40 = vld [vmem:[%s18355_s0 + $0x2dc] ss:$28 sps:$4 sm:$0xff]  }
  0x26   :  { %556 = vmatprep.mubr.bf16.mxu0 %v18360_v1  ;;  %669 = vmatprep.mubr.bf16.mxu1 %v18360_v1 }
  0x27   :  { %2345 = vrot.lane.b32.xlu0 %v9938_v42, %s9641_s19  ;;  %9057 = vmatprep.subr.bf16.mxu1 %v9227_v45 }
  0x28   :  { %2347 = vrot.lane.b32.xlu1 %v9952_v44, %s9641_s19  ;;  %742 = vmatprep.subr.bf16.mxu0 %v9967_v47 }
  0x29   :  { %9058 = vmatpush3.bf16.msra.mxu1 %v9227_v45  ;;  %743 = vmatpush1.bf16.msra.mxu0 %v9978_v49  ;;  %v10371_v45 = vld [vmem:[%s18355_s0 + $0x20c] ss:$28 sps:$4 sm:$0xff]  }
  0x2a   :  { %9059 = vmatprep.subr.bf16.mxu1 %v9232_v50  ;;  %744 = vmatprep.subr.bf16.mxu0 %v9990_v51 }
  0x2b   :  { %2349 = vrot.lane.b32.xlu0 %v9225_v46, %s9641_s19 }
  0x2c   :  { %557 = vmatmul.mubr.bf16.gmra.mxu0 %v9973_v48  ;;  %670 = vmatmul.mubr.bf16.gmra.mxu1 %v9973_v48 }
  0x2d   :  { %2351 = vrot.lane.b32.xlu1 %v9843_v28, %s9641_s19  ;;  %566 = vmatprep.mubr.bf16.mxu0 %v18360_v1 }
  0x2e   :  { %679 = vmatprep.mubr.bf16.mxu1 %v18360_v1  ;;  %9060 = vmatpush3.bf16.msra.mxu1 %v9232_v50 }
  0x2f   :  { %2353 = vrot.lane.b32.xlu0 %v9828_v26, %s9641_s19  ;;  %745 = vmatpush1.bf16.msra.mxu0 %v10000_v52 }
  0x30   :  { %9061 = vmatprep.subr.bf16.mxu1 %v9241_v53  ;;  %746 = vmatprep.subr.bf16.mxu0 %v9244_v55 }
  0x31   :  { %2355 = vrot.lane.b32.xlu1 %v9848_v29, %s9641_s19 }
  0x32   :  { %9062 = vmatpush3.bf16.msra.mxu1 %v9241_v53 }
  0x33   :  { %2357 = vrot.lane.b32.xlu0 %v9836_v27, %s9641_s19  ;;  %9063 = vmatprep.subr.bf16.mxu1 %v9246_v56 }
  0x34   :  { %567 = vmatmul.mubr.bf16.gmra.mxu0 %v10015_v54  ;;  %680 = vmatmul.mubr.bf16.gmra.mxu1 %v10015_v54 }
  0x35   :  { %2359 = vrot.lane.b32.xlu1 %v9233_v57, %s9641_s19  ;;  %576 = vmatprep.mubr.bf16.mxu0 %v18360_v1 }
  0x36   :  { %689 = vmatprep.mubr.bf16.mxu1 %v18360_v1  ;;  %747 = vmatpush1.bf16.msra.mxu0 %v9242_v60 }
  0x37   :  { %2361 = vrot.lane.b32.xlu0 %v9235_v58, %s9641_s19  ;;  %9064 = vmatpush3.bf16.msra.mxu1 %v9246_v56  ;;  %v9285_v56 = vld [vmem:[%s18355_s0 + $0x26c] ss:$28 sps:$4 sm:$0xff]  }
  0x38   :  { %748 = vmatprep.subr.bf16.mxu0 %v9235_v58  ;;  %9065 = vmatprep.subr.bf16.mxu1 %v9249_v61  ;;  %v10436_v58 = vld [vmem:[%s18355_s0 + $0x274] ss:$28 sps:$4 sm:$0xff]  }
  0x39   :  { %2363 = vrot.lane.b32.xlu1 %v9239_v59, %s9641_s19  ;;  %v9292_v59 = vld [vmem:[%s18355_s0 + $0x230] ss:$28 sps:$4 sm:$0xff]  }
  0x3a   :  { %749 = vmatpush1.bf16.msra.mxu0 %v9233_v57 }
  0x3b   :  { %2365 = vrot.lane.b32.xlu0 %v9806_v22, %s9641_s19  ;;  %9066 = vmatpush3.bf16.msra.mxu1 %v9249_v61  ;;  %v9283_v61 = vld [vmem:[%s18355_s0 + $0x268] ss:$28 sps:$4 sm:$0xff]  }
  0x3c   :  { %577 = vmatmul.mubr.bf16.gmra.mxu0 %v10054_v62  ;;  %690 = vmatmul.mubr.bf16.gmra.mxu1 %v10054_v62 }
  0x3d   :  { %2367 = vrot.lane.b32.xlu1 %v9793_v20, %s9641_s19  ;;  %586 = vmatprep.mubr.bf16.mxu0 %v18360_v1 }
  0x3e   :  { %699 = vmatprep.mubr.bf16.mxu1 %v18360_v1  ;;  %750 = vmatprep.subr.bf16.mxu0 %v9952_v44  ;;  %v10365_v44 = vld [vmem:[%s18355_s0 + $0x208] ss:$28 sps:$4 sm:$0xff]  }
  0x3f   :  { %2369 = vrot.lane.b32.xlu0 %v9811_v23, %s9641_s19  ;;  %751 = vmatpush1.bf16.msra.mxu0 %v9938_v42  ;;  %v10355_v42 = vld [vmem:[%s18355_s0 + $0x2e4] ss:$28 sps:$4 sm:$0xff]  }
  0x40   :  { %9067 = vmatprep.subr.bf16.mxu1 %v9251_v63  ;;  %752 = vmatprep.subr.bf16.mxu0 %v9899_v37  ;;  %v9255_v37 = vld [vmem:[%s18355_s0 + $0x168] ss:$28 sps:$4 sm:$0xff]  }
  0x41   :  { %2371 = vrot.lane.b32.xlu1 %v9799_v21, %s9641_s19  ;;  %9068 = vmatpush3.bf16.msra.mxu1 %v9251_v63  ;;  %v9286_v63 = vld [vmem:[%s18355_s0 + $0x270] ss:$28 sps:$4 sm:$0xff]  }
  0x42   :  { %9069 = vmatprep.subr.bf16.mxu1 %v9254_v0 }
  0x43   :  { %2373 = vrot.lane.b32.xlu0 %v9242_v60, %s9641_s19  ;;  %753 = vmatpush1.bf16.msra.mxu0 %v9894_v36  ;;  %v10137_v36 = vld [vmem:[%s18356_s2 + $0x38] sm:$0xff]  }
  0x44   :  { %587 = vmatmul.mubr.bf16.gmra.mxu0 %v10077_v2  ;;  %700 = vmatmul.mubr.bf16.gmra.mxu1 %v10077_v2 }
  0x45   :  { %2375 = vrot.lane.b32.xlu1 %v9244_v55, %s9641_s19  ;;  %596 = vmatprep.mubr.bf16.mxu0 %v18360_v1  ;;  %v10422_v55 = vld [vmem:[%s18355_s0 + $0x2a8] ss:$28 sps:$4 sm:$0xff]  }
  0x46   :  { %709 = vmatprep.mubr.bf16.mxu1 %v18360_v1  ;;  %9070 = vmatpush3.bf16.msra.mxu1 %v9254_v0 }
  0x47   :  { %2377 = vrot.lane.b32.xlu0 %v9247_v3, %s9641_s19  ;;  %754 = vmatprep.subr.bf16.mxu0 %v9780_v18  ;;  %v9252_v18 = vld [vmem:[%s18355_s0 + $0x130] ss:$28 sps:$4 sm:$0xff]   ;;  %v9297_v3 = vld [vmem:[%s18355_s0 + $0x23c] ss:$28 sps:$4 sm:$0xff]  }
  0x48   :  { %1431 = vmatprep.subr.bf16.mxu1 %v9707_v6  ;;  %755 = vmatpush1.bf16.msra.mxu0 %v9751_v13  ;;  %v10118_v13 = vld [vmem:[%s18356_s2 + $0x30] sm:$0xff]  }
  0x49   :  { %2379 = vrot.lane.b32.xlu1 %v9770_v16, %s9641_s19  ;;  %1318 = vmatprep.subr.bf16.mxu0 %v9700_v5 }
  0x4b   :  { %2381 = vrot.lane.b32.xlu0 %v9757_v14, %s9641_s19 }
  0x4c   :  { %597 = vmatmul.mubr.bf16.gmra.mxu0 %v10097_v19  ;;  %710 = vmatmul.mubr.bf16.gmra.mxu1 %v10097_v19 }
  0x4d   :  { %2383 = vrot.lane.b32.xlu1 %v9775_v17, %s9641_s19  ;;  %606 = vmatprep.mubr.bf16.mxu0 %v18360_v1 }
  0x4e   :  { %719 = vmatprep.mubr.bf16.mxu1 %v18360_v1 }
  0x4f   :  { %2385 = vrot.lane.b32.xlu0 %v9763_v15, %s9641_s19 }
  0x51   :  { %2387 = vrot.lane.b32.xlu1 %v10000_v52, %s9641_s19  ;;  %v9320_v52 = vld [vmem:[%s18355_s0 + $0x210] ss:$28 sps:$4 sm:$0xff]  }
  0x53   :  { %2389 = vrot.lane.b32.xlu0 %v9990_v51, %s9641_s19  ;;  %v10401_v51 = vld [vmem:[%s18355_s0 + $0x2ac] ss:$28 sps:$4 sm:$0xff]  }
  0x54   :  { %607 = vmatmul.mubr.bf16.gmra.mxu0 %v10118_v13  ;;  %720 = vmatmul.mubr.bf16.gmra.mxu1 %v10118_v13 }
  0x55   :  { %2391 = vrot.lane.b32.xlu1 %v9252_v18, %s9641_s19  ;;  %616 = vmatprep.mubr.bf16.mxu0 %v18360_v1 }
  0x56   :  { %729 = vmatprep.mubr.bf16.mxu1 %v18360_v1 }
  0x57   :  { %2393 = vrot.lane.b32.xlu0 %v9738_v11, %s9641_s19 }
  0x59   :  { %2395 = vrot.lane.b32.xlu1 %v9725_v9, %s9641_s19 }
  0x5b   :  { %2397 = vrot.lane.b32.xlu0 %v9743_v12, %s9641_s19 }
  0x5c   :  { %617 = vmatmul.mubr.bf16.gmra.mxu0 %v10137_v36  ;;  %730 = vmatmul.mubr.bf16.gmra.mxu1 %v10137_v36 }
  0x5d   :  { %2399 = vrot.lane.b32.xlu1 %v9733_v10, %s9641_s19  ;;  %772 = vmatprep.mubr.bf16.mxu0 %v18360_v1 }
  0x5e   :  { %9071 = vmatprep.mubr.bf16.mxu1 %v9930_v41 }
  0x5f   :  { %2401 = vrot.lane.b32.xlu0 %v9978_v49, %s9641_s19  ;;  %v10391_v49 = vld [vmem:[%s18355_s0 + $0x2a4] ss:$28 sps:$4 sm:$0xff]  }
  0x61   :  { %2403 = vrot.lane.b32.xlu1 %v9967_v47, %s9641_s19  ;;  %v10379_v47 = vld [vmem:[%s18355_s0 + $0x2d8] ss:$28 sps:$4 sm:$0xff]  }
  0x63   :  { %2405 = vrot.lane.b32.xlu0 %v9255_v37, %s9641_s19 }
  0x64   :  { %773 = vmatmul.mubr.bf16.vlgmr.msra.gmra.mxu0 %v9930_v41  ;;  %9072 = vmatmul.mubr.bf16.vlgmr.msra.gmra.mxu1 %v9973_v48 }
  0x65   :  { %1319 = vmatpush1.bf16.msra.mxu0 %v9712_v7  ;;  %1432 = vmatpush1.bf16.msra.mxu1 %v9718_v8 }
  0x66   :  { %2407 = vrot.lane.b32.xlu1 %v9712_v7, %s9641_s19  ;;  %1320 = vmatprep.subr.bf16.mxu0 %v9725_v9  ;;  %v10201_v7 = vld [vmem:[%s18355_s0 + $0x1c4] ss:$28 sps:$4 sm:$0xff]  }
  0x67   :  { %1433 = vmatprep.subr.bf16.mxu1 %v9733_v10  ;;  %2409 = vrot.lane.b32.xlu0 %v9700_v5, %s9641_s19  ;;  %v9280_v5 = vld [vmem:[%s18355_s0 + $0x1a0] ss:$28 sps:$4 sm:$0xff]   ;;  %v10212_v9 = vld [vmem:[%s18355_s0 + $0x1c8] ss:$28 sps:$4 sm:$0xff]  }
  0x68   :  { %782 = vmatprep.mubr.bf16.mxu0 %v18360_v1  ;;  %9075 = vmatprep.mubr.bf16.mxu1 %v10015_v54 }
  0x69   :  { %1321 = vmatpush1.bf16.msra.mxu0 %v9738_v11  ;;  %1434 = vmatpush1.bf16.msra.mxu1 %v9743_v12  ;;  %v10226_v11 = vld [vmem:[%s18355_s0 + $0x1cc] ss:$28 sps:$4 sm:$0xff]  }
  0x6a   :  { %2411 = vrot.lane.b32.xlu1 %v9718_v8, %s9641_s19  ;;  %1322 = vmatprep.subr.bf16.mxu0 %v9757_v14  ;;  %v10234_v12 = vld [vmem:[%s18355_s0 + $0x1d0] ss:$28 sps:$4 sm:$0xff]  }
  0x6b   :  { %1435 = vmatprep.subr.bf16.mxu1 %v9763_v15  ;;  %2413 = vrot.lane.b32.xlu0 %v9707_v6, %s9641_s19  ;;  %v10191_v6 = vld [vmem:[%s18355_s0 + $0x1c0] ss:$28 sps:$4 sm:$0xff]  }
  0x6c   :  { %783 = vmatmul.mubr.bf16.gmra.mxu0 %v9973_v48  ;;  %9076 = vmatmul.mubr.bf16.gmra.mxu1 %v10054_v62  ;;  %v10386_v48 = vld [vmem:[%s18355_s0 + $0x2e0] ss:$28 sps:$4 sm:$0xff]  }
  0x6d   :  { %1323 = vmatpush1.bf16.msra.mxu0 %v9770_v16  ;;  %792 = vmatprep.mubr.bf16.mxu0 %v18360_v1  ;;  %v10248_v16 = vld [vmem:[%s18355_s0 + $0x1d4] ss:$28 sps:$4 sm:$0xff]  }
  0x6e   :  { %1436 = vmatpush1.bf16.msra.mxu1 %v9775_v17  ;;  %2415 = vrot.lane.b32.xlu1 %v9944_v43, %s9641_s19  ;;  %v9308_v17 = vld [vmem:[%s18355_s0 + $0x1d8] ss:$28 sps:$4 sm:$0xff]   ;;  %v10360_v43 = vld [vmem:[%s18355_s0 + $0x204] ss:$28 sps:$4 sm:$0xff]  }
  0x6f   :  { %1324 = vmatprep.subr.bf16.mxu0 %v9793_v20  ;;  %1437 = vmatprep.subr.bf16.mxu1 %v9799_v21  ;;  %v10261_v20 = vld [vmem:[%s18357_s1 + $0x4] ss:$8 sps:$4 sm:$0xff]  }
  0x70   :  { %2417 = vrot.lane.b32.xlu0 %v9919_v39, %s9641_s19  ;;  %9079 = vmatprep.mubr.bf16.mxu1 %v10077_v2  ;;  %v9258_v21 = vld [vmem:[%s18355_s0 + $0x34c] ss:$28 sps:$4 sm:$0xff]   ;;  %v10340_v39 = vld [vmem:[%s18355_s0 + $0x318] ss:$28 sps:$4 sm:$0xff]  }
  0x71   :  { %1325 = vmatpush1.bf16.msra.mxu0 %v9806_v22 }
  0x72   :  { %1438 = vmatpush1.bf16.msra.mxu1 %v9811_v23  ;;  %1326 = vmatprep.subr.bf16.mxu0 %v9828_v26  ;;  %v9261_v23 = vld [vmem:[%s18355_s0 + $0x354] ss:$28 sps:$4 sm:$0xff]   ;;  %v9593_v26 = vld [vmem:[%s18355_s0 + $0xc] ss:$28 sps:$4 sm:$0xff]  }
  0x73   :  { %1439 = vmatprep.subr.bf16.mxu1 %v9836_v27  ;;  %2419 = vrot.lane.b32.xlu1 %v9280_v5, %s9641_s19  ;;  %v10289_v27 = vld [vmem:[%s18355_s0 + $0x1f8] ss:$28 sps:$4 sm:$0xff]   ;;  %v10484_v5 = vld [vmem:[%s18355_s0 + $0x244] ss:$28 sps:$4 sm:$0xff]  }
  0x74   :  { %793 = vmatmul.mubr.bf16.gmra.mxu0 %v10015_v54  ;;  %3274 = vrot.lane.b32.xlu0 %v10191_v6, %s9641_s19  ;;  %v10414_v54 = vld [vmem:[%s18355_s0 + $0x2a0] ss:$28 sps:$4 sm:$0xff]  }
  0x75   :  { %v10206_v8 = vpop.permute.xlu1 %2313  ;;  %1327 = vmatpush1.bf16.msra.mxu0 %v9843_v28  ;;  %v10218_v10 = vpop.permute.xlu0 %2309  ;;  %802 = vmatprep.mubr.bf16.mxu0 %v18360_v1  ;;  %v10299_v28 = vld [vmem:[%s18355_s0 + $0x314] ss:$28 sps:$4 sm:$0xff]  }
  0x76   :  { %18746 = vst [vmem:[#allocation2_spill] sm:$0xff] %v10218_v10  ;;  %1440 = vmatpush1.bf16.msra.mxu1 %v9848_v29  ;;  %1328 = vmatprep.subr.bf16.mxu0 %v9866_v32  ;;  %v9594_v29 = vld [vmem:[%s18355_s0] ss:$28 sps:$4 sm:$0xff]  }
  0x77   :  { %1441 = vmatprep.subr.bf16.mxu1 %v9874_v33  ;;  %3276 = vrot.lane.b32.xlu1 %v10201_v7, %s9641_s19  ;;  %v10315_v32 = vld [vmem:[%s18355_s0 + $0x31c] ss:$28 sps:$4 sm:$0xff]  }
  0x78   :  { %9080 = vmatmul.mubr.bf16.gmra.mxu1 %v10097_v19  ;;  %3278 = vrot.lane.b32.xlu0 %v10212_v9, %s9641_s19  ;;  %v10320_v33 = vld [vmem:[%s18355_s0 + $0x1fc] ss:$28 sps:$4 sm:$0xff]  }
  0x79   :  { %v10236_v14 = vpop.permute.xlu1 %2315  ;;  %1329 = vmatpush1.bf16.msra.mxu0 %v9881_v34  ;;  %v10242_v15 = vpop.permute.xlu0 %2311  ;;  %9083 = vmatprep.mubr.bf16.mxu1 %v10118_v13  ;;  %v9343_v10 = vld [vmem:[%s18355_s0 + $0x320] ss:$28 sps:$4 sm:$0xff]  }
  0x7a   :  { %18747 = vst [vmem:[#allocation3_spill] sm:$0xff] %v10236_v14  ;;  %1442 = vmatpush1.bf16.msra.mxu1 %v9886_v35  ;;  %1330 = vmatprep.subr.bf16.mxu0 %v9823_v25  ;;  %v10327_v35 = vld [vmem:[%s18355_s0 + $0x310] ss:$28 sps:$4 sm:$0xff]  }
  0x7b   :  { %1443 = vmatprep.subr.bf16.mxu1 %v9861_v31  ;;  %3280 = vrot.lane.b32.xlu1 %v10226_v11, %s9641_s19  ;;  %v9595_v31 = vld [vmem:[%s18355_s0 + $0x8] ss:$28 sps:$4 sm:$0xff]  }
  0x7c   :  { %803 = vmatmul.mubr.bf16.gmra.mxu0 %v10054_v62  ;;  %3282 = vrot.lane.b32.xlu0 %v10234_v12, %s9641_s19  ;;  %v9294_v62 = vld [vmem:[%s18355_s0 + $0x234] ss:$28 sps:$4 sm:$0xff]  }
  0x7d   :  { %1331 = vmatpush1.bf16.msra.mxu0 %v9818_v24  ;;  %v10270_v22 = vpop.permute.xlu0 %2317  ;;  %812 = vmatprep.mubr.bf16.mxu0 %v18360_v1  ;;  %v10278_v25 = vpop.permute.xlu1 %2319  ;;  %v9256_v24 = vld [vmem:[%s18355_s0 + $0x348] ss:$28 sps:$4 sm:$0xff]  }
  0x7e   :  { %1444 = vmatpush1.bf16.msra.mxu1 %v9856_v30  ;;  %1332 = vmatprep.subr.bf16.mxu0 %v9695_v4  ;;  %18748 = vst [vmem:[#allocation4_spill] sm:$0xff] %v10278_v25  ;;  %v9259_v4 = vld [vmem:[%s18355_s0 + $0x350] ss:$28 sps:$4 sm:$0xff]  }
  0x7f   :  { %1445 = vmatprep.subr.bf16.mxu1 %v9593_v26  ;;  %3284 = vrot.lane.b32.xlu1 %v10248_v16, %s9641_s19  ;;  %v9613_v25 = vld [vmem:[%s18355_s0 + $0x4c] ss:$28 sps:$4 sm:$0xff]  }
  0x80   :  { %9084 = vmatmul.mubr.bf16.gmra.mxu1 %v10137_v36  ;;  %3286 = vrot.lane.b32.xlu0 %v9308_v17, %s9641_s19  ;;  %v9328_v17 = vld [vmem:[%s18355_s0 + $0x248] ss:$28 sps:$4 sm:$0xff]  }
  0x81   :  { %1333 = vmatpush1.bf16.msra.mxu0 %v9594_v29  ;;  %v10306_v30 = vpop.permute.xlu0 %2321  ;;  %1463 = vmatprep.mubr.bf16.mxu1 %v10261_v20  ;;  %v10322_v34 = vpop.permute.xlu1 %2323  ;;  %v9319_v29 = vld [vmem:[%s18355_s0 + $0x328] ss:$28 sps:$4 sm:$0xff]  }
  0x82   :  { %18749 = vst [vmem:[#allocation5_spill] sm:$0xff] %v10306_v30  ;;  %1446 = vmatpush1.bf16.msra.mxu1 %v9595_v31  ;;  %1334 = vmatprep.subr.bf16.mxu0 %v9258_v21 }
  0x83   :  { %1447 = vmatprep.subr.bf16.mxu1 %v9261_v23  ;;  %3288 = vrot.lane.b32.xlu1 %v10289_v27, %s9641_s19 }
  0x84   :  { %813 = vmatmul.mubr.bf16.gmra.mxu0 %v10077_v2  ;;  %3290 = vrot.lane.b32.xlu0 %v10320_v33, %s9641_s19  ;;  %v9295_v2 = vld [vmem:[%s18355_s0 + $0x238] ss:$28 sps:$4 sm:$0xff]  }
  0x85   :  { %1335 = vmatpush2.bf16.msra.mxu0 %v9256_v24  ;;  %v10349_v41 = vpop.permute.xlu0 %2325  ;;  %822 = vmatprep.mubr.bf16.mxu0 %v18360_v1  ;;  %v10374_v46 = vpop.permute.xlu1 %2327  ;;  %v9312_v24 = vld [vmem:[%s18355_s0 + $0x360] ss:$28 sps:$4 sm:$0xff]  }
  0x86   :  { %1448 = vmatpush2.bf16.msra.mxu1 %v9259_v4  ;;  %1336 = vmatprep.subr.bf16.mxu0 %v10299_v28 }
  0x87   :  { %1449 = vmatprep.subr.bf16.mxu1 %v10315_v32  ;;  %3292 = vrot.lane.b32.xlu1 %v10332_v38, %s9641_s19 }
  0x88   :  { %3294 = vrot.lane.b32.xlu0 %v10360_v43, %s9641_s19 }
  0x89   :  { %1337 = vmatpush2.bf16.msra.mxu0 %v10327_v35  ;;  %v10396_v50 = vpop.permute.xlu0 %2329  ;;  %v10409_v53 = vpop.permute.xlu1 %2331 }
  0x8a   :  { %1450 = vmatpush2.bf16.msra.mxu1 %v10340_v39  ;;  %1338 = vmatprep.subr.bf16.mxu0 %v10345_v40 }
  0x8b   :  { %1451 = vmatprep.subr.bf16.mxu1 %v10355_v42  ;;  %3296 = vrot.lane.b32.xlu1 %v10365_v44, %s9641_s19 }
  0x8c   :  { %823 = vmatmul.mubr.bf16.gmra.mxu0 %v10097_v19  ;;  %3298 = vrot.lane.b32.xlu0 %v10371_v45, %s9641_s19  ;;  %v10470_v19 = vld [vmem:[%s18355_s0 + $0x240] ss:$28 sps:$4 sm:$0xff]  }
  0x8d   :  { %1339 = vmatpush2.bf16.msra.mxu0 %v10379_v47  ;;  %v10430_v57 = vpop.permute.xlu0 %2333  ;;  %832 = vmatprep.mubr.bf16.mxu0 %v18360_v1  ;;  %v10444_v60 = vpop.permute.xlu1 %2335 }
  0x8e   :  { %18750 = vst [vmem:[#allocation6_spill] sm:$0xff] %v10430_v57  ;;  %1452 = vmatpush2.bf16.msra.mxu1 %v10386_v48  ;;  %1340 = vmatprep.subr.bf16.mxu0 %v10391_v49  ;;  %18751 = vst [vmem:[#allocation7_spill] sm:$0xff] %v10444_v60  ;;  %v9616_v57 = vld [vmem:[%s18355_s0 + $0x14] ss:$28 sps:$4 sm:$0xff]   ;;  %v10728_v60 = vld [vmem:[%s18355_s0 + $0x35c] ss:$28 sps:$4 sm:$0xff]  }
  0x8f   :  { %1453 = vmatprep.subr.bf16.mxu1 %v10401_v51  ;;  %3300 = vrot.lane.b32.xlu1 %v9320_v52, %s9641_s19  ;;  %v9599_v52 = vld [vmem:[%s18355_s0 + $0x164] ss:$28 sps:$4 sm:$0xff]  }
  0x90   :  { %3302 = vrot.lane.b32.xlu0 %v9292_v59, %s9641_s19 }
  0x91   :  { %1341 = vmatpush2.bf16.msra.mxu0 %v10414_v54  ;;  %v10458_v0 = vpop.permute.xlu0 %2337  ;;  %v10473_v18 = vpop.permute.xlu1 %2339 }
  0x92   :  { %1454 = vmatpush2.bf16.msra.mxu1 %v10422_v55  ;;  %1342 = vmatprep.subr.bf16.mxu0 %v9285_v56 }
  0x93   :  { %1455 = vmatprep.subr.bf16.mxu1 %v10436_v58  ;;  %3304 = vrot.lane.b32.xlu1 %v9294_v62, %s9641_s19 }
  0x94   :  { %833 = vmatmul.mubr.bf16.gmra.mxu0 %v10118_v13  ;;  %3306 = vrot.lane.b32.xlu0 %v9295_v2, %s9641_s19 }
  0x95   :  { %1343 = vmatpush2.bf16.msra.mxu0 %v9283_v61  ;;  %v10478_v37 = vpop.permute.xlu0 %2341  ;;  %842 = vmatprep.mubr.bf16.mxu0 %v18360_v1  ;;  %v10489_v13 = vpop.permute.xlu1 %2343 }
  0x96   :  { %1456 = vmatpush2.bf16.msra.mxu1 %v9286_v63  ;;  %1344 = vmatprep.subr.bf16.mxu0 %v9294_v62  ;;  %v9600_v62 = vld [vmem:[%s18355_s0 + $0x160] ss:$28 sps:$4 sm:$0xff]  }
  0x97   :  { %1457 = vmatprep.subr.bf16.mxu1 %v9297_v3  ;;  %3308 = vrot.lane.b32.xlu1 %v9297_v3, %s9641_s19  ;;  %v9602_v3 = vld [vmem:[%s18355_s0 + $0x168] ss:$28 sps:$4 sm:$0xff]  }
  0x98   :  { %3310 = vrot.lane.b32.xlu0 %v10470_v19, %s9641_s19 }
  0x99   :  { %1345 = vmatpush2.bf16.msra.mxu0 %v9292_v59  ;;  %v10494_v21 = vpop.permute.xlu0 %2345 }
  0x9a   :  { %1458 = vmatpush2.bf16.msra.mxu1 %v9295_v2  ;;  %1346 = vmatprep.subr.bf16.mxu0 %v10320_v33  ;;  %v10498_v23 = vpop.permute.xlu1 %2347  ;;  %v9597_v33 = vld [vmem:[%s18355_s0 + $0x198] ss:$28 sps:$4 sm:$0xff]   ;;  %v9601_v2 = vld [vmem:[%s18355_s0 + $0x12c] ss:$28 sps:$4 sm:$0xff]  }
  0x9b   :  { %1459 = vmatprep.subr.bf16.mxu1 %v10360_v43  ;;  %18752 = vst [vmem:[#allocation8_spill] sm:$0xff] %v10498_v23  ;;  %3312 = vrot.lane.b32.xlu1 %v10484_v5, %s9641_s19  ;;  %v9598_v43 = vld [vmem:[%s18355_s0 + $0x1a0] ss:$28 sps:$4 sm:$0xff]   ;;  %v9365_v23 = vld [vmem:[%s18355_s0 + $0x1d8] ss:$28 sps:$4 sm:$0xff]  }
  0x9c   :  { %843 = vmatmul.mubr.bf16.gmra.mxu0 %v10137_v36  ;;  %3314 = vrot.lane.b32.xlu0 %v9328_v17, %s9641_s19  ;;  %v10516_v36 = vld [vmem:[%s18357_s1] ss:$8 sps:$4 sm:$0xff]   ;;  %v10599_v17 = vld [vmem:[%s18357_s1 + $0x24] ss:$8 sps:$4 sm:$0xff]  }
  0x9d   :  { %1347 = vmatpush2.bf16.msra.mxu0 %v10289_v27  ;;  %v10505_v26 = vpop.permute.xlu0 %2349  ;;  %1350 = vmatprep.mubr.bf16.mxu0 %v10261_v20 }
  0x9e   :  { %18753 = vst [vmem:[#allocation9_spill] sm:$0xff] %v10505_v26  ;;  %1460 = vmatpush2.bf16.msra.mxu1 %v10332_v38  ;;  %1348 = vmatprep.subr.bf16.mxu0 %v10201_v7  ;;  %v10529_v7 = vld [vmem:[%s18357_s1 + $0x14] ss:$8 sps:$4 sm:$0xff]  }
  0x9f   :  { %1461 = vmatprep.subr.bf16.mxu1 %v10226_v11  ;;  %v10519_v27 = vpop.permute.xlu1 %2351  ;;  %3316 = vrot.lane.b32.xlu1 %v9283_v61, %s9641_s19  ;;  %v9596_v11 = vld [vmem:[%s18355_s0 + $0x19c] ss:$28 sps:$4 sm:$0xff]  }
  0xa0   :  { %3318 = vrot.lane.b32.xlu0 %v9285_v56, %s9641_s19  ;;  %v10569_v56 = vld [vmem:[%s18357_s1 + $0x10] ss:$8 sps:$4 sm:$0xff]   ;;  %v9346_v61 = vld [vmem:[%s18355_s0 + $0x280] ss:$28 sps:$4 sm:$0xff]  }
  0xa1   :  { %1349 = vmatpush2.bf16.msra.mxu0 %v10191_v6  ;;  %v10524_v4 = vpop.permute.xlu0 %2353  ;;  %v10541_v6 = vld [vmem:[%s18355_s0 + $0x278] ss:$28 sps:$4 sm:$0xff]  }
  0xa2   :  { %1462 = vmatpush2.bf16.msra.mxu1 %v10212_v9  ;;  %1544 = vmatprep.subr.bf16.mxu0 %v9596_v11  ;;  %v10549_v9 = vld [vmem:[%s18355_s0 + $0x27c] ss:$28 sps:$4 sm:$0xff]  }
  0xa3   :  { %8831 = vmatprep.subr.bf16.mxu1 %v9312_v24  ;;  %v10543_v31 = vpop.permute.xlu1 %2355  ;;  %3320 = vrot.lane.b32.xlu1 %v9286_v63, %s9641_s19  ;;  %v9332_v11 = vld [vmem:[%s18355_s0 + $0x2b8] ss:$28 sps:$4 sm:$0xff]  }
  0xa4   :  { %1351 = vmatmul.mubr.bf16.vlgmr.msra.gmra.mxu0 %v10516_v36  ;;  %3322 = vrot.lane.b32.xlu0 %v10436_v58, %s9641_s19  ;;  %v9324_v58 = vld [vmem:[%s18355_s0 + $0x2f0] ss:$28 sps:$4 sm:$0xff]  }
  0xa5   :  { %1464 = vmatmul.mubr.bf16.vlgmr.msra.gmra.mxu1 %v10516_v36  ;;  %1545 = vmatpush1.bf16.msra.mxu0 %v9597_v33  ;;  %v10558_v38 = vpop.permute.xlu0 %2357 }
  0xa6   :  { %8832 = vmatpush3.bf16.msra.mxu1 %v9598_v43  ;;  %1546 = vmatprep.subr.bf16.mxu0 %v9599_v52  ;;  %v9604_v43 = vld [vmem:[%s18355_s0 + $0xf4] ss:$28 sps:$4 sm:$0xff]   ;;  %v10621_v52 = vld [vmem:[%s18357_s1 + $0x20] ss:$8 sps:$4 sm:$0xff]  }
  0xa7   :  { %v10574_v59 = vpop.permute.xlu1 %2359  ;;  %1473 = vmatprep.mubr.bf16.mxu1 %v10529_v7  ;;  %1360 = vmatprep.mubr.bf16.mxu0 %v10529_v7 }
  0xa8   :  { %8833 = vmatprep.subr.bf16.mxu1 %v9319_v29  ;;  %3324 = vrot.lane.b32.xlu1 %v10541_v6, %s9641_s19  ;;  %v9603_v29 = vld [vmem:[%s18355_s0 + $0x128] ss:$28 sps:$4 sm:$0xff]  }
  0xa9   :  { %1547 = vmatpush1.bf16.msra.mxu0 %v9600_v62  ;;  %v10586_v63 = vpop.permute.xlu0 %2361  ;;  %3326 = vrot.lane.b32.xlu0 %v10549_v9, %s9641_s19  ;;  %v9339_v62 = vld [vmem:[%s18355_s0 + $0x280] ss:$28 sps:$4 sm:$0xff]  }
  0xaa   :  { %18754 = vst [vmem:[#allocation10_spill] sm:$0xff] %v10586_v63  ;;  %1548 = vmatprep.subr.bf16.mxu0 %v9601_v2  ;;  %8834 = vmatpush3.bf16.msra.mxu1 %v9602_v3  ;;  %v9606_v2 = vld [vmem:[%s18355_s0 + $0xf0] ss:$28 sps:$4 sm:$0xff]  }
  0xab   :  { %v10601_v24 = vpop.permute.xlu1 %2363  ;;  %8835 = vmatprep.subr.bf16.mxu1 %v9324_v58  ;;  %v9617_v63 = vld [vmem:[%s18355_s0 + $0x50] ss:$28 sps:$4 sm:$0xff]  }
  0xac   :  { %18755 = vst [vmem:[#allocation11_spill] sm:$0xff] %v10601_v24  ;;  %1361 = vmatmul.mubr.bf16.gmra.mxu0 %v10569_v56  ;;  %3328 = vrot.lane.b32.xlu1 %v9346_v61, %s9641_s19  ;;  %v9605_v61 = vld [vmem:[%s18355_s0 + $0x130] ss:$28 sps:$4 sm:$0xff]  }
  0xad   :  { %1474 = vmatmul.mubr.bf16.gmra.mxu1 %v10569_v56  ;;  %1549 = vmatpush1.bf16.msra.mxu0 %v9603_v29  ;;  %v10612_v33 = vpop.permute.xlu0 %2365  ;;  %v9607_v29 = vld [vmem:[%s18355_s0 + $0xbc] ss:$28 sps:$4 sm:$0xff]   ;;  %v9618_v24 = vld [vmem:[%s18355_s0 + $0x10] ss:$28 sps:$4 sm:$0xff]  }
  0xae   :  { %1550 = vmatprep.subr.bf16.mxu0 %v9604_v43  ;;  %1483 = vmatprep.mubr.bf16.mxu1 %v10599_v17  ;;  %v9608_v43 = vld [vmem:[%s18355_s0 + $0xf8] ss:$28 sps:$4 sm:$0xff]  }
  0xaf   :  { %v10623_v58 = vpop.permute.xlu1 %2367  ;;  %1370 = vmatprep.mubr.bf16.mxu0 %v10599_v17  ;;  %8836 = vmatpush3.bf16.msra.mxu1 %v9605_v61  ;;  %v9609_v61 = vld [vmem:[%s18355_s0 + $0xb8] ss:$28 sps:$4 sm:$0xff]  }
  0xb0   :  { %8837 = vmatprep.subr.bf16.mxu1 %v9332_v11  ;;  %3330 = vrot.lane.b32.xlu0 %v10414_v54, %s9641_s19  ;;  %v10647_v11 = vld [vmem:[%s18357_s1 + $0x34] ss:$8 sps:$4 sm:$0xff]  }
  0xb1   :  { %1551 = vmatpush1.bf16.msra.mxu0 %v9606_v2  ;;  %v10637_v3 = vpop.permute.xlu0 %2369  ;;  %3332 = vrot.lane.b32.xlu1 %v10391_v49, %s9641_s19  ;;  %v9353_v49 = vld [vmem:[%s18355_s0 + $0x248] ss:$28 sps:$4 sm:$0xff]  }
  0xb2   :  { %1552 = vmatprep.subr.bf16.mxu0 %v9607_v29  ;;  %v9610_v29 = vld [vmem:[%s18355_s0 + $0x84] ss:$28 sps:$4 sm:$0xff]  }
  0xb3   :  { %v10649_v54 = vpop.permute.xlu1 %2371  ;;  %8838 = vmatpush3.bf16.msra.mxu1 %v9608_v43 }
  0xb4   :  { %1371 = vmatmul.mubr.bf16.gmra.mxu0 %v10621_v52  ;;  %8839 = vmatprep.subr.bf16.mxu1 %v9339_v62  ;;  %v10674_v62 = vld [vmem:[%s18357_s1 + $0x30] ss:$8 sps:$4 sm:$0xff]  }
  0xb5   :  { %1484 = vmatmul.mubr.bf16.gmra.mxu1 %v10621_v52  ;;  %1553 = vmatpush1.bf16.msra.mxu0 %v9609_v61  ;;  %v10662_v2 = vpop.permute.xlu0 %2373  ;;  %v9611_v61 = vld [vmem:[%s18355_s0 + $0xc0] ss:$28 sps:$4 sm:$0xff]  }
  0xb6   :  { %1554 = vmatprep.subr.bf16.mxu0 %v9610_v29  ;;  %1493 = vmatprep.mubr.bf16.mxu1 %v10647_v11  ;;  %v9612_v29 = vld [vmem:[%s18355_s0 + $0x80] ss:$28 sps:$4 sm:$0xff]  }
  0xb7   :  { %v10668_v43 = vpop.permute.xlu1 %2375  ;;  %1380 = vmatprep.mubr.bf16.mxu0 %v10647_v11  ;;  %8840 = vmatpush3.bf16.msra.mxu1 %v9611_v61 }
  0xb8   :  { %18756 = vst [vmem:[#allocation12_spill] sm:$0xff] %v10668_v43  ;;  %8841 = vmatprep.subr.bf16.mxu1 %v9353_v49  ;;  %3334 = vrot.lane.b32.xlu0 %v10422_v55, %s9641_s19  ;;  %v10694_v49 = vld [vmem:[%s18357_s1 + $0x44] ss:$8 sps:$4 sm:$0xff]  }
  0xb9   :  { %1555 = vmatpush1.bf16.msra.mxu0 %v9612_v29  ;;  %v10684_v1 = vpop.permute.xlu0 %2377  ;;  %3336 = vrot.lane.b32.xlu1 %v10401_v51, %s9641_s19  ;;  %18758 = vst [vmem:[#allocation14_spill] sm:$0xff] %v10694_v49  ;;  %v10699_v55 = vld [vmem:[%s18355_s0 + $0x2b0] ss:$28 sps:$4 sm:$0xff]   ;;  %v9614_v51 = vld [vmem:[%s18355_s0 + $0x88] ss:$28 sps:$4 sm:$0xff]  }
  0xba   :  { %18757 = vst [vmem:[#allocation13_spill] sm:$0xff] %v10684_v1  ;;  %1556 = vmatprep.subr.bf16.mxu0 %v9613_v25  ;;  %v9360_v25 = vld [vmem:[%s18355_s0 + $0x210] ss:$28 sps:$4 sm:$0xff]   ;;  %v9615_v29 = vld [vmem:[%s18355_s0 + $0x48] ss:$28 sps:$4 sm:$0xff]  }
  0xbb   :  { %v10701_v61 = vpop.permute.xlu1 %2379  ;;  %8842 = vmatpush3.bf16.msra.mxu1 %v9614_v51  ;;  %v9361_v51 = vld [vmem:[%s18355_s0 + $0x2b8] ss:$28 sps:$4 sm:$0xff]  }
  0xbc   :  { %1381 = vmatmul.mubr.bf16.gmra.mxu0 %v10674_v62  ;;  %3338 = vrot.lane.b32.xlu0 %v10699_v55, %s9641_s19 }
  0xbd   :  { %1494 = vmatmul.mubr.bf16.gmra.mxu1 %v10674_v62  ;;  %1557 = vmatpush1.bf16.msra.mxu0 %v9615_v29  ;;  %v10716_v30 = vpop.permute.xlu0 %2381  ;;  %v9356_v29 = vld [vmem:[%s18355_s0 + $0x2b4] ss:$28 sps:$4 sm:$0xff]  }
  0xbe   :  { %1558 = vmatprep.subr.bf16.mxu0 %v9616_v57  ;;  %1503 = vmatprep.mubr.bf16.mxu1 %v10694_v49  ;;  %v10742_v57 = vld [vmem:[%s18357_s1 + $0x40] ss:$8 sps:$4 sm:$0xff]  }
  0xbf   :  { %v10736_v26 = vpop.permute.xlu1 %2383  ;;  %1390 = vmatprep.mubr.bf16.mxu0 %v10694_v49  ;;  %8843 = vmatprep.subr.bf16.mxu1 %v9360_v25  ;;  %18759 = vst [vmem:[#allocation15_spill] sm:$0xff] %v10742_v57  ;;  %v10756_v25 = vld [vmem:[%s18355_s0 + $0x358] ss:$28 sps:$4 sm:$0xff]  }
  0xc0   :  { %8844 = vmatpush3.bf16.msra.mxu1 %v9617_v63  ;;  %3340 = vrot.lane.b32.xlu1 %v9356_v29, %s9641_s19  ;;  %v10763_v63 = vld [vmem:[%s18355_s0 + $0x324] ss:$28 sps:$4 sm:$0xff]  }
  0xc1   :  { %1559 = vmatpush1.bf16.msra.mxu0 %v9618_v24  ;;  %v10751_v43 = vpop.permute.xlu0 %2385  ;;  %3342 = vrot.lane.b32.xlu0 %v9361_v51, %s9641_s19  ;;  %v10768_v24 = vld [vmem:[%s18357_s1 + $0x54] ss:$8 sps:$4 sm:$0xff]  }
  0xc2   :  { %1560 = vmatprep.subr.bf16.mxu0 %v10728_v60  ;;  %18760 = vst [vmem:[#allocation16_spill] sm:$0xff] %v10768_v24  ;;  %8845 = vmatprep.subr.bf16.mxu1 %v9365_v23  ;;  %v9352_v23 = vld [vmem:[%s18355_s0 + $0x2ec] ss:$28 sps:$4 sm:$0xff]  }
  0xc3   :  { %v10770_v1 = vpop.permute.xlu1 %2387 }
  0xc4   :  { %1391 = vmatmul.mubr.bf16.gmra.mxu0 %v10742_v57  ;;  %3344 = vrot.lane.b32.xlu1 %v10379_v47, %s9641_s19  ;;  %v10795_v47 = vld [vmem:[%s18357_s1 + $0x50] ss:$8 sps:$4 sm:$0xff]  }
  0xc5   :  { %1504 = vmatmul.mubr.bf16.gmra.mxu1 %v10742_v57  ;;  %1561 = vmatpush2.bf16.msra.mxu0 %v10756_v25  ;;  %v10777_v51 = vpop.permute.xlu0 %2389 }
  0xc6   :  { %18761 = vst [vmem:[#allocation17_spill] sm:$0xff] %v10777_v51  ;;  %1562 = vmatprep.subr.bf16.mxu0 %v10763_v63  ;;  %1513 = vmatprep.mubr.bf16.mxu1 %v10768_v24  ;;  %v9619_v51 = vld [vmem:[%s18355_s0 + $0x18] ss:$28 sps:$4 sm:$0xff]  }
  0xc7   :  { %v10787_v49 = vpop.permute.xlu1 %2391  ;;  %1400 = vmatprep.mubr.bf16.mxu0 %v10768_v24  ;;  %3346 = vrot.lane.b32.xlu0 %v10345_v40, %s9641_s19  ;;  %v9350_v40 = vld [vmem:[%s18355_s0 + $0x2e8] ss:$28 sps:$4 sm:$0xff]  }
  0xc8   :  { %18762 = vst [vmem:[#allocation18_spill] sm:$0xff] %v10787_v49  ;;  %8846 = vmatpush3.bf16.msra.mxu1 %v9619_v51  ;;  %3348 = vrot.lane.b32.xlu1 %v10386_v48, %s9641_s19  ;;  %v10810_v24 = vld [vmem:[%s18357_s1 + $0x64] ss:$8 sps:$4 sm:$0xff]  }
  0xc9   :  { %1563 = vmatpush2.bf16.msra.mxu0 %v9343_v10  ;;  %v10802_v49 = vpop.permute.xlu0 %2393  ;;  %18763 = vst [vmem:[#allocation19_spill] sm:$0xff] %v10810_v24  ;;  %v9366_v48 = vld [vmem:[%s18355_s0 + $0x2f0] ss:$28 sps:$4 sm:$0xff]  }
  0xca   :  { %1564 = vmatprep.subr.bf16.mxu0 %v9352_v23 }
  0xcb   :  { %v10812_v57 = vpop.permute.xlu1 %2395  ;;  %3350 = vrot.lane.b32.xlu0 %v10355_v42, %s9641_s19  ;;  %v10832_v42 = vld [vmem:[%s18357_s1 + $0x60] ss:$8 sps:$4 sm:$0xff]  }
  0xcc   :  { %1401 = vmatmul.mubr.bf16.gmra.mxu0 %v10795_v47  ;;  %3352 = vrot.lane.b32.xlu1 %v9350_v40, %s9641_s19 }
  0xcd   :  { %1514 = vmatmul.mubr.bf16.gmra.mxu1 %v10795_v47  ;;  %1565 = vmatpush2.bf16.msra.mxu0 %v9350_v40  ;;  %v10822_v51 = vpop.permute.xlu0 %2397 }
  0xce   :  { %1566 = vmatprep.subr.bf16.mxu0 %v9356_v29  ;;  %1523 = vmatprep.mubr.bf16.mxu1 %v10810_v24  ;;  %v10842_v29 = vld [vmem:[%s18357_s1 + $0x74] ss:$8 sps:$4 sm:$0xff]  }
  0xcf   :  { %v10825_v14 = vpop.permute.xlu1 %2399  ;;  %1410 = vmatprep.mubr.bf16.mxu0 %v10810_v24  ;;  %3354 = vrot.lane.b32.xlu0 %v9352_v23, %s9641_s19 }
  0xd0   :  { %3356 = vrot.lane.b32.xlu1 %v9366_v48, %s9641_s19 }
  0xd1   :  { %1567 = vmatpush2.bf16.msra.mxu0 %v10699_v55  ;;  %v10836_v40 = vpop.permute.xlu0 %2401 }
  0xd2   :  { %1568 = vmatprep.subr.bf16.mxu0 %v10549_v9 }
  0xd3   :  { %v10844_v24 = vpop.permute.xlu1 %2403  ;;  %3358 = vrot.lane.b32.xlu0 %v10327_v35, %s9641_s19 }
  0xd4   :  { %1411 = vmatmul.mubr.bf16.gmra.mxu0 %v10832_v42  ;;  %3360 = vrot.lane.b32.xlu1 %v10299_v28, %s9641_s19  ;;  %v10863_v28 = vld [vmem:[%s18357_s1 + $0x70] ss:$8 sps:$4 sm:$0xff]  }
  0xd5   :  { %1524 = vmatmul.mubr.bf16.gmra.mxu1 %v10832_v42  ;;  %1569 = vmatpush2.bf16.msra.mxu0 %v10541_v6  ;;  %v10853_v9 = vpop.permute.xlu0 %2405 }
  0xd6   :  { %18764 = vst [vmem:[#allocation20_spill] sm:$0xff] %v10853_v9  ;;  %1570 = vmatprep.subr.bf16.mxu0 %v10484_v5  ;;  %1533 = vmatprep.mubr.bf16.mxu1 %v10842_v29 }
  0xd7   :  { %1420 = vmatprep.mubr.bf16.mxu0 %v10842_v29  ;;  %3362 = vrot.lane.b32.xlu0 %v10340_v39, %s9641_s19  ;;  %v9367_v39 = vld [vmem:[%s18355_s0 + $0x328] ss:$28 sps:$4 sm:$0xff]  }
  0xd8   :  { %v2408_v35 = vpop.permute.xlu1 %2407  ;;  %3364 = vrot.lane.b32.xlu1 %v10315_v32, %s9641_s19  ;;  %v9368_v32 = vld [vmem:[%s18355_s0 + $0x348] ss:$28 sps:$4 sm:$0xff]  }
  0xd9   :  { %1571 = vmatpush2.bf16.msra.mxu0 %v10470_v19  ;;  %v2410_v6 = vpop.permute.xlu0 %2409  ;;  %v9370_v19 = vld [vmem:[%s18355_s0 + $0x34c] ss:$28 sps:$4 sm:$0xff]  }
  0xda   :  { %1572 = vmatprep.subr.bf16.mxu0 %v10371_v45 }
  0xdb   :  { %3366 = vrot.lane.b32.xlu0 %v9343_v10, %s9641_s19 }
  0xdc   :  { %v2412_v5 = vpop.permute.xlu1 %2411  ;;  %1421 = vmatmul.mubr.bf16.gmra.mxu0 %v10863_v28  ;;  %3368 = vrot.lane.b32.xlu1 %v10763_v63, %s9641_s19  ;;  %v10907_v63 = vsel %vm2421_vm0, %v2408_v35, %v2410_v6  ;;  %v9373_v35 = vld [vmem:[%s18355_s0 + $0x354] ss:$28 sps:$4 sm:$0xff]  }
  0xdd   :  { %1534 = vmatmul.mubr.bf16.gmra.mxu1 %v10863_v28  ;;  %1573 = vmatpush2.bf16.msra.mxu0 %v10365_v44  ;;  %v2414_v45 = vpop.permute.xlu0 %2413  ;;  %v10884_v10 = vsel %vm2421_vm0, %v2410_v6, %v2412_v5 }
  0xde   :  { %1574 = vmatprep.subr.bf16.mxu0 %v10248_v16  ;;  %1689 = vmatprep.mubr.bf16.mxu1 %v10261_v20  ;;  %v9371_v16 = vld [vmem:[%s18355_s0 + $0x350] ss:$28 sps:$4 sm:$0xff]   ;;  %v10910_v23 = vsel %vm2421_vm0, %v2412_v5, %v2414_v45 }
  0xdf   :  { %1576 = vmatprep.mubr.bf16.mxu0 %v10261_v20  ;;  %3370 = vrot.lane.b32.xlu0 %v9367_v39, %s9641_s19  ;;  %v10924_v39 = vsel %vm2421_vm0, %v10825_v14, %v10836_v40 }
  0xe0   :  { %v10891_v55 = vpop.permute.xlu1 %2415  ;;  %3372 = vrot.lane.b32.xlu1 %v9368_v32, %s9641_s19 }
  0xe1   :  { %1575 = vmatpush2.bf16.msra.mxu0 %v10234_v12  ;;  %v10900_v44 = vsel %vm2421_vm0, %v2414_v45, %v10891_v55  ;;  %v10915_v12 = vsel %vm2421_vm0, %v10812_v57, %v10822_v51  ;;  %v10943_v45 = vsel %vm2421_vm0, %v10802_v49, %v10812_v57  ;;  %v10961_v49 = vsel %vm2421_vm0, %v10751_v43, %v10770_v1 }
  0xe2   :  { %2526 = vmatprep.subr.bf16.mxu0 %v10884_v10  ;;  %v10903_v20 = vpop.permute.xlu0 %2417  ;;  %2639 = vmatprep.subr.bf16.mxu1 %v10900_v44  ;;  %18765 = vst [vmem:[#allocation21_spill] sm:$0xff] %v10915_v12 }
  0xe3   :  { %3374 = vrot.lane.b32.xlu0 %v9370_v19, %s9641_s19 }
  0xe4   :  { %v10918_v48 = vpop.f32.mrf.mxu0  ;;  %1577 = vmatmul.mubr.bf16.vlgmr.msra.gmra.mxu0 %v10516_v36  ;;  %3376 = vrot.lane.b32.xlu1 %v9371_v16, %s9641_s19  ;;  %v10931_v6 = vpop.f32.mrf.mxu1  ;;  %v10953_v16 = vsel %vm2421_vm0, %v10822_v51, %v10825_v14  ;;  %v10971_v14 = vsel %vm2421_vm0, %v10716_v30, %v10736_v26 }
  0xe5   :  { %1690 = vmatmul.mubr.bf16.vlgmr.msra.gmra.mxu1 %v10516_v36  ;;  %2527 = vmatpush1.bf16.msra.mxu0 %v10907_v63  ;;  %v10934_v5 = vpop.permute.xlu1 %2419 }
  0xe6   :  { %18766 = vst [vmem:[#allocation22_spill] sm:$0xff] %v10934_v5  ;;  %2640 = vmatpush1.bf16.msra.mxu1 %v10910_v23  ;;  %2528 = vmatprep.subr.bf16.mxu0 %v10915_v12  ;;  %v10938_v32 = vpop.f32.mrf.mxu0  ;;  %v10945_v19 = vpop.permute.xlu0 %3274 }
  0xe7   :  { %18767 = vst [vmem:[#allocation23_spill] sm:$0xff] %v10945_v19  ;;  %2641 = vmatprep.subr.bf16.mxu1 %v10924_v39  ;;  %v10948_v36 = vpop.f32.mrf.mxu1  ;;  %1697 = vmatprep.mubr.bf16.mxu1 %v10529_v7 }
  0xe8   :  { %v10956_v12 = vpop.f32.mrf.mxu0  ;;  %1586 = vmatprep.mubr.bf16.mxu0 %v10529_v7  ;;  %3378 = vrot.lane.b32.xlu0 %v9373_v35, %s9641_s19 }
  0xe9   :  { %v10965_v57 = vpop.f32.mrf.mxu1  ;;  %2529 = vmatpush1.bf16.msra.mxu0 %v10943_v45  ;;  %3380 = vrot.lane.b32.xlu1 %v10756_v25, %s9641_s19  ;;  %v10975_v51 = vpop.permute.xlu1 %3276  ;;  %v10992_v25 = vsel %vm2421_vm0, %v10701_v61, %v10716_v30  ;;  %v11011_v30 = vsel %vm2421_vm0, %v10623_v58, %v10637_v3 }
  0xea   :  { %18768 = vst [vmem:[#allocation24_spill] sm:$0xff] %v10965_v57  ;;  %18769 = vst [vmem:[#allocation25_spill] sm:$0xff] %v10975_v51  ;;  %2642 = vmatpush1.bf16.msra.mxu1 %v10953_v16  ;;  %2530 = vmatprep.subr.bf16.mxu0 %v10971_v14  ;;  %v10979_v7 = vpop.f32.mrf.mxu0  ;;  %v10981_v35 = vpop.permute.xlu0 %3278  ;;  %v9374_v51 = vld [vmem:[%s18355_s0 + $0x360] ss:$28 sps:$4 sm:$0xff]  }
  0xeb   :  { %18770 = vst [vmem:[#allocation26_spill] sm:$0xff] %v10981_v35  ;;  %2643 = vmatprep.subr.bf16.mxu1 %v10961_v49  ;;  %v10984_v19 = vpop.f32.mrf.mxu1  ;;  %v11003_v35 = vsel %vm2421_vm0, %v10736_v26, %v10751_v43  ;;  %v11022_v26 = vsel %vm2421_vm0, %v10649_v54, %v10662_v2 }
  0xec   :  { %v10986_v57 = vpop.f32.mrf.mxu0  ;;  %1587 = vmatmul.mubr.bf16.gmra.mxu0 %v10569_v56  ;;  %3382 = vrot.lane.b32.xlu0 %v10728_v60, %s9641_s19  ;;  %18772 = vst [vmem:[#allocation28_spill] sm:$0xff] %v11003_v35  ;;  %v9375_v60 = vld [vmem:[%s18355_s0] ss:$28 sps:$4 sm:$0xff]  }
  0xed   :  { %18771 = vst [vmem:[#allocation27_spill] sm:$0xff] %v10986_v57  ;;  %1698 = vmatmul.mubr.bf16.gmra.mxu1 %v10569_v56  ;;  %v11005_v57 = vpop.f32.mrf.mxu1  ;;  %2531 = vmatpush1.bf16.msra.mxu0 %v10992_v25  ;;  %v11016_v61 = vpop.permute.xlu1 %3280 }
  0xee   :  { %18773 = vst [vmem:[#allocation29_spill] sm:$0xff] %v11005_v57  ;;  %18774 = vst [vmem:[#allocation30_spill] sm:$0xff] %v11016_v61  ;;  %2644 = vmatpush1.bf16.msra.mxu1 %v11003_v35  ;;  %2532 = vmatprep.subr.bf16.mxu0 %v11011_v30  ;;  %v11025_v56 = vpop.f32.mrf.mxu0  ;;  %v11027_v43 = vpop.permute.xlu0 %3282  ;;  %v11038_v35 = vsel %vm2421_vm0, %v10612_v33, %v10623_v58  ;;  %v11056_v33 = vsel %vm2421_vm0, %v10524_v4, %v10543_v31 }
  0xef   :  { %18775 = vst [vmem:[#allocation31_spill] sm:$0xff] %v11025_v56  ;;  %18776 = vst [vmem:[#allocation32_spill] sm:$0xff] %v11027_v43  ;;  %2645 = vmatprep.subr.bf16.mxu1 %v11022_v26  ;;  %v11030_v57 = vpop.f32.mrf.mxu1  ;;  %1705 = vmatprep.mubr.bf16.mxu1 %v10599_v17  ;;  %v9377_v43 = vld [vmem:[%s18355_s0 + $0x4] ss:$28 sps:$4 sm:$0xff]   ;;  %v11065_v58 = vsel %vm2421_vm0, %v10558_v38, %v10574_v59 }
  0xf0   :  { %18777 = vst [vmem:[#allocation33_spill] sm:$0xff] %v11030_v57  ;;  %v11033_v61 = vpop.f32.mrf.mxu0  ;;  %1596 = vmatprep.mubr.bf16.mxu0 %v10599_v17  ;;  %3384 = vrot.lane.b32.xlu1 %v9374_v51, %s9641_s19  ;;  %v11048_v57 = vsel %vm2421_vm0, %v10637_v3, %v10649_v54 }
  0xf1   :  { %v11050_v56 = vpop.f32.mrf.mxu1  ;;  %2533 = vmatpush1.bf16.msra.mxu0 %v11038_v35  ;;  %4704 = vrot.lane.b32.xlu0 %v9375_v60, %s9642_s10  ;;  %v11059_v17 = vpop.permute.xlu1 %3284 }
  0xf2   :  { %18778 = vst [vmem:[#allocation34_spill] sm:$0xff] %v11059_v17  ;;  %2646 = vmatpush1.bf16.msra.mxu1 %v11048_v57  ;;  %2534 = vmatprep.subr.bf16.mxu0 %v11056_v33  ;;  %v11068_v3 = vpop.f32.mrf.mxu0  ;;  %v11070_v54 = vpop.permute.xlu0 %3286  ;;  %v11081_v17 = vsel %vm2421_vm0, %v10519_v27, %v10524_v4  ;;  %v11099_v27 = vsel %vm2421_vm0, %v10473_v18, %v10478_v37  ;;  %v9380_v4 = vld [vmem:[%s18355_s0 + $0xc] ss:$28 sps:$4 sm:$0xff]  }
  0xf3   :  { %18779 = vst [vmem:[#allocation35_spill] sm:$0xff] %v11068_v3  ;;  %18780 = vst [vmem:[#allocation36_spill] sm:$0xff] %v11070_v54  ;;  %2647 = vmatprep.subr.bf16.mxu1 %v11065_v58  ;;  %v11073_v51 = vpop.f32.mrf.mxu1  ;;  %v9378_v3 = vld [vmem:[%s18355_s0 + $0x8] ss:$28 sps:$4 sm:$0xff]   ;;  %v11091_v54 = vsel %vm2421_vm0, %v10543_v31, %v10558_v38  ;;  %v11110_v31 = vsel %vm2421_vm0, %v10489_v13, %v10494_v21 }
  0xf4   :  { %v11075_v60 = vpop.f32.mrf.mxu0  ;;  %1597 = vmatmul.mubr.bf16.gmra.mxu0 %v10621_v52  ;;  %4706 = vrot.lane.b32.xlu1 %v9377_v43, %s9642_s10  ;;  %18782 = vst [vmem:[#allocation38_spill] sm:$0xff] %v11091_v54 }
  0xf5   :  { %18781 = vst [vmem:[#allocation37_spill] sm:$0xff] %v11075_v60  ;;  %1706 = vmatmul.mubr.bf16.gmra.mxu1 %v10621_v52  ;;  %v11093_v60 = vpop.f32.mrf.mxu1  ;;  %2535 = vmatpush1.bf16.msra.mxu0 %v11081_v17  ;;  %v11104_v43 = vpop.permute.xlu1 %3288 }
  0xf6   :  { %18783 = vst [vmem:[#allocation39_spill] sm:$0xff] %v11093_v60  ;;  %18784 = vst [vmem:[#allocation40_spill] sm:$0xff] %v11104_v43  ;;  %2648 = vmatpush1.bf16.msra.mxu1 %v11091_v54  ;;  %2536 = vmatprep.subr.bf16.mxu0 %v11099_v27  ;;  %v11113_v38 = vpop.f32.mrf.mxu0  ;;  %v11115_v52 = vpop.permute.xlu0 %3290  ;;  %v11126_v54 = vsel %vm2421_vm0, %v10458_v0, %v10473_v18  ;;  %v11144_v0 = vsel %vm2421_vm0, %v10349_v41, %v10374_v46 }
  0xf7   :  { %18785 = vst [vmem:[#allocation41_spill] sm:$0xff] %v11113_v38  ;;  %18786 = vst [vmem:[#allocation42_spill] sm:$0xff] %v11115_v52  ;;  %2649 = vmatprep.subr.bf16.mxu1 %v11110_v31  ;;  %v11118_v60 = vpop.f32.mrf.mxu1  ;;  %1713 = vmatprep.mubr.bf16.mxu1 %v10647_v11  ;;  %v9381_v52 = vld [vmem:[%s18355_s0 + $0x10] ss:$28 sps:$4 sm:$0xff]  }
  0xf8   :  { %18787 = vst [vmem:[#allocation43_spill] sm:$0xff] %v11118_v60  ;;  %v11121_v43 = vpop.f32.mrf.mxu0  ;;  %1606 = vmatprep.mubr.bf16.mxu0 %v10647_v11  ;;  %4708 = vrot.lane.b32.xlu0 %v9378_v3, %s9642_s10  ;;  %v11136_v60 = vsel %vm2421_vm0, %v10478_v37, %v10489_v13  ;;  %v11153_v37 = vsel %vm2421_vm0, %v10396_v50, %v10409_v53 }
  0xf9   :  { %v11138_v38 = vpop.f32.mrf.mxu1  ;;  %2537 = vmatpush1.bf16.msra.mxu0 %v11126_v54  ;;  %4710 = vrot.lane.b32.xlu1 %v9380_v4, %s9642_s10  ;;  %v11147_v18 = vpop.permute.xlu1 %3292  ;;  %18789 = vst [vmem:[#allocation45_spill] sm:$0xff] %v11153_v37 }
  0xfa   :  { %18788 = vst [vmem:[#allocation44_spill] sm:$0xff] %v11147_v18  ;;  %2650 = vmatpush1.bf16.msra.mxu1 %v11136_v60  ;;  %2538 = vmatprep.subr.bf16.mxu0 %v11144_v0  ;;  %v11156_v13 = vpop.f32.mrf.mxu0  ;;  %v11158_v11 = vpop.permute.xlu0 %3294  ;;  %v11169_v18 = vsel %vm2421_vm0, %v10322_v34, %v10349_v41  ;;  %v11187_v34 = vsel %vm2421_vm0, %v10242_v15, %v10206_v8  ;;  %v9384_v41 = vld [vmem:[%s18355_s0 + $0x18] ss:$28 sps:$4 sm:$0xff]  }
  0xfb   :  { %18790 = vst [vmem:[#allocation46_spill] sm:$0xff] %v11156_v13  ;;  %18791 = vst [vmem:[#allocation47_spill] sm:$0xff] %v11158_v11  ;;  %2651 = vmatprep.subr.bf16.mxu1 %v11153_v37  ;;  %v11161_v3 = vpop.f32.mrf.mxu1  ;;  %v9383_v13 = vld [vmem:[%s18355_s0 + $0x14] ss:$28 sps:$4 sm:$0xff]   ;;  %v11179_v11 = vsel %vm2421_vm0, %v10374_v46, %v10396_v50  ;;  %v18799_v46 = vld [vmem:[#allocation3_spill] sm:$0xff] }
  0xfc   :  { %18792 = vst [vmem:[#allocation48_spill] sm:$0xff] %v11161_v3  ;;  %v11163_v4 = vpop.f32.mrf.mxu0  ;;  %1607 = vmatmul.mubr.bf16.gmra.mxu0 %v10674_v62  ;;  %18794 = vst [vmem:[#allocation50_spill] sm:$0xff] %v11169_v18  ;;  %4712 = vrot.lane.b32.xlu0 %v9381_v52, %s9642_s10  ;;  %v11198_v50 = vsel %vm2421_vm0, %v18799_v46, %v10270_v22  ;;  %v18803_v3 = vld [vmem:[#allocation14_spill] sm:$0xff] }
  0xfd   :  { %18793 = vst [vmem:[#allocation49_spill] sm:$0xff] %v11163_v4  ;;  %1714 = vmatmul.mubr.bf16.gmra.mxu1 %v10674_v62  ;;  %18795 = vst [vmem:[#allocation51_spill] sm:$0xff] %v11179_v11  ;;  %v11181_v4 = vpop.f32.mrf.mxu1  ;;  %2539 = vmatpush1.bf16.msra.mxu0 %v11169_v18  ;;  %v11192_v52 = vpop.permute.xlu1 %3296  ;;  %v18805_v37 = vld [vmem:[#allocation2_spill] sm:$0xff] }
  0xfe   :  { %18796 = vst [vmem:[#allocation52_spill] sm:$0xff] %v11181_v4  ;;  %18797 = vst [vmem:[#allocation53_spill] sm:$0xff] %v11187_v34  ;;  %2652 = vmatpush1.bf16.msra.mxu1 %v11179_v11  ;;  %2540 = vmatprep.subr.bf16.mxu0 %v11187_v34  ;;  %v11201_v62 = vpop.f32.mrf.mxu0  ;;  %v11203_v4 = vpop.permute.xlu0 %3298  ;;  %v11219_v34 = vsel %vm2421_vm0, %v18805_v37, %v10242_v15 }
  0xff   :  { %18798 = vst [vmem:[#allocation54_spill] sm:$0xff] %v11192_v52  ;;  %18800 = vst [vmem:[#allocation3_spill] sm:$0xff] %v11201_v62  ;;  %2653 = vmatprep.subr.bf16.mxu1 %v11198_v50  ;;  %v11206_v18 = vpop.f32.mrf.mxu1  ;;  %1721 = vmatprep.mubr.bf16.mxu1 %v18803_v3  ;;  %v11212_v52 = vsel %vm2421_vm0, %v10903_v20, %v10934_v5 }
 0x100   :  { %18801 = vst [vmem:[#allocation55_spill] sm:$0xff] %v11203_v4  ;;  %18802 = vst [vmem:[#allocation56_spill] sm:$0xff] %v11206_v18  ;;  %v11214_v11 = vpop.f32.mrf.mxu0  ;;  %1616 = vmatprep.mubr.bf16.mxu0 %v18803_v3  ;;  %4714 = vrot.lane.b32.xlu1 %v9383_v13, %s9642_s10  ;;  %v9385_v4 = vld [vmem:[%s18355_s0 + $0x38] ss:$28 sps:$4 sm:$0xff]   ;;  %v11229_v18 = vsel %vm2421_vm0, %v10206_v8, %v18799_v46 }
 0x101   :  { %18804 = vst [vmem:[#allocation14_spill] sm:$0xff] %v11212_v52  ;;  %18806 = vst [vmem:[#allocation2_spill] sm:$0xff] %v11229_v18  ;;  %v11231_v62 = vpop.f32.mrf.mxu1  ;;  %2541 = vmatpush1.bf16.msra.mxu0 %v11219_v34  ;;  %4716 = vrot.lane.b32.xlu0 %v9384_v41, %s9642_s10  ;;  %v11235_v15 = vpop.permute.xlu1 %3300  ;;  %v9387_v13 = vld [vmem:[%s18355_s0 + $0x3c] ss:$28 sps:$4 sm:$0xff]   ;;  %v18812_v41 = vld [vmem:[#allocation15_spill] sm:$0xff] }
 0x102   :  { %18807 = vst [vmem:[#allocation57_spill] sm:$0xff] %v11235_v15  ;;  %2654 = vmatpush1.bf16.msra.mxu1 %v11229_v18  ;;  %v11238_v37 = vpop.f32.mrf.mxu0  ;;  %2752 = vmatprep.subr.bf16.mxu0 %v11212_v52  ;;  %v11244_v8 = vpop.permute.xlu0 %3302  ;;  %v9388_v15 = vld [vmem:[%s18355_s0 + $0x40] ss:$28 sps:$4 sm:$0xff]  }
 0x103   :  { %18808 = vst [vmem:[#allocation58_spill] sm:$0xff] %v11238_v37  ;;  %18809 = vst [vmem:[#allocation59_spill] sm:$0xff] %v11244_v8  ;;  %v11246_v3 = vpop.f32.mrf.mxu1  ;;  %9087 = vmatprep.subr.bf16.mxu1 %v10934_v5  ;;  %v18813_v37 = vld [vmem:[#allocation16_spill] sm:$0xff] }
 0x104   :  { %18810 = vst [vmem:[#allocation60_spill] sm:$0xff] %v11246_v3  ;;  %v11249_v46 = vpop.f32.mrf.mxu0  ;;  %1617 = vmatmul.mubr.bf16.gmra.mxu0 %v18812_v41  ;;  %4718 = vrot.lane.b32.xlu1 %v9385_v4, %s9642_s10  ;;  %v9390_v4 = vld [vmem:[%s18355_s0 + $0x44] ss:$28 sps:$4 sm:$0xff]  }
 0x105   :  { %18811 = vst [vmem:[#allocation61_spill] sm:$0xff] %v11249_v46  ;;  %1722 = vmatmul.mubr.bf16.gmra.mxu1 %v18812_v41  ;;  %v11257_v52 = vpop.f32.mrf.mxu1  ;;  %1626 = vmatprep.mubr.bf16.mxu0 %v18813_v37  ;;  %v11260_v8 = vpop.permute.xlu1 %3304 }
 0x106   :  { %18814 = vst [vmem:[#allocation15_spill] sm:$0xff] %v11260_v8  ;;  %v11262_v3 = vpop.f32.mrf.mxu0  ;;  %1729 = vmatprep.mubr.bf16.mxu1 %v18813_v37  ;;  %4720 = vrot.lane.b32.xlu0 %v9387_v13, %s9642_s10  ;;  %v11269_v46 = vpop.permute.xlu0 %3306  ;;  %v9391_v8 = vld [vmem:[%s18355_s0 + $0x48] ss:$28 sps:$4 sm:$0xff]  }
 0x107   :  { %18815 = vst [vmem:[#allocation16_spill] sm:$0xff] %v11262_v3  ;;  %18816 = vst [vmem:[#allocation62_spill] sm:$0xff] %v11269_v46  ;;  %v11271_v18 = vpop.f32.mrf.mxu1  ;;  %v9393_v46 = vld [vmem:[%s18355_s0 + $0x4c] ss:$28 sps:$4 sm:$0xff]  }
 0x108   :  { %18817 = vst [vmem:[#allocation63_spill] sm:$0xff] %v11271_v18  ;;  %v11273_v41 = vpop.f32.mrf.mxu0  ;;  %4722 = vrot.lane.b32.xlu1 %v9388_v15, %s9642_s10 }
 0x109   :  { %18818 = vst [vmem:[#allocation64_spill] sm:$0xff] %v11273_v41  ;;  %v11279_v3 = vpop.f32.mrf.mxu1  ;;  %v11281_v37 = vpop.permute.xlu1 %3308 }
 0x10a   :  { %18819 = vst [vmem:[#allocation65_spill] sm:$0xff] %v11279_v3  ;;  %18820 = vst [vmem:[#allocation66_spill] sm:$0xff] %v11281_v37  ;;  %v11283_v13 = vpop.f32.mrf.mxu0  ;;  %4724 = vrot.lane.b32.xlu0 %v9390_v4, %s9642_s10  ;;  %v11289_v18 = vpop.permute.xlu0 %3310  ;;  %v9394_v37 = vld [vmem:[%s18355_s0 + $0x50] ss:$28 sps:$4 sm:$0xff]  }
 0x10b   :  { %18821 = vst [vmem:[#allocation67_spill] sm:$0xff] %v11283_v13  ;;  %18822 = vst [vmem:[#allocation68_spill] sm:$0xff] %v11289_v18  ;;  %v11291_v41 = vpop.f32.mrf.mxu1  ;;  %v18826_v13 = vld [vmem:[#allocation19_spill] sm:$0xff] }
 0x10c   :  { %18823 = vst [vmem:[#allocation69_spill] sm:$0xff] %v11291_v41  ;;  %v11293_v15 = vpop.f32.mrf.mxu0  ;;  %1627 = vmatmul.mubr.bf16.gmra.mxu0 %v10795_v47  ;;  %4726 = vrot.lane.b32.xlu1 %v9391_v8, %s9642_s10  ;;  %v9395_v8 = vld [vmem:[%s18355_s0 + $0x70] ss:$28 sps:$4 sm:$0xff]  }
 0x10d   :  { %18824 = vst [vmem:[#allocation70_spill] sm:$0xff] %v11293_v15  ;;  %1730 = vmatmul.mubr.bf16.gmra.mxu1 %v10795_v47  ;;  %v11301_v4 = vpop.f32.mrf.mxu1  ;;  %1636 = vmatprep.mubr.bf16.mxu0 %v18826_v13  ;;  %v11304_v3 = vpop.permute.xlu1 %3312 }
 0x10e   :  { %18825 = vst [vmem:[#allocation71_spill] sm:$0xff] %v11301_v4  ;;  %18827 = vst [vmem:[#allocation19_spill] sm:$0xff] %v11304_v3  ;;  %v11306_v18 = vpop.f32.mrf.mxu0  ;;  %1737 = vmatprep.mubr.bf16.mxu1 %v18826_v13  ;;  %4728 = vrot.lane.b32.xlu0 %v9393_v46, %s9642_s10  ;;  %v11313_v15 = vpop.permute.xlu0 %3314  ;;  %v9397_v3 = vld [vmem:[%s18355_s0 + $0x74] ss:$28 sps:$4 sm:$0xff]  }
 0x10f   :  { %18828 = vst [vmem:[#allocation72_spill] sm:$0xff] %v11306_v18  ;;  %18829 = vst [vmem:[#allocation73_spill] sm:$0xff] %v11313_v15  ;;  %v11315_v41 = vpop.f32.mrf.mxu1  ;;  %v9398_v15 = vld [vmem:[%s18355_s0 + $0x78] ss:$28 sps:$4 sm:$0xff]  }
 0x110   :  { %18830 = vst [vmem:[#allocation74_spill] sm:$0xff] %v11315_v41  ;;  %v11317_v47 = vpop.f32.mrf.mxu0  ;;  %4730 = vrot.lane.b32.xlu1 %v9394_v37, %s9642_s10 }
 0x111   :  { %18831 = vst [vmem:[#allocation75_spill] sm:$0xff] %v11317_v47  ;;  %v11323_v18 = vpop.f32.mrf.mxu1  ;;  %v11325_v13 = vpop.permute.xlu1 %3316 }
 0x112   :  { %18832 = vst [vmem:[#allocation76_spill] sm:$0xff] %v11323_v18  ;;  %18833 = vst [vmem:[#allocation77_spill] sm:$0xff] %v11325_v13  ;;  %v11327_v46 = vpop.f32.mrf.mxu0  ;;  %4732 = vrot.lane.b32.xlu0 %v9395_v8, %s9642_s10  ;;  %v11333_v41 = vpop.permute.xlu0 %3318  ;;  %v9401_v13 = vld [vmem:[%s18355_s0 + $0x7c] ss:$28 sps:$4 sm:$0xff]  }
 0x113   :  { %18834 = vst [vmem:[#allocation78_spill] sm:$0xff] %v11327_v46  ;;  %18835 = vst [vmem:[#allocation79_spill] sm:$0xff] %v11333_v41  ;;  %v11335_v47 = vpop.f32.mrf.mxu1 }
 0x114   :  { %18836 = vst [vmem:[#allocation80_spill] sm:$0xff] %v11335_v47  ;;  %v11337_v37 = vpop.f32.mrf.mxu0  ;;  %1637 = vmatmul.mubr.bf16.gmra.mxu0 %v10832_v42  ;;  %4734 = vrot.lane.b32.xlu1 %v9397_v3, %s9642_s10  ;;  %v9402_v3 = vld [vmem:[%s18355_s0 + $0x80] ss:$28 sps:$4 sm:$0xff]  }
 0x115   :  { %18837 = vst [vmem:[#allocation81_spill] sm:$0xff] %v11337_v37  ;;  %1738 = vmatmul.mubr.bf16.gmra.mxu1 %v10832_v42  ;;  %v11345_v8 = vpop.f32.mrf.mxu1  ;;  %1646 = vmatprep.mubr.bf16.mxu0 %v10842_v29  ;;  %v11348_v46 = vpop.permute.xlu1 %3320  ;;  %v9404_v42 = vld [vmem:[%s18355_s0 + $0x84] ss:$28 sps:$4 sm:$0xff]  }
 0x116   :  { %18838 = vst [vmem:[#allocation82_spill] sm:$0xff] %v11345_v8  ;;  %18839 = vst [vmem:[#allocation83_spill] sm:$0xff] %v11348_v46  ;;  %v11350_v18 = vpop.f32.mrf.mxu0  ;;  %1745 = vmatprep.mubr.bf16.mxu1 %v10842_v29  ;;  %4736 = vrot.lane.b32.xlu0 %v9398_v15, %s9642_s10  ;;  %v11365_v8 = vpop.permute.xlu0 %3322  ;;  %v9405_v15 = vld [vmem:[%s18355_s0 + $0x88] ss:$28 sps:$4 sm:$0xff]  }
 0x117   :  { %18840 = vst [vmem:[#allocation84_spill] sm:$0xff] %v11350_v18  ;;  %v11357_v37 = vpop.f32.mrf.mxu1  ;;  %18843 = vst [vmem:[#allocation87_spill] sm:$0xff] %v11365_v8 }
 0x118   :  { %18841 = vst [vmem:[#allocation85_spill] sm:$0xff] %v11357_v37  ;;  %v11359_v47 = vpop.f32.mrf.mxu0  ;;  %4738 = vrot.lane.b32.xlu1 %v9401_v13, %s9642_s10 }
 0x119   :  { %18842 = vst [vmem:[#allocation86_spill] sm:$0xff] %v11359_v47  ;;  %v11367_v18 = vpop.f32.mrf.mxu1 }
 0x11a   :  { %18844 = vst [vmem:[#allocation88_spill] sm:$0xff] %v11367_v18  ;;  %v11369_v29 = vpop.f32.mrf.mxu0  ;;  %4740 = vrot.lane.b32.xlu0 %v9402_v3, %s9642_s10  ;;  %v11375_v37 = vpop.permute.xlu1 %3324  ;;  %v18850_v18 = vmov 0  }
 0x11b   :  { %18845 = vst [vmem:[#allocation89_spill] sm:$0xff] %v11369_v29  ;;  %18846 = vst [vmem:[#allocation90_spill] sm:$0xff] %v11375_v37  ;;  %v11377_v47 = vpop.f32.mrf.mxu1  ;;  %v9407_v29 = vld [vmem:[%s18355_s0 + $0xa8] ss:$28 sps:$4 sm:$0xff]  }
 0x11c   :  { %18847 = vst [vmem:[#allocation91_spill] sm:$0xff] %v11377_v47  ;;  %v11379_v13 = vpop.f32.mrf.mxu0  ;;  %1647 = vmatmul.mubr.bf16.gmra.mxu0 %v10863_v28  ;;  %4742 = vrot.lane.b32.xlu1 %v9404_v42, %s9642_s10  ;;  %v9409_v42 = vld [vmem:[%s18355_s0 + $0xac] ss:$28 sps:$4 sm:$0xff]  }
 0x11d   :  { %18848 = vst [vmem:[#allocation92_spill] sm:$0xff] %v11379_v13  ;;  %1746 = vmatmul.mubr.bf16.gmra.mxu1 %v10863_v28  ;;  %v11387_v3 = vpop.f32.mrf.mxu1  ;;  %2558 = vmatprep.mubr.bf16.mxu0 %v18850_v18  ;;  %v11397_v13 = vpop.permute.xlu0 %3326  ;;  %v11406_v28 = vld [vmem:[%s18356_s2 + $0x40] sm:$0xff]  }
 0x11e   :  { %18849 = vst [vmem:[#allocation93_spill] sm:$0xff] %v11387_v3  ;;  %v11390_v8 = vpop.f32.mrf.mxu0  ;;  %2671 = vmatprep.mubr.bf16.mxu1 %v18850_v18  ;;  %4744 = vrot.lane.b32.xlu0 %v9405_v15, %s9642_s10  ;;  %18852 = vst [vmem:[#allocation95_spill] sm:$0xff] %v11397_v13  ;;  %v9410_v15 = vld [vmem:[%s18355_s0 + $0xb0] ss:$28 sps:$4 sm:$0xff]  }
 0x11f   :  { %18851 = vst [vmem:[#allocation94_spill] sm:$0xff] %v11390_v8  ;;  %v11399_v47 = vpop.f32.mrf.mxu1  ;;  %v11412_v8 = vpop.permute.xlu1 %3328 }
 0x120   :  { %18853 = vst [vmem:[#allocation96_spill] sm:$0xff] %v11399_v47  ;;  %v11401_v37 = vpop.f32.mrf.mxu0  ;;  %4746 = vrot.lane.b32.xlu1 %v9407_v29, %s9642_s10  ;;  %18855 = vst [vmem:[#allocation98_spill] sm:$0xff] %v11412_v8  ;;  %v11425_v29 = vsel %vm2421_vm0, %v10891_v55, %v10903_v20  ;;  %v9412_v8 = vld [vmem:[%s18355_s0 + $0xb4] ss:$28 sps:$4 sm:$0xff]  }
 0x121   :  { %18854 = vst [vmem:[#allocation97_spill] sm:$0xff] %v11401_v37  ;;  %v11414_v3 = vpop.f32.mrf.mxu1  ;;  %18859 = vst [vmem:[#allocation102_spill] sm:$0xff] %v11425_v29  ;;  %v9414_v55 = vld [vmem:[%s18355_s0 + $0xb8] ss:$28 sps:$4 sm:$0xff]  }
 0x122   :  { %18856 = vst [vmem:[#allocation99_spill] sm:$0xff] %v11414_v3  ;;  %v11416_v13 = vpop.f32.mrf.mxu0  ;;  %4748 = vrot.lane.b32.xlu0 %v9409_v42, %s9642_s10  ;;  %v11431_v3 = vpop.permute.xlu0 %3330  ;;  %v11440_v42 = vsel %vm2421_vm0, %v10844_v24, %v10853_v9 }
 0x123   :  { %18857 = vst [vmem:[#allocation100_spill] sm:$0xff] %v11416_v13  ;;  %18860 = vst [vmem:[#allocation103_spill] sm:$0xff] %v11431_v3  ;;  %v11433_v13 = vpop.f32.mrf.mxu1 }
 0x124   :  { %v11419_v37 = vpop.f32.mrf.mxu0  ;;  %2559 = vmatmul.mubr.bf16.vlgmr.msra.gmra.mxu0 %v11406_v28  ;;  %4750 = vrot.lane.b32.xlu1 %v9410_v15, %s9642_s10  ;;  %18861 = vst [vmem:[#allocation104_spill] sm:$0xff] %v11433_v13  ;;  %18862 = vst [vmem:[#allocation105_spill] sm:$0xff] %v11440_v42  ;;  %v11449_v15 = vpop.permute.xlu1 %3332 }
 0x125   :  { %18858 = vst [vmem:[#allocation101_spill] sm:$0xff] %v11419_v37  ;;  %2672 = vmatmul.mubr.bf16.vlgmr.msra.gmra.mxu1 %v11406_v28  ;;  %2753 = vmatpush1.bf16.msra.mxu0 %v11425_v29  ;;  %18864 = vst [vmem:[#allocation107_spill] sm:$0xff] %v11449_v15  ;;  %v11458_v37 = vsel %vm2421_vm0, %v10836_v40, %v10844_v24  ;;  %v18869_v24 = vld [vmem:[#allocation17_spill] sm:$0xff] }
 0x126   :  { %9088 = vmatpush3.bf16.msra.mxu1 %v10934_v5  ;;  %2754 = vmatprep.subr.bf16.mxu0 %v11440_v42  ;;  %v11447_v20 = vpop.f32.mrf.mxu0  ;;  %18866 = vst [vmem:[#allocation109_spill] sm:$0xff] %v11458_v37  ;;  %v11464_v42 = vld [vmem:[%s18356_s2 + $0x48] sm:$0xff]   ;;  %v11470_v5 = vpop.f32.mrf.mxu1 }
 0x127   :  { %18863 = vst [vmem:[#allocation106_spill] sm:$0xff] %v11447_v20  ;;  %9089 = vmatprep.subr.bf16.mxu1 %v10853_v9  ;;  %2681 = vmatprep.mubr.bf16.mxu1 %v18850_v18  ;;  %v9416_v20 = vld [vmem:[%s18355_s0 + $0xbc] ss:$28 sps:$4 sm:$0xff]   ;;  %18867 = vst [vmem:[#allocation110_spill] sm:$0xff] %v11470_v5 }
 0x128   :  { %v11453_v29 = vpop.f32.mrf.mxu0  ;;  %2568 = vmatprep.mubr.bf16.mxu0 %v18850_v18  ;;  %4752 = vrot.lane.b32.xlu0 %v9412_v8, %s9642_s10 }
 0x129   :  { %18865 = vst [vmem:[#allocation108_spill] sm:$0xff] %v11453_v29  ;;  %2755 = vmatpush1.bf16.msra.mxu0 %v11458_v37  ;;  %v18868_v29 = vld [vmem:[#allocation18_spill] sm:$0xff]  ;;  %4754 = vrot.lane.b32.xlu1 %v9414_v55, %s9642_s10  ;;  %v11492_v37 = vsel %vm2421_vm0, %v10770_v1, %v18869_v24 }
 0x12a   :  { %v11476_v40 = vsel %vm2421_vm0, %v18869_v24, %v18868_v29  ;;  %9090 = vmatpush3.bf16.msra.mxu1 %v10853_v9  ;;  %v11481_v8 = vpop.f32.mrf.mxu0  ;;  %v11483_v13 = vpop.permute.xlu0 %3334  ;;  %18874 = vst [vmem:[#allocation114_spill] sm:$0xff] %v11492_v37  ;;  %v9417_v55 = vld [vmem:[%s18355_s0 + $0xc0] ss:$28 sps:$4 sm:$0xff]   ;;  %v18878_v9 = vld [vmem:[#allocation12_spill] sm:$0xff] }
 0x12b   :  { %18870 = vst [vmem:[#allocation17_spill] sm:$0xff] %v11476_v40  ;;  %2756 = vmatprep.subr.bf16.mxu0 %v11476_v40  ;;  %18871 = vst [vmem:[#allocation111_spill] sm:$0xff] %v11481_v8  ;;  %9091 = vmatprep.subr.bf16.mxu1 %v18868_v29  ;;  %v11498_v8 = vpop.permute.xlu1 %3336  ;;  %v11500_v40 = vpop.f32.mrf.mxu1  ;;  %v9418_v1 = vld [vmem:[%s18355_s0 + $0xe0] ss:$28 sps:$4 sm:$0xff]  }
 0x12c   :  { %18872 = vst [vmem:[#allocation112_spill] sm:$0xff] %v11483_v13  ;;  %v11486_v5 = vpop.f32.mrf.mxu0  ;;  %2569 = vmatmul.mubr.bf16.gmra.mxu0 %v11464_v42  ;;  %4756 = vrot.lane.b32.xlu0 %v9416_v20, %s9642_s10  ;;  %18875 = vst [vmem:[#allocation115_spill] sm:$0xff] %v11498_v8 }
 0x12d   :  { %18873 = vst [vmem:[#allocation113_spill] sm:$0xff] %v11486_v5  ;;  %18876 = vst [vmem:[#allocation116_spill] sm:$0xff] %v11500_v40  ;;  %2682 = vmatmul.mubr.bf16.gmra.mxu1 %v11464_v42  ;;  %2757 = vmatpush1.bf16.msra.mxu0 %v11492_v37  ;;  %v18877_v5 = vld [vmem:[#allocation13_spill] sm:$0xff]  ;;  %v11525_v40 = vsel %vm2421_vm0, %v10662_v2, %v18878_v9  ;;  %v18886_v2 = vld [vmem:[#allocation10_spill] sm:$0xff] }
 0x12e   :  { %v11507_v47 = vsel %vm2421_vm0, %v18878_v9, %v18877_v5  ;;  %9092 = vmatpush3.bf16.msra.mxu1 %v18868_v29  ;;  %v11514_v20 = vpop.f32.mrf.mxu0  ;;  %v11516_v24 = vpop.permute.xlu0 %3338  ;;  %2691 = vmatprep.mubr.bf16.mxu1 %v18850_v18  ;;  %18883 = vst [vmem:[#allocation120_spill] sm:$0xff] %v11525_v40 }
 0x12f   :  { %18879 = vst [vmem:[#allocation12_spill] sm:$0xff] %v11507_v47  ;;  %2758 = vmatprep.subr.bf16.mxu0 %v11507_v47  ;;  %18880 = vst [vmem:[#allocation117_spill] sm:$0xff] %v11514_v20  ;;  %9093 = vmatprep.subr.bf16.mxu1 %v18877_v5  ;;  %v11531_v47 = vld [vmem:[%s18356_s2 + $0x50] sm:$0xff]   ;;  %v9421_v20 = vld [vmem:[%s18355_s0 + $0xe4] ss:$28 sps:$4 sm:$0xff]   ;;  %v11537_v29 = vpop.f32.mrf.mxu1 }
 0x130   :  { %18881 = vst [vmem:[#allocation118_spill] sm:$0xff] %v11516_v24  ;;  %v11520_v37 = vpop.f32.mrf.mxu0  ;;  %2578 = vmatprep.mubr.bf16.mxu0 %v18850_v18  ;;  %4758 = vrot.lane.b32.xlu1 %v9417_v55, %s9642_s10  ;;  %18884 = vst [vmem:[#allocation121_spill] sm:$0xff] %v11537_v29 }
 0x131   :  { %18882 = vst [vmem:[#allocation119_spill] sm:$0xff] %v11520_v37  ;;  %2759 = vmatpush1.bf16.msra.mxu0 %v11525_v40  ;;  %v18885_v37 = vld [vmem:[#allocation11_spill] sm:$0xff]  ;;  %4760 = vrot.lane.b32.xlu0 %v9418_v1, %s9642_s10  ;;  %v11561_v1 = vsel %vm2421_vm0, %v10574_v59, %v18886_v2 }
 0x132   :  { %v11543_v9 = vsel %vm2421_vm0, %v18886_v2, %v18885_v37  ;;  %9094 = vmatpush3.bf16.msra.mxu1 %v18877_v5  ;;  %v11548_v55 = vpop.f32.mrf.mxu0  ;;  %v11550_v41 = vpop.permute.xlu1 %3340  ;;  %18892 = vst [vmem:[#allocation126_spill] sm:$0xff] %v11561_v1  ;;  %v9424_v59 = vld [vmem:[%s18355_s0 + $0xec] ss:$28 sps:$4 sm:$0xff]  }
 0x133   :  { %18887 = vst [vmem:[#allocation10_spill] sm:$0xff] %v11543_v9  ;;  %2760 = vmatprep.subr.bf16.mxu0 %v11543_v9  ;;  %18888 = vst [vmem:[#allocation122_spill] sm:$0xff] %v11548_v55  ;;  %9095 = vmatprep.subr.bf16.mxu1 %v18885_v37  ;;  %v11553_v29 = vpop.permute.xlu0 %3342  ;;  %v9422_v55 = vld [vmem:[%s18355_s0 + $0xe8] ss:$28 sps:$4 sm:$0xff]   ;;  %v18895_v9 = vld [vmem:[#allocation8_spill] sm:$0xff] }
 0x134   :  { %18889 = vst [vmem:[#allocation123_spill] sm:$0xff] %v11550_v41  ;;  %18890 = vst [vmem:[#allocation124_spill] sm:$0xff] %v11553_v29  ;;  %v11555_v40 = vpop.f32.mrf.mxu0  ;;  %2579 = vmatmul.mubr.bf16.gmra.mxu0 %v11531_v47  ;;  %4762 = vrot.lane.b32.xlu1 %v9421_v20, %s9642_s10  ;;  %v11567_v41 = vpop.f32.mrf.mxu1 }
 0x135   :  { %18891 = vst [vmem:[#allocation125_spill] sm:$0xff] %v11555_v40  ;;  %18893 = vst [vmem:[#allocation127_spill] sm:$0xff] %v11567_v41  ;;  %2692 = vmatmul.mubr.bf16.gmra.mxu1 %v11531_v47  ;;  %2761 = vmatpush1.bf16.msra.mxu0 %v11561_v1  ;;  %v18894_v40 = vld [vmem:[#allocation9_spill] sm:$0xff]  ;;  %v11594_v41 = vsel %vm2421_vm0, %v10494_v21, %v18895_v9 }
 0x136   :  { %v11574_v5 = vsel %vm2421_vm0, %v18895_v9, %v18894_v40  ;;  %9096 = vmatpush3.bf16.msra.mxu1 %v18885_v37  ;;  %v11581_v20 = vpop.f32.mrf.mxu0  ;;  %v11583_v2 = vpop.permute.xlu1 %3344  ;;  %2701 = vmatprep.mubr.bf16.mxu1 %v18850_v18  ;;  %18901 = vst [vmem:[#allocation132_spill] sm:$0xff] %v11594_v41 }
 0x137   :  { %18896 = vst [vmem:[#allocation8_spill] sm:$0xff] %v11574_v5  ;;  %2762 = vmatprep.subr.bf16.mxu0 %v11574_v5  ;;  %18897 = vst [vmem:[#allocation128_spill] sm:$0xff] %v11581_v20  ;;  %9097 = vmatprep.subr.bf16.mxu1 %v18894_v40  ;;  %v11587_v1 = vpop.f32.mrf.mxu1  ;;  %v11600_v20 = vld [vmem:[%s18356_s2 + $0x58] sm:$0xff]   ;;  %v18903_v5 = vld [vmem:[#allocation6_spill] sm:$0xff] }
 0x138   :  { %18898 = vst [vmem:[#allocation129_spill] sm:$0xff] %v11583_v2  ;;  %18899 = vst [vmem:[#allocation130_spill] sm:$0xff] %v11587_v1  ;;  %v11589_v29 = vpop.f32.mrf.mxu0  ;;  %2588 = vmatprep.mubr.bf16.mxu0 %v18850_v18  ;;  %4764 = vrot.lane.b32.xlu0 %v9422_v55, %s9642_s10  ;;  %v9425_v1 = vld [vmem:[%s18355_s0 + $0xf0] ss:$28 sps:$4 sm:$0xff]   ;;  %v9452_v2 = vld [vmem:[%s18355_s0 + $0x168] ss:$28 sps:$4 sm:$0xff]  }
 0x139   :  { %18900 = vst [vmem:[#allocation131_spill] sm:$0xff] %v11589_v29  ;;  %2763 = vmatpush1.bf16.msra.mxu0 %v11594_v41  ;;  %v18902_v29 = vld [vmem:[#allocation7_spill] sm:$0xff]  ;;  %4766 = vrot.lane.b32.xlu1 %v9424_v59, %s9642_s10  ;;  %v11613_v9 = vpop.permute.xlu0 %3346  ;;  %v11622_v41 = vpop.f32.mrf.mxu1  ;;  %v11630_v59 = vsel %vm2421_vm0, %v10409_v53, %v18903_v5  ;;  %v9429_v53 = vld [vmem:[%s18355_s0 + $0xf8] ss:$28 sps:$4 sm:$0xff]  }
 0x13a   :  { %v11610_v21 = vsel %vm2421_vm0, %v18903_v5, %v18902_v29  ;;  %18905 = vst [vmem:[#allocation133_spill] sm:$0xff] %v11613_v9  ;;  %9098 = vmatpush3.bf16.msra.mxu1 %v18894_v40  ;;  %v11617_v55 = vpop.f32.mrf.mxu0  ;;  %v11619_v37 = vpop.permute.xlu1 %3348  ;;  %18908 = vst [vmem:[#allocation136_spill] sm:$0xff] %v11622_v41  ;;  %v18912_v40 = vld [vmem:[#allocation4_spill] sm:$0xff] }
 0x13b   :  { %18904 = vst [vmem:[#allocation6_spill] sm:$0xff] %v11610_v21  ;;  %2764 = vmatprep.subr.bf16.mxu0 %v11610_v21  ;;  %18906 = vst [vmem:[#allocation134_spill] sm:$0xff] %v11617_v55  ;;  %9099 = vmatprep.subr.bf16.mxu1 %v18902_v29  ;;  %v9428_v55 = vld [vmem:[%s18355_s0 + $0xf4] ss:$28 sps:$4 sm:$0xff]   ;;  %v18911_v21 = vld [vmem:[#allocation5_spill] sm:$0xff]  ;;  %v11663_v8 = vsel %vm2421_vm0, %v10270_v22, %v18912_v40 }
 0x13c   :  { %18907 = vst [vmem:[#allocation135_spill] sm:$0xff] %v11619_v37  ;;  %v11624_v46 = vpop.f32.mrf.mxu0  ;;  %2589 = vmatmul.mubr.bf16.gmra.mxu0 %v11600_v20  ;;  %18910 = vst [vmem:[#allocation138_spill] sm:$0xff] %v11630_v59  ;;  %4768 = vrot.lane.b32.xlu0 %v9425_v1, %s9642_s10  ;;  %v9432_v22 = vld [vmem:[%s18355_s0 + $0x11c] ss:$28 sps:$4 sm:$0xff]  }
 0x13d   :  { %18909 = vst [vmem:[#allocation137_spill] sm:$0xff] %v11624_v46  ;;  %2702 = vmatmul.mubr.bf16.gmra.mxu1 %v11600_v20  ;;  %2765 = vmatpush1.bf16.msra.mxu0 %v11630_v59  ;;  %v11641_v46 = vsel %vm2421_vm0, %v18912_v40, %v18911_v21  ;;  %v11646_v5 = vpop.permute.xlu0 %3350  ;;  %v11656_v59 = vpop.f32.mrf.mxu1  ;;  %18919 = vst [vmem:[#allocation144_spill] sm:$0xff] %v11663_v8 }
 0x13e   :  { %18913 = vst [vmem:[#allocation4_spill] sm:$0xff] %v11641_v46  ;;  %18914 = vst [vmem:[#allocation139_spill] sm:$0xff] %v11646_v5  ;;  %9100 = vmatpush3.bf16.msra.mxu1 %v18902_v29  ;;  %2766 = vmatprep.subr.bf16.mxu0 %v11641_v46  ;;  %v11650_v1 = vpop.f32.mrf.mxu0  ;;  %v11652_v41 = vpop.permute.xlu1 %3352 }
 0x13f   :  { %18915 = vst [vmem:[#allocation140_spill] sm:$0xff] %v11650_v1  ;;  %18916 = vst [vmem:[#allocation141_spill] sm:$0xff] %v11652_v41  ;;  %9101 = vmatprep.subr.bf16.mxu1 %v18911_v21  ;;  %2711 = vmatprep.mubr.bf16.mxu1 %v18850_v18  ;;  %v11669_v1 = vld [vmem:[%s18356_s2 + $0x60] sm:$0xff]   ;;  %v11689_v46 = vpop.f32.mrf.mxu1 }
 0x140   :  { %18917 = vst [vmem:[#allocation142_spill] sm:$0xff] %v11656_v59  ;;  %v11658_v3 = vpop.f32.mrf.mxu0  ;;  %2598 = vmatprep.mubr.bf16.mxu0 %v18850_v18  ;;  %4770 = vrot.lane.b32.xlu1 %v9428_v55, %s9642_s10  ;;  %v9430_v59 = vld [vmem:[%s18355_s0 + $0x118] ss:$28 sps:$4 sm:$0xff]   ;;  %18923 = vst [vmem:[#allocation148_spill] sm:$0xff] %v11689_v46 }
 0x141   :  { %18918 = vst [vmem:[#allocation143_spill] sm:$0xff] %v11658_v3  ;;  %2767 = vmatpush1.bf16.msra.mxu0 %v11663_v8  ;;  %4772 = vrot.lane.b32.xlu0 %v9429_v53, %s9642_s10  ;;  %v11680_v40 = vpop.permute.xlu0 %3354  ;;  %v9434_v53 = vld [vmem:[%s18355_s0 + $0x120] ss:$28 sps:$4 sm:$0xff]  }
 0x142   :  { %18920 = vst [vmem:[#allocation145_spill] sm:$0xff] %v11680_v40  ;;  %9102 = vmatpush3.bf16.msra.mxu1 %v18911_v21  ;;  %3490 = vmatprep.subr.bf16.mxu0 %v10884_v10  ;;  %v11684_v3 = vpop.f32.mrf.mxu0  ;;  %v11686_v55 = vpop.permute.xlu1 %3356  ;;  %v9436_v10 = vld [vmem:[%s18355_s0 + $0x124] ss:$28 sps:$4 sm:$0xff]   ;;  %v9439_v21 = vld [vmem:[%s18355_s0 + $0x12c] ss:$28 sps:$4 sm:$0xff]  }
 0x143   :  { %18921 = vst [vmem:[#allocation146_spill] sm:$0xff] %v11684_v3  ;;  %18922 = vst [vmem:[#allocation147_spill] sm:$0xff] %v11686_v55  ;;  %3603 = vmatprep.subr.bf16.mxu1 %v10900_v44 }
 0x144   :  { %v11691_v8 = vpop.f32.mrf.mxu0  ;;  %2599 = vmatmul.mubr.bf16.gmra.mxu0 %v11669_v1  ;;  %4774 = vrot.lane.b32.xlu1 %v9430_v59, %s9642_s10 }
 0x145   :  { %18924 = vst [vmem:[#allocation149_spill] sm:$0xff] %v11691_v8  ;;  %2712 = vmatmul.mubr.bf16.gmra.mxu1 %v11669_v1  ;;  %4776 = vrot.lane.b32.xlu0 %v9432_v22, %s9642_s10  ;;  %v11703_v44 = vpop.permute.xlu0 %3358  ;;  %v11711_v8 = vpop.f32.mrf.mxu1  ;;  %v11718_v22 = vld [vmem:[%s18356_s2 + $0x68] sm:$0xff]  }
 0x146   :  { %18925 = vst [vmem:[#allocation150_spill] sm:$0xff] %v11703_v44  ;;  %v11705_v40 = vpop.f32.mrf.mxu0  ;;  %2721 = vmatprep.mubr.bf16.mxu1 %v18850_v18  ;;  %2608 = vmatprep.mubr.bf16.mxu0 %v18850_v18  ;;  %v11709_v59 = vpop.permute.xlu1 %3360  ;;  %18927 = vst [vmem:[#allocation152_spill] sm:$0xff] %v11711_v8 }
 0x147   :  { %18926 = vst [vmem:[#allocation151_spill] sm:$0xff] %v11705_v40  ;;  %v9437_v40 = vld [vmem:[%s18355_s0 + $0x128] ss:$28 sps:$4 sm:$0xff]   ;;  %v11734_v46 = vpop.f32.mrf.mxu1 }
 0x148   :  { %v11713_v3 = vpop.f32.mrf.mxu0  ;;  %4778 = vrot.lane.b32.xlu1 %v9434_v53, %s9642_s10  ;;  %18930 = vst [vmem:[#allocation155_spill] sm:$0xff] %v11734_v46  ;;  %v9441_v53 = vld [vmem:[%s18355_s0 + $0x130] ss:$28 sps:$4 sm:$0xff]  }
 0x149   :  { %18928 = vst [vmem:[#allocation153_spill] sm:$0xff] %v11713_v3  ;;  %4780 = vrot.lane.b32.xlu0 %v9436_v10, %s9642_s10  ;;  %v11728_v8 = vpop.permute.xlu0 %3362  ;;  %v9442_v10 = vld [vmem:[%s18355_s0 + $0x150] ss:$28 sps:$4 sm:$0xff]  }
 0x14a   :  { %v11730_v3 = vpop.f32.mrf.mxu0  ;;  %v11732_v29 = vpop.permute.xlu1 %3364 }
 0x14b   :  { %18929 = vst [vmem:[#allocation154_spill] sm:$0xff] %v11730_v3 }
 0x14c   :  { %v11736_v55 = vpop.f32.mrf.mxu0  ;;  %2609 = vmatmul.mubr.bf16.gmra.mxu0 %v11718_v22  ;;  %4782 = vrot.lane.b32.xlu1 %v9437_v40, %s9642_s10 }
 0x14d   :  { %18931 = vst [vmem:[#allocation156_spill] sm:$0xff] %v11736_v55  ;;  %2722 = vmatmul.mubr.bf16.gmra.mxu1 %v11718_v22  ;;  %4784 = vrot.lane.b32.xlu0 %v9439_v21, %s9642_s10  ;;  %v11748_v3 = vpop.permute.xlu0 %3366  ;;  %v11756_v55 = vpop.f32.mrf.mxu1  ;;  %v11763_v21 = vld [vmem:[%s18356_s2 + $0x70] sm:$0xff]  }
 0x14e   :  { %v11750_v46 = vpop.f32.mrf.mxu0  ;;  %2731 = vmatprep.mubr.bf16.mxu1 %v18850_v18  ;;  %2618 = vmatprep.mubr.bf16.mxu0 %v18850_v18  ;;  %v11754_v40 = vpop.permute.xlu1 %3368  ;;  %18934 = vst [vmem:[#allocation159_spill] sm:$0xff] %v11756_v55 }
 0x14f   :  { %18932 = vst [vmem:[#allocation157_spill] sm:$0xff] %v11750_v46  ;;  %18933 = vst [vmem:[#allocation158_spill] sm:$0xff] %v11754_v40  ;;  %v9444_v46 = vld [vmem:[%s18355_s0 + $0x154] ss:$28 sps:$4 sm:$0xff]   ;;  %v11779_v15 = vpop.f32.mrf.mxu1 }
 0x150   :  { %v11758_v24 = vpop.f32.mrf.mxu0  ;;  %4786 = vrot.lane.b32.xlu1 %v9441_v53, %s9642_s10  ;;  %v9445_v40 = vld [vmem:[%s18355_s0 + $0x158] ss:$28 sps:$4 sm:$0xff]   ;;  %18938 = vst [vmem:[#allocation163_spill] sm:$0xff] %v11779_v15 }
 0x151   :  { %18935 = vst [vmem:[#allocation160_spill] sm:$0xff] %v11758_v24  ;;  %4788 = vrot.lane.b32.xlu0 %v9442_v10, %s9642_s10  ;;  %v11773_v55 = vpop.permute.xlu0 %3370  ;;  %v9448_v53 = vld [vmem:[%s18355_s0 + $0x15c] ss:$28 sps:$4 sm:$0xff]  }
 0x152   :  { %18936 = vst [vmem:[#allocation161_spill] sm:$0xff] %v11773_v55  ;;  %v11775_v24 = vpop.f32.mrf.mxu0  ;;  %v11777_v4 = vpop.permute.xlu1 %3372  ;;  %v9449_v10 = vld [vmem:[%s18355_s0 + $0x160] ss:$28 sps:$4 sm:$0xff]  }
 0x153   :  { %18937 = vst [vmem:[#allocation162_spill] sm:$0xff] %v11775_v24 }
 0x154   :  { %v11781_v13 = vpop.f32.mrf.mxu0  ;;  %2619 = vmatmul.mubr.bf16.gmra.mxu0 %v11763_v21  ;;  %4790 = vrot.lane.b32.xlu1 %v9444_v46, %s9642_s10 }
 0x155   :  { %18939 = vst [vmem:[#allocation164_spill] sm:$0xff] %v11781_v13  ;;  %2732 = vmatmul.mubr.bf16.gmra.mxu1 %v11763_v21  ;;  %4792 = vrot.lane.b32.xlu0 %v9445_v40, %s9642_s10  ;;  %v11793_v24 = vpop.permute.xlu0 %3374  ;;  %v11801_v13 = vpop.f32.mrf.mxu1  ;;  %v11808_v40 = vld [vmem:[%s18356_s2 + $0x78] sm:$0xff]  }
 0x156   :  { %v11795_v15 = vpop.f32.mrf.mxu0  ;;  %2741 = vmatprep.mubr.bf16.mxu1 %v18850_v18  ;;  %2628 = vmatprep.mubr.bf16.mxu0 %v18850_v18  ;;  %v11799_v46 = vpop.permute.xlu1 %3376  ;;  %18941 = vst [vmem:[#allocation166_spill] sm:$0xff] %v11801_v13 }
 0x157   :  { %18940 = vst [vmem:[#allocation165_spill] sm:$0xff] %v11795_v15  ;;  %v9451_v15 = vld [vmem:[%s18355_s0 + $0x164] ss:$28 sps:$4 sm:$0xff]   ;;  %v11822_v5 = vpop.f32.mrf.mxu1 }
 0x158   :  { %v11803_v55 = vpop.f32.mrf.mxu0  ;;  %4794 = vrot.lane.b32.xlu1 %v9448_v53, %s9642_s10  ;;  %18944 = vst [vmem:[#allocation169_spill] sm:$0xff] %v11822_v5  ;;  %v9453_v53 = vld [vmem:[%s18355_s0 + $0x188] ss:$28 sps:$4 sm:$0xff]  }
 0x159   :  { %18942 = vst [vmem:[#allocation167_spill] sm:$0xff] %v11803_v55  ;;  %4796 = vrot.lane.b32.xlu0 %v9449_v10, %s9642_s10 }
 0x15a   :  { %v11818_v13 = vpop.f32.mrf.mxu0  ;;  %v11820_v55 = vpop.permute.xlu0 %3378 }
 0x15b   :  { %18943 = vst [vmem:[#allocation168_spill] sm:$0xff] %v11818_v13  ;;  %v11831_v10 = vpop.permute.xlu1 %3380  ;;  %v9455_v13 = vld [vmem:[%s18355_s0 + $0x18c] ss:$28 sps:$4 sm:$0xff]  }
 0x15c   :  { %v11824_v41 = vpop.f32.mrf.mxu0  ;;  %2629 = vmatmul.mubr.bf16.gmra.mxu0 %v11808_v40  ;;  %4798 = vrot.lane.b32.xlu1 %v9451_v15, %s9642_s10 }
 0x15d   :  { %18945 = vst [vmem:[#allocation170_spill] sm:$0xff] %v11824_v41  ;;  %2742 = vmatmul.mubr.bf16.gmra.mxu1 %v11808_v40  ;;  %4800 = vrot.lane.b32.xlu0 %v9452_v2, %s9642_s10  ;;  %v11844_v41 = vpop.f32.mrf.mxu1  ;;  %v9456_v2 = vld [vmem:[%s18355_s0 + $0x190] ss:$28 sps:$4 sm:$0xff]  }
 0x15e   :  { %v11838_v5 = vpop.f32.mrf.mxu0  ;;  %9103 = vmatprep.mubr.bf16.mxu1 %v11406_v28  ;;  %2784 = vmatprep.mubr.bf16.mxu0 %v18850_v18  ;;  %v11842_v15 = vpop.permute.xlu0 %3382  ;;  %18948 = vst [vmem:[#allocation173_spill] sm:$0xff] %v11844_v41  ;;  %v9458_v41 = vld [vmem:[%s18355_s0 + $0x194] ss:$28 sps:$4 sm:$0xff]  }
 0x15f   :  { %18946 = vst [vmem:[#allocation171_spill] sm:$0xff] %v11838_v5  ;;  %18947 = vst [vmem:[#allocation172_spill] sm:$0xff] %v11842_v15  ;;  %v11857_v44 = vpop.f32.mrf.mxu1 }
 0x160   :  { %v11846_v9 = vpop.f32.mrf.mxu0  ;;  %4802 = vrot.lane.b32.xlu1 %v9453_v53, %s9642_s10  ;;  %18952 = vst [vmem:[#allocation177_spill] sm:$0xff] %v11857_v44  ;;  %v9459_v53 = vld [vmem:[%s18355_s0 + $0x198] ss:$28 sps:$4 sm:$0xff]  }
 0x161   :  { %18949 = vst [vmem:[#allocation174_spill] sm:$0xff] %v11846_v9  ;;  %4804 = vrot.lane.b32.xlu0 %v9455_v13, %s9642_s10 }
 0x162   :  { %v11853_v37 = vpop.f32.mrf.mxu0  ;;  %v11855_v5 = vpop.permute.xlu1 %3384 }
 0x163   :  { %18950 = vst [vmem:[#allocation175_spill] sm:$0xff] %v11853_v37  ;;  %18951 = vst [vmem:[#allocation176_spill] sm:$0xff] %v11855_v5  ;;  %v11867_v13 = vpop.permute.xlu0 %4704 }
 0x164   :  { %v1352_v15 = vpop.f32.mrf.mxu0  ;;  %2785 = vmatmul.mubr.bf16.vlgmr.msra.gmra.mxu0 %v11406_v28  ;;  %4806 = vrot.lane.b32.xlu1 %v9456_v2, %s9642_s10  ;;  %18953 = vst [vmem:[#allocation178_spill] sm:$0xff] %v11867_v13  ;;  %v18954_v28 = vld [vmem:[#allocation21_spill] sm:$0xff] }
 0x165   :  { %v1465_v37 = vpop.f32.mrf.mxu1  ;;  %9104 = vmatmul.mubr.bf16.vlgmr.msra.gmra.mxu1 %v11464_v42  ;;  %v1353_v9 = vadd.f32 %v1352_v15, %v10918_v48  ;;  %3491 = vmatpush1.bf16.msra.mxu0 %v10907_v63  ;;  %v9461_v63 = vld [vmem:[%s18355_s0 + $0x19c] ss:$28 sps:$4 sm:$0xff]  }
 0x166   :  { %v1466_v44 = vadd.f32 %v1465_v37, %v10931_v6  ;;  %3604 = vmatpush1.bf16.msra.mxu1 %v10910_v23  ;;  %3492 = vmatprep.subr.bf16.mxu0 %v18954_v28  ;;  %v1354_v2 = vpop.f32.mrf.mxu0  ;;  %v11875_v5 = vpop.permute.xlu1 %4706 }
 0x167   :  { %18955 = vst [vmem:[#allocation21_spill] sm:$0xff] %v11875_v5  ;;  %1754 = vst [vmem:[%s18358_s4] sm:$0xff] %v1353_v9  ;;  %3605 = vmatprep.subr.bf16.mxu1 %v10924_v39  ;;  %v1467_v13 = vpop.f32.mrf.mxu1  ;;  %v1355_v48 = vadd.f32 %v1354_v2, %v10938_v32  ;;  %4808 = vrot.lane.b32.xlu0 %v9458_v41, %s9642_s10  ;;  %v9462_v39 = vld [vmem:[%s18355_s0 + $0x1a0] ss:$28 sps:$4 sm:$0xff]   ;;  %v18961_v2 = vld [vmem:[#allocation28_spill] sm:$0xff] }
 0x168   :  { %1756 = vst [vmem:[%s18358_s4 + $0x10] sm:$0xff] %v1466_v44  ;;  %v1468_v23 = vadd.f32 %v1467_v13, %v10948_v36  ;;  %v1356_v6 = vpop.f32.mrf.mxu0  ;;  %2794 = vmatprep.mubr.bf16.mxu0 %v18850_v18  ;;  %4810 = vrot.lane.b32.xlu1 %v9459_v53, %s9642_s10  ;;  %v18956_v36 = vld [vmem:[#allocation24_spill] sm:$0xff]  ;;  %v18959_v53 = vld [vmem:[#allocation27_spill] sm:$0xff] }
 0x169   :  { %1755 = vst [vmem:[%s18358_s4 + $0x8] sm:$0xff] %v1355_v48  ;;  %v1469_v32 = vpop.f32.mrf.mxu1  ;;  %v1357_v41 = vadd.f32 %v1356_v6, %v10956_v12  ;;  %3493 = vmatpush1.bf16.msra.mxu0 %v10943_v45  ;;  %9107 = vmatprep.mubr.bf16.mxu1 %v11531_v47 }
 0x16a   :  { %1757 = vst [vmem:[%s18358_s4 + $0x18] sm:$0xff] %v1468_v23  ;;  %v1470_v37 = vadd.f32 %v1469_v32, %v18956_v36  ;;  %3606 = vmatpush1.bf16.msra.mxu1 %v10953_v16  ;;  %3494 = vmatprep.subr.bf16.mxu0 %v10971_v14  ;;  %v1358_v9 = vpop.f32.mrf.mxu0  ;;  %v11907_v44 = vpop.permute.xlu0 %4708  ;;  %v18963_v23 = vld [vmem:[#allocation31_spill] sm:$0xff] }
 0x16b   :  { %18957 = vst [vmem:[#allocation24_spill] sm:$0xff] %v11907_v44  ;;  %1762 = vst [vmem:[%s18358_s4 + $0x38] sm:$0xff] %v1357_v41  ;;  %3607 = vmatprep.subr.bf16.mxu1 %v10961_v49  ;;  %v1471_v12 = vpop.f32.mrf.mxu1  ;;  %v1359_v45 = vadd.f32 %v1358_v9, %v10979_v7  ;;  %4812 = vrot.lane.b32.xlu0 %v9461_v63, %s9642_s10  ;;  %v11920_v15 = vpop.permute.xlu1 %4710  ;;  %v9466_v49 = vld [vmem:[%s18355_s0 + $0x1c0] ss:$28 sps:$4 sm:$0xff]  }
 0x16c   :  { %1764 = vst [vmem:[%s18358_s4 + $0x48] sm:$0xff] %v1470_v37  ;;  %v1472_v16 = vadd.f32 %v1471_v12, %v10984_v19  ;;  %v1362_v14 = vpop.f32.mrf.mxu0  ;;  %2795 = vmatmul.mubr.bf16.gmra.mxu0 %v11464_v42  ;;  %18958 = vst [vmem:[#allocation179_spill] sm:$0xff] %v11920_v15  ;;  %4814 = vrot.lane.b32.xlu1 %v9462_v39, %s9642_s10  ;;  %v9468_v19 = vld [vmem:[%s18355_s0 + $0x1c4] ss:$28 sps:$4 sm:$0xff]   ;;  %v18960_v42 = vld [vmem:[#allocation29_spill] sm:$0xff] }
 0x16d   :  { %1763 = vst [vmem:[%s18358_s4 + $0x40] sm:$0xff] %v1359_v45  ;;  %v1475_v7 = vpop.f32.mrf.mxu1  ;;  %v1363_v13 = vadd.f32 %v1362_v14, %v18959_v53  ;;  %3495 = vmatpush1.bf16.msra.mxu0 %v10992_v25  ;;  %2804 = vmatprep.mubr.bf16.mxu0 %v18850_v18  ;;  %v18964_v39 = vld [vmem:[#allocation33_spill] sm:$0xff]  ;;  %v18970_v53 = vld [vmem:[#allocation38_spill] sm:$0xff] }
 0x16e   :  { %1765 = vst [vmem:[%s18358_s4 + $0x50] sm:$0xff] %v1472_v16  ;;  %v1476_v28 = vadd.f32 %v1475_v7, %v18960_v42  ;;  %3608 = vmatpush1.bf16.msra.mxu1 %v18961_v2  ;;  %3496 = vmatprep.subr.bf16.mxu0 %v11011_v30  ;;  %v1364_v48 = vpop.f32.mrf.mxu0  ;;  %v11941_v63 = vpop.permute.xlu0 %4712  ;;  %v18968_v14 = vld [vmem:[#allocation37_spill] sm:$0xff]  ;;  %v18972_v2 = vld [vmem:[#allocation43_spill] sm:$0xff] }
 0x16f   :  { %18962 = vst [vmem:[#allocation27_spill] sm:$0xff] %v11941_v63  ;;  %1769 = vst [vmem:[%s18358_s4 + $0x70] sm:$0xff] %v1363_v13  ;;  %3609 = vmatprep.subr.bf16.mxu1 %v11022_v26  ;;  %v1477_v25 = vpop.f32.mrf.mxu1  ;;  %v1365_v6 = vadd.f32 %v1364_v48, %v18963_v23  ;;  %9108 = vmatmul.mubr.bf16.gmra.mxu1 %v11600_v20  ;;  %v9469_v26 = vld [vmem:[%s18355_s0 + $0x1c8] ss:$28 sps:$4 sm:$0xff]   ;;  %v18971_v42 = vld [vmem:[#allocation41_spill] sm:$0xff] }
 0x170   :  { %1771 = vst [vmem:[%s18358_s4 + $0x80] sm:$0xff] %v1476_v28  ;;  %v1478_v30 = vadd.f32 %v1477_v25, %v18964_v39  ;;  %v1366_v32 = vpop.f32.mrf.mxu0  ;;  %9111 = vmatprep.mubr.bf16.mxu1 %v11669_v1  ;;  %5669 = vrot.lane.b32.xlu0 %v9466_v49, %s9642_s10 }
 0x171   :  { %1770 = vst [vmem:[%s18358_s4 + $0x78] sm:$0xff] %v1365_v6  ;;  %v1479_v41 = vpop.f32.mrf.mxu1  ;;  %v1367_v36 = vadd.f32 %v1366_v32, %v11033_v61  ;;  %3497 = vmatpush1.bf16.msra.mxu0 %v11038_v35  ;;  %5671 = vrot.lane.b32.xlu1 %v9468_v19, %s9642_s10  ;;  %v18966_v61 = vld [vmem:[#allocation35_spill] sm:$0xff] }
 0x172   :  { %1772 = vst [vmem:[%s18358_s4 + $0x88] sm:$0xff] %v1478_v30  ;;  %v1480_v37 = vadd.f32 %v1479_v41, %v11050_v56  ;;  %3610 = vmatpush1.bf16.msra.mxu1 %v11048_v57  ;;  %3498 = vmatprep.subr.bf16.mxu0 %v11056_v33  ;;  %v1368_v9 = vpop.f32.mrf.mxu0  ;;  %v11970_v12 = vpop.permute.xlu1 %4714  ;;  %v9471_v33 = vld [vmem:[%s18355_s0 + $0x1cc] ss:$28 sps:$4 sm:$0xff]  }
 0x173   :  { %18965 = vst [vmem:[#allocation29_spill] sm:$0xff] %v11970_v12  ;;  %1776 = vst [vmem:[%s18358_s4 + $0xa8] sm:$0xff] %v1367_v36  ;;  %3611 = vmatprep.subr.bf16.mxu1 %v11065_v58  ;;  %v1481_v35 = vpop.f32.mrf.mxu1  ;;  %v1369_v45 = vadd.f32 %v1368_v9, %v18966_v61  ;;  %v11977_v16 = vpop.permute.xlu0 %4716  ;;  %v9478_v9 = vld [vmem:[%s18355_s0 + $0x1d8] ss:$28 sps:$4 sm:$0xff]  }
 0x174   :  { %18967 = vst [vmem:[#allocation28_spill] sm:$0xff] %v11977_v16  ;;  %1778 = vst [vmem:[%s18358_s4 + $0xb8] sm:$0xff] %v1480_v37  ;;  %v1482_v57 = vadd.f32 %v1481_v35, %v11073_v51  ;;  %v1372_v56 = vpop.f32.mrf.mxu0  ;;  %2805 = vmatmul.mubr.bf16.gmra.mxu0 %v11531_v47  ;;  %5673 = vrot.lane.b32.xlu0 %v9469_v26, %s9642_s10  ;;  %v9474_v51 = vld [vmem:[%s18355_s0 + $0x1d0] ss:$28 sps:$4 sm:$0xff]   ;;  %v18974_v26 = vld [vmem:[#allocation46_spill] sm:$0xff] }
 0x175   :  { %1777 = vst [vmem:[%s18358_s4 + $0xb0] sm:$0xff] %v1369_v45  ;;  %v1485_v58 = vpop.f32.mrf.mxu1  ;;  %v1373_v49 = vadd.f32 %v1372_v56, %v18968_v14  ;;  %3499 = vmatpush1.bf16.msra.mxu0 %v11081_v17  ;;  %2814 = vmatprep.mubr.bf16.mxu0 %v18850_v18  ;;  %v18969_v47 = vld [vmem:[#allocation39_spill] sm:$0xff]  ;;  %v18976_v61 = vld [vmem:[#allocation49_spill] sm:$0xff]  ;;  %v18977_v45 = vld [vmem:[#allocation50_spill] sm:$0xff] }
 0x176   :  { %1779 = vst [vmem:[%s18358_s4 + $0xc0] sm:$0xff] %v1482_v57  ;;  %v1486_v7 = vadd.f32 %v1485_v58, %v18969_v47  ;;  %3612 = vmatpush1.bf16.msra.mxu1 %v18970_v53  ;;  %3500 = vmatprep.subr.bf16.mxu0 %v11099_v27  ;;  %v1374_v13 = vpop.f32.mrf.mxu0  ;;  %v12003_v19 = vpop.permute.xlu1 %4718  ;;  %v12051_v37 = vld [vmem:[%s18357_s1 + $0x84] ss:$8 sps:$4 sm:$0xff]   ;;  %v4334_v57 = vld [vmem:[%s18355_s0 + $0x1f8] sm:$0xff]  ;;  %v18978_v58 = vld [vmem:[#allocation52_spill] sm:$0xff] }
 0x177   :  { %1783 = vst [vmem:[%s18358_s4 + $0xe0] sm:$0xff] %v1373_v49  ;;  %3613 = vmatprep.subr.bf16.mxu1 %v11110_v31  ;;  %v1487_v17 = vpop.f32.mrf.mxu1  ;;  %v1375_v28 = vadd.f32 %v1374_v13, %v18971_v42  ;;  %9112 = vmatmul.mubr.bf16.gmra.mxu1 %v11718_v22  ;;  %v9477_v31 = vld [vmem:[%s18355_s0 + $0x1d4] ss:$28 sps:$4 sm:$0xff]   ;;  %v18979_v49 = vld [vmem:[#allocation51_spill] sm:$0xff] }
 0x178   :  { %1785 = vst [vmem:[%s18358_s4 + $0xf0] sm:$0xff] %v1486_v7  ;;  %v1488_v27 = vadd.f32 %v1487_v17, %v18972_v2  ;;  %v1376_v48 = vpop.f32.mrf.mxu0  ;;  %v12015_v25 = vpop.permute.xlu0 %4720  ;;  %9115 = vmatprep.mubr.bf16.mxu1 %v11763_v21  ;;  %5675 = vrot.lane.b32.xlu1 %v9471_v33, %s9642_s10  ;;  %v4338_v56 = vld [vmem:[%s18355_s0 + $0x214] sm:$0xff]  ;;  %v18981_v13 = vld [vmem:[#allocation3_spill] sm:$0xff] }
 0x179   :  { %1784 = vst [vmem:[%s18358_s4 + $0xe8] sm:$0xff] %v1375_v28  ;;  %v1489_v23 = vpop.f32.mrf.mxu1  ;;  %v1377_v6 = vadd.f32 %v1376_v48, %v11121_v43  ;;  %3501 = vmatpush1.bf16.msra.mxu0 %v11126_v54  ;;  %5677 = vrot.lane.b32.xlu0 %v9474_v51, %s9642_s10  ;;  %v18973_v54 = vld [vmem:[#allocation45_spill] sm:$0xff]  ;;  %v18982_v42 = vld [vmem:[#allocation56_spill] sm:$0xff] }
 0x17a   :  { %1786 = vst [vmem:[%s18358_s4 + $0xf8] sm:$0xff] %v1488_v27  ;;  %v1490_v39 = vadd.f32 %v1489_v23, %v11138_v38  ;;  %3614 = vmatpush1.bf16.msra.mxu1 %v11136_v60  ;;  %3502 = vmatprep.subr.bf16.mxu0 %v11144_v0  ;;  %v1378_v30 = vpop.f32.mrf.mxu0  ;;  %v12034_v32 = vpop.permute.xlu1 %4722  ;;  %v18975_v38 = vld [vmem:[#allocation48_spill] sm:$0xff]  ;;  %v18980_v51 = vld [vmem:[#allocation53_spill] sm:$0xff]  ;;  %v3431_v27 = vsel %vm2421_vm0, %v11820_v55, %v11831_v10 }
 0x17b   :  { %1790 = vst [vmem:[%s18358_s4 + $0x118] sm:$0xff] %v1377_v6  ;;  %3615 = vmatprep.subr.bf16.mxu1 %v18973_v54  ;;  %v1491_v43 = vpop.f32.mrf.mxu1  ;;  %v1379_v41 = vadd.f32 %v1378_v30, %v18974_v26  ;;  %v9479_v33 = vld [vmem:[%s18355_s0 + $0x1f8] ss:$28 sps:$4 sm:$0xff]   ;;  %v3429_v6 = vsel %vm2421_vm0, %v11793_v24, %v11799_v46  ;;  %v4339_v30 = vld [vmem:[%s18355_s0 + $0x21c] sm:$0xff] }
 0x17c   :  { %1792 = vst [vmem:[%s18358_s4 + $0x128] sm:$0xff] %v1490_v39  ;;  %v1492_v60 = vadd.f32 %v1491_v43, %v18975_v38  ;;  %v1382_v36 = vpop.f32.mrf.mxu0  ;;  %2815 = vmatmul.mubr.bf16.gmra.mxu0 %v11600_v20  ;;  %v12046_v0 = vpop.permute.xlu0 %4724  ;;  %5679 = vrot.lane.b32.xlu1 %v9477_v31, %s9642_s10  ;;  %v4335_v39 = vld [vmem:[%s18355_s0 + $0x200] sm:$0xff] }
 0x17d   :  { %1791 = vst [vmem:[%s18358_s4 + $0x120] sm:$0xff] %v1379_v41  ;;  %v1495_v35 = vpop.f32.mrf.mxu1  ;;  %v1383_v20 = vadd.f32 %v1382_v36, %v18976_v61  ;;  %3503 = vmatpush1.bf16.msra.mxu0 %v18977_v45  ;;  %2824 = vmatprep.mubr.bf16.mxu0 %v18850_v18  ;;  %v18986_v41 = vld [vmem:[#allocation58_spill] sm:$0xff] }
 0x17e   :  { %1793 = vst [vmem:[%s18358_s4 + $0x130] sm:$0xff] %v1492_v60  ;;  %v1496_v14 = vadd.f32 %v1495_v35, %v18978_v58  ;;  %3616 = vmatpush1.bf16.msra.mxu1 %v18979_v49  ;;  %3504 = vmatprep.subr.bf16.mxu0 %v18980_v51  ;;  %v1384_v47 = vpop.f32.mrf.mxu0  ;;  %v12078_v7 = vpop.permute.xlu1 %4726  ;;  %v9484_v60 = vld [vmem:[%s18355_s0 + $0x200] ss:$28 sps:$4 sm:$0xff]   ;;  %v3428_v35 = vsel %vm2421_vm0, %v11777_v4, %v11793_v24  ;;  %v4336_v24 = vld [vmem:[%s18355_s0 + $0x208] sm:$0xff]  ;;  %v18989_v51 = vld [vmem:[#allocation16_spill] sm:$0xff] }
 0x17f   :  { %1797 = vst [vmem:[%s18358_s4 + $0x150] sm:$0xff] %v1383_v20  ;;  %3617 = vmatprep.subr.bf16.mxu1 %v11198_v50  ;;  %v1497_v53 = vpop.f32.mrf.mxu1  ;;  %v1385_v17 = vadd.f32 %v1384_v47, %v18981_v13  ;;  %9116 = vmatmul.mubr.bf16.gmra.mxu1 %v11808_v40  ;;  %v8767_v50 = vcombine.high %v4334_v57, %v4338_v56  ;;  %v18988_v56 = vld [vmem:[#allocation61_spill] sm:$0xff] }
 0x180   :  { %1799 = vst [vmem:[%s18358_s4 + $0x160] sm:$0xff] %v1496_v14  ;;  %v1498_v28 = vadd.f32 %v1497_v53, %v18982_v42  ;;  %v1386_v2 = vpop.f32.mrf.mxu0  ;;  %v12093_v48 = vpop.permute.xlu0 %4728  ;;  %3635 = vmatprep.mubr.bf16.mxu1 %v12051_v37  ;;  %5681 = vrot.lane.b32.xlu0 %v9478_v9, %s9642_s10  ;;  %v8769_v20 = vcombine.high %v4335_v39, %v4339_v30  ;;  %v18990_v53 = vld [vmem:[#allocation63_spill] sm:$0xff]  ;;  %v18991_v42 = vld [vmem:[#allocation150_spill] sm:$0xff]  ;;  %v18994_v30 = vld [vmem:[#allocation133_spill] sm:$0xff] }
 0x181   :  { %18983 = vst [vmem:[#allocation31_spill] sm:$0xff] %v12093_v48  ;;  %1798 = vst [vmem:[%s18358_s4 + $0x158] sm:$0xff] %v1385_v17  ;;  %v1499_v31 = vpop.f32.mrf.mxu1  ;;  %v1387_v23 = vadd.f32 %v1386_v2, %v11214_v11  ;;  %3505 = vmatpush1.bf16.msra.mxu0 %v11219_v34  ;;  %5683 = vrot.lane.b32.xlu1 %v9479_v33, %s9642_s10  ;;  %v18984_v34 = vld [vmem:[#allocation2_spill] sm:$0xff]  ;;  %v3430_v57 = vsel %vm2421_vm0, %v11799_v46, %v11820_v55  ;;  %v18993_v39 = vld [vmem:[#allocation135_spill] sm:$0xff] }
 0x182   :  { %1800 = vst [vmem:[%s18358_s4 + $0x168] sm:$0xff] %v1498_v28  ;;  %v1500_v11 = vadd.f32 %v1499_v31, %v11231_v62  ;;  %3618 = vmatpush1.bf16.msra.mxu1 %v18984_v34  ;;  %3506 = vmatprep.subr.bf16.mxu0 %v3429_v6  ;;  %v1388_v54 = vpop.f32.mrf.mxu0  ;;  %v12117_v43 = vpop.permute.xlu1 %4730  ;;  %v18987_v62 = vld [vmem:[#allocation60_spill] sm:$0xff]  ;;  %v3423_v4 = vsel %vm2421_vm0, %v11709_v59, %v11728_v8  ;;  %v4340_v33 = vld [vmem:[%s18355_s0 + $0x224] sm:$0xff] }
 0x183   :  { %18985 = vst [vmem:[#allocation33_spill] sm:$0xff] %v12117_v43  ;;  %1804 = vst [vmem:[%s18358_s4 + $0x188] sm:$0xff] %v1387_v23  ;;  %3619 = vmatprep.subr.bf16.mxu1 %v3431_v27  ;;  %v1501_v26 = vpop.f32.mrf.mxu1  ;;  %v1389_v38 = vadd.f32 %v1388_v54, %v18986_v41  ;;  %v3425_v46 = vsel %vm2421_vm0, %v11732_v29, %v11748_v3  ;;  %v3422_v28 = vsel %vm2421_vm0, %v18991_v42, %v11709_v59  ;;  %v18992_v23 = vld [vmem:[#allocation64_spill] sm:$0xff]  ;;  %v18996_v54 = vld [vmem:[#allocation141_spill] sm:$0xff] }
 0x184   :  { %1806 = vst [vmem:[%s18358_s4 + $0x198] sm:$0xff] %v1500_v11  ;;  %v1502_v36 = vadd.f32 %v1501_v26, %v18987_v62  ;;  %v1392_v9 = vpop.f32.mrf.mxu0  ;;  %2825 = vmatmul.mubr.bf16.gmra.mxu0 %v11669_v1  ;;  %v12134_v61 = vpop.permute.xlu0 %4732  ;;  %5685 = vrot.lane.b32.xlu0 %v8767_v50, %s9642_s10  ;;  %v8771_v27 = vcombine.high %v4336_v24, %v4340_v33  ;;  %v18995_v11 = vld [vmem:[#allocation65_spill] sm:$0xff]  ;;  %v18997_v26 = vld [vmem:[#allocation139_spill] sm:$0xff]  ;;  %v19001_v24 = vld [vmem:[#allocation70_spill] sm:$0xff] }
 0x185   :  { %1805 = vst [vmem:[%s18358_s4 + $0x190] sm:$0xff] %v1389_v38  ;;  %v1505_v45 = vpop.f32.mrf.mxu1  ;;  %v1393_v1 = vadd.f32 %v1392_v9, %v18988_v56  ;;  %3507 = vmatpush2.bf16.msra.mxu0 %v3428_v35  ;;  %2834 = vmatprep.mubr.bf16.mxu0 %v18850_v18  ;;  %v3424_v31 = vsel %vm2421_vm0, %v11728_v8, %v11732_v29  ;;  %v18999_v9 = vld [vmem:[#allocation69_spill] sm:$0xff]  ;;  %v19089_v48 = vld [vmem:[#allocation8_spill] sm:$0xff] }
 0x186   :  { %1807 = vst [vmem:[%s18358_s4 + $0x1a0] sm:$0xff] %v1502_v36  ;;  %v1506_v55 = vadd.f32 %v1505_v45, %v11257_v52  ;;  %3620 = vmatpush2.bf16.msra.mxu1 %v3430_v57  ;;  %3508 = vmatprep.subr.bf16.mxu0 %v3423_v4  ;;  %v1394_v58 = vpop.f32.mrf.mxu0  ;;  %v12161_v14 = vpop.permute.xlu1 %4734  ;;  %v9486_v52 = vld [vmem:[%s18355_s0 + $0x208] ss:$28 sps:$4 sm:$0xff]   ;;  %v3417_v59 = vsel %vm2421_vm0, %v18994_v30, %v18993_v39  ;;  %v9491_v36 = vld [vmem:[%s18355_s0 + $0x210] ss:$28 sps:$4 sm:$0xff]   ;;  %v19000_v45 = vld [vmem:[#allocation129_spill] sm:$0xff] }
 0x187   :  { %1811 = vst [vmem:[%s18358_s4 + $0x1c0] sm:$0xff] %v1393_v1  ;;  %3621 = vmatprep.subr.bf16.mxu1 %v3425_v46  ;;  %v1507_v49 = vpop.f32.mrf.mxu1  ;;  %v1395_v47 = vadd.f32 %v1394_v58, %v18989_v51  ;;  %5687 = vrot.lane.b32.xlu1 %v9484_v60, %s9642_s10  ;;  %v3419_v41 = vsel %vm2421_vm0, %v18997_v26, %v18996_v54  ;;  %v18998_v60 = vld [vmem:[#allocation67_spill] sm:$0xff] }
 0x188   :  { %1813 = vst [vmem:[%s18358_s4 + $0x1d0] sm:$0xff] %v1506_v55  ;;  %v1508_v13 = vadd.f32 %v1507_v49, %v18990_v53  ;;  %v1396_v17 = vpop.f32.mrf.mxu0  ;;  %v12178_v2 = vpop.permute.xlu0 %4736  ;;  %5689 = vrot.lane.b32.xlu0 %v8769_v20, %s9642_s10  ;;  %v3416_v57 = vsel %vm2421_vm0, %v19000_v45, %v18994_v30  ;;  %v9492_v1 = vld [vmem:[%s18355_s0 + $0x230] ss:$28 sps:$4 sm:$0xff]  }
 0x189   :  { %1812 = vst [vmem:[%s18358_s4 + $0x1c8] sm:$0xff] %v1395_v47  ;;  %v1509_v50 = vpop.f32.mrf.mxu1  ;;  %v1397_v6 = vadd.f32 %v1396_v17, %v18992_v23  ;;  %3509 = vmatpush2.bf16.msra.mxu0 %v3422_v28  ;;  %v19002_v55 = vld [vmem:[#allocation112_spill] sm:$0xff]  ;;  %v19003_v46 = vld [vmem:[#allocation107_spill] sm:$0xff]  ;;  %v19005_v47 = vld [vmem:[#allocation118_spill] sm:$0xff] }
 0x18a   :  { %1814 = vst [vmem:[%s18358_s4 + $0x1d8] sm:$0xff] %v1508_v13  ;;  %v1510_v34 = vadd.f32 %v1509_v50, %v18995_v11  ;;  %3622 = vmatpush2.bf16.msra.mxu1 %v3424_v31  ;;  %3510 = vmatprep.subr.bf16.mxu0 %v3417_v59  ;;  %v1398_v29 = vpop.f32.mrf.mxu0  ;;  %v12198_v8 = vpop.permute.xlu1 %4738  ;;  %v3411_v58 = vsel %vm2421_vm0, %v19003_v46, %v19002_v55  ;;  %v19004_v49 = vld [vmem:[#allocation71_spill] sm:$0xff]  ;;  %v19008_v28 = vld [vmem:[#allocation72_spill] sm:$0xff]  ;;  %v19009_v31 = vld [vmem:[#allocation74_spill] sm:$0xff] }
 0x18b   :  { %1818 = vst [vmem:[%s18358_s4 + $0x1f8] sm:$0xff] %v1397_v6  ;;  %3623 = vmatprep.subr.bf16.mxu1 %v3419_v41  ;;  %v1511_v38 = vpop.f32.mrf.mxu1  ;;  %v1399_v62 = vadd.f32 %v1398_v29, %v18998_v60  ;;  %5691 = vrot.lane.b32.xlu1 %v9486_v52, %s9642_s10  ;;  %v19006_v52 = vld [vmem:[#allocation115_spill] sm:$0xff]  ;;  %v9494_v50 = vld [vmem:[%s18355_s0 + $0x234] ss:$28 sps:$4 sm:$0xff]  }
 0x18c   :  { %1820 = vst [vmem:[%s18358_s4 + $0x208] sm:$0xff] %v1510_v34  ;;  %v1512_v35 = vadd.f32 %v1511_v38, %v18999_v9  ;;  %v1402_v20 = vpop.f32.mrf.mxu0  ;;  %2835 = vmatmul.mubr.bf16.gmra.mxu0 %v11718_v22  ;;  %v12216_v56 = vpop.permute.xlu0 %4740  ;;  %5693 = vrot.lane.b32.xlu0 %v8771_v27, %s9642_s10  ;;  %v3418_v22 = vsel %vm2421_vm0, %v18993_v39, %v18997_v26  ;;  %v19010_v39 = vld [vmem:[#allocation103_spill] sm:$0xff]  ;;  %v9497_v11 = vld [vmem:[%s18355_s0 + $0x238] ss:$28 sps:$4 sm:$0xff]  }
 0x18d   :  { %1819 = vst [vmem:[%s18358_s4 + $0x200] sm:$0xff] %v1399_v62  ;;  %v1515_v4 = vpop.f32.mrf.mxu1  ;;  %v1403_v33 = vadd.f32 %v1402_v20, %v19001_v24  ;;  %3511 = vmatpush2.bf16.msra.mxu0 %v3416_v57  ;;  %2844 = vmatprep.mubr.bf16.mxu0 %v18850_v18  ;;  %v3413_v53 = vsel %vm2421_vm0, %v19006_v52, %v19005_v47  ;;  %v19012_v41 = vld [vmem:[#allocation75_spill] sm:$0xff] }
 0x18e   :  { %1821 = vst [vmem:[%s18358_s4 + $0x210] sm:$0xff] %v1512_v35  ;;  %v1516_v51 = vadd.f32 %v1515_v4, %v19004_v49  ;;  %3624 = vmatpush2.bf16.msra.mxu1 %v3418_v22  ;;  %3512 = vmatprep.subr.bf16.mxu0 %v3411_v58  ;;  %v1404_v13 = vpop.f32.mrf.mxu0  ;;  %v12240_v17 = vpop.permute.xlu1 %4742  ;;  %v3410_v30 = vsel %vm2421_vm0, %v19010_v39, %v19003_v46  ;;  %v19013_v38 = vld [vmem:[#allocation83_spill] sm:$0xff]  ;;  %v19016_v35 = vld [vmem:[#allocation90_spill] sm:$0xff]  ;;  %v19020_v49 = vld [vmem:[#allocation77_spill] sm:$0xff] }
 0x18f   :  { %19007 = vst [vmem:[#allocation35_spill] sm:$0xff] %v12240_v17  ;;  %1825 = vst [vmem:[%s18358_s4 + $0x230] sm:$0xff] %v1403_v33  ;;  %3625 = vmatprep.subr.bf16.mxu1 %v3413_v53  ;;  %v1517_v42 = vpop.f32.mrf.mxu1  ;;  %v1405_v27 = vadd.f32 %v1404_v13, %v19008_v28  ;;  %5695 = vrot.lane.b32.xlu1 %v9491_v36, %s9642_s10  ;;  %v3412_v26 = vsel %vm2421_vm0, %v19002_v55, %v19006_v52  ;;  %v19014_v60 = vld [vmem:[#allocation79_spill] sm:$0xff]  ;;  %v19015_v36 = vld [vmem:[#allocation76_spill] sm:$0xff] }
 0x190   :  { %1827 = vst [vmem:[%s18358_s4 + $0x240] sm:$0xff] %v1516_v51  ;;  %v1518_v23 = vadd.f32 %v1517_v42, %v19009_v31  ;;  %v1406_v6 = vpop.f32.mrf.mxu0  ;;  %v12257_v59 = vpop.permute.xlu0 %4744  ;;  %5697 = vrot.lane.b32.xlu0 %v9492_v1, %s9642_s10  ;;  %v3405_v62 = vsel %vm2421_vm0, %v19014_v60, %v19013_v38  ;;  %v19017_v20 = vld [vmem:[#allocation87_spill] sm:$0xff]  ;;  %v19018_v22 = vld [vmem:[#allocation78_spill] sm:$0xff]  ;;  %v9500_v33 = vld [vmem:[%s18355_s0 + $0x23c] ss:$28 sps:$4 sm:$0xff]   ;;  %v3404_v51 = vsel %vm2421_vm0, %v19020_v49, %v19014_v60 }
 0x191   :  { %19011 = vst [vmem:[#allocation37_spill] sm:$0xff] %v12257_v59  ;;  %1826 = vst [vmem:[%s18358_s4 + $0x238] sm:$0xff] %v1405_v27  ;;  %v1519_v34 = vpop.f32.mrf.mxu1  ;;  %v1407_v29 = vadd.f32 %v1406_v6, %v19012_v41  ;;  %3513 = vmatpush2.bf16.msra.mxu0 %v3410_v30  ;;  %v3407_v45 = vsel %vm2421_vm0, %v19017_v20, %v19016_v35  ;;  %v19019_v55 = vld [vmem:[#allocation80_spill] sm:$0xff]  ;;  %v9501_v53 = vld [vmem:[%s18355_s0 + $0x240] ss:$28 sps:$4 sm:$0xff]  }
 0x192   :  { %1828 = vst [vmem:[%s18358_s4 + $0x248] sm:$0xff] %v1518_v23  ;;  %v1520_v9 = vadd.f32 %v1519_v34, %v19015_v36  ;;  %3626 = vmatpush2.bf16.msra.mxu1 %v3412_v26  ;;  %3514 = vmatprep.subr.bf16.mxu0 %v3405_v62  ;;  %v1408_v57 = vpop.f32.mrf.mxu0  ;;  %v12280_v1 = vpop.permute.xlu1 %4746  ;;  %v19021_v42 = vld [vmem:[#allocation81_spill] sm:$0xff]  ;;  %v19022_v27 = vld [vmem:[#allocation62_spill] sm:$0xff]  ;;  %v19025_v39 = vld [vmem:[#allocation68_spill] sm:$0xff] }
 0x193   :  { %1832 = vst [vmem:[%s18358_s4 + $0x268] sm:$0xff] %v1407_v29  ;;  %3627 = vmatprep.subr.bf16.mxu1 %v3407_v45  ;;  %v1521_v4 = vpop.f32.mrf.mxu1  ;;  %v1409_v24 = vadd.f32 %v1408_v57, %v19018_v22  ;;  %5699 = vrot.lane.b32.xlu1 %v9494_v50, %s9642_s10  ;;  %v19023_v50 = vld [vmem:[#allocation15_spill] sm:$0xff]  ;;  %v19024_v23 = vld [vmem:[#allocation82_spill] sm:$0xff]  ;;  %v19027_v29 = vld [vmem:[#allocation84_spill] sm:$0xff] }
 0x194   :  { %1834 = vst [vmem:[%s18358_s4 + $0x278] sm:$0xff] %v1520_v9  ;;  %v1522_v46 = vadd.f32 %v1521_v4, %v19019_v55  ;;  %v1412_v58 = vpop.f32.mrf.mxu0  ;;  %2845 = vmatmul.mubr.bf16.gmra.mxu0 %v11763_v21  ;;  %v12298_v52 = vpop.permute.xlu0 %4748  ;;  %5701 = vrot.lane.b32.xlu0 %v9497_v11, %s9642_s10  ;;  %v3406_v21 = vsel %vm2421_vm0, %v19013_v38, %v19017_v20  ;;  %v19026_v30 = vld [vmem:[#allocation66_spill] sm:$0xff]  ;;  %v19028_v62 = vld [vmem:[#allocation85_spill] sm:$0xff]  ;;  %v19029_v20 = vld [vmem:[#allocation59_spill] sm:$0xff] }
 0x195   :  { %1833 = vst [vmem:[%s18358_s4 + $0x270] sm:$0xff] %v1409_v24  ;;  %v1525_v13 = vpop.f32.mrf.mxu1  ;;  %v1413_v28 = vadd.f32 %v1412_v58, %v19021_v42  ;;  %3515 = vmatpush2.bf16.msra.mxu0 %v3404_v51  ;;  %v3399_v31 = vsel %vm2421_vm0, %v19023_v50, %v19022_v27  ;;  %2854 = vmatprep.mubr.bf16.mxu0 %v18850_v18  ;;  %v9503_v60 = vld [vmem:[%s18355_s0 + $0x244] ss:$28 sps:$4 sm:$0xff]   ;;  %v19031_v55 = vld [vmem:[#allocation44_spill] sm:$0xff]  ;;  %v4350_v49 = vld [vmem:[%s18355_s0 + $0x268] sm:$0xff] }
 0x196   :  { %1835 = vst [vmem:[%s18358_s4 + $0x280] sm:$0xff] %v1522_v46  ;;  %v1526_v6 = vadd.f32 %v1525_v13, %v19024_v23  ;;  %3628 = vmatpush2.bf16.msra.mxu1 %v3406_v21  ;;  %v3401_v11 = vsel %vm2421_vm0, %v19026_v30, %v19025_v39  ;;  %3516 = vmatprep.subr.bf16.mxu0 %v3399_v31  ;;  %v1414_v34 = vpop.f32.mrf.mxu0  ;;  %v12322_v26 = vpop.permute.xlu1 %4750  ;;  %v9506_v57 = vld [vmem:[%s18355_s0 + $0x248] ss:$28 sps:$4 sm:$0xff]   ;;  %v19036_v23 = vld [vmem:[#allocation89_spill] sm:$0xff]  ;;  %v19104_v18 = vld [vmem:[#allocation4_spill] sm:$0xff] }
 0x197   :  { %1839 = vst [vmem:[%s18358_s4 + $0x2a0] sm:$0xff] %v1413_v28  ;;  %3629 = vmatprep.subr.bf16.mxu1 %v3401_v11  ;;  %v1527_v41 = vpop.f32.mrf.mxu1  ;;  %v1415_v38 = vadd.f32 %v1414_v34, %v19027_v29  ;;  %5703 = vrot.lane.b32.xlu1 %v9500_v33, %s9642_s10  ;;  %v3398_v45 = vsel %vm2421_vm0, %v19029_v20, %v19023_v50  ;;  %v19030_v24 = vld [vmem:[#allocation86_spill] sm:$0xff]  ;;  %v19035_v42 = vld [vmem:[#allocation47_spill] sm:$0xff]  ;;  %v19038_v29 = vld [vmem:[#allocation40_spill] sm:$0xff] }
 0x198   :  { %1841 = vst [vmem:[%s18358_s4 + $0x2b0] sm:$0xff] %v1526_v6  ;;  %v1528_v36 = vadd.f32 %v1527_v41, %v19028_v62  ;;  %v1416_v9 = vpop.f32.mrf.mxu0  ;;  %5705 = vrot.lane.b32.xlu0 %v9501_v53, %s9642_s10  ;;  %v3400_v22 = vsel %vm2421_vm0, %v19022_v27, %v19026_v30  ;;  %v19032_v46 = vld [vmem:[#allocation42_spill] sm:$0xff]  ;;  %v19033_v53 = vld [vmem:[#allocation88_spill] sm:$0xff]  ;;  %v19037_v11 = vld [vmem:[#allocation91_spill] sm:$0xff] }
 0x199   :  { %1840 = vst [vmem:[%s18358_s4 + $0x2a8] sm:$0xff] %v1415_v38  ;;  %v1529_v4 = vpop.f32.mrf.mxu1  ;;  %v1417_v33 = vadd.f32 %v1416_v9, %v19030_v24  ;;  %3517 = vmatpush2.bf16.msra.mxu0 %v3398_v45  ;;  %v3393_v58 = vsel %vm2421_vm0, %v19032_v46, %v19031_v55  ;;  %v4354_v51 = vld [vmem:[%s18355_s0 + $0x284] sm:$0xff]  ;;  %v3392_v38 = vsel %vm2421_vm0, %v19038_v29, %v19032_v46  ;;  %v19039_v20 = vld [vmem:[#allocation92_spill] sm:$0xff]  ;;  %v19049_v29 = vld [vmem:[#allocation97_spill] sm:$0xff] }
 0x19a   :  { %1842 = vst [vmem:[%s18358_s4 + $0x2b8] sm:$0xff] %v1528_v36  ;;  %v1530_v13 = vadd.f32 %v1529_v4, %v19033_v53  ;;  %3630 = vmatpush2.bf16.msra.mxu1 %v3400_v22  ;;  %v19034_v21 = vld [vmem:[#allocation54_spill] sm:$0xff]  ;;  %3518 = vmatprep.subr.bf16.mxu0 %v3393_v58  ;;  %v1418_v27 = vpop.f32.mrf.mxu0  ;;  %v12366_v50 = vpop.permute.xlu0 %4752  ;;  %v3394_v9 = vsel %vm2421_vm0, %v19031_v55, %v19035_v42  ;;  %v19041_v4 = vld [vmem:[#allocation25_spill] sm:$0xff]  ;;  %v4355_v24 = vld [vmem:[%s18355_s0 + $0x28c] sm:$0xff] }
 0x19b   :  { %v3395_v28 = vsel %vm2421_vm0, %v19035_v42, %v19034_v21  ;;  %1846 = vst [vmem:[%s18358_s4 + $0x2d8] sm:$0xff] %v1417_v33  ;;  %v1531_v31 = vpop.f32.mrf.mxu1  ;;  %v1419_v6 = vadd.f32 %v1418_v27, %v19036_v23  ;;  %5707 = vrot.lane.b32.xlu1 %v9503_v60, %s9642_s10  ;;  %v9508_v30 = vld [vmem:[%s18355_s0 + $0x268] ss:$28 sps:$4 sm:$0xff]   ;;  %v12384_v62 = vpop.permute.xlu1 %4754  ;;  %v8781_v60 = vcombine.high %v4350_v49, %v4354_v51  ;;  %v19042_v33 = vld [vmem:[#allocation93_spill] sm:$0xff]  ;;  %v19043_v46 = vld [vmem:[#allocation32_spill] sm:$0xff] }
 0x19c   :  { %3631 = vmatprep.subr.bf16.mxu1 %v3395_v28  ;;  %1848 = vst [vmem:[%s18358_s4 + $0x2e8] sm:$0xff] %v1530_v13  ;;  %v1532_v34 = vadd.f32 %v1531_v31, %v19037_v11  ;;  %v1422_v41 = vpop.f32.mrf.mxu0  ;;  %2855 = vmatmul.mubr.bf16.gmra.mxu0 %v11808_v40  ;;  %v19040_v45 = vld [vmem:[#allocation26_spill] sm:$0xff]  ;;  %v9510_v28 = vld [vmem:[%s18355_s0 + $0x270] ss:$28 sps:$4 sm:$0xff]  }
 0x19d   :  { %5709 = vrot.lane.b32.xlu0 %v9506_v57, %s9642_s10  ;;  %1847 = vst [vmem:[%s18358_s4 + $0x2e0] sm:$0xff] %v1419_v6  ;;  %v1535_v36 = vpop.f32.mrf.mxu1  ;;  %v1423_v40 = vadd.f32 %v1422_v41, %v19039_v20  ;;  %3519 = vmatpush2.bf16.msra.mxu0 %v3392_v38  ;;  %v3387_v22 = vsel %vm2421_vm0, %v19041_v4, %v19040_v45  ;;  %v4351_v57 = vld [vmem:[%s18355_s0 + $0x270] sm:$0xff]  ;;  %v19044_v58 = vld [vmem:[#allocation30_spill] sm:$0xff]  ;;  %v19048_v6 = vld [vmem:[#allocation23_spill] sm:$0xff] }
 0x19e   :  { %3522 = vmatprep.mubr.bf16.mxu0 %v12051_v37  ;;  %1849 = vst [vmem:[%s18358_s4 + $0x2f0] sm:$0xff] %v1532_v34  ;;  %v1536_v55 = vadd.f32 %v1535_v36, %v19042_v33  ;;  %3632 = vmatpush2.bf16.msra.mxu1 %v3394_v9  ;;  %v3389_v49 = vsel %vm2421_vm0, %v19044_v58, %v19043_v46  ;;  %v1424_v37 = vpop.f32.mrf.mxu0  ;;  %v12411_v51 = vpop.permute.xlu0 %4756  ;;  %v19046_v13 = vld [vmem:[#allocation94_spill] sm:$0xff]  ;;  %v19047_v27 = vld [vmem:[#allocation96_spill] sm:$0xff] }
 0x19f   :  { %3520 = vmatprep.subr.bf16.mxu0 %v3387_v22  ;;  %19045 = vst [vmem:[#allocation39_spill] sm:$0xff] %v12411_v51  ;;  %1853 = vst [vmem:[%s18358_s4 + $0x310] sm:$0xff] %v1423_v40  ;;  %3633 = vmatprep.subr.bf16.mxu1 %v3389_v49  ;;  %v1537_v53 = vpop.f32.mrf.mxu1  ;;  %v1425_v42 = vadd.f32 %v1424_v37, %v19046_v13  ;;  %v3386_v11 = vsel %vm2421_vm0, %v19048_v6, %v19041_v4  ;;  %v12439_v36 = vld [vmem:[%s18357_s1 + $0x80] ss:$8 sps:$4 sm:$0xff]   ;;  %v4356_v22 = vld [vmem:[%s18355_s0 + $0x294] sm:$0xff] }
 0x1a0   :  { %5711 = vrot.lane.b32.xlu1 %v9508_v30, %s9642_s10  ;;  %1855 = vst [vmem:[%s18358_s4 + $0x320] sm:$0xff] %v1536_v55  ;;  %v1538_v31 = vadd.f32 %v1537_v53, %v19047_v27  ;;  %v1426_v23 = vpop.f32.mrf.mxu0  ;;  %v8783_v34 = vcombine.high %v4351_v57, %v4355_v24  ;;  %v3388_v41 = vsel %vm2421_vm0, %v19040_v45, %v19044_v58  ;;  %v19051_v20 = vld [vmem:[#allocation14_spill] sm:$0xff]  ;;  %v4352_v45 = vld [vmem:[%s18355_s0 + $0x278] sm:$0xff]  ;;  %v19053_v57 = vld [vmem:[#allocation176_spill] sm:$0xff] }
 0x1a1   :  { %5713 = vrot.lane.b32.xlu0 %v8781_v60, %s9642_s10  ;;  %1854 = vst [vmem:[%s18358_s4 + $0x318] sm:$0xff] %v1425_v42  ;;  %v1539_v30 = vpop.f32.mrf.mxu1  ;;  %v1427_v38 = vadd.f32 %v1426_v23, %v19049_v29  ;;  %3521 = vmatpush2.bf16.msra.mxu0 %v3386_v11  ;;  %v19050_v60 = vld [vmem:[#allocation99_spill] sm:$0xff]  ;;  %v19054_v33 = vld [vmem:[#allocation100_spill] sm:$0xff]  ;;  %v19056_v27 = vld [vmem:[#allocation101_spill] sm:$0xff]  ;;  %v8785_v6 = vcombine.high %v4352_v45, %v4356_v22 }
 0x1a2   :  { %1856 = vst [vmem:[%s18358_s4 + $0x328] sm:$0xff] %v1538_v31  ;;  %v1540_v9 = vadd.f32 %v1539_v30, %v19050_v60  ;;  %3634 = vmatpush2.bf16.msra.mxu1 %v3388_v41  ;;  %3716 = vmatprep.subr.bf16.mxu0 %v19051_v20  ;;  %v1428_v40 = vpop.f32.mrf.mxu0  ;;  %v12446_v4 = vpop.permute.xlu1 %4758  ;;  %v12462_v58 = vld [vmem:[%s18357_s1 + $0x94] ss:$8 sps:$4 sm:$0xff]   ;;  %v19057_v23 = vld [vmem:[#allocation102_spill] sm:$0xff] }
 0x1a3   :  { %19052 = vst [vmem:[#allocation38_spill] sm:$0xff] %v12446_v4  ;;  %1860 = vst [vmem:[%s18358_s4 + $0x348] sm:$0xff] %v1427_v38  ;;  %8911 = vmatprep.subr.bf16.mxu1 %v19053_v57  ;;  %v1541_v24 = vpop.f32.mrf.mxu1  ;;  %v1429_v55 = vadd.f32 %v1428_v40, %v19054_v33  ;;  %v19055_v49 = vld [vmem:[#allocation104_spill] sm:$0xff]  ;;  %v12470_v13 = vpop.permute.xlu0 %4760  ;;  %v19058_v11 = vld [vmem:[#allocation22_spill] sm:$0xff] }
 0x1a4   :  { %5715 = vrot.lane.b32.xlu1 %v9510_v28, %s9642_s10  ;;  %1862 = vst [vmem:[%s18358_s4 + $0x358] sm:$0xff] %v1540_v9  ;;  %v1542_v37 = vadd.f32 %v1541_v24, %v19055_v49  ;;  %v1578_v53 = vpop.f32.mrf.mxu0  ;;  %3523 = vmatmul.mubr.bf16.vlgmr.msra.gmra.mxu0 %v12439_v36  ;;  %v9515_v42 = vld [vmem:[%s18355_s0 + $0x278] ss:$28 sps:$4 sm:$0xff]   ;;  %v19061_v60 = vld [vmem:[#allocation106_spill] sm:$0xff] }
 0x1a5   :  { %5717 = vrot.lane.b32.xlu0 %v8783_v34, %s9642_s10  ;;  %1861 = vst [vmem:[%s18358_s4 + $0x350] sm:$0xff] %v1429_v55  ;;  %3636 = vmatmul.mubr.bf16.vlgmr.msra.gmra.mxu1 %v12439_v36  ;;  %v8847_v28 = vpop.f32.mrf.mxu1  ;;  %v1579_v31 = vadd.f32 %v1578_v53, %v19056_v27  ;;  %v19059_v34 = vld [vmem:[#allocation105_spill] sm:$0xff]  ;;  %v19062_v24 = vld [vmem:[#allocation108_spill] sm:$0xff]  ;;  %v19096_v51 = vld [vmem:[#allocation6_spill] sm:$0xff] }
 0x1a6   :  { %3717 = vmatpush1.bf16.msra.mxu0 %v19057_v23  ;;  %1863 = vst [vmem:[%s18358_s4 + $0x360] sm:$0xff] %v1542_v37  ;;  %8912 = vmatpush3.bf16.msra.mxu1 %v19058_v11  ;;  %v1580_v30 = vpop.f32.mrf.mxu0  ;;  %v12487_v41 = vpop.permute.xlu1 %4762  ;;  %v19060_v29 = vld [vmem:[#allocation161_spill] sm:$0xff]  ;;  %v19064_v37 = vld [vmem:[#allocation116_spill] sm:$0xff]  ;;  %v19067_v23 = vld [vmem:[#allocation147_spill] sm:$0xff] }
 0x1a7   :  { %3718 = vmatprep.subr.bf16.mxu0 %v19059_v34  ;;  %1758 = vst [vmem:[%s18358_s4 + $0x20] sm:$0xff] %v1579_v31  ;;  %8913 = vmatprep.subr.bf16.mxu1 %v19060_v29  ;;  %v8848_v38 = vpop.f32.mrf.mxu1  ;;  %v1581_v9 = vadd.f32 %v1580_v30, %v19061_v60  ;;  %v9517_v45 = vld [vmem:[%s18355_s0 + $0x280] ss:$28 sps:$4 sm:$0xff]   ;;  %v12508_v49 = vld [vmem:[%s18357_s1 + $0x90] ss:$8 sps:$4 sm:$0xff]   ;;  %v19068_v34 = vld [vmem:[#allocation111_spill] sm:$0xff] }
 0x1a8   :  { %3645 = vmatprep.mubr.bf16.mxu1 %v12462_v58  ;;  %v8849_v20 = vadd.f32 %v8848_v38, %v8847_v28  ;;  %v1582_v40 = vpop.f32.mrf.mxu0  ;;  %3532 = vmatprep.mubr.bf16.mxu0 %v12462_v58  ;;  %v19063_v55 = vld [vmem:[#allocation109_spill] sm:$0xff] }
 0x1a9   :  { %5719 = vrot.lane.b32.xlu1 %v9515_v42, %s9642_s10  ;;  %1759 = vst [vmem:[%s18358_s4 + $0x28] sm:$0xff] %v1581_v9  ;;  %v8850_v22 = vpop.f32.mrf.mxu1  ;;  %v1583_v33 = vadd.f32 %v1582_v40, %v19062_v24  ;;  %5721 = vrot.lane.b32.xlu0 %v8785_v6, %s9642_s10  ;;  %v19065_v42 = vld [vmem:[#allocation20_spill] sm:$0xff]  ;;  %v19066_v28 = vld [vmem:[#allocation17_spill] sm:$0xff]  ;;  %v12524_v6 = vld [vmem:[%s18357_s1 + $0xa4] ss:$8 sps:$4 sm:$0xff]  }
 0x1aa   :  { %3719 = vmatpush1.bf16.msra.mxu0 %v19063_v55  ;;  %v1692_v53 = vadd.f32 %v8849_v20, %v19064_v37  ;;  %8914 = vmatpush3.bf16.msra.mxu1 %v19065_v42  ;;  %v1584_v27 = vpop.f32.mrf.mxu0  ;;  %v12514_v31 = vpop.permute.xlu0 %4764  ;;  %v9520_v20 = vld [vmem:[%s18355_s0 + $0x2a0] ss:$28 sps:$4 sm:$0xff]   ;;  %v19073_v42 = vld [vmem:[#allocation12_spill] sm:$0xff] }
 0x1ab   :  { %3720 = vmatprep.subr.bf16.mxu0 %v19066_v28  ;;  %1766 = vst [vmem:[%s18358_s4 + $0x58] sm:$0xff] %v1583_v33  ;;  %8915 = vmatprep.subr.bf16.mxu1 %v19067_v23  ;;  %v8851_v11 = vpop.f32.mrf.mxu1  ;;  %v1585_v30 = vadd.f32 %v1584_v27, %v19068_v34  ;;  %v12531_v9 = vpop.permute.xlu1 %4766  ;;  %v19069_v24 = vld [vmem:[#allocation113_spill] sm:$0xff]  ;;  %v19070_v33 = vld [vmem:[#allocation114_spill] sm:$0xff] }
 0x1ac   :  { %1761 = vst.msk [vmem:[%s18358_s4 + $0x30] sm:$0xff] %vm1760_vm1, %v1692_v53  ;;  %v8852_v38 = vadd.f32 %v8851_v11, %v8850_v22  ;;  %v1588_v60 = vpop.f32.mrf.mxu0  ;;  %3533 = vmatmul.mubr.bf16.gmra.mxu0 %v12508_v49  ;;  %v9523_v55 = vld [vmem:[%s18355_s0 + $0x2a4] ss:$28 sps:$4 sm:$0xff]   ;;  %v19074_v11 = vld [vmem:[#allocation124_spill] sm:$0xff] }
 0x1ad   :  { %5723 = vrot.lane.b32.xlu1 %v9517_v45, %s9642_s10  ;;  %1767 = vst [vmem:[%s18358_s4 + $0x60] sm:$0xff] %v1585_v30  ;;  %3646 = vmatmul.mubr.bf16.gmra.mxu1 %v12508_v49  ;;  %v8853_v40 = vpop.f32.mrf.mxu1  ;;  %v1589_v22 = vadd.f32 %v1588_v60, %v19069_v24  ;;  %v19071_v45 = vld [vmem:[#allocation127_spill] sm:$0xff]  ;;  %v19072_v53 = vld [vmem:[#allocation18_spill] sm:$0xff]  ;;  %v19075_v30 = vld [vmem:[#allocation117_spill] sm:$0xff] }
 0x1ae   :  { %3721 = vmatpush1.bf16.msra.mxu0 %v19070_v33  ;;  %v1695_v37 = vadd.f32 %v8852_v38, %v19071_v45  ;;  %8916 = vmatpush3.bf16.msra.mxu1 %v19072_v53  ;;  %v1590_v28 = vpop.f32.mrf.mxu0  ;;  %v12549_v27 = vpop.permute.xlu0 %4768  ;;  %v19076_v45 = vld [vmem:[#allocation119_spill] sm:$0xff] }
 0x1af   :  { %3722 = vmatprep.subr.bf16.mxu0 %v19073_v42  ;;  %1773 = vst [vmem:[%s18358_s4 + $0x90] sm:$0xff] %v1589_v22  ;;  %8917 = vmatprep.subr.bf16.mxu1 %v19074_v11  ;;  %v8854_v34 = vpop.f32.mrf.mxu1  ;;  %v1591_v60 = vadd.f32 %v1590_v28, %v19075_v30  ;;  %v9524_v22 = vld [vmem:[%s18355_s0 + $0x2a8] ss:$28 sps:$4 sm:$0xff]   ;;  %v19077_v42 = vld [vmem:[#allocation120_spill] sm:$0xff]  ;;  %v19079_v28 = vld [vmem:[#allocation13_spill] sm:$0xff] }
 0x1b0   :  { %3655 = vmatprep.mubr.bf16.mxu1 %v12524_v6  ;;  %1768 = vst.msk [vmem:[%s18358_s4 + $0x68] sm:$0xff] %vm1760_vm1, %v1695_v37  ;;  %v8855_v38 = vadd.f32 %v8854_v34, %v8853_v40  ;;  %v1592_v24 = vpop.f32.mrf.mxu0  ;;  %3542 = vmatprep.mubr.bf16.mxu0 %v12524_v6  ;;  %v12574_v40 = vld [vmem:[%s18357_s1 + $0xa0] ss:$8 sps:$4 sm:$0xff]  }
 0x1b1   :  { %5725 = vrot.lane.b32.xlu0 %v9520_v20, %s9642_s10  ;;  %1774 = vst [vmem:[%s18358_s4 + $0x98] sm:$0xff] %v1591_v60  ;;  %v8856_v33 = vpop.f32.mrf.mxu1  ;;  %v1593_v53 = vadd.f32 %v1592_v24, %v19076_v45  ;;  %5727 = vrot.lane.b32.xlu1 %v9523_v55, %s9642_s10  ;;  %v19078_v20 = vld [vmem:[#allocation110_spill] sm:$0xff]  ;;  %v12592_v55 = vld [vmem:[%s18357_s1 + $0xb4] ss:$8 sps:$4 sm:$0xff]  }
 0x1b2   :  { %3723 = vmatpush1.bf16.msra.mxu0 %v19077_v42  ;;  %v1700_v37 = vadd.f32 %v19078_v20, %v8855_v38  ;;  %8918 = vmatpush3.bf16.msra.mxu1 %v19079_v28  ;;  %v19080_v34 = vld [vmem:[#allocation10_spill] sm:$0xff]  ;;  %v1594_v30 = vpop.f32.mrf.mxu0  ;;  %v12580_v60 = vpop.permute.xlu1 %4770 }
 0x1b3   :  { %3724 = vmatprep.subr.bf16.mxu0 %v19080_v34  ;;  %19081 = vst [vmem:[#allocation41_spill] sm:$0xff] %v12580_v60  ;;  %1780 = vst [vmem:[%s18358_s4 + $0xc8] sm:$0xff] %v1593_v53  ;;  %v19082_v24 = vld [vmem:[#allocation98_spill] sm:$0xff]  ;;  %v8857_v45 = vpop.f32.mrf.mxu1  ;;  %v12587_v16 = vpop.permute.xlu0 %4772  ;;  %v9526_v53 = vld [vmem:[%s18355_s0 + $0x2ac] ss:$28 sps:$4 sm:$0xff]  }
 0x1b4   :  { %8919 = vmatprep.subr.bf16.mxu1 %v19082_v24  ;;  %v19083_v42 = vld [vmem:[#allocation122_spill] sm:$0xff]  ;;  %19084 = vst [vmem:[#allocation43_spill] sm:$0xff] %v12587_v16  ;;  %1775 = vst.msk [vmem:[%s18358_s4 + $0xa0] sm:$0xff] %vm1760_vm1, %v1700_v37  ;;  %v8858_v38 = vadd.f32 %v8857_v45, %v8856_v33  ;;  %v1598_v20 = vpop.f32.mrf.mxu0  ;;  %3543 = vmatmul.mubr.bf16.gmra.mxu0 %v12574_v40  ;;  %v19085_v34 = vld [vmem:[#allocation125_spill] sm:$0xff] }
 0x1b5   :  { %v1595_v12 = vadd.f32 %v1594_v30, %v19083_v42  ;;  %5729 = vrot.lane.b32.xlu0 %v9524_v22, %s9642_s10  ;;  %3656 = vmatmul.mubr.bf16.gmra.mxu1 %v12574_v40  ;;  %v8859_v28 = vpop.f32.mrf.mxu1  ;;  %v1599_v30 = vadd.f32 %v1598_v20, %v19085_v34  ;;  %v19086_v37 = vld [vmem:[#allocation126_spill] sm:$0xff]  ;;  %v9527_v33 = vld [vmem:[%s18355_s0 + $0x2b0] ss:$28 sps:$4 sm:$0xff]   ;;  %v19087_v22 = vld [vmem:[#allocation121_spill] sm:$0xff] }
 0x1b6   :  { %3725 = vmatpush1.bf16.msra.mxu0 %v19086_v37  ;;  %v1703_v45 = vadd.f32 %v19087_v22, %v8858_v38  ;;  %v19088_v42 = vld [vmem:[#allocation11_spill] sm:$0xff]  ;;  %v1600_v43 = vpop.f32.mrf.mxu0  ;;  %v12615_v17 = vpop.permute.xlu1 %4774  ;;  %v19091_v34 = vld [vmem:[#allocation128_spill] sm:$0xff]  ;;  %3665 = vmatprep.mubr.bf16.mxu1 %v12592_v55 }
 0x1b7   :  { %1781 = vst [vmem:[%s18358_s4 + $0xd0] sm:$0xff] %v1595_v12  ;;  %8920 = vmatpush3.bf16.msra.mxu1 %v19088_v42  ;;  %3726 = vmatprep.subr.bf16.mxu0 %v19089_v48  ;;  %1787 = vst [vmem:[%s18358_s4 + $0x100] sm:$0xff] %v1599_v30  ;;  %v19090_v12 = vld [vmem:[#allocation73_spill] sm:$0xff]  ;;  %v8860_v20 = vpop.f32.mrf.mxu1  ;;  %v1601_v37 = vadd.f32 %v1600_v43, %v19091_v34  ;;  %v12623_v59 = vpop.permute.xlu0 %4776  ;;  %v9529_v30 = vld [vmem:[%s18355_s0 + $0x2b4] ss:$28 sps:$4 sm:$0xff]  }
 0x1b8   :  { %8921 = vmatprep.subr.bf16.mxu1 %v19090_v12  ;;  %1782 = vst.msk [vmem:[%s18358_s4 + $0xd8] sm:$0xff] %vm1760_vm1, %v1703_v45  ;;  %v8861_v48 = vadd.f32 %v8860_v20, %v8859_v28  ;;  %v1602_v38 = vpop.f32.mrf.mxu0  ;;  %3552 = vmatprep.mubr.bf16.mxu0 %v12592_v55  ;;  %v19092_v22 = vld [vmem:[#allocation131_spill] sm:$0xff]  ;;  %v19093_v34 = vld [vmem:[#allocation132_spill] sm:$0xff]  ;;  %v19095_v20 = vld [vmem:[#allocation9_spill] sm:$0xff] }
 0x1b9   :  { %5731 = vrot.lane.b32.xlu1 %v9526_v53, %s9642_s10  ;;  %1788 = vst [vmem:[%s18358_s4 + $0x108] sm:$0xff] %v1601_v37  ;;  %v8862_v43 = vpop.f32.mrf.mxu1  ;;  %v1603_v42 = vadd.f32 %v1602_v38, %v19092_v22  ;;  %v12642_v28 = vld [vmem:[%s18357_s1 + $0xb0] ss:$8 sps:$4 sm:$0xff]   ;;  %5733 = vrot.lane.b32.xlu0 %v9527_v33, %s9642_s10 }
 0x1ba   :  { %3727 = vmatpush1.bf16.msra.mxu0 %v19093_v34  ;;  %v19094_v53 = vld [vmem:[#allocation136_spill] sm:$0xff]  ;;  %v1604_v4 = vpop.f32.mrf.mxu0  ;;  %v12648_v37 = vpop.permute.xlu1 %4778  ;;  %v19097_v38 = vld [vmem:[#allocation57_spill] sm:$0xff]  ;;  %v19098_v34 = vld [vmem:[#allocation134_spill] sm:$0xff] }
 0x1bb   :  { %v1708_v45 = vadd.f32 %v8861_v48, %v19094_v53  ;;  %8922 = vmatpush3.bf16.msra.mxu1 %v19095_v20  ;;  %3728 = vmatprep.subr.bf16.mxu0 %v19096_v51  ;;  %1794 = vst [vmem:[%s18358_s4 + $0x138] sm:$0xff] %v1603_v42  ;;  %v8863_v22 = vpop.f32.mrf.mxu1  ;;  %v1605_v60 = vadd.f32 %v1604_v4, %v19098_v34  ;;  %v12655_v16 = vpop.permute.xlu0 %4780  ;;  %v12660_v33 = vld [vmem:[%s18357_s1 + $0xc4] ss:$8 sps:$4 sm:$0xff]   ;;  %v9530_v4 = vld [vmem:[%s18355_s0 + $0x2b8] ss:$28 sps:$4 sm:$0xff]  }
 0x1bc   :  { %8923 = vmatprep.subr.bf16.mxu1 %v19097_v38  ;;  %19099 = vst [vmem:[#allocation45_spill] sm:$0xff] %v12660_v33  ;;  %v8864_v51 = vadd.f32 %v8863_v22, %v8862_v43  ;;  %v1608_v48 = vpop.f32.mrf.mxu0  ;;  %3553 = vmatmul.mubr.bf16.gmra.mxu0 %v12642_v28  ;;  %v19100_v53 = vld [vmem:[#allocation137_spill] sm:$0xff]  ;;  %v19103_v34 = vld [vmem:[#allocation7_spill] sm:$0xff] }
 0x1bd   :  { %1789 = vst.msk [vmem:[%s18358_s4 + $0x110] sm:$0xff] %vm1760_vm1, %v1708_v45  ;;  %5735 = vrot.lane.b32.xlu1 %v9529_v30, %s9642_s10  ;;  %1795 = vst [vmem:[%s18358_s4 + $0x140] sm:$0xff] %v1605_v60  ;;  %3666 = vmatmul.mubr.bf16.gmra.mxu1 %v12642_v28  ;;  %v8865_v42 = vpop.f32.mrf.mxu1  ;;  %v1609_v20 = vadd.f32 %v1608_v48, %v19100_v53  ;;  %v19101_v45 = vld [vmem:[#allocation138_spill] sm:$0xff]  ;;  %v9531_v43 = vld [vmem:[%s18355_s0 + $0x2d8] ss:$28 sps:$4 sm:$0xff]  }
 0x1be   :  { %3729 = vmatpush1.bf16.msra.mxu0 %v19101_v45  ;;  %v19102_v30 = vld [vmem:[#allocation148_spill] sm:$0xff]  ;;  %v1610_v15 = vpop.f32.mrf.mxu0  ;;  %v12683_v63 = vpop.permute.xlu1 %4782  ;;  %3675 = vmatprep.mubr.bf16.mxu1 %v12660_v33 }
 0x1bf   :  { %v1711_v22 = vadd.f32 %v8864_v51, %v19102_v30  ;;  %8924 = vmatpush3.bf16.msra.mxu1 %v19103_v34  ;;  %3730 = vmatprep.subr.bf16.mxu0 %v19104_v18  ;;  %1801 = vst [vmem:[%s18358_s4 + $0x170] sm:$0xff] %v1609_v20  ;;  %v19105_v60 = vld [vmem:[#allocation36_spill] sm:$0xff]  ;;  %v8866_v48 = vpop.f32.mrf.mxu1  ;;  %v12691_v5 = vpop.permute.xlu0 %4784  ;;  %v9533_v20 = vld [vmem:[%s18355_s0 + $0x2dc] ss:$28 sps:$4 sm:$0xff]   ;;  %v19108_v30 = vld [vmem:[#allocation143_spill] sm:$0xff] }
 0x1c0   :  { %8925 = vmatprep.subr.bf16.mxu1 %v19105_v60  ;;  %v19106_v53 = vld [vmem:[#allocation140_spill] sm:$0xff]  ;;  %19107 = vst [vmem:[#allocation46_spill] sm:$0xff] %v12691_v5  ;;  %v8867_v18 = vadd.f32 %v8866_v48, %v8865_v42  ;;  %v1612_v51 = vpop.f32.mrf.mxu0  ;;  %3562 = vmatprep.mubr.bf16.mxu0 %v12660_v33  ;;  %v19112_v48 = vld [vmem:[#allocation130_spill] sm:$0xff]  ;;  %v19113_v33 = vld [vmem:[#allocation5_spill] sm:$0xff] }
 0x1c1   :  { %v1611_v45 = vadd.f32 %v1610_v15, %v19106_v53  ;;  %1796 = vst.msk [vmem:[%s18358_s4 + $0x148] sm:$0xff] %vm1760_vm1, %v1711_v22  ;;  %5737 = vrot.lane.b32.xlu0 %v9530_v4, %s9642_s10  ;;  %v8868_v15 = vpop.f32.mrf.mxu1  ;;  %v1613_v34 = vadd.f32 %v1612_v51, %v19108_v30  ;;  %v19109_v53 = vld [vmem:[#allocation144_spill] sm:$0xff]  ;;  %v12713_v4 = vld [vmem:[%s18357_s1 + $0xc0] ss:$8 sps:$4 sm:$0xff]   ;;  %5739 = vrot.lane.b32.xlu1 %v9531_v43, %s9642_s10 }
 0x1c2   :  { %3731 = vmatpush1.bf16.msra.mxu0 %v19109_v53  ;;  %v19110_v42 = vld [vmem:[#allocation172_spill] sm:$0xff]  ;;  %19111 = vst [vmem:[#allocation48_spill] sm:$0xff] %v12713_v4  ;;  %v1716_v5 = vadd.f32 %v19112_v48, %v8867_v18  ;;  %v12718_v51 = vpop.permute.xlu1 %4786  ;;  %v19116_v53 = vld [vmem:[#allocation146_spill] sm:$0xff] }
 0x1c3   :  { %1802 = vst [vmem:[%s18358_s4 + $0x178] sm:$0xff] %v1611_v45  ;;  %v3433_v22 = vsel %vm2421_vm0, %v19110_v42, %v19053_v57  ;;  %8926 = vmatpush3.bf16.msra.mxu1 %v19113_v33  ;;  %v1614_v45 = vpop.f32.mrf.mxu0  ;;  %19114 = vst [vmem:[#allocation49_spill] sm:$0xff] %v12718_v51  ;;  %v12723_v30 = vld [vmem:[%s18357_s1 + $0xd4] ss:$8 sps:$4 sm:$0xff]   ;;  %v8869_v57 = vpop.f32.mrf.mxu1  ;;  %v9536_v48 = vld [vmem:[%s18355_s0 + $0x2e4] ss:$28 sps:$4 sm:$0xff]  }
 0x1c4   :  { %3732 = vmatprep.subr.bf16.mxu0 %v3433_v22  ;;  %19115 = vst [vmem:[#allocation50_spill] sm:$0xff] %v12723_v30  ;;  %1808 = vst [vmem:[%s18358_s4 + $0x1a8] sm:$0xff] %v1613_v34  ;;  %v1615_v43 = vadd.f32 %v1614_v45, %v19116_v53  ;;  %v12729_v44 = vpop.permute.xlu0 %4788  ;;  %v9534_v33 = vld [vmem:[%s18355_s0 + $0x2e0] ss:$28 sps:$4 sm:$0xff]   ;;  %v8870_v18 = vadd.f32 %v8869_v57, %v8868_v15  ;;  %3563 = vmatmul.mubr.bf16.gmra.mxu0 %v12713_v4 }
 0x1c5   :  { %1803 = vst.msk [vmem:[%s18358_s4 + $0x180] sm:$0xff] %vm1760_vm1, %v1716_v5  ;;  %v1618_v22 = vpop.f32.mrf.mxu0  ;;  %v3432_v34 = vsel %vm2421_vm0, %v11831_v10, %v19110_v42  ;;  %5741 = vrot.lane.b32.xlu0 %v9533_v20, %s9642_s10  ;;  %3676 = vmatmul.mubr.bf16.gmra.mxu1 %v12713_v4  ;;  %v8871_v5 = vpop.f32.mrf.mxu1  ;;  %v19117_v15 = vld [vmem:[#allocation149_spill] sm:$0xff]  ;;  %v19118_v57 = vld [vmem:[#allocation158_spill] sm:$0xff]  ;;  %v19120_v4 = vld [vmem:[#allocation151_spill] sm:$0xff] }
 0x1c6   :  { %1809 = vst [vmem:[%s18358_s4 + $0x1b0] sm:$0xff] %v1615_v43  ;;  %v1619_v45 = vadd.f32 %v1618_v22, %v19117_v15  ;;  %3733 = vmatpush2.bf16.msra.mxu0 %v3432_v34  ;;  %v3427_v10 = vsel %vm2421_vm0, %v19118_v57, %v19060_v29  ;;  %v19119_v42 = vld [vmem:[#allocation142_spill] sm:$0xff]  ;;  %3685 = vmatprep.mubr.bf16.mxu1 %v12723_v30  ;;  %v12756_v51 = vpop.permute.xlu1 %4790 }
 0x1c7   :  { %v1719_v20 = vadd.f32 %v19119_v42, %v8870_v18  ;;  %3734 = vmatprep.subr.bf16.mxu0 %v3427_v10  ;;  %v1620_v53 = vpop.f32.mrf.mxu0  ;;  %v8872_v43 = vpop.f32.mrf.mxu1  ;;  %3572 = vmatprep.mubr.bf16.mxu0 %v12723_v30  ;;  %v9537_v29 = vld [vmem:[%s18355_s0 + $0x2e8] ss:$28 sps:$4 sm:$0xff]   ;;  %v19121_v10 = vld [vmem:[#allocation153_spill] sm:$0xff] }
 0x1c8   :  { %1815 = vst [vmem:[%s18358_s4 + $0x1e0] sm:$0xff] %v1619_v45  ;;  %v1621_v22 = vadd.f32 %v1620_v53, %v19120_v4  ;;  %v12763_v34 = vpop.permute.xlu0 %4792  ;;  %5743 = vrot.lane.b32.xlu1 %v9534_v33, %s9642_s10  ;;  %v8873_v18 = vadd.f32 %v8872_v43, %v8871_v5  ;;  %v3426_v4 = vsel %vm2421_vm0, %v11748_v3, %v19118_v57  ;;  %v9539_v33 = vld [vmem:[%s18355_s0 + $0x2ec] ss:$28 sps:$4 sm:$0xff]   ;;  %v19122_v5 = vld [vmem:[#allocation145_spill] sm:$0xff] }
 0x1c9   :  { %1810 = vst.msk [vmem:[%s18358_s4 + $0x1b8] sm:$0xff] %vm1760_vm1, %v1719_v20  ;;  %v1622_v15 = vpop.f32.mrf.mxu0  ;;  %5745 = vrot.lane.b32.xlu0 %v9536_v48, %s9642_s10  ;;  %v8874_v45 = vpop.f32.mrf.mxu1  ;;  %v3421_v20 = vsel %vm2421_vm0, %v19122_v5, %v19067_v23  ;;  %v12790_v3 = vld [vmem:[%s18357_s1 + $0xd0] ss:$8 sps:$4 sm:$0xff]   ;;  %v19124_v48 = vld [vmem:[#allocation155_spill] sm:$0xff] }
 0x1ca   :  { %1816 = vst [vmem:[%s18358_s4 + $0x1e8] sm:$0xff] %v1621_v22  ;;  %v1623_v42 = vadd.f32 %v1622_v15, %v19121_v10  ;;  %3735 = vmatpush2.bf16.msra.mxu0 %v3426_v4  ;;  %19123 = vst [vmem:[#allocation52_spill] sm:$0xff] %v12790_v3  ;;  %v1724_v57 = vadd.f32 %v8873_v18, %v19124_v48  ;;  %v12793_v43 = vpop.permute.xlu1 %4794  ;;  %v12798_v22 = vld [vmem:[%s18357_s1 + $0xe4] ss:$8 sps:$4 sm:$0xff]  }
 0x1cb   :  { %3736 = vmatprep.subr.bf16.mxu0 %v3421_v20  ;;  %v1624_v53 = vpop.f32.mrf.mxu0  ;;  %v8875_v23 = vpop.f32.mrf.mxu1  ;;  %v19125_v15 = vld [vmem:[#allocation154_spill] sm:$0xff]  ;;  %v9540_v18 = vld [vmem:[%s18355_s0 + $0x2f0] ss:$28 sps:$4 sm:$0xff]  }
 0x1cc   :  { %1822 = vst [vmem:[%s18358_s4 + $0x218] sm:$0xff] %v1623_v42  ;;  %v1625_v4 = vadd.f32 %v1624_v53, %v19125_v15  ;;  %v12804_v10 = vpop.permute.xlu0 %4796  ;;  %5747 = vrot.lane.b32.xlu1 %v9537_v29, %s9642_s10  ;;  %1817 = vst.msk [vmem:[%s18358_s4 + $0x1f0] sm:$0xff] %vm1760_vm1, %v1724_v57  ;;  %v8876_v20 = vadd.f32 %v8875_v23, %v8874_v45  ;;  %3573 = vmatmul.mubr.bf16.gmra.mxu0 %v12790_v3  ;;  %v9541_v29 = vld [vmem:[%s18355_s0 + $0x310] ss:$28 sps:$4 sm:$0xff]  }
 0x1cd   :  { %v1628_v48 = vpop.f32.mrf.mxu0  ;;  %v3420_v42 = vsel %vm2421_vm0, %v18996_v54, %v19122_v5  ;;  %5749 = vrot.lane.b32.xlu0 %v9539_v33, %s9642_s10  ;;  %3686 = vmatmul.mubr.bf16.gmra.mxu1 %v12790_v3  ;;  %v8877_v45 = vpop.f32.mrf.mxu1  ;;  %v19126_v57 = vld [vmem:[#allocation156_spill] sm:$0xff]  ;;  %v19127_v23 = vld [vmem:[#allocation123_spill] sm:$0xff]  ;;  %v19130_v3 = vld [vmem:[#allocation157_spill] sm:$0xff] }
 0x1ce   :  { %1823 = vst [vmem:[%s18358_s4 + $0x220] sm:$0xff] %v1625_v4  ;;  %v1629_v53 = vadd.f32 %v1628_v48, %v19126_v57  ;;  %3737 = vmatpush2.bf16.msra.mxu0 %v3420_v42  ;;  %v3415_v54 = vsel %vm2421_vm0, %v19127_v23, %v19074_v11  ;;  %v19128_v5 = vld [vmem:[#allocation163_spill] sm:$0xff]  ;;  %3695 = vmatprep.mubr.bf16.mxu1 %v12798_v22  ;;  %v12832_v30 = vpop.permute.xlu1 %4798  ;;  %v9543_v11 = vld [vmem:[%s18355_s0 + $0x314] ss:$28 sps:$4 sm:$0xff]  }
 0x1cf   :  { %v1727_v33 = vadd.f32 %v8876_v20, %v19128_v5  ;;  %3738 = vmatprep.subr.bf16.mxu0 %v3415_v54  ;;  %v1630_v15 = vpop.f32.mrf.mxu0  ;;  %19129 = vst [vmem:[#allocation51_spill] sm:$0xff] %v12832_v30  ;;  %v8878_v4 = vpop.f32.mrf.mxu1  ;;  %3582 = vmatprep.mubr.bf16.mxu0 %v12798_v22  ;;  %v19132_v54 = vld [vmem:[#allocation160_spill] sm:$0xff] }
 0x1d0   :  { %1829 = vst [vmem:[%s18358_s4 + $0x250] sm:$0xff] %v1629_v53  ;;  %v1631_v48 = vadd.f32 %v1630_v15, %v19130_v3  ;;  %v12839_v42 = vpop.permute.xlu0 %4800  ;;  %5751 = vrot.lane.b32.xlu1 %v9540_v18, %s9642_s10  ;;  %v8879_v20 = vadd.f32 %v8878_v4, %v8877_v45  ;;  %v3414_v3 = vsel %vm2421_vm0, %v19005_v47, %v19127_v23  ;;  %v9544_v18 = vld [vmem:[%s18355_s0 + $0x318] ss:$28 sps:$4 sm:$0xff]   ;;  %v19133_v45 = vld [vmem:[#allocation95_spill] sm:$0xff] }
 0x1d1   :  { %19131 = vst [vmem:[#allocation53_spill] sm:$0xff] %v12839_v42  ;;  %1824 = vst.msk [vmem:[%s18358_s4 + $0x228] sm:$0xff] %vm1760_vm1, %v1727_v33  ;;  %v1632_v57 = vpop.f32.mrf.mxu0  ;;  %5753 = vrot.lane.b32.xlu0 %v9541_v29, %s9642_s10  ;;  %v8880_v53 = vpop.f32.mrf.mxu1  ;;  %v3409_v33 = vsel %vm2421_vm0, %v19133_v45, %v19082_v24  ;;  %v12866_v47 = vld [vmem:[%s18357_s1 + $0xe0] ss:$8 sps:$4 sm:$0xff]   ;;  %v19134_v29 = vld [vmem:[#allocation152_spill] sm:$0xff] }
 0x1d2   :  { %1830 = vst [vmem:[%s18358_s4 + $0x258] sm:$0xff] %v1631_v48  ;;  %v1633_v5 = vadd.f32 %v1632_v57, %v19132_v54  ;;  %3739 = vmatpush2.bf16.msra.mxu0 %v3414_v3  ;;  %v1732_v23 = vadd.f32 %v19134_v29, %v8879_v20  ;;  %v12869_v4 = vpop.permute.xlu1 %4802  ;;  %v12874_v48 = vld [vmem:[%s18357_s1 + $0xf4] ss:$8 sps:$4 sm:$0xff]   ;;  %v19135_v57 = vld [vmem:[#allocation162_spill] sm:$0xff] }
 0x1d3   :  { %3740 = vmatprep.subr.bf16.mxu0 %v3409_v33  ;;  %v1634_v15 = vpop.f32.mrf.mxu0  ;;  %v8881_v24 = vpop.f32.mrf.mxu1  ;;  %v9546_v20 = vld [vmem:[%s18355_s0 + $0x31c] ss:$28 sps:$4 sm:$0xff]  }
 0x1d4   :  { %1836 = vst [vmem:[%s18358_s4 + $0x288] sm:$0xff] %v1633_v5  ;;  %v1635_v3 = vadd.f32 %v1634_v15, %v19135_v57  ;;  %v12880_v54 = vpop.permute.xlu0 %4804  ;;  %5755 = vrot.lane.b32.xlu1 %v9543_v11, %s9642_s10  ;;  %1831 = vst.msk [vmem:[%s18358_s4 + $0x260] sm:$0xff] %vm1760_vm1, %v1732_v23  ;;  %v8882_v33 = vadd.f32 %v8881_v24, %v8880_v53  ;;  %3583 = vmatmul.mubr.bf16.gmra.mxu0 %v12866_v47  ;;  %v9547_v11 = vld [vmem:[%s18355_s0 + $0x320] ss:$28 sps:$4 sm:$0xff]   ;;  %v19136_v23 = vld [vmem:[#allocation164_spill] sm:$0xff] }
 0x1d5   :  { %v1638_v29 = vpop.f32.mrf.mxu0  ;;  %v3408_v5 = vsel %vm2421_vm0, %v19016_v35, %v19133_v45  ;;  %5757 = vrot.lane.b32.xlu0 %v9544_v18, %s9642_s10  ;;  %3696 = vmatmul.mubr.bf16.gmra.mxu1 %v12866_v47  ;;  %v8883_v53 = vpop.f32.mrf.mxu1  ;;  %v19137_v24 = vld [vmem:[#allocation19_spill] sm:$0xff]  ;;  %v19139_v42 = vld [vmem:[#allocation165_spill] sm:$0xff] }
 0x1d6   :  { %1837 = vst [vmem:[%s18358_s4 + $0x290] sm:$0xff] %v1635_v3  ;;  %v1639_v15 = vadd.f32 %v1638_v29, %v19136_v23  ;;  %3741 = vmatpush2.bf16.msra.mxu0 %v3408_v5  ;;  %v3403_v35 = vsel %vm2421_vm0, %v19137_v24, %v19090_v12  ;;  %v19138_v45 = vld [vmem:[#allocation159_spill] sm:$0xff]  ;;  %3705 = vmatprep.mubr.bf16.mxu1 %v12874_v48  ;;  %v12908_v30 = vpop.permute.xlu1 %4806  ;;  %v9549_v12 = vld [vmem:[%s18355_s0 + $0x324] ss:$28 sps:$4 sm:$0xff]  }
 0x1d7   :  { %v1735_v18 = vadd.f32 %v19138_v45, %v8882_v33  ;;  %3742 = vmatprep.subr.bf16.mxu0 %v3403_v35  ;;  %v1640_v57 = vpop.f32.mrf.mxu0  ;;  %v8884_v3 = vpop.f32.mrf.mxu1  ;;  %3592 = vmatprep.mubr.bf16.mxu0 %v12874_v48  ;;  %v3402_v23 = vsel %vm2421_vm0, %v19025_v39, %v19137_v24  ;;  %v19141_v35 = vld [vmem:[#allocation55_spill] sm:$0xff]  ;;  %v19142_v24 = vld [vmem:[#allocation169_spill] sm:$0xff] }
 0x1d8   :  { %1843 = vst [vmem:[%s18358_s4 + $0x2c0] sm:$0xff] %v1639_v15  ;;  %v1641_v29 = vadd.f32 %v1640_v57, %v19139_v42  ;;  %5759 = vrot.lane.b32.xlu1 %v9546_v20, %s9642_s10  ;;  %v8885_v33 = vadd.f32 %v8884_v3, %v8883_v53  ;;  %v19140_v20 = vld [vmem:[#allocation167_spill] sm:$0xff]  ;;  %v3397_v45 = vsel %vm2421_vm0, %v19141_v35, %v19097_v38  ;;  %v12937_v53 = vld [vmem:[%s18357_s1 + $0xf0] ss:$8 sps:$4 sm:$0xff]  }
 0x1d9   :  { %1838 = vst.msk [vmem:[%s18358_s4 + $0x298] sm:$0xff] %vm1760_vm1, %v1735_v18  ;;  %v1642_v5 = vpop.f32.mrf.mxu0  ;;  %5761 = vrot.lane.b32.xlu0 %v9547_v11, %s9642_s10  ;;  %v8886_v42 = vpop.f32.mrf.mxu1 }
 0x1da   :  { %1844 = vst [vmem:[%s18358_s4 + $0x2c8] sm:$0xff] %v1641_v29  ;;  %v1643_v15 = vadd.f32 %v1642_v5, %v19140_v20  ;;  %3743 = vmatpush2.bf16.msra.mxu0 %v3402_v23  ;;  %v4809_v39 = vpop.permute.xlu0 %4808  ;;  %v1740_v11 = vadd.f32 %v8885_v33, %v19142_v24  ;;  %v12940_v57 = vpop.permute.xlu1 %4810  ;;  %v19143_v29 = vld [vmem:[#allocation168_spill] sm:$0xff]  ;;  %v9550_v33 = vld [vmem:[%s18355_s0 + $0x328] ss:$28 sps:$4 sm:$0xff]  }
 0x1db   :  { %3744 = vmatprep.subr.bf16.mxu0 %v3397_v45  ;;  %v1644_v18 = vpop.f32.mrf.mxu0  ;;  %v8887_v3 = vpop.f32.mrf.mxu1  ;;  %v12948_v5 = vsel %vm4816_vm2, %v4809_v39, %v12940_v57  ;;  %v19145_v45 = vld [vmem:[#allocation170_spill] sm:$0xff] }
 0x1dc   :  { %1850 = vst [vmem:[%s18358_s4 + $0x2f8] sm:$0xff] %v1643_v15  ;;  %v1645_v38 = vadd.f32 %v1644_v18, %v19143_v29  ;;  %19144 = vst [vmem:[#allocation3_spill] sm:$0xff] %v12948_v5  ;;  %5763 = vrot.lane.b32.xlu1 %v9549_v12, %s9642_s10  ;;  %v8888_v23 = vadd.f32 %v8887_v3, %v8886_v42  ;;  %3593 = vmatmul.mubr.bf16.gmra.mxu0 %v12937_v53  ;;  %v9551_v12 = vld [vmem:[%s18355_s0 + $0x348] ss:$28 sps:$4 sm:$0xff]  }
 0x1dd   :  { %1845 = vst.msk [vmem:[%s18358_s4 + $0x2d0] sm:$0xff] %vm1760_vm1, %v1740_v11  ;;  %v1648_v20 = vpop.f32.mrf.mxu0  ;;  %v3396_v15 = vsel %vm2421_vm0, %v19034_v21, %v19141_v35  ;;  %5034 = vmatprep.subr.bf16.mxu1 %v12948_v5  ;;  %3706 = vmatmul.mubr.bf16.gmra.mxu1 %v12937_v53  ;;  %v8889_v42 = vpop.f32.mrf.mxu1  ;;  %v19146_v11 = vld [vmem:[#allocation34_spill] sm:$0xff]  ;;  %v19147_v35 = vld [vmem:[#allocation177_spill] sm:$0xff] }
 0x1de   :  { %1851 = vst [vmem:[%s18358_s4 + $0x300] sm:$0xff] %v1645_v38  ;;  %v1649_v24 = vadd.f32 %v1648_v20, %v19145_v45  ;;  %3745 = vmatpush2.bf16.msra.mxu0 %v3396_v15  ;;  %v3391_v21 = vsel %vm2421_vm0, %v19146_v11, %v19105_v60  ;;  %v1743_v18 = vadd.f32 %v8888_v23, %v19147_v35  ;;  %v9620_v29 = vld [vmem:[%s18357_s1 + $0x84] ss:$8 sps:$4 sm:$0xff]   ;;  %v12978_v38 = vpop.permute.xlu1 %4814  ;;  %v12984_v5 = vpop.permute.xlu0 %4812 }
 0x1df   :  { %3746 = vmatprep.subr.bf16.mxu0 %v3391_v21  ;;  %v1650_v3 = vpop.f32.mrf.mxu0  ;;  %3861 = vmatprep.mubr.bf16.mxu1 %v9620_v29  ;;  %19148 = vst [vmem:[#allocation56_spill] sm:$0xff] %v12978_v38  ;;  %v8890_v20 = vpop.f32.mrf.mxu1  ;;  %v19149_v15 = vld [vmem:[#allocation171_spill] sm:$0xff]  ;;  %v12989_v60 = vsel %vm4816_vm2, %v12880_v54, %v12908_v30  ;;  %v3390_v35 = vsel %vm2421_vm0, %v19043_v46, %v19146_v11 }
 0x1e0   :  { %1857 = vst [vmem:[%s18358_s4 + $0x330] sm:$0xff] %v1649_v24  ;;  %v1651_v45 = vadd.f32 %v1650_v3, %v19149_v15  ;;  %3748 = vmatprep.mubr.bf16.mxu0 %v9620_v29  ;;  %5765 = vrot.lane.b32.xlu0 %v9550_v33, %s9642_s10  ;;  %v9553_v23 = vld [vmem:[%s18355_s0 + $0x34c] ss:$28 sps:$4 sm:$0xff]   ;;  %1852 = vst.msk [vmem:[%s18358_s4 + $0x308] sm:$0xff] %vm1760_vm1, %v1743_v18  ;;  %v8891_v24 = vadd.f32 %v8890_v20, %v8889_v42  ;;  %v19150_v29 = vld [vmem:[#allocation174_spill] sm:$0xff] }
 0x1e1   :  { %v1652_v21 = vpop.f32.mrf.mxu0  ;;  %5767 = vrot.lane.b32.xlu1 %v9551_v12, %s9642_s10  ;;  %v9554_v33 = vld [vmem:[%s18355_s0 + $0x350] ss:$28 sps:$4 sm:$0xff]   ;;  %v8892_v3 = vpop.f32.mrf.mxu1  ;;  %v19151_v42 = vld [vmem:[#allocation166_spill] sm:$0xff]  ;;  %v13015_v46 = vsel %vm4816_vm2, %v12869_v4, %v12880_v54 }
 0x1e2   :  { %1858 = vst [vmem:[%s18358_s4 + $0x338] sm:$0xff] %v1651_v45  ;;  %v1653_v15 = vadd.f32 %v1652_v21, %v19150_v29  ;;  %3747 = vmatpush2.bf16.msra.mxu0 %v3390_v35  ;;  %v1748_v18 = vadd.f32 %v19151_v42, %v8891_v24  ;;  %v19152_v11 = vld [vmem:[#allocation175_spill] sm:$0xff]  ;;  %v13023_v21 = vsel %vm4816_vm2, %v12908_v30, %v4809_v39  ;;  %v13031_v4 = vpop.permute.xlu0 %5669  ;;  %v19155_v29 = vld [vmem:[#allocation173_spill] sm:$0xff] }
 0x1e3   :  { %4921 = vmatprep.subr.bf16.mxu0 %v12989_v60  ;;  %v1654_v20 = vpop.f32.mrf.mxu0  ;;  %v8893_v12 = vpop.f32.mrf.mxu1  ;;  %v13028_v24 = vsel %vm4816_vm2, %v12756_v51, %v12763_v34  ;;  %19153 = vst [vmem:[#allocation2_spill] sm:$0xff] %v13031_v4  ;;  %v13040_v30 = vsel %vm4816_vm2, %v12793_v43, %v12804_v10 }
 0x1e4   :  { %1864 = vst [vmem:[%s18358_s4 + $0x368] sm:$0xff] %v1653_v15  ;;  %v1655_v45 = vadd.f32 %v1654_v20, %v19152_v11  ;;  %5769 = vrot.lane.b32.xlu0 %v9553_v23, %s9642_s10  ;;  %1859 = vst.msk [vmem:[%s18358_s4 + $0x340] sm:$0xff] %vm1760_vm1, %v1748_v18  ;;  %v8894_v54 = vadd.f32 %v8893_v12, %v8892_v3  ;;  %v9556_v23 = vld [vmem:[%s18355_s0 + $0x354] ss:$28 sps:$4 sm:$0xff]   ;;  %v13049_v35 = vpop.permute.xlu1 %5671  ;;  %v13077_v20 = vsel %vm4816_vm2, %v12763_v34, %v12793_v43 }
 0x1e5   :  { %v13042_v39 = vpop.f32.mrf.mxu0  ;;  %3749 = vmatmul.mubr.bf16.vlgmr.msra.gmra.mxu0 %v12439_v36  ;;  %5771 = vrot.lane.b32.xlu1 %v9554_v33, %s9642_s10  ;;  %19154 = vst [vmem:[#allocation58_spill] sm:$0xff] %v13049_v35  ;;  %v13055_v3 = vpop.f32.mrf.mxu1  ;;  %v9557_v33 = vld [vmem:[%s18355_s0 + $0x358] ss:$28 sps:$4 sm:$0xff]   ;;  %v13102_v12 = vsel %vm4816_vm2, %v12623_v59, %v12648_v37  ;;  %v13164_v35 = vsel %vm4816_vm2, %v12470_v13, %v12487_v41 }
 0x1e6   :  { %1865 = vst [vmem:[%s18358_s4 + $0x370] sm:$0xff] %v1655_v45  ;;  %3862 = vmatmul.mubr.bf16.vlgmr.msra.gmra.mxu1 %v12439_v36  ;;  %4922 = vmatpush1.bf16.msra.mxu0 %v13015_v46  ;;  %v1751_v15 = vadd.f32 %v19155_v29, %v8894_v54  ;;  %v13069_v36 = vsel %vm4816_vm2, %v12729_v44, %v12756_v51  ;;  %v9559_v34 = vld [vmem:[%s18355_s0 + $0x35c] ss:$28 sps:$4 sm:$0xff]   ;;  %v13105_v11 = vpop.permute.xlu0 %5673 }
 0x1e7   :  { %5035 = vmatpush1.bf16.msra.mxu1 %v13023_v21  ;;  %4923 = vmatprep.subr.bf16.mxu0 %v13028_v24  ;;  %v13064_v42 = vpop.f32.mrf.mxu0  ;;  %v13072_v18 = vpop.f32.mrf.mxu1  ;;  %v13087_v44 = vsel %vm4816_vm2, %v12655_v16, %v12683_v63  ;;  %19156 = vst [vmem:[#allocation60_spill] sm:$0xff] %v13105_v11  ;;  %v9562_v29 = vld [vmem:[%s18355_s0 + $0x360] ss:$28 sps:$4 sm:$0xff]   ;;  %v13185_v13 = vsel %vm4816_vm2, %v12366_v50, %v12384_v62 }
 0x1e8   :  { %5036 = vmatprep.subr.bf16.mxu1 %v13040_v30  ;;  %3869 = vmatprep.mubr.bf16.mxu1 %v12462_v58  ;;  %1866 = vst.msk [vmem:[%s18358_s4 + $0x378] sm:$0xff] %vm1760_vm1, %v1751_v15  ;;  %v13132_v15 = vsel %vm4816_vm2, %v12648_v37, %v12655_v16  ;;  %19160 = vst [vmem:[#allocation150_spill] sm:$0xff] %v13185_v13 }
 0x1e9   :  { %v13089_v51 = vpop.f32.mrf.mxu0  ;;  %3758 = vmatprep.mubr.bf16.mxu0 %v12462_v58  ;;  %5773 = vrot.lane.b32.xlu0 %v9556_v23, %s9642_s10  ;;  %v13096_v43 = vpop.f32.mrf.mxu1 }
 0x1ea   :  { %4924 = vmatpush1.bf16.msra.mxu0 %v13069_v36  ;;  %5775 = vrot.lane.b32.xlu1 %v9557_v33, %s9642_s10  ;;  %v13111_v45 = vpop.permute.xlu1 %5675  ;;  %v13122_v33 = vsel %vm4816_vm2, %v12615_v17, %v12623_v59  ;;  %v13140_v17 = vsel %vm4816_vm2, %v12487_v41, %v12514_v31  ;;  %v13146_v59 = vsel %vm4816_vm2, %v12531_v9, %v12549_v27 }
 0x1eb   :  { %5037 = vmatpush1.bf16.msra.mxu1 %v13077_v20  ;;  %4925 = vmatprep.subr.bf16.mxu0 %v13102_v12  ;;  %v13109_v58 = vpop.f32.mrf.mxu0  ;;  %19157 = vst [vmem:[#allocation61_spill] sm:$0xff] %v13111_v45  ;;  %v13114_v54 = vpop.f32.mrf.mxu1 }
 0x1ec   :  { %5038 = vmatprep.subr.bf16.mxu1 %v13087_v44 }
 0x1ed   :  { %v13116_v23 = vpop.f32.mrf.mxu0  ;;  %3759 = vmatmul.mubr.bf16.gmra.mxu0 %v12508_v49  ;;  %5777 = vrot.lane.b32.xlu0 %v9559_v34, %s9642_s10  ;;  %v13134_v4 = vpop.f32.mrf.mxu1 }
 0x1ee   :  { %3870 = vmatmul.mubr.bf16.gmra.mxu1 %v12508_v49  ;;  %4926 = vmatpush1.bf16.msra.mxu0 %v13122_v33  ;;  %v13151_v49 = vpop.permute.xlu1 %5679  ;;  %v13157_v34 = vpop.permute.xlu0 %5677 }
 0x1ef   :  { %5039 = vmatpush1.bf16.msra.mxu1 %v13132_v15  ;;  %4927 = vmatprep.subr.bf16.mxu0 %v13140_v17  ;;  %v13149_v16 = vpop.f32.mrf.mxu0  ;;  %19158 = vst [vmem:[#allocation16_spill] sm:$0xff] %v13151_v49  ;;  %v13154_v37 = vpop.f32.mrf.mxu1  ;;  %19159 = vst [vmem:[#allocation63_spill] sm:$0xff] %v13157_v34  ;;  %v13171_v49 = vsel %vm4816_vm2, %v12514_v31, %v12531_v9  ;;  %v13179_v34 = vsel %vm4816_vm2, %v12298_v52, %v12322_v26 }
 0x1f0   :  { %5040 = vmatprep.subr.bf16.mxu1 %v13146_v59  ;;  %3877 = vmatprep.mubr.bf16.mxu1 %v12524_v6 }
 0x1f1   :  { %v13159_v45 = vpop.f32.mrf.mxu0  ;;  %3768 = vmatprep.mubr.bf16.mxu0 %v12524_v6  ;;  %5779 = vrot.lane.b32.xlu1 %v9562_v29, %s9642_s10  ;;  %v13173_v11 = vpop.f32.mrf.mxu1  ;;  %v13201_v29 = vsel %vm4816_vm2, %v12280_v1, %v12298_v52  ;;  %v13223_v1 = vsel %vm4816_vm2, %v12198_v8, %v12216_v56 }
 0x1f2   :  { %4928 = vmatpush1.bf16.msra.mxu0 %v13164_v35 }
 0x1f3   :  { %5041 = vmatpush1.bf16.msra.mxu1 %v13171_v49  ;;  %4929 = vmatprep.subr.bf16.mxu0 %v13179_v34  ;;  %v13188_v41 = vpop.f32.mrf.mxu0  ;;  %v13191_v31 = vpop.f32.mrf.mxu1 }
 0x1f4   :  { %19161 = vst [vmem:[#allocation64_spill] sm:$0xff] %v13188_v41  ;;  %5042 = vmatprep.subr.bf16.mxu1 %v13185_v13  ;;  %v13193_v6 = vpop.permute.xlu1 %5683  ;;  %v13207_v41 = vsel %vm4816_vm2, %v12322_v26, %v12366_v50 }
 0x1f5   :  { %19162 = vst [vmem:[#allocation135_spill] sm:$0xff] %v13193_v6  ;;  %v13195_v9 = vpop.f32.mrf.mxu0  ;;  %3769 = vmatmul.mubr.bf16.gmra.mxu0 %v12574_v40  ;;  %v13209_v13 = vpop.f32.mrf.mxu1  ;;  %v13215_v6 = vsel %vm4816_vm2, %v12161_v14, %v12178_v2 }
 0x1f6   :  { %19163 = vst [vmem:[#allocation133_spill] sm:$0xff] %v13195_v9  ;;  %3878 = vmatmul.mubr.bf16.gmra.mxu1 %v12574_v40  ;;  %4930 = vmatpush1.bf16.msra.mxu0 %v13201_v29  ;;  %v13217_v9 = vpop.permute.xlu0 %5681  ;;  %v13237_v40 = vsel %vm4816_vm2, %v12134_v61, %v12161_v14  ;;  %v13259_v61 = vsel %vm4816_vm2, %v12046_v0, %v12078_v7 }
 0x1f7   :  { %19164 = vst [vmem:[#allocation65_spill] sm:$0xff] %v13217_v9  ;;  %5043 = vmatpush1.bf16.msra.mxu1 %v13207_v41  ;;  %4931 = vmatprep.subr.bf16.mxu0 %v13215_v6  ;;  %v13226_v52 = vpop.f32.mrf.mxu0  ;;  %v13229_v26 = vpop.f32.mrf.mxu1  ;;  %v13243_v9 = vsel %vm4816_vm2, %v12178_v2, %v12198_v8  ;;  %19171 = vst [vmem:[#allocation112_spill] sm:$0xff] %v13259_v61 }
 0x1f8   :  { %19165 = vst [vmem:[#allocation141_spill] sm:$0xff] %v13226_v52  ;;  %5044 = vmatprep.subr.bf16.mxu1 %v13223_v1  ;;  %19166 = vst [vmem:[#allocation139_spill] sm:$0xff] %v13229_v26  ;;  %3885 = vmatprep.mubr.bf16.mxu1 %v12592_v55 }
 0x1f9   :  { %v13232_v50 = vpop.f32.mrf.mxu0  ;;  %3778 = vmatprep.mubr.bf16.mxu0 %v12592_v55  ;;  %19168 = vst [vmem:[#allocation69_spill] sm:$0xff] %v13243_v9  ;;  %v13245_v52 = vpop.f32.mrf.mxu1 }
 0x1fa   :  { %19167 = vst [vmem:[#allocation67_spill] sm:$0xff] %v13232_v50  ;;  %4932 = vmatpush1.bf16.msra.mxu0 %v13237_v40  ;;  %v13251_v50 = vsel %vm4816_vm2, %v12015_v25, %v12034_v32  ;;  %v13253_v26 = vpop.permute.xlu1 %5687  ;;  %v13267_v8 = vpop.permute.xlu0 %5685 }
 0x1fb   :  { %19169 = vst [vmem:[#allocation129_spill] sm:$0xff] %v13251_v50  ;;  %19170 = vst [vmem:[#allocation70_spill] sm:$0xff] %v13253_v26  ;;  %5045 = vmatpush1.bf16.msra.mxu1 %v13243_v9  ;;  %4933 = vmatprep.subr.bf16.mxu0 %v13251_v50  ;;  %v13262_v14 = vpop.f32.mrf.mxu0  ;;  %v13265_v2 = vpop.f32.mrf.mxu1  ;;  %v13275_v26 = vsel %vm4816_vm2, %v12003_v19, %v12015_v25  ;;  %v19182_v19 = vld [vmem:[#allocation27_spill] sm:$0xff]  ;;  %v19190_v9 = vld [vmem:[#allocation178_spill] sm:$0xff] }
 0x1fc   :  { %19172 = vst [vmem:[#allocation107_spill] sm:$0xff] %v13262_v14  ;;  %5046 = vmatprep.subr.bf16.mxu1 %v13259_v61  ;;  %19173 = vst [vmem:[#allocation71_spill] sm:$0xff] %v13265_v2  ;;  %v13281_v14 = vsel %vm4816_vm2, %v12034_v32, %v12046_v0  ;;  %v19183_v25 = vld [vmem:[#allocation179_spill] sm:$0xff] }
 0x1fd   :  { %19174 = vst [vmem:[#allocation118_spill] sm:$0xff] %v13267_v8  ;;  %v13269_v55 = vpop.f32.mrf.mxu0  ;;  %3779 = vmatmul.mubr.bf16.gmra.mxu0 %v12642_v28  ;;  %19176 = vst [vmem:[#allocation72_spill] sm:$0xff] %v13275_v26  ;;  %v13283_v61 = vpop.f32.mrf.mxu1  ;;  %v19179_v8 = vld [vmem:[#allocation24_spill] sm:$0xff] }
 0x1fe   :  { %19175 = vst [vmem:[#allocation115_spill] sm:$0xff] %v13269_v55  ;;  %3886 = vmatmul.mubr.bf16.gmra.mxu1 %v12642_v28  ;;  %19177 = vst [vmem:[#allocation74_spill] sm:$0xff] %v13281_v14  ;;  %4934 = vmatpush1.bf16.msra.mxu0 %v13275_v26  ;;  %v19180_v55 = vld [vmem:[#allocation21_spill] sm:$0xff]  ;;  %v13295_v28 = vsel %vm4816_vm2, %v19183_v25, %v19182_v19  ;;  %v13307_v26 = vsel %vm4816_vm2, %v12984_v5, %v12978_v38 }
 0x1ff   :  { %19178 = vst [vmem:[#allocation103_spill] sm:$0xff] %v13283_v61  ;;  %v13289_v2 = vsel %vm4816_vm2, %v19180_v55, %v19179_v8  ;;  %5047 = vmatpush1.bf16.msra.mxu1 %v13281_v14  ;;  %19184 = vst [vmem:[#allocation83_spill] sm:$0xff] %v13295_v28  ;;  %v13298_v32 = vpop.f32.mrf.mxu0  ;;  %v13301_v0 = vpop.f32.mrf.mxu1  ;;  %v19187_v61 = vld [vmem:[#allocation45_spill] sm:$0xff] }
 0x200   :  { %19181 = vst [vmem:[#allocation75_spill] sm:$0xff] %v13289_v2  ;;  %4935 = vmatprep.subr.bf16.mxu0 %v13289_v2  ;;  %19185 = vst [vmem:[#allocation79_spill] sm:$0xff] %v13298_v32  ;;  %5048 = vmatprep.subr.bf16.mxu1 %v13295_v28  ;;  %v13309_v14 = vpop.permute.xlu1 %5691  ;;  %v13316_v2 = vsel %vm4816_vm2, %v19190_v9, %v19180_v55  ;;  %v13327_v28 = vpop.permute.xlu0 %5689 }
 0x201   :  { %19186 = vst [vmem:[#allocation76_spill] sm:$0xff] %v13301_v0  ;;  %3893 = vmatprep.mubr.bf16.mxu1 %v19187_v61  ;;  %19188 = vst [vmem:[#allocation90_spill] sm:$0xff] %v13307_v26  ;;  %v13311_v50 = vpop.f32.mrf.mxu0  ;;  %3788 = vmatprep.mubr.bf16.mxu0 %v19187_v61  ;;  %v13322_v0 = vsel %vm4816_vm2, %v19179_v8, %v19183_v25  ;;  %v13324_v32 = vpop.f32.mrf.mxu1  ;;  %v19198_v8 = vld [vmem:[#allocation48_spill] sm:$0xff]  ;;  %v19200_v25 = vld [vmem:[#allocation50_spill] sm:$0xff] }
 0x202   :  { %19189 = vst [vmem:[#allocation87_spill] sm:$0xff] %v13309_v14  ;;  %19191 = vst [vmem:[#allocation78_spill] sm:$0xff] %v13316_v2  ;;  %4936 = vmatpush1.bf16.msra.mxu0 %v13316_v2 }
 0x203   :  { %19192 = vst [vmem:[#allocation80_spill] sm:$0xff] %v13322_v0  ;;  %19193 = vst [vmem:[#allocation77_spill] sm:$0xff] %v13324_v32  ;;  %5049 = vmatpush1.bf16.msra.mxu1 %v13322_v0  ;;  %v13330_v14 = vpop.f32.mrf.mxu0  ;;  %5147 = vmatprep.subr.bf16.mxu0 %v13307_v26  ;;  %v13333_v9 = vpop.f32.mrf.mxu1 }
 0x204   :  { %19194 = vst [vmem:[#allocation81_spill] sm:$0xff] %v13327_v28  ;;  %19195 = vst [vmem:[#allocation62_spill] sm:$0xff] %v13330_v14  ;;  %9119 = vmatprep.subr.bf16.mxu1 %v12978_v38  ;;  %v13343_v28 = vpop.permute.xlu1 %5695 }
 0x205   :  { %19196 = vst [vmem:[#allocation15_spill] sm:$0xff] %v13333_v9  ;;  %v13336_v61 = vpop.f32.mrf.mxu0  ;;  %3789 = vmatmul.mubr.bf16.gmra.mxu0 %v19198_v8  ;;  %v13340_v55 = vpop.f32.mrf.mxu1  ;;  %19201 = vst [vmem:[#allocation66_spill] sm:$0xff] %v13343_v28  ;;  %v19210_v28 = vld [vmem:[#allocation52_spill] sm:$0xff] }
 0x206   :  { %19197 = vst [vmem:[#allocation82_spill] sm:$0xff] %v13336_v61  ;;  %3894 = vmatmul.mubr.bf16.gmra.mxu1 %v19198_v8  ;;  %19199 = vst [vmem:[#allocation68_spill] sm:$0xff] %v13340_v55  ;;  %3798 = vmatprep.mubr.bf16.mxu0 %v19200_v25  ;;  %v13350_v9 = vpop.permute.xlu0 %5693 }
 0x207   :  { %v13345_v0 = vpop.f32.mrf.mxu0  ;;  %3901 = vmatprep.mubr.bf16.mxu1 %v19200_v25  ;;  %v13348_v26 = vpop.f32.mrf.mxu1  ;;  %19203 = vst [vmem:[#allocation85_spill] sm:$0xff] %v13350_v9 }
 0x208   :  { %19202 = vst [vmem:[#allocation84_spill] sm:$0xff] %v13348_v26  ;;  %v13360_v55 = vpop.permute.xlu1 %5699 }
 0x209   :  { %v13352_v14 = vpop.f32.mrf.mxu0  ;;  %v13354_v61 = vpop.f32.mrf.mxu1  ;;  %19208 = vst [vmem:[#allocation88_spill] sm:$0xff] %v13360_v55 }
 0x20a   :  { %19204 = vst [vmem:[#allocation59_spill] sm:$0xff] %v13352_v14  ;;  %19205 = vst [vmem:[#allocation86_spill] sm:$0xff] %v13354_v61  ;;  %v13369_v9 = vpop.permute.xlu0 %5697 }
 0x20b   :  { %v13356_v32 = vpop.f32.mrf.mxu0  ;;  %v13358_v8 = vpop.f32.mrf.mxu1  ;;  %19212 = vst [vmem:[#allocation89_spill] sm:$0xff] %v13369_v9 }
 0x20c   :  { %19206 = vst [vmem:[#allocation44_spill] sm:$0xff] %v13356_v32  ;;  %19207 = vst [vmem:[#allocation42_spill] sm:$0xff] %v13358_v8 }
 0x20d   :  { %v13362_v2 = vpop.f32.mrf.mxu0  ;;  %3799 = vmatmul.mubr.bf16.gmra.mxu0 %v19210_v28  ;;  %v13366_v25 = vpop.f32.mrf.mxu1 }
 0x20e   :  { %19209 = vst [vmem:[#allocation54_spill] sm:$0xff] %v13362_v2  ;;  %3902 = vmatmul.mubr.bf16.gmra.mxu1 %v19210_v28  ;;  %19211 = vst [vmem:[#allocation47_spill] sm:$0xff] %v13366_v25  ;;  %3808 = vmatprep.mubr.bf16.mxu0 %v12798_v22  ;;  %v13380_v2 = vpop.permute.xlu1 %5703  ;;  %v13386_v25 = vpop.permute.xlu0 %5701 }
 0x20f   :  { %v13371_v14 = vpop.f32.mrf.mxu0  ;;  %3909 = vmatprep.mubr.bf16.mxu1 %v12798_v22  ;;  %v13374_v32 = vpop.f32.mrf.mxu1  ;;  %19217 = vst [vmem:[#allocation25_spill] sm:$0xff] %v13380_v2  ;;  %19220 = vst [vmem:[#allocation30_spill] sm:$0xff] %v13386_v25 }
 0x210   :  { %19213 = vst [vmem:[#allocation91_spill] sm:$0xff] %v13371_v14  ;;  %19214 = vst [vmem:[#allocation40_spill] sm:$0xff] %v13374_v32 }
 0x211   :  { %v13376_v8 = vpop.f32.mrf.mxu0  ;;  %v13378_v55 = vpop.f32.mrf.mxu1 }
 0x212   :  { %19215 = vst [vmem:[#allocation92_spill] sm:$0xff] %v13376_v8  ;;  %19216 = vst [vmem:[#allocation26_spill] sm:$0xff] %v13378_v55 }
 0x213   :  { %v13382_v61 = vpop.f32.mrf.mxu0  ;;  %v13384_v28 = vpop.f32.mrf.mxu1 }
 0x214   :  { %19218 = vst [vmem:[#allocation93_spill] sm:$0xff] %v13382_v61  ;;  %19219 = vst [vmem:[#allocation32_spill] sm:$0xff] %v13384_v28  ;;  %v13400_v61 = vpop.permute.xlu1 %5707 }
 0x215   :  { %v13388_v26 = vpop.f32.mrf.mxu0  ;;  %3809 = vmatmul.mubr.bf16.gmra.mxu0 %v12866_v47  ;;  %v13392_v22 = vpop.f32.mrf.mxu1  ;;  %19225 = vst [vmem:[#allocation99_spill] sm:$0xff] %v13400_v61 }
 0x216   :  { %19221 = vst [vmem:[#allocation94_spill] sm:$0xff] %v13388_v26  ;;  %3910 = vmatmul.mubr.bf16.gmra.mxu1 %v12866_v47  ;;  %19222 = vst [vmem:[#allocation96_spill] sm:$0xff] %v13392_v22  ;;  %3818 = vmatprep.mubr.bf16.mxu0 %v12874_v48  ;;  %v13406_v26 = vpop.permute.xlu0 %5705 }
 0x217   :  { %v13395_v9 = vpop.f32.mrf.mxu0  ;;  %3917 = vmatprep.mubr.bf16.mxu1 %v12874_v48  ;;  %v13398_v2 = vpop.f32.mrf.mxu1  ;;  %19228 = vst [vmem:[#allocation100_spill] sm:$0xff] %v13406_v26 }
 0x218   :  { %19223 = vst [vmem:[#allocation23_spill] sm:$0xff] %v13395_v9  ;;  %19224 = vst [vmem:[#allocation97_spill] sm:$0xff] %v13398_v2  ;;  %v19233_v2 = vmov 0   ;;  %v13419_v61 = vpop.permute.xlu1 %5711 }
 0x219   :  { %v13402_v28 = vpop.f32.mrf.mxu0  ;;  %v13404_v25 = vpop.f32.mrf.mxu1  ;;  %19234 = vst [vmem:[#allocation105_spill] sm:$0xff] %v13419_v61 }
 0x21a   :  { %19226 = vst [vmem:[#allocation14_spill] sm:$0xff] %v13402_v28  ;;  %19227 = vst [vmem:[#allocation176_spill] sm:$0xff] %v13404_v25 }
 0x21b   :  { %v13408_v55 = vpop.f32.mrf.mxu0  ;;  %v13410_v47 = vpop.f32.mrf.mxu1 }
 0x21c   :  { %19229 = vst [vmem:[#allocation104_spill] sm:$0xff] %v13408_v55  ;;  %19230 = vst [vmem:[#allocation101_spill] sm:$0xff] %v13410_v47  ;;  %v13426_v55 = vpop.permute.xlu0 %5709  ;;  %v13439_v9 = vpop.permute.xlu1 %5715 }
 0x21d   :  { %v13412_v22 = vpop.f32.mrf.mxu0  ;;  %3819 = vmatmul.mubr.bf16.gmra.mxu0 %v12937_v53  ;;  %v13416_v48 = vpop.f32.mrf.mxu1  ;;  %19237 = vst [vmem:[#allocation108_spill] sm:$0xff] %v13426_v55  ;;  %19241 = vst [vmem:[#allocation17_spill] sm:$0xff] %v13439_v9  ;;  %v13447_v55 = vsel %vm4816_vm2, %v12940_v57, %v12984_v5 }
 0x21e   :  { %19231 = vst [vmem:[#allocation102_spill] sm:$0xff] %v13412_v22  ;;  %3918 = vmatmul.mubr.bf16.gmra.mxu1 %v12937_v53  ;;  %19232 = vst [vmem:[#allocation22_spill] sm:$0xff] %v13416_v48  ;;  %4953 = vmatprep.mubr.bf16.mxu0 %v19233_v2  ;;  %v13435_v53 = vld [vmem:[%s18356_s2 + $0x80] sm:$0xff]  }
 0x21f   :  { %v13421_v28 = vpop.f32.mrf.mxu0  ;;  %5066 = vmatprep.mubr.bf16.mxu1 %v19233_v2  ;;  %v13424_v25 = vpop.f32.mrf.mxu1  ;;  %19243 = vst [vmem:[#allocation111_spill] sm:$0xff] %v13447_v55 }
 0x220   :  { %19235 = vst [vmem:[#allocation161_spill] sm:$0xff] %v13421_v28  ;;  %19236 = vst [vmem:[#allocation106_spill] sm:$0xff] %v13424_v25  ;;  %v19246_v25 = vld [vmem:[#allocation51_spill] sm:$0xff]  ;;  %v13458_v26 = vpop.permute.xlu0 %5713 }
 0x221   :  { %v13428_v47 = vpop.f32.mrf.mxu0  ;;  %v13430_v22 = vpop.f32.mrf.mxu1  ;;  %19248 = vst [vmem:[#allocation127_spill] sm:$0xff] %v13458_v26  ;;  %v13471_v5 = vsel %vm4816_vm2, %v12804_v10, %v19246_v25 }
 0x222   :  { %19238 = vst [vmem:[#allocation109_spill] sm:$0xff] %v13428_v47  ;;  %19239 = vst [vmem:[#allocation116_spill] sm:$0xff] %v13430_v22  ;;  %v19245_v22 = vld [vmem:[#allocation53_spill] sm:$0xff] }
 0x223   :  { %v13437_v48 = vpop.f32.mrf.mxu0  ;;  %v13449_v47 = vpop.f32.mrf.mxu1  ;;  %19251 = vst [vmem:[#allocation124_spill] sm:$0xff] %v13471_v5 }
 0x224   :  { %19240 = vst [vmem:[#allocation20_spill] sm:$0xff] %v13437_v48  ;;  %19244 = vst [vmem:[#allocation113_spill] sm:$0xff] %v13449_v47  ;;  %v13456_v48 = vsel %vm4816_vm2, %v19246_v25, %v19245_v22  ;;  %v13487_v47 = vpop.permute.xlu1 %5719  ;;  %v13494_v25 = vpop.permute.xlu0 %5717 }
 0x225   :  { %v13441_v28 = vpop.f32.mrf.mxu0  ;;  %4954 = vmatmul.mubr.bf16.vlgmr.msra.gmra.mxu0 %v13435_v53  ;;  %19247 = vst [vmem:[#allocation114_spill] sm:$0xff] %v13456_v48  ;;  %19256 = vst [vmem:[#allocation120_spill] sm:$0xff] %v13487_v47 }
 0x226   :  { %19242 = vst [vmem:[#allocation147_spill] sm:$0xff] %v13441_v28  ;;  %5067 = vmatmul.mubr.bf16.vlgmr.msra.gmra.mxu1 %v13435_v53  ;;  %5148 = vmatpush1.bf16.msra.mxu0 %v13447_v55  ;;  %v13474_v55 = vpop.f32.mrf.mxu1  ;;  %19258 = vst [vmem:[#allocation13_spill] sm:$0xff] %v13494_v25 }
 0x227   :  { %9120 = vmatpush3.bf16.msra.mxu1 %v12978_v38  ;;  %5149 = vmatprep.subr.bf16.mxu0 %v13456_v48  ;;  %v13462_v28 = vpop.f32.mrf.mxu0  ;;  %19252 = vst [vmem:[#allocation117_spill] sm:$0xff] %v13474_v55  ;;  %v19253_v48 = vld [vmem:[#allocation49_spill] sm:$0xff]  ;;  %v19254_v38 = vld [vmem:[#allocation46_spill] sm:$0xff] }
 0x228   :  { %19249 = vst [vmem:[#allocation18_spill] sm:$0xff] %v13462_v28  ;;  %9121 = vmatprep.subr.bf16.mxu1 %v19245_v22  ;;  %5076 = vmatprep.mubr.bf16.mxu1 %v19233_v2  ;;  %v13480_v28 = vsel %vm4816_vm2, %v19254_v38, %v19253_v48  ;;  %v13504_v61 = vpop.f32.mrf.mxu1 }
 0x229   :  { %v13466_v57 = vpop.f32.mrf.mxu0  ;;  %4963 = vmatprep.mubr.bf16.mxu0 %v19233_v2  ;;  %19255 = vst [vmem:[#allocation119_spill] sm:$0xff] %v13480_v28  ;;  %19261 = vst [vmem:[#allocation122_spill] sm:$0xff] %v13504_v61 }
 0x22a   :  { %19250 = vst [vmem:[#allocation12_spill] sm:$0xff] %v13466_v57  ;;  %5150 = vmatpush1.bf16.msra.mxu0 %v13471_v5  ;;  %v13485_v57 = vld [vmem:[%s18356_s2 + $0x88] sm:$0xff]   ;;  %v13502_v5 = vsel %vm4816_vm2, %v12683_v63, %v19254_v38  ;;  %v13519_v63 = vpop.permute.xlu1 %5723 }
 0x22b   :  { %9122 = vmatpush3.bf16.msra.mxu1 %v19245_v22  ;;  %5151 = vmatprep.subr.bf16.mxu0 %v13480_v28  ;;  %v13491_v10 = vpop.f32.mrf.mxu0  ;;  %19260 = vst [vmem:[#allocation98_spill] sm:$0xff] %v13502_v5  ;;  %v19263_v28 = vld [vmem:[#allocation41_spill] sm:$0xff]  ;;  %19266 = vst [vmem:[#allocation121_spill] sm:$0xff] %v13519_v63  ;;  %v13540_v63 = vld [vmem:[%s18356_s2 + $0x90] sm:$0xff]  }
 0x22c   :  { %19257 = vst [vmem:[#allocation110_spill] sm:$0xff] %v13491_v10  ;;  %9123 = vmatprep.subr.bf16.mxu1 %v19253_v48  ;;  %v19262_v10 = vld [vmem:[#allocation43_spill] sm:$0xff] }
 0x22d   :  { %v13496_v55 = vpop.f32.mrf.mxu0  ;;  %4964 = vmatmul.mubr.bf16.gmra.mxu0 %v13485_v57  ;;  %v13511_v22 = vsel %vm4816_vm2, %v19263_v28, %v19262_v10 }
 0x22e   :  { %19259 = vst [vmem:[#allocation10_spill] sm:$0xff] %v13496_v55  ;;  %5077 = vmatmul.mubr.bf16.gmra.mxu1 %v13485_v57  ;;  %5152 = vmatpush1.bf16.msra.mxu0 %v13502_v5  ;;  %19264 = vst [vmem:[#allocation125_spill] sm:$0xff] %v13511_v22  ;;  %v13526_v5 = vsel %vm4816_vm2, %v12549_v27, %v19263_v28 }
 0x22f   :  { %9124 = vmatpush3.bf16.msra.mxu1 %v19253_v48  ;;  %5153 = vmatprep.subr.bf16.mxu0 %v13511_v22  ;;  %v13515_v55 = vpop.f32.mrf.mxu0  ;;  %19268 = vst [vmem:[#allocation8_spill] sm:$0xff] %v13526_v5  ;;  %v13529_v48 = vpop.f32.mrf.mxu1  ;;  %v19271_v22 = vld [vmem:[#allocation39_spill] sm:$0xff] }
 0x230   :  { %19265 = vst [vmem:[#allocation126_spill] sm:$0xff] %v13515_v55  ;;  %9125 = vmatprep.subr.bf16.mxu1 %v19262_v10  ;;  %5086 = vmatprep.mubr.bf16.mxu1 %v19233_v2  ;;  %19269 = vst [vmem:[#allocation73_spill] sm:$0xff] %v13529_v48  ;;  %v19270_v55 = vld [vmem:[#allocation38_spill] sm:$0xff]  ;;  %v13555_v48 = vsel %vm4816_vm2, %v12384_v62, %v19271_v22 }
 0x231   :  { %v13521_v38 = vpop.f32.mrf.mxu0  ;;  %4973 = vmatprep.mubr.bf16.mxu0 %v19233_v2  ;;  %v13535_v61 = vsel %vm4816_vm2, %v19271_v22, %v19270_v55  ;;  %19276 = vst [vmem:[#allocation9_spill] sm:$0xff] %v13555_v48 }
 0x232   :  { %19267 = vst [vmem:[#allocation11_spill] sm:$0xff] %v13521_v38  ;;  %5154 = vmatpush1.bf16.msra.mxu0 %v13526_v5  ;;  %19272 = vst [vmem:[#allocation128_spill] sm:$0xff] %v13535_v61  ;;  %v13542_v38 = vpop.permute.xlu0 %5721  ;;  %v13557_v5 = vpop.f32.mrf.mxu1 }
 0x233   :  { %19273 = vst [vmem:[#allocation131_spill] sm:$0xff] %v13542_v38  ;;  %9126 = vmatpush3.bf16.msra.mxu1 %v19262_v10  ;;  %5155 = vmatprep.subr.bf16.mxu0 %v13535_v61  ;;  %v13546_v27 = vpop.f32.mrf.mxu0  ;;  %19277 = vst [vmem:[#allocation6_spill] sm:$0xff] %v13557_v5  ;;  %v19278_v38 = vld [vmem:[#allocation37_spill] sm:$0xff]  ;;  %v19279_v61 = vld [vmem:[#allocation35_spill] sm:$0xff]  ;;  %v13566_v10 = vpop.permute.xlu1 %5727 }
 0x234   :  { %19274 = vst [vmem:[#allocation132_spill] sm:$0xff] %v13546_v27  ;;  %9127 = vmatprep.subr.bf16.mxu1 %v19270_v55  ;;  %v13564_v27 = vsel %vm4816_vm2, %v19279_v61, %v19278_v38  ;;  %19281 = vst [vmem:[#allocation134_spill] sm:$0xff] %v13566_v10  ;;  %v13574_v62 = vpop.f32.mrf.mxu1  ;;  %v13583_v5 = vsel %vm4816_vm2, %v12216_v56, %v19279_v61 }
 0x235   :  { %v13549_v28 = vpop.f32.mrf.mxu0  ;;  %4974 = vmatmul.mubr.bf16.gmra.mxu0 %v13540_v63  ;;  %19280 = vst [vmem:[#allocation57_spill] sm:$0xff] %v13564_v27  ;;  %19283 = vst [vmem:[#allocation138_spill] sm:$0xff] %v13574_v62  ;;  %v13595_v62 = vld [vmem:[%s18356_s2 + $0x98] sm:$0xff]  }
 0x236   :  { %19275 = vst [vmem:[#allocation136_spill] sm:$0xff] %v13549_v28  ;;  %5087 = vmatmul.mubr.bf16.gmra.mxu1 %v13540_v63  ;;  %5156 = vmatpush1.bf16.msra.mxu0 %v13555_v48  ;;  %v13576_v22 = vpop.permute.xlu0 %5725  ;;  %19286 = vst [vmem:[#allocation4_spill] sm:$0xff] %v13583_v5  ;;  %v13602_v61 = vpop.f32.mrf.mxu1 }
 0x237   :  { %9128 = vmatpush3.bf16.msra.mxu1 %v19270_v55  ;;  %5157 = vmatprep.subr.bf16.mxu0 %v13564_v27  ;;  %v13570_v28 = vpop.f32.mrf.mxu0  ;;  %19284 = vst [vmem:[#allocation148_spill] sm:$0xff] %v13576_v22  ;;  %v19288_v27 = vld [vmem:[#allocation31_spill] sm:$0xff]  ;;  %19291 = vst [vmem:[#allocation143_spill] sm:$0xff] %v13602_v61 }
 0x238   :  { %19282 = vst [vmem:[#allocation137_spill] sm:$0xff] %v13570_v28  ;;  %9129 = vmatprep.subr.bf16.mxu1 %v19278_v38  ;;  %5096 = vmatprep.mubr.bf16.mxu1 %v19233_v2  ;;  %v19287_v28 = vld [vmem:[#allocation33_spill] sm:$0xff]  ;;  %v13612_v25 = vsel %vm4816_vm2, %v12078_v7, %v19288_v27  ;;  %v13629_v7 = vpop.f32.mrf.mxu1 }
 0x239   :  { %v13578_v48 = vpop.f32.mrf.mxu0  ;;  %4983 = vmatprep.mubr.bf16.mxu0 %v19233_v2  ;;  %v13590_v55 = vsel %vm4816_vm2, %v19288_v27, %v19287_v28  ;;  %19294 = vst [vmem:[#allocation130_spill] sm:$0xff] %v13612_v25  ;;  %19299 = vst [vmem:[#allocation149_spill] sm:$0xff] %v13629_v7 }
 0x23a   :  { %19285 = vst [vmem:[#allocation7_spill] sm:$0xff] %v13578_v48  ;;  %5158 = vmatpush1.bf16.msra.mxu0 %v13583_v5  ;;  %19289 = vst [vmem:[#allocation36_spill] sm:$0xff] %v13590_v55  ;;  %v13604_v5 = vpop.permute.xlu1 %5731  ;;  %v13621_v61 = vpop.permute.xlu0 %5729 }
 0x23b   :  { %9130 = vmatpush3.bf16.msra.mxu1 %v19278_v38  ;;  %5159 = vmatprep.subr.bf16.mxu0 %v13590_v55  ;;  %v13599_v56 = vpop.f32.mrf.mxu0  ;;  %19292 = vst [vmem:[#allocation144_spill] sm:$0xff] %v13604_v5  ;;  %v19296_v55 = vld [vmem:[#allocation29_spill] sm:$0xff] }
 0x23c   :  { %19290 = vst [vmem:[#allocation140_spill] sm:$0xff] %v13599_v56  ;;  %9131 = vmatprep.subr.bf16.mxu1 %v19287_v28  ;;  %v19295_v56 = vld [vmem:[#allocation28_spill] sm:$0xff] }
 0x23d   :  { %v13606_v48 = vpop.f32.mrf.mxu0  ;;  %4984 = vmatmul.mubr.bf16.gmra.mxu0 %v13595_v62  ;;  %v13619_v38 = vsel %vm4816_vm2, %v19296_v55, %v19295_v56 }
 0x23e   :  { %19293 = vst [vmem:[#allocation172_spill] sm:$0xff] %v13606_v48  ;;  %5097 = vmatmul.mubr.bf16.gmra.mxu1 %v13595_v62  ;;  %5160 = vmatpush1.bf16.msra.mxu0 %v13612_v25  ;;  %19297 = vst [vmem:[#allocation5_spill] sm:$0xff] %v13619_v38  ;;  %v13636_v25 = vsel %vm4816_vm2, %v19182_v19, %v19296_v55  ;;  %v13652_v19 = vpop.f32.mrf.mxu1  ;;  %v13654_v55 = vpop.permute.xlu0 %5733 }
 0x23f   :  { %9132 = vmatpush3.bf16.msra.mxu1 %v19287_v28  ;;  %5161 = vmatprep.subr.bf16.mxu0 %v13619_v38  ;;  %v13625_v48 = vpop.f32.mrf.mxu0  ;;  %19301 = vst [vmem:[#allocation142_spill] sm:$0xff] %v13636_v25  ;;  %v13645_v38 = vpop.permute.xlu1 %5735  ;;  %19305 = vst [vmem:[#allocation145_spill] sm:$0xff] %v13652_v19 }
 0x240   :  { %19298 = vst [vmem:[#allocation146_spill] sm:$0xff] %v13625_v48  ;;  %9133 = vmatprep.subr.bf16.mxu1 %v19295_v56  ;;  %5106 = vmatprep.mubr.bf16.mxu1 %v19233_v2  ;;  %v13643_v48 = vld [vmem:[%s18356_s2 + $0xa0] sm:$0xff]   ;;  %19302 = vst [vmem:[#allocation151_spill] sm:$0xff] %v13645_v38 }
 0x241   :  { %v13631_v27 = vpop.f32.mrf.mxu0  ;;  %4993 = vmatprep.mubr.bf16.mxu0 %v19233_v2  ;;  %19306 = vst [vmem:[#allocation155_spill] sm:$0xff] %v13654_v55 }
 0x242   :  { %19300 = vst [vmem:[#allocation158_spill] sm:$0xff] %v13631_v27  ;;  %5162 = vmatpush1.bf16.msra.mxu0 %v13636_v25  ;;  %v19304_v27 = vld [vmem:[#allocation3_spill] sm:$0xff] }
 0x243   :  { %9134 = vmatpush3.bf16.msra.mxu1 %v19295_v56  ;;  %5885 = vmatprep.subr.bf16.mxu0 %v12989_v60  ;;  %v13649_v7 = vpop.f32.mrf.mxu0  ;;  %v13664_v60 = vpop.f32.mrf.mxu1 }
 0x244   :  { %19303 = vst [vmem:[#allocation153_spill] sm:$0xff] %v13649_v7  ;;  %5998 = vmatprep.subr.bf16.mxu1 %v19304_v27  ;;  %19309 = vst [vmem:[#allocation123_spill] sm:$0xff] %v13664_v60  ;;  %v13666_v7 = vpop.permute.xlu1 %5739  ;;  %v13675_v56 = vpop.permute.xlu0 %5737 }
 0x245   :  { %v13656_v25 = vpop.f32.mrf.mxu0  ;;  %4994 = vmatmul.mubr.bf16.gmra.mxu0 %v13643_v48  ;;  %19311 = vst [vmem:[#allocation157_spill] sm:$0xff] %v13675_v56  ;;  %v13679_v19 = vpop.f32.mrf.mxu1 }
 0x246   :  { %19307 = vst [vmem:[#allocation154_spill] sm:$0xff] %v13656_v25  ;;  %5107 = vmatmul.mubr.bf16.gmra.mxu1 %v13643_v48  ;;  %5003 = vmatprep.mubr.bf16.mxu0 %v19233_v2  ;;  %v13673_v25 = vld [vmem:[%s18356_s2 + $0xa8] sm:$0xff]   ;;  %19313 = vst [vmem:[#allocation95_spill] sm:$0xff] %v13679_v19 }
 0x247   :  { %v13661_v38 = vpop.f32.mrf.mxu0  ;;  %5116 = vmatprep.mubr.bf16.mxu1 %v19233_v2  ;;  %v13691_v47 = vpop.f32.mrf.mxu1 }
 0x248   :  { %19308 = vst [vmem:[#allocation156_spill] sm:$0xff] %v13661_v38  ;;  %v13686_v60 = vpop.permute.xlu1 %5743  ;;  %19316 = vst [vmem:[#allocation164_spill] sm:$0xff] %v13691_v47  ;;  %v13693_v56 = vpop.permute.xlu0 %5741 }
 0x249   :  { %v13668_v27 = vpop.f32.mrf.mxu0  ;;  %v13704_v26 = vpop.f32.mrf.mxu1 }
 0x24a   :  { %19310 = vst [vmem:[#allocation163_spill] sm:$0xff] %v13668_v27  ;;  %19319 = vst [vmem:[#allocation165_spill] sm:$0xff] %v13704_v26 }
 0x24b   :  { %v13677_v28 = vpop.f32.mrf.mxu0  ;;  %v13718_v8 = vpop.f32.mrf.mxu1 }
 0x24c   :  { %19312 = vst [vmem:[#allocation160_spill] sm:$0xff] %v13677_v28  ;;  %v13706_v9 = vpop.permute.xlu1 %5747  ;;  %v13713_v47 = vpop.permute.xlu0 %5745  ;;  %19322 = vst [vmem:[#allocation169_spill] sm:$0xff] %v13718_v8 }
 0x24d   :  { %v13681_v38 = vpop.f32.mrf.mxu0  ;;  %5004 = vmatmul.mubr.bf16.gmra.mxu0 %v13673_v25  ;;  %v13731_v32 = vpop.f32.mrf.mxu1 }
 0x24e   :  { %19314 = vst [vmem:[#allocation152_spill] sm:$0xff] %v13681_v38  ;;  %5117 = vmatmul.mubr.bf16.gmra.mxu1 %v13673_v25  ;;  %5013 = vmatprep.mubr.bf16.mxu0 %v19233_v2  ;;  %v13700_v38 = vld [vmem:[%s18356_s2 + $0xb0] sm:$0xff]   ;;  %19326 = vst [vmem:[#allocation177_spill] sm:$0xff] %v13731_v32 }
 0x24f   :  { %v13688_v27 = vpop.f32.mrf.mxu0  ;;  %5126 = vmatprep.mubr.bf16.mxu1 %v19233_v2 }
 0x250   :  { %19315 = vst [vmem:[#allocation162_spill] sm:$0xff] %v13688_v27  ;;  %v13727_v26 = vpop.permute.xlu1 %5751  ;;  %v13733_v14 = vpop.permute.xlu0 %5749 }
 0x251   :  { %v13695_v28 = vpop.f32.mrf.mxu0  ;;  %19324 = vst [vmem:[#allocation170_spill] sm:$0xff] %v13727_v26  ;;  %19327 = vst [vmem:[#allocation171_spill] sm:$0xff] %v13733_v14 }
 0x252   :  { %19317 = vst [vmem:[#allocation19_spill] sm:$0xff] %v13695_v28 }
 0x253   :  { %v13702_v19 = vpop.f32.mrf.mxu0 }
 0x254   :  { %19318 = vst [vmem:[#allocation159_spill] sm:$0xff] %v13702_v19  ;;  %v13745_v26 = vpop.permute.xlu1 %5755  ;;  %v13749_v32 = vpop.permute.xlu0 %5753 }
 0x255   :  { %v13708_v27 = vpop.f32.mrf.mxu0  ;;  %5014 = vmatmul.mubr.bf16.gmra.mxu0 %v13700_v38 }
 0x256   :  { %19320 = vst [vmem:[#allocation167_spill] sm:$0xff] %v13708_v27  ;;  %5127 = vmatmul.mubr.bf16.gmra.mxu1 %v13700_v38  ;;  %5023 = vmatprep.mubr.bf16.mxu0 %v19233_v2  ;;  %v13725_v27 = vld [vmem:[%s18356_s2 + $0xb8] sm:$0xff]  }
 0x257   :  { %v13715_v28 = vpop.f32.mrf.mxu0  ;;  %5136 = vmatprep.mubr.bf16.mxu1 %v19233_v2 }
 0x258   :  { %19321 = vst [vmem:[#allocation55_spill] sm:$0xff] %v13715_v28 }
 0x259   :  { %v13720_v19 = vpop.f32.mrf.mxu0 }
 0x25a   :  { %19323 = vst [vmem:[#allocation168_spill] sm:$0xff] %v13720_v19  ;;  %v13743_v19 = vpop.f32.mrf.mxu1 }
 0x25b   :  { %v13729_v22 = vpop.f32.mrf.mxu0  ;;  %19330 = vst [vmem:[#allocation175_spill] sm:$0xff] %v13743_v19  ;;  %v13759_v19 = vpop.permute.xlu1 %5759 }
 0x25c   :  { %19325 = vst [vmem:[#allocation34_spill] sm:$0xff] %v13729_v22 }
 0x25d   :  { %v13735_v28 = vpop.f32.mrf.mxu0  ;;  %5024 = vmatmul.mubr.bf16.gmra.mxu0 %v13725_v27 }
 0x25e   :  { %19328 = vst [vmem:[#allocation174_spill] sm:$0xff] %v13735_v28  ;;  %5137 = vmatmul.mubr.bf16.gmra.mxu1 %v13725_v27  ;;  %5179 = vmatprep.mubr.bf16.mxu0 %v19233_v2  ;;  %v13753_v28 = vpop.f32.mrf.mxu1 }
 0x25f   :  { %v13740_v8 = vpop.f32.mrf.mxu0  ;;  %9135 = vmatprep.mubr.bf16.mxu1 %v13435_v53  ;;  %19333 = vst [vmem:[#allocation21_spill] sm:$0xff] %v13753_v28  ;;  %v3928_v28 = vld [vmem:[%s18358_s4 + $0x10] sm:$0xff] }
 0x260   :  { %19329 = vst [vmem:[#allocation166_spill] sm:$0xff] %v13740_v8 }
 0x261   :  { %v13747_v22 = vpop.f32.mrf.mxu0 }
 0x262   :  { %19331 = vst [vmem:[#allocation173_spill] sm:$0xff] %v13747_v22 }
 0x263   :  { %v13751_v14 = vpop.f32.mrf.mxu0 }
 0x264   :  { %19332 = vst [vmem:[#allocation24_spill] sm:$0xff] %v13751_v14  ;;  %v3926_v14 = vld [vmem:[%s18358_s4] sm:$0xff] }
 0x265   :  { %v3524_v5 = vpop.f32.mrf.mxu0  ;;  %5180 = vmatmul.mubr.bf16.vlgmr.msra.gmra.mxu0 %v13435_v53  ;;  %v3637_v55 = vpop.f32.mrf.mxu1 }
 0x266   :  { %9136 = vmatmul.mubr.bf16.vlgmr.msra.gmra.mxu1 %v13485_v57  ;;  %v3525_v8 = vadd.f32 %v3524_v5, %v13042_v39  ;;  %5886 = vmatpush1.bf16.msra.mxu0 %v13015_v46  ;;  %v3638_v22 = vadd.f32 %v3637_v55, %v13055_v3 }
 0x267   :  { %5999 = vmatpush1.bf16.msra.mxu1 %v13023_v21  ;;  %5887 = vmatprep.subr.bf16.mxu0 %v13028_v24  ;;  %v3526_v53 = vpop.f32.mrf.mxu0  ;;  %v3639_v39 = vpop.f32.mrf.mxu1  ;;  %v3927_v24 = vld [vmem:[%s18358_s4 + $0x8] sm:$0xff] }
 0x268   :  { %6000 = vmatprep.subr.bf16.mxu1 %v13040_v30  ;;  %v4038_v46 = vadd.f32 %v3926_v14, %v3525_v8  ;;  %v3527_v5 = vadd.f32 %v3526_v53, %v13064_v42  ;;  %5189 = vmatprep.mubr.bf16.mxu0 %v19233_v2  ;;  %v13773_v21 = vpop.permute.xlu0 %5757  ;;  %v4040_v3 = vadd.f32 %v3928_v28, %v3638_v22  ;;  %v3929_v30 = vld [vmem:[%s18358_s4 + $0x18] sm:$0xff] }
 0x269   :  { %v3640_v55 = vadd.f32 %v3639_v39, %v13072_v18  ;;  %v3528_v10 = vpop.f32.mrf.mxu0  ;;  %9139 = vmatprep.mubr.bf16.mxu1 %v13540_v63  ;;  %v3641_v14 = vpop.f32.mrf.mxu1  ;;  %v3933_v22 = vld [vmem:[%s18358_s4 + $0x38] sm:$0xff]  ;;  %v3934_v39 = vld [vmem:[%s18358_s4 + $0x40] sm:$0xff] }
 0x26a   :  { %4150 = vst [vmem:[%s18358_s4] sm:$0xff] %v4038_v46  ;;  %v4039_v42 = vadd.f32 %v3927_v24, %v3527_v5  ;;  %v3529_v8 = vadd.f32 %v3528_v10, %v13089_v51  ;;  %5888 = vmatpush1.bf16.msra.mxu0 %v13069_v36  ;;  %4152 = vst [vmem:[%s18358_s4 + $0x10] sm:$0xff] %v4040_v3  ;;  %v3642_v28 = vadd.f32 %v3641_v14, %v13096_v43  ;;  %v3935_v36 = vld [vmem:[%s18358_s4 + $0x48] sm:$0xff]  ;;  %v13805_v10 = vpop.permute.xlu1 %5763 }
 0x26b   :  { %v4041_v18 = vadd.f32 %v3929_v30, %v3640_v55  ;;  %6001 = vmatpush1.bf16.msra.mxu1 %v13077_v20  ;;  %5889 = vmatprep.subr.bf16.mxu0 %v13102_v12  ;;  %v3530_v53 = vpop.f32.mrf.mxu0  ;;  %v3643_v43 = vpop.f32.mrf.mxu1 }
 0x26c   :  { %4151 = vst [vmem:[%s18358_s4 + $0x8] sm:$0xff] %v4039_v42  ;;  %6002 = vmatprep.subr.bf16.mxu1 %v13087_v44  ;;  %v4045_v51 = vadd.f32 %v3933_v22, %v3529_v8  ;;  %v3531_v20 = vadd.f32 %v3530_v53, %v13109_v58  ;;  %v4047_v12 = vadd.f32 %v3935_v36, %v3642_v28  ;;  %v3936_v44 = vld [vmem:[%s18358_s4 + $0x50] sm:$0xff]  ;;  %v3942_v42 = vld [vmem:[%s18358_s4 + $0x80] sm:$0xff]  ;;  %v13868_v36 = vld [vmem:[%s18359_s3 + $0x8] sm:$0xff] }
 0x26d   :  { %4153 = vst [vmem:[%s18358_s4 + $0x18] sm:$0xff] %v4041_v18  ;;  %v3644_v46 = vadd.f32 %v3643_v43, %v13114_v54  ;;  %v3534_v5 = vpop.f32.mrf.mxu0  ;;  %5190 = vmatmul.mubr.bf16.gmra.mxu0 %v13485_v57  ;;  %v3647_v3 = vpop.f32.mrf.mxu1  ;;  %v7106_v57 = vld [vmem:[%s18359_s3] sm:$0xff]  ;;  %v3941_v18 = vld [vmem:[%s18358_s4 + $0x78] sm:$0xff]  ;;  %7129 = vperm.xlu1 %9158, %v13868_v36  }
 0x26e   :  { %4157 = vst [vmem:[%s18358_s4 + $0x38] sm:$0xff] %v4045_v51  ;;  %v4046_v58 = vadd.f32 %v3934_v39, %v3531_v20  ;;  %v3535_v55 = vadd.f32 %v3534_v5, %v13116_v23  ;;  %5890 = vmatpush1.bf16.msra.mxu0 %v13122_v33  ;;  %v13823_v54 = vpop.permute.xlu0 %5761  ;;  %5199 = vmatprep.mubr.bf16.mxu0 %v19233_v2  ;;  %4159 = vst [vmem:[%s18358_s4 + $0x48] sm:$0xff] %v4047_v12  ;;  %v3940_v23 = vld [vmem:[%s18358_s4 + $0x70] sm:$0xff]  ;;  %v13863_v53 = vpop.permute.xlu1 %5767  ;;  %v3949_v20 = vld [vmem:[%s18358_s4 + $0xb8] sm:$0xff] }
 0x26f   :  { %v4048_v24 = vadd.f32 %v3936_v44, %v3644_v46  ;;  %v3648_v30 = vadd.f32 %v3647_v3, %v13134_v4  ;;  %6003 = vmatpush1.bf16.msra.mxu1 %v13132_v15  ;;  %5891 = vmatprep.subr.bf16.mxu0 %v13140_v17  ;;  %v3536_v33 = vpop.f32.mrf.mxu0  ;;  %v3649_v14 = vpop.f32.mrf.mxu1  ;;  %v19334_v12 = vld [vmem:[#allocation150_spill] sm:$0xff] }
 0x270   :  { %4158 = vst [vmem:[%s18358_s4 + $0x40] sm:$0xff] %v4046_v58  ;;  %6004 = vmatprep.subr.bf16.mxu1 %v13146_v59  ;;  %v4052_v4 = vadd.f32 %v3940_v23, %v3535_v55  ;;  %v3537_v15 = vadd.f32 %v3536_v33, %v13149_v16  ;;  %9140 = vmatmul.mubr.bf16.gmra.mxu1 %v13595_v62  ;;  %v3943_v59 = vld [vmem:[%s18358_s4 + $0x88] sm:$0xff]  ;;  %v3948_v58 = vld [vmem:[%s18358_s4 + $0xb0] sm:$0xff]  ;;  %v3950_v55 = vld [vmem:[%s18358_s4 + $0xc0] sm:$0xff] }
 0x271   :  { %4160 = vst [vmem:[%s18358_s4 + $0x50] sm:$0xff] %v4048_v24  ;;  %v4054_v17 = vadd.f32 %v3942_v42, %v3648_v30  ;;  %v3650_v8 = vadd.f32 %v3649_v14, %v13154_v37  ;;  %v3538_v28 = vpop.f32.mrf.mxu0  ;;  %9143 = vmatprep.mubr.bf16.mxu1 %v13643_v48  ;;  %7124 = vperm.xlu0 %9157, %v7106_v57   ;;  %v3651_v22 = vpop.f32.mrf.mxu1  ;;  %v19336_v30 = vld [vmem:[#allocation133_spill] sm:$0xff] }
 0x272   :  { %4164 = vst [vmem:[%s18358_s4 + $0x70] sm:$0xff] %v4052_v4  ;;  %v4053_v16 = vadd.f32 %v3941_v18, %v3537_v15  ;;  %v3539_v37 = vadd.f32 %v3538_v28, %v13159_v45  ;;  %5892 = vmatpush1.bf16.msra.mxu0 %v13164_v35  ;;  %v3652_v43 = vadd.f32 %v3651_v22, %v13173_v11  ;;  %v3947_v35 = vld [vmem:[%s18358_s4 + $0xa8] sm:$0xff]  ;;  %v13887_v5 = vpop.permute.xlu0 %5765  ;;  %v3956_v4 = vld [vmem:[%s18358_s4 + $0xf0] sm:$0xff] }
 0x273   :  { %4166 = vst [vmem:[%s18358_s4 + $0x80] sm:$0xff] %v4054_v17  ;;  %v4055_v51 = vadd.f32 %v3943_v59, %v3650_v8  ;;  %6005 = vmatpush1.bf16.msra.mxu1 %v13171_v49  ;;  %5893 = vmatprep.subr.bf16.mxu0 %v13179_v34  ;;  %v3540_v45 = vpop.f32.mrf.mxu0  ;;  %v3653_v46 = vpop.f32.mrf.mxu1  ;;  %v19335_v49 = vld [vmem:[#allocation64_spill] sm:$0xff]  ;;  %v19338_v8 = vld [vmem:[#allocation139_spill] sm:$0xff]  ;;  %v3957_v59 = vld [vmem:[%s18358_s4 + $0xf8] sm:$0xff] }
 0x274   :  { %4165 = vst [vmem:[%s18358_s4 + $0x78] sm:$0xff] %v4053_v16  ;;  %6006 = vmatprep.subr.bf16.mxu1 %v19334_v12  ;;  %v4059_v11 = vadd.f32 %v3947_v35, %v3539_v37  ;;  %v3541_v39 = vadd.f32 %v3540_v45, %v19335_v49  ;;  %v4061_v34 = vadd.f32 %v3949_v20, %v3652_v43  ;;  %v13929_v17 = vpop.permute.xlu1 %5771  ;;  %v3955_v28 = vld [vmem:[%s18358_s4 + $0xe8] sm:$0xff]  ;;  %v7109_v35 = vld [vmem:[%s18359_s3 + $0x18] sm:$0xff] }
 0x275   :  { %4167 = vst [vmem:[%s18358_s4 + $0x88] sm:$0xff] %v4055_v51  ;;  %v3654_v44 = vadd.f32 %v3653_v46, %v13191_v31  ;;  %v3544_v3 = vpop.f32.mrf.mxu0  ;;  %5200 = vmatmul.mubr.bf16.gmra.mxu0 %v13540_v63  ;;  %v3657_v24 = vpop.f32.mrf.mxu1  ;;  %v13910_v31 = vld [vmem:[%s18359_s3 + $0x10] sm:$0xff]  ;;  %v19339_v51 = vld [vmem:[#allocation67_spill] sm:$0xff]  ;;  %v19340_v12 = vld [vmem:[#allocation69_spill] sm:$0xff]  ;;  %7139 = vperm.xlu0 %9157, %v7109_v35  }
 0x276   :  { %4171 = vst [vmem:[%s18358_s4 + $0xa8] sm:$0xff] %v4059_v11  ;;  %v4060_v57 = vadd.f32 %v3948_v58, %v3541_v39  ;;  %v3545_v23 = vadd.f32 %v3544_v3, %v19336_v30  ;;  %5894 = vmatpush1.bf16.msra.mxu0 %v13201_v29  ;;  %5209 = vmatprep.mubr.bf16.mxu0 %v19233_v2  ;;  %4173 = vst [vmem:[%s18358_s4 + $0xb8] sm:$0xff] %v4061_v34  ;;  %v3954_v29 = vld [vmem:[%s18358_s4 + $0xe0] sm:$0xff]  ;;  %v13947_v37 = vpop.permute.xlu0 %5769  ;;  %v3961_v11 = vld [vmem:[%s18358_s4 + $0x118] sm:$0xff] }
 0x277   :  { %v4062_v63 = vadd.f32 %v3950_v55, %v3654_v44  ;;  %v3658_v33 = vadd.f32 %v3657_v24, %v13209_v13  ;;  %6007 = vmatpush1.bf16.msra.mxu1 %v13207_v41  ;;  %5895 = vmatprep.subr.bf16.mxu0 %v13215_v6  ;;  %v3546_v42 = vpop.f32.mrf.mxu0  ;;  %v3659_v14 = vpop.f32.mrf.mxu1  ;;  %v19337_v41 = vld [vmem:[#allocation141_spill] sm:$0xff]  ;;  %v3963_v49 = vld [vmem:[%s18358_s4 + $0x128] sm:$0xff]  ;;  %v19342_v39 = vld [vmem:[#allocation112_spill] sm:$0xff] }
 0x278   :  { %4172 = vst [vmem:[%s18358_s4 + $0xb0] sm:$0xff] %v4060_v57  ;;  %6008 = vmatprep.subr.bf16.mxu1 %v13223_v1  ;;  %v4066_v13 = vadd.f32 %v3954_v29, %v3545_v23  ;;  %v3547_v15 = vadd.f32 %v3546_v42, %v19337_v41  ;;  %9144 = vmatmul.mubr.bf16.gmra.mxu1 %v13673_v25  ;;  %v19341_v46 = vld [vmem:[#allocation129_spill] sm:$0xff]  ;;  %v19343_v44 = vld [vmem:[#allocation107_spill] sm:$0xff]  ;;  %v3962_v24 = vld [vmem:[%s18358_s4 + $0x120] sm:$0xff] }
 0x279   :  { %4174 = vst [vmem:[%s18358_s4 + $0xc0] sm:$0xff] %v4062_v63  ;;  %v4068_v6 = vadd.f32 %v3956_v4, %v3658_v33  ;;  %v3660_v18 = vadd.f32 %v3659_v14, %v19338_v8  ;;  %v3548_v1 = vpop.f32.mrf.mxu0  ;;  %9147 = vmatprep.mubr.bf16.mxu1 %v13700_v38  ;;  %7134 = vperm.xlu1 %9158, %v13910_v31   ;;  %v3661_v22 = vpop.f32.mrf.mxu1  ;;  %v19344_v55 = vld [vmem:[#allocation71_spill] sm:$0xff]  ;;  %v3964_v63 = vld [vmem:[%s18358_s4 + $0x130] sm:$0xff]  ;;  %v13998_v14 = vld [vmem:[%s18359_s3 + $0x20] sm:$0xff] }
 0x27a   :  { %4178 = vst [vmem:[%s18358_s4 + $0xe0] sm:$0xff] %v4066_v13  ;;  %v4067_v16 = vadd.f32 %v3955_v28, %v3547_v15  ;;  %v3549_v43 = vadd.f32 %v3548_v1, %v19339_v51  ;;  %5896 = vmatpush1.bf16.msra.mxu0 %v13237_v40  ;;  %v3662_v20 = vadd.f32 %v3661_v22, %v13245_v52  ;;  %v13982_v23 = vld [vmem:[%s18357_s1 + $0x104] ss:$8 sps:$4 sm:$0xff]   ;;  %v19346_v13 = vld [vmem:[#allocation72_spill] sm:$0xff]  ;;  %v5774_v22 = vpop.permute.xlu0 %5773 }
 0x27b   :  { %4180 = vst [vmem:[%s18358_s4 + $0xf0] sm:$0xff] %v4068_v6  ;;  %v4069_v45 = vadd.f32 %v3957_v59, %v3660_v18  ;;  %6009 = vmatpush1.bf16.msra.mxu1 %v19340_v12  ;;  %5897 = vmatprep.subr.bf16.mxu0 %v19341_v46  ;;  %v3550_v40 = vpop.f32.mrf.mxu0  ;;  %v3663_v34 = vpop.f32.mrf.mxu1  ;;  %v19345_v42 = vld [vmem:[#allocation115_spill] sm:$0xff]  ;;  %v19348_v8 = vld [vmem:[#allocation74_spill] sm:$0xff]  ;;  %v3968_v18 = vld [vmem:[%s18358_s4 + $0x150] sm:$0xff] }
 0x27c   :  { %4179 = vst [vmem:[%s18358_s4 + $0xe8] sm:$0xff] %v4067_v16  ;;  %6010 = vmatprep.subr.bf16.mxu1 %v19342_v39  ;;  %v4073_v52 = vadd.f32 %v3961_v11, %v3549_v43  ;;  %v3551_v58 = vadd.f32 %v3550_v40, %v19343_v44  ;;  %v4075_v3 = vadd.f32 %v3963_v49, %v3662_v20  ;;  %v19347_v15 = vld [vmem:[#allocation103_spill] sm:$0xff]  ;;  %v3970_v59 = vld [vmem:[%s18358_s4 + $0x160] sm:$0xff]  ;;  %v19352_v12 = vld [vmem:[#allocation76_spill] sm:$0xff] }
 0x27d   :  { %4181 = vst [vmem:[%s18358_s4 + $0xf8] sm:$0xff] %v4069_v45  ;;  %v3664_v57 = vadd.f32 %v3663_v34, %v19344_v55  ;;  %v3554_v30 = vpop.f32.mrf.mxu0  ;;  %5210 = vmatmul.mubr.bf16.gmra.mxu0 %v13595_v62  ;;  %v3667_v29 = vpop.f32.mrf.mxu1  ;;  %v19349_v28 = vld [vmem:[#allocation75_spill] sm:$0xff]  ;;  %v3969_v46 = vld [vmem:[%s18358_s4 + $0x158] sm:$0xff]  ;;  %7144 = vperm.xlu1 %9158, %v13998_v14  }
 0x27e   :  { %4185 = vst [vmem:[%s18358_s4 + $0x118] sm:$0xff] %v4073_v52  ;;  %v4074_v33 = vadd.f32 %v3962_v24, %v3551_v58  ;;  %v3555_v4 = vadd.f32 %v3554_v30, %v19345_v42  ;;  %5898 = vmatpush1.bf16.msra.mxu0 %v19346_v13  ;;  %v13992_v62 = vpop.permute.xlu1 %5775  ;;  %5219 = vmatprep.mubr.bf16.mxu0 %v19233_v2  ;;  %4187 = vst [vmem:[%s18358_s4 + $0x128] sm:$0xff] %v4075_v3  ;;  %v19350_v16 = vld [vmem:[#allocation83_spill] sm:$0xff]  ;;  %v19353_v58 = vld [vmem:[#allocation78_spill] sm:$0xff] }
 0x27f   :  { %v4076_v41 = vadd.f32 %v3964_v63, %v3664_v57  ;;  %v3668_v6 = vadd.f32 %v3667_v29, %v19347_v15  ;;  %6011 = vmatpush1.bf16.msra.mxu1 %v19348_v8  ;;  %5899 = vmatprep.subr.bf16.mxu0 %v19349_v28  ;;  %v3556_v1 = vpop.f32.mrf.mxu0  ;;  %v3669_v43 = vpop.f32.mrf.mxu1  ;;  %v19351_v35 = vld [vmem:[#allocation79_spill] sm:$0xff]  ;;  %v5826_v49 = vsel %vm4816_vm2, %v5774_v22, %v13992_v62  ;;  %v19354_v24 = vld [vmem:[#allocation77_spill] sm:$0xff]  ;;  %v19355_v63 = vld [vmem:[#allocation80_spill] sm:$0xff] }
 0x280   :  { %4186 = vst [vmem:[%s18358_s4 + $0x120] sm:$0xff] %v4074_v33  ;;  %6012 = vmatprep.subr.bf16.mxu1 %v19350_v16  ;;  %v4080_v51 = vadd.f32 %v3968_v18, %v3555_v4  ;;  %v3557_v45 = vadd.f32 %v3556_v1, %v19351_v35  ;;  %9148 = vmatmul.mubr.bf16.gmra.mxu1 %v13725_v27  ;;  %v3971_v39 = vld [vmem:[%s18358_s4 + $0x168] sm:$0xff]  ;;  %v3977_v29 = vld [vmem:[%s18358_s4 + $0x198] sm:$0xff]  ;;  %v19356_v13 = vld [vmem:[#allocation62_spill] sm:$0xff] }
 0x281   :  { %4188 = vst [vmem:[%s18358_s4 + $0x130] sm:$0xff] %v4076_v41  ;;  %v4082_v20 = vadd.f32 %v3970_v59, %v3668_v6  ;;  %v3670_v11 = vadd.f32 %v3669_v43, %v19352_v12  ;;  %v3558_v40 = vpop.f32.mrf.mxu0  ;;  %6030 = vmatprep.mubr.bf16.mxu1 %v13982_v23  ;;  %v3671_v34 = vpop.f32.mrf.mxu1  ;;  %v5824_v3 = vsel %vm4816_vm2, %v13947_v37, %v13929_v17  ;;  %v14043_v55 = vld [vmem:[%s18359_s3 + $0x28] sm:$0xff]  ;;  %v3976_v18 = vld [vmem:[%s18358_s4 + $0x190] sm:$0xff]  ;;  %v3978_v16 = vld [vmem:[%s18358_s4 + $0x1a0] sm:$0xff] }
 0x282   :  { %4192 = vst [vmem:[%s18358_s4 + $0x150] sm:$0xff] %v4080_v51  ;;  %v4081_v52 = vadd.f32 %v3969_v46, %v3557_v45  ;;  %v3559_v44 = vadd.f32 %v3558_v40, %v13311_v50  ;;  %5900 = vmatpush1.bf16.msra.mxu0 %v19353_v58  ;;  %v3672_v30 = vadd.f32 %v3671_v34, %v19354_v24  ;;  %v3975_v50 = vld [vmem:[%s18358_s4 + $0x188] sm:$0xff]  ;;  %v19358_v35 = vld [vmem:[#allocation82_spill] sm:$0xff]  ;;  %v3984_v46 = vld [vmem:[%s18358_s4 + $0x1d0] sm:$0xff] }
 0x283   :  { %4194 = vst [vmem:[%s18358_s4 + $0x160] sm:$0xff] %v4082_v20  ;;  %v4083_v57 = vadd.f32 %v3971_v39, %v3670_v11  ;;  %6013 = vmatpush1.bf16.msra.mxu1 %v19355_v63  ;;  %5901 = vmatprep.subr.bf16.mxu0 %v5824_v3  ;;  %v3560_v33 = vpop.f32.mrf.mxu0  ;;  %v3673_v4 = vpop.f32.mrf.mxu1  ;;  %v19357_v6 = vld [vmem:[#allocation15_spill] sm:$0xff]  ;;  %v5823_v1 = vsel %vm4816_vm2, %v13863_v53, %v13947_v37  ;;  %v14088_v53 = vld [vmem:[%s18359_s3 + $0x30] sm:$0xff] }
 0x284   :  { %4193 = vst [vmem:[%s18358_s4 + $0x158] sm:$0xff] %v4081_v52  ;;  %v4087_v42 = vadd.f32 %v3975_v50, %v3559_v44  ;;  %6014 = vmatprep.subr.bf16.mxu1 %v5826_v49  ;;  %v3561_v41 = vadd.f32 %v3560_v33, %v19356_v13  ;;  %7149 = vperm.xlu0 %9157, %v14043_v55   ;;  %v19359_v20 = vld [vmem:[#allocation68_spill] sm:$0xff]  ;;  %v3983_v58 = vld [vmem:[%s18358_s4 + $0x1c8] sm:$0xff] }
 0x285   :  { %4195 = vst [vmem:[%s18358_s4 + $0x168] sm:$0xff] %v4083_v57  ;;  %v4089_v15 = vadd.f32 %v3977_v29, %v3672_v30  ;;  %v3674_v8 = vadd.f32 %v3673_v4, %v19357_v6  ;;  %v3564_v28 = vpop.f32.mrf.mxu0  ;;  %5220 = vmatmul.mubr.bf16.gmra.mxu0 %v13643_v48  ;;  %v5818_v59 = vsel %vm4816_vm2, %v13745_v26, %v13773_v21  ;;  %v3677_v43 = vpop.f32.mrf.mxu1  ;;  %v19360_v34 = vld [vmem:[#allocation84_spill] sm:$0xff]  ;;  %v19361_v50 = vld [vmem:[#allocation59_spill] sm:$0xff] }
 0x286   :  { %4199 = vst [vmem:[%s18358_s4 + $0x188] sm:$0xff] %v4087_v42  ;;  %v4088_v51 = vadd.f32 %v3976_v18, %v3561_v41  ;;  %v5825_v48 = vsel %vm4816_vm2, %v13929_v17, %v5774_v22  ;;  %v3565_v45 = vadd.f32 %v3564_v28, %v19358_v35  ;;  %5902 = vmatpush2.bf16.msra.mxu0 %v5823_v1  ;;  %v3982_v22 = vld [vmem:[%s18358_s4 + $0x1c0] sm:$0xff]  ;;  %v3991_v41 = vld [vmem:[%s18358_s4 + $0x208] sm:$0xff] }
 0x287   :  { %5229 = vmatprep.mubr.bf16.mxu0 %v19233_v2  ;;  %4201 = vst [vmem:[%s18358_s4 + $0x198] sm:$0xff] %v4089_v15  ;;  %v4090_v37 = vadd.f32 %v3978_v16, %v3674_v8  ;;  %v3678_v12 = vadd.f32 %v3677_v43, %v19359_v20  ;;  %6015 = vmatpush2.bf16.msra.mxu1 %v5825_v48  ;;  %v3566_v11 = vpop.f32.mrf.mxu0  ;;  %v3679_v49 = vpop.f32.mrf.mxu1  ;;  %v19362_v42 = vld [vmem:[#allocation86_spill] sm:$0xff]  ;;  %v19363_v8 = vld [vmem:[#allocation44_spill] sm:$0xff] }
 0x288   :  { %v5820_v17 = vsel %vm4816_vm2, %v13759_v19, %v13823_v54  ;;  %5903 = vmatprep.subr.bf16.mxu0 %v5818_v59  ;;  %4200 = vst [vmem:[%s18358_s4 + $0x190] sm:$0xff] %v4088_v51  ;;  %v4094_v40 = vadd.f32 %v3982_v22, %v3565_v45  ;;  %v3567_v39 = vadd.f32 %v3566_v11, %v13345_v0  ;;  %v3985_v0 = vld [vmem:[%s18358_s4 + $0x1d8] sm:$0xff]  ;;  %v19364_v1 = vld [vmem:[#allocation42_spill] sm:$0xff]  ;;  %v3992_v45 = vld [vmem:[%s18358_s4 + $0x210] sm:$0xff] }
 0x289   :  { %6016 = vmatprep.subr.bf16.mxu1 %v5820_v17  ;;  %7154 = vperm.xlu1 %9158, %v14088_v53   ;;  %4202 = vst [vmem:[%s18358_s4 + $0x1a0] sm:$0xff] %v4090_v37  ;;  %v4096_v52 = vadd.f32 %v3984_v46, %v3678_v12  ;;  %v3680_v44 = vadd.f32 %v3679_v49, %v19360_v34  ;;  %v3568_v3 = vpop.f32.mrf.mxu0  ;;  %v3681_v30 = vpop.f32.mrf.mxu1  ;;  %v3990_v16 = vld [vmem:[%s18358_s4 + $0x200] sm:$0xff]  ;;  %v19367_v22 = vld [vmem:[#allocation47_spill] sm:$0xff] }
 0x28a   :  { %v5817_v57 = vsel %vm4816_vm2, %v13749_v32, %v13745_v26  ;;  %4206 = vst [vmem:[%s18358_s4 + $0x1c0] sm:$0xff] %v4094_v40  ;;  %v4095_v24 = vadd.f32 %v3983_v58, %v3567_v39  ;;  %v5819_v63 = vsel %vm4816_vm2, %v13773_v21, %v13759_v19  ;;  %v3569_v33 = vadd.f32 %v3568_v3, %v19361_v50  ;;  %v14134_v32 = vld [vmem:[%s18359_s3 + $0x38] sm:$0xff]  ;;  %v19365_v48 = vld [vmem:[#allocation134_spill] sm:$0xff]  ;;  %v19368_v46 = vld [vmem:[#allocation155_spill] sm:$0xff] }
 0x28b   :  { %5904 = vmatpush2.bf16.msra.mxu0 %v5817_v57  ;;  %v5812_v26 = vsel %vm4816_vm2, %v13693_v56, %v13686_v60  ;;  %4208 = vst [vmem:[%s18358_s4 + $0x1d0] sm:$0xff] %v4096_v52  ;;  %v4097_v29 = vadd.f32 %v3985_v0, %v3680_v44  ;;  %v3682_v4 = vadd.f32 %v3681_v30, %v19362_v42  ;;  %v3989_v21 = vld [vmem:[%s18358_s4 + $0x1f8] sm:$0xff]  ;;  %v3570_v13 = vpop.f32.mrf.mxu0  ;;  %v3683_v6 = vpop.f32.mrf.mxu1  ;;  %v19366_v12 = vld [vmem:[#allocation54_spill] sm:$0xff]  ;;  %v3996_v40 = vld [vmem:[%s18358_s4 + $0x230] sm:$0xff] }
 0x28c   :  { %6017 = vmatpush2.bf16.msra.mxu1 %v5819_v63  ;;  %v5814_v19 = vsel %vm4816_vm2, %v13713_v47, %v13706_v9  ;;  %5905 = vmatprep.subr.bf16.mxu0 %v5812_v26  ;;  %4207 = vst [vmem:[%s18358_s4 + $0x1c8] sm:$0xff] %v4095_v24  ;;  %v4101_v15 = vadd.f32 %v3989_v21, %v3569_v33  ;;  %v3998_v39 = vld [vmem:[%s18358_s4 + $0x240] sm:$0xff]  ;;  %v19370_v44 = vld [vmem:[#allocation91_spill] sm:$0xff]  ;;  %v19371_v57 = vld [vmem:[#allocation40_spill] sm:$0xff] }
 0x28d   :  { %6018 = vmatprep.subr.bf16.mxu1 %v5814_v19  ;;  %v3571_v18 = vadd.f32 %v3570_v13, %v19363_v8  ;;  %7159 = vperm.xlu0 %9157, %v14134_v32   ;;  %4209 = vst [vmem:[%s18358_s4 + $0x1d8] sm:$0xff] %v4097_v29  ;;  %v4103_v28 = vadd.f32 %v3991_v41, %v3682_v4  ;;  %v3574_v51 = vpop.f32.mrf.mxu0  ;;  %v3687_v20 = vpop.f32.mrf.mxu1  ;;  %v3997_v24 = vld [vmem:[%s18358_s4 + $0x238] sm:$0xff]  ;;  %v19372_v63 = vld [vmem:[#allocation148_spill] sm:$0xff]  ;;  %v3999_v33 = vld [vmem:[%s18358_s4 + $0x248] sm:$0xff] }
 0x28e   :  { %v3684_v59 = vadd.f32 %v3683_v6, %v19364_v1  ;;  %5230 = vmatmul.mubr.bf16.gmra.mxu0 %v13673_v25  ;;  %v5811_v43 = vsel %vm4816_vm2, %v13666_v7, %v13693_v56  ;;  %v5806_v35 = vsel %vm4816_vm2, %v19365_v48, %v13621_v61  ;;  %4213 = vst [vmem:[%s18358_s4 + $0x1f8] sm:$0xff] %v4101_v15  ;;  %v14182_v7 = vld [vmem:[%s18359_s3 + $0x40] sm:$0xff]  ;;  %v19373_v4 = vld [vmem:[#allocation92_spill] sm:$0xff]  ;;  %v19374_v21 = vld [vmem:[#allocation17_spill] sm:$0xff] }
 0x28f   :  { %v4102_v37 = vadd.f32 %v3990_v16, %v3571_v18  ;;  %v5813_v25 = vsel %vm4816_vm2, %v13686_v60, %v13713_v47  ;;  %v3575_v56 = vadd.f32 %v3574_v51, %v19366_v12  ;;  %5906 = vmatpush2.bf16.msra.mxu0 %v5811_v43  ;;  %5239 = vmatprep.mubr.bf16.mxu0 %v19233_v2  ;;  %v19369_v47 = vld [vmem:[#allocation144_spill] sm:$0xff]  ;;  %v3576_v49 = vpop.f32.mrf.mxu0  ;;  %v3689_v34 = vpop.f32.mrf.mxu1  ;;  %v19375_v13 = vld [vmem:[#allocation127_spill] sm:$0xff]  ;;  %v19376_v8 = vld [vmem:[#allocation26_spill] sm:$0xff] }
 0x290   :  { %4215 = vst [vmem:[%s18358_s4 + $0x208] sm:$0xff] %v4103_v28  ;;  %v4104_v17 = vadd.f32 %v3992_v45, %v3684_v59  ;;  %v3688_v11 = vadd.f32 %v3687_v20, %v19367_v22  ;;  %6019 = vmatpush2.bf16.msra.mxu1 %v5813_v25  ;;  %v5808_v60 = vsel %vm4816_vm2, %v19369_v47, %v19368_v46  ;;  %v14228_v15 = vld [vmem:[%s18359_s3 + $0x48] sm:$0xff]  ;;  %v19378_v28 = vld [vmem:[#allocation13_spill] sm:$0xff]  ;;  %v19380_v20 = vld [vmem:[#allocation32_spill] sm:$0xff] }
 0x291   :  { %5907 = vmatprep.subr.bf16.mxu0 %v5806_v35  ;;  %4214 = vst [vmem:[%s18358_s4 + $0x200] sm:$0xff] %v4102_v37  ;;  %6020 = vmatprep.subr.bf16.mxu1 %v5808_v60  ;;  %v4108_v52 = vadd.f32 %v3996_v40, %v3575_v56  ;;  %v3577_v58 = vadd.f32 %v3576_v49, %v19370_v44  ;;  %v3578_v30 = vpop.f32.mrf.mxu0  ;;  %v3691_v29 = vpop.f32.mrf.mxu1  ;;  %v4003_v59 = vld [vmem:[%s18358_s4 + $0x268] sm:$0xff]  ;;  %v4005_v51 = vld [vmem:[%s18358_s4 + $0x278] sm:$0xff]  ;;  %v4004_v12 = vld [vmem:[%s18358_s4 + $0x270] sm:$0xff] }
 0x292   :  { %7164 = vperm.xlu1 %9158, %v14182_v7   ;;  %4216 = vst [vmem:[%s18358_s4 + $0x210] sm:$0xff] %v4104_v17  ;;  %v4110_v3 = vadd.f32 %v3998_v39, %v3688_v11  ;;  %v3690_v0 = vadd.f32 %v3689_v34, %v19371_v57  ;;  %v5805_v50 = vsel %vm4816_vm2, %v19372_v63, %v19365_v48  ;;  %v19379_v35 = vld [vmem:[#allocation93_spill] sm:$0xff]  ;;  %v19382_v11 = vld [vmem:[#allocation30_spill] sm:$0xff]  ;;  %v14276_v44 = vld [vmem:[%s18359_s3 + $0x50] sm:$0xff] }
 0x293   :  { %4220 = vst [vmem:[%s18358_s4 + $0x230] sm:$0xff] %v4108_v52  ;;  %v4109_v26 = vadd.f32 %v3997_v24, %v3577_v58  ;;  %v5807_v42 = vsel %vm4816_vm2, %v13621_v61, %v19369_v47  ;;  %v3579_v19 = vadd.f32 %v3578_v30, %v19373_v4  ;;  %5908 = vmatpush2.bf16.msra.mxu0 %v5805_v50  ;;  %v19377_v61 = vld [vmem:[#allocation120_spill] sm:$0xff]  ;;  %v3580_v16 = vpop.f32.mrf.mxu0  ;;  %v3693_v48 = vpop.f32.mrf.mxu1  ;;  %v19381_v17 = vld [vmem:[#allocation105_spill] sm:$0xff]  ;;  %v4006_v40 = vld [vmem:[%s18358_s4 + $0x280] sm:$0xff] }
 0x294   :  { %v5800_v41 = vsel %vm4816_vm2, %v19375_v13, %v19374_v21  ;;  %4222 = vst [vmem:[%s18358_s4 + $0x240] sm:$0xff] %v4110_v3  ;;  %v4111_v6 = vadd.f32 %v3999_v33, %v3690_v0  ;;  %v3692_v18 = vadd.f32 %v3691_v29, %v19376_v8  ;;  %6021 = vmatpush2.bf16.msra.mxu1 %v5807_v42  ;;  %v19383_v47 = vld [vmem:[#allocation88_spill] sm:$0xff]  ;;  %v19384_v52 = vld [vmem:[#allocation94_spill] sm:$0xff]  ;;  %v19387_v24 = vld [vmem:[#allocation25_spill] sm:$0xff] }
 0x295   :  { %v5802_v1 = vsel %vm4816_vm2, %v19378_v28, %v19377_v61  ;;  %5909 = vmatprep.subr.bf16.mxu0 %v5800_v41  ;;  %4221 = vst [vmem:[%s18358_s4 + $0x238] sm:$0xff] %v4109_v26  ;;  %v4115_v43 = vadd.f32 %v4003_v59, %v3579_v19  ;;  %v3581_v45 = vadd.f32 %v3580_v16, %v19379_v35  ;;  %v3584_v56 = vpop.f32.mrf.mxu0  ;;  %v3697_v39 = vpop.f32.mrf.mxu1  ;;  %v19385_v3 = vld [vmem:[#allocation96_spill] sm:$0xff]  ;;  %v19388_v29 = vld [vmem:[#allocation23_spill] sm:$0xff]  ;;  %v19389_v19 = vld [vmem:[#allocation97_spill] sm:$0xff] }
 0x296   :  { %6022 = vmatprep.subr.bf16.mxu1 %v5802_v1  ;;  %7169 = vperm.xlu0 %9157, %v14228_v15   ;;  %4223 = vst [vmem:[%s18358_s4 + $0x248] sm:$0xff] %v4111_v6  ;;  %v4117_v37 = vadd.f32 %v4005_v51, %v3692_v18  ;;  %v3694_v25 = vadd.f32 %v3693_v48, %v19380_v20  ;;  %v19386_v0 = vld [vmem:[#allocation100_spill] sm:$0xff]  ;;  %v19390_v6 = vld [vmem:[#allocation89_spill] sm:$0xff]  ;;  %v19391_v16 = vld [vmem:[#allocation14_spill] sm:$0xff] }
 0x297   :  { %5240 = vmatmul.mubr.bf16.gmra.mxu0 %v13700_v38  ;;  %v5799_v22 = vsel %vm4816_vm2, %v19381_v17, %v19375_v13  ;;  %v5794_v60 = vsel %vm4816_vm2, %v19383_v47, %v19382_v11  ;;  %4227 = vst [vmem:[%s18358_s4 + $0x268] sm:$0xff] %v4115_v43  ;;  %v4116_v49 = vadd.f32 %v4004_v12, %v3581_v45  ;;  %v3586_v63 = vpop.f32.mrf.mxu0  ;;  %v4012_v50 = vld [vmem:[%s18358_s4 + $0x2b0] sm:$0xff]  ;;  %v3699_v26 = vpop.f32.mrf.mxu1  ;;  %v4011_v13 = vld [vmem:[%s18358_s4 + $0x2a8] sm:$0xff]  ;;  %v4013_v18 = vld [vmem:[%s18358_s4 + $0x2b8] sm:$0xff] }
 0x298   :  { %v5801_v38 = vsel %vm4816_vm2, %v19374_v21, %v19378_v28  ;;  %v3585_v34 = vadd.f32 %v3584_v56, %v19384_v52  ;;  %5910 = vmatpush2.bf16.msra.mxu0 %v5799_v22  ;;  %5249 = vmatprep.mubr.bf16.mxu0 %v19233_v2  ;;  %4229 = vst [vmem:[%s18358_s4 + $0x278] sm:$0xff] %v4117_v37  ;;  %v4010_v2 = vld [vmem:[%s18358_s4 + $0x2a0] sm:$0xff]  ;;  %v14322_v45 = vld [vmem:[%s18359_s3 + $0x58] sm:$0xff]  ;;  %v19394_v20 = vld [vmem:[#allocation176_spill] sm:$0xff] }
 0x299   :  { %v4118_v58 = vadd.f32 %v4006_v40, %v3694_v25  ;;  %v3698_v57 = vadd.f32 %v3697_v39, %v19385_v3  ;;  %6023 = vmatpush2.bf16.msra.mxu1 %v5801_v38  ;;  %v5796_v30 = vsel %vm4816_vm2, %v19387_v24, %v19386_v0  ;;  %5911 = vmatprep.subr.bf16.mxu0 %v5794_v60  ;;  %v3588_v41 = vpop.f32.mrf.mxu0  ;;  %v3701_v1 = vpop.f32.mrf.mxu1  ;;  %v19392_v43 = vld [vmem:[#allocation70_spill] sm:$0xff]  ;;  %v19395_v12 = vld [vmem:[#allocation87_spill] sm:$0xff]  ;;  %v19396_v56 = vld [vmem:[#allocation81_spill] sm:$0xff] }
 0x29a   :  { %4228 = vst [vmem:[%s18358_s4 + $0x270] sm:$0xff] %v4116_v49  ;;  %6024 = vmatprep.subr.bf16.mxu1 %v5796_v30  ;;  %v4122_v33 = vadd.f32 %v4010_v2, %v3585_v34  ;;  %v3587_v42 = vadd.f32 %v3586_v63, %v19388_v29  ;;  %7174 = vperm.xlu1 %9158, %v14276_v44   ;;  %v19393_v48 = vld [vmem:[#allocation118_spill] sm:$0xff]  ;;  %v4017_v22 = vld [vmem:[%s18358_s4 + $0x2d8] sm:$0xff]  ;;  %v19397_v49 = vld [vmem:[#allocation104_spill] sm:$0xff] }
 0x29b   :  { %4230 = vst [vmem:[%s18358_s4 + $0x280] sm:$0xff] %v4118_v58  ;;  %v4124_v4 = vadd.f32 %v4012_v50, %v3698_v57  ;;  %v3700_v21 = vadd.f32 %v3699_v26, %v19389_v19  ;;  %v5793_v8 = vsel %vm4816_vm2, %v19390_v6, %v19383_v47  ;;  %v5795_v59 = vsel %vm4816_vm2, %v19382_v11, %v19387_v24  ;;  %v3590_v11 = vpop.f32.mrf.mxu0  ;;  %v4019_v47 = vld [vmem:[%s18358_s4 + $0x2e8] sm:$0xff]  ;;  %v3703_v40 = vpop.f32.mrf.mxu1  ;;  %v19398_v52 = vld [vmem:[#allocation101_spill] sm:$0xff]  ;;  %v4018_v58 = vld [vmem:[%s18358_s4 + $0x2e0] sm:$0xff] }
 0x29c   :  { %4234 = vst [vmem:[%s18358_s4 + $0x2a0] sm:$0xff] %v4122_v33  ;;  %v4123_v28 = vadd.f32 %v4011_v13, %v3587_v42  ;;  %v3589_v51 = vadd.f32 %v3588_v41, %v19391_v16  ;;  %5912 = vmatpush2.bf16.msra.mxu0 %v5793_v8  ;;  %v5788_v35 = vsel %vm4816_vm2, %v19393_v48, %v19392_v43  ;;  %v19399_v57 = vld [vmem:[#allocation135_spill] sm:$0xff]  ;;  %v19400_v30 = vld [vmem:[#allocation60_spill] sm:$0xff]  ;;  %v19401_v2 = vld [vmem:[#allocation58_spill] sm:$0xff] }
 0x29d   :  { %4236 = vst [vmem:[%s18358_s4 + $0x2b0] sm:$0xff] %v4124_v4  ;;  %v4125_v37 = vadd.f32 %v4013_v18, %v3700_v21  ;;  %v3702_v25 = vadd.f32 %v3701_v1, %v19394_v20  ;;  %6025 = vmatpush2.bf16.msra.mxu1 %v5795_v59  ;;  %v5790_v17 = vsel %vm4816_vm2, %v19396_v56, %v19395_v12  ;;  %v3594_v3 = vpop.f32.mrf.mxu0  ;;  %v4020_v50 = vld [vmem:[%s18358_s4 + $0x2f0] sm:$0xff]  ;;  %v3707_v26 = vpop.f32.mrf.mxu1  ;;  %v19402_v29 = vld [vmem:[#allocation102_spill] sm:$0xff]  ;;  %v19404_v41 = vld [vmem:[#allocation63_spill] sm:$0xff] }
 0x29e   :  { %5913 = vmatprep.subr.bf16.mxu0 %v5788_v35  ;;  %4235 = vst [vmem:[%s18358_s4 + $0x2a8] sm:$0xff] %v4123_v28  ;;  %6026 = vmatprep.subr.bf16.mxu1 %v5790_v17  ;;  %v4129_v60 = vadd.f32 %v4017_v22, %v3589_v51  ;;  %v3591_v39 = vadd.f32 %v3590_v11, %v19397_v49  ;;  %v14370_v4 = vld [vmem:[%s18359_s3 + $0x60] sm:$0xff]  ;;  %v19405_v6 = vld [vmem:[#allocation61_spill] sm:$0xff]  ;;  %v4027_v11 = vld [vmem:[%s18358_s4 + $0x328] sm:$0xff] }
 0x29f   :  { %7179 = vperm.xlu0 %9157, %v14322_v45   ;;  %4237 = vst [vmem:[%s18358_s4 + $0x2b8] sm:$0xff] %v4125_v37  ;;  %v4131_v38 = vadd.f32 %v4019_v47, %v3702_v25  ;;  %v3704_v34 = vadd.f32 %v3703_v40, %v19398_v52  ;;  %5250 = vmatmul.mubr.bf16.gmra.mxu0 %v13725_v27  ;;  %v19403_v21 = vld [vmem:[#allocation22_spill] sm:$0xff]  ;;  %v3596_v18 = vpop.f32.mrf.mxu0  ;;  %v3709_v59 = vpop.f32.mrf.mxu1  ;;  %v19406_v16 = vld [vmem:[#allocation161_spill] sm:$0xff] }
 0x2a0   :  { %v5787_v24 = vsel %vm4816_vm2, %v19399_v57, %v19393_v48  ;;  %v5782_v63 = vsel %vm4816_vm2, %v19401_v2, %v19400_v30  ;;  %4241 = vst [vmem:[%s18358_s4 + $0x2d8] sm:$0xff] %v4129_v60  ;;  %v4130_v33 = vadd.f32 %v4018_v58, %v3591_v39  ;;  %v5789_v27 = vsel %vm4816_vm2, %v19392_v43, %v19396_v56  ;;  %v4026_v28 = vld [vmem:[%s18358_s4 + $0x320] sm:$0xff]  ;;  %v14393_v43 = vld [vmem:[%s18359_s3 + $0x68] sm:$0xff]  ;;  %v4025_v20 = vld [vmem:[%s18358_s4 + $0x318] sm:$0xff]  ;;  %v14402_v25 = vpop.permute.xlu1 %5779 }
 0x2a1   :  { %v3595_v42 = vadd.f32 %v3594_v3, %v19402_v29  ;;  %5914 = vmatpush2.bf16.msra.mxu0 %v5787_v24  ;;  %5917 = vmatprep.mubr.bf16.mxu0 %v13982_v23  ;;  %4243 = vst [vmem:[%s18358_s4 + $0x2e8] sm:$0xff] %v4131_v38  ;;  %v4132_v19 = vadd.f32 %v4020_v50, %v3704_v34  ;;  %v4024_v23 = vld [vmem:[%s18358_s4 + $0x310] sm:$0xff]  ;;  %v19407_v35 = vld [vmem:[#allocation106_spill] sm:$0xff]  ;;  %v3598_v56 = vpop.f32.mrf.mxu0  ;;  %v3711_v60 = vpop.f32.mrf.mxu1  ;;  %v19409_v49 = vld [vmem:[#allocation109_spill] sm:$0xff] }
 0x2a2   :  { %v3708_v13 = vadd.f32 %v3707_v26, %v19403_v21  ;;  %6027 = vmatpush2.bf16.msra.mxu1 %v5789_v27  ;;  %v5784_v8 = vsel %vm4816_vm2, %v19405_v6, %v19404_v41  ;;  %5915 = vmatprep.subr.bf16.mxu0 %v5782_v63  ;;  %4242 = vst [vmem:[%s18358_s4 + $0x2e0] sm:$0xff] %v4130_v33  ;;  %v19408_v17 = vld [vmem:[#allocation2_spill] sm:$0xff]  ;;  %v19410_v34 = vld [vmem:[#allocation116_spill] sm:$0xff]  ;;  %v4031_v3 = vld [vmem:[%s18358_s4 + $0x348] sm:$0xff] }
 0x2a3   :  { %6028 = vmatprep.subr.bf16.mxu1 %v5784_v8  ;;  %v4136_v1 = vadd.f32 %v4024_v23, %v3595_v42  ;;  %v3597_v51 = vadd.f32 %v3596_v18, %v19406_v16  ;;  %7184 = vperm.xlu1 %9158, %v14370_v4   ;;  %4244 = vst [vmem:[%s18358_s4 + $0x2f0] sm:$0xff] %v4132_v19  ;;  %v14421_v38 = vld [vmem:[%s18357_s1 + $0x100] ss:$8 sps:$4 sm:$0xff]   ;;  %v3600_v24 = vpop.f32.mrf.mxu0  ;;  %v3713_v63 = vpop.f32.mrf.mxu1  ;;  %v19412_v50 = vld [vmem:[#allocation20_spill] sm:$0xff]  ;;  %v14447_v27 = vld [vmem:[%s18359_s3 + $0x78] sm:$0xff] }
 0x2a4   :  { %v4138_v48 = vadd.f32 %v4026_v28, %v3708_v13  ;;  %v3710_v37 = vadd.f32 %v3709_v59, %v19407_v35  ;;  %v5781_v22 = vsel %vm4816_vm2, %v19408_v17, %v19401_v2  ;;  %7189 = vperm.xlu0 %9157, %v14393_v43   ;;  %v5783_v40 = vsel %vm4816_vm2, %v19400_v30, %v19405_v6  ;;  %v19411_v57 = vld [vmem:[#allocation90_spill] sm:$0xff]  ;;  %v4033_v30 = vld [vmem:[%s18358_s4 + $0x358] sm:$0xff]  ;;  %v4032_v21 = vld [vmem:[%s18358_s4 + $0x350] sm:$0xff] }
 0x2a5   :  { %4248 = vst [vmem:[%s18358_s4 + $0x310] sm:$0xff] %v4136_v1  ;;  %v4137_v47 = vadd.f32 %v4025_v20, %v3597_v51  ;;  %v3599_v39 = vadd.f32 %v3598_v56, %v19409_v49  ;;  %5916 = vmatpush2.bf16.msra.mxu0 %v5781_v22  ;;  %v3712_v58 = vadd.f32 %v3711_v60, %v19410_v34  ;;  %v14442_v26 = vld [vmem:[%s18357_s1 + $0x114] ss:$8 sps:$4 sm:$0xff]   ;;  %v3750_v13 = vpop.f32.mrf.mxu0  ;;  %v4034_v6 = vld [vmem:[%s18358_s4 + $0x360] sm:$0xff]  ;;  %v19414_v18 = vld [vmem:[#allocation147_spill] sm:$0xff] }
 0x2a6   :  { %4250 = vst [vmem:[%s18358_s4 + $0x320] sm:$0xff] %v4138_v48  ;;  %v4139_v52 = vadd.f32 %v4027_v11, %v3710_v37  ;;  %6029 = vmatpush2.bf16.msra.mxu1 %v5783_v40  ;;  %6111 = vmatprep.subr.bf16.mxu0 %v19411_v57  ;;  %v3601_v33 = vadd.f32 %v3600_v24, %v19412_v50  ;;  %v19413_v42 = vld [vmem:[#allocation113_spill] sm:$0xff]  ;;  %v8927_v23 = vpop.f32.mrf.mxu1  ;;  %v19415_v1 = vld [vmem:[#allocation111_spill] sm:$0xff]  ;;  %v14470_v59 = vld [vmem:[%s18359_s3 + $0x70] sm:$0xff] }
 0x2a7   :  { %4249 = vst [vmem:[%s18358_s4 + $0x318] sm:$0xff] %v4137_v47  ;;  %v4143_v2 = vadd.f32 %v4031_v3, %v3599_v39  ;;  %8991 = vmatprep.subr.bf16.mxu1 %v14402_v25  ;;  %v4145_v29 = vadd.f32 %v4033_v30, %v3712_v58  ;;  %v3714_v19 = vadd.f32 %v3713_v63, %v19413_v42  ;;  %v19416_v51 = vld [vmem:[#allocation56_spill] sm:$0xff]  ;;  %v3930_v48 = vld [vmem:[%s18358_s4 + $0x20] sm:$0xff]  ;;  %v3752_v37 = vpop.f32.mrf.mxu0  ;;  %v3931_v47 = vld [vmem:[%s18358_s4 + $0x28] sm:$0xff] }
 0x2a8   :  { %4251 = vst [vmem:[%s18358_s4 + $0x328] sm:$0xff] %v4139_v52  ;;  %5918 = vmatmul.mubr.bf16.vlgmr.msra.gmra.mxu0 %v14421_v38  ;;  %7199 = vperm.xlu0 %9157, %v14447_v27   ;;  %v4144_v8 = vadd.f32 %v4032_v21, %v3601_v33  ;;  %v3751_v28 = vadd.f32 %v3750_v13, %v19414_v18  ;;  %v19417_v35 = vld [vmem:[#allocation114_spill] sm:$0xff]  ;;  %v8928_v56 = vpop.f32.mrf.mxu1  ;;  %v19419_v39 = vld [vmem:[#allocation12_spill] sm:$0xff]  ;;  %v19422_v24 = vld [vmem:[#allocation53_spill] sm:$0xff] }
 0x2a9   :  { %4255 = vst [vmem:[%s18358_s4 + $0x348] sm:$0xff] %v4143_v2  ;;  %6031 = vmatmul.mubr.bf16.vlgmr.msra.gmra.mxu1 %v14421_v38  ;;  %6112 = vmatpush1.bf16.msra.mxu0 %v19415_v1  ;;  %4257 = vst [vmem:[%s18358_s4 + $0x358] sm:$0xff] %v4145_v29  ;;  %v4146_v16 = vadd.f32 %v4034_v6, %v3714_v19  ;;  %v19418_v17 = vld [vmem:[#allocation18_spill] sm:$0xff]  ;;  %v8929_v11 = vadd.f32 %v8928_v56, %v8927_v23  ;;  %v3754_v60 = vpop.f32.mrf.mxu0  ;;  %v19420_v34 = vld [vmem:[#allocation124_spill] sm:$0xff] }
 0x2aa   :  { %8992 = vmatpush3.bf16.msra.mxu1 %v19416_v51  ;;  %6113 = vmatprep.subr.bf16.mxu0 %v19417_v35  ;;  %4256 = vst [vmem:[%s18358_s4 + $0x350] sm:$0xff] %v4144_v8  ;;  %v4042_v20 = vadd.f32 %v3930_v48, %v3751_v28  ;;  %v3753_v22 = vadd.f32 %v3752_v37, %v19418_v17  ;;  %v8930_v49 = vpop.f32.mrf.mxu1  ;;  %v14502_v58 = vld [vmem:[%s18357_s1 + $0x110] ss:$8 sps:$4 sm:$0xff]   ;;  %v19421_v3 = vld [vmem:[#allocation122_spill] sm:$0xff]  ;;  %v19423_v2 = vld [vmem:[#allocation119_spill] sm:$0xff]  ;;  %v9643_v28 = vmov 1  }
 0x2ab   :  { %8993 = vmatprep.subr.bf16.mxu1 %v13887_v5  ;;  %6040 = vmatprep.mubr.bf16.mxu1 %v14442_v26  ;;  %4258 = vst [vmem:[%s18358_s4 + $0x360] sm:$0xff] %v4146_v16  ;;  %v3755_v52 = vadd.f32 %v3754_v60, %v19419_v39  ;;  %v3864_v57 = vadd.f32 %v8929_v11, %v19421_v3  ;;  %v3937_v30 = vld [vmem:[%s18358_s4 + $0x58] sm:$0xff]  ;;  %v3756_v63 = vpop.f32.mrf.mxu0  ;;  %v3932_v50 = vld [vmem:[%s18358_s4 + $0x30] sm:$0xff]  ;;  %v19424_v33 = vld [vmem:[#allocation170_spill] sm:$0xff] }
 0x2ac   :  { %5927 = vmatprep.mubr.bf16.mxu0 %v14442_v26  ;;  %7194 = vperm.xlu1 %9158, %v14470_v59   ;;  %4154 = vst [vmem:[%s18358_s4 + $0x20] sm:$0xff] %v4042_v20  ;;  %v4043_v40 = vadd.f32 %v3931_v47, %v3753_v22  ;;  %v8931_v42 = vpop.f32.mrf.mxu1  ;;  %v19425_v19 = vld [vmem:[#allocation110_spill] sm:$0xff]  ;;  %v19429_v56 = vld [vmem:[#allocation49_spill] sm:$0xff]  ;;  %v3944_v17 = vld [vmem:[%s18358_s4 + $0x90] sm:$0xff] }
 0x2ad   :  { %6114 = vmatpush1.bf16.msra.mxu0 %v19420_v34  ;;  %v4049_v29 = vadd.f32 %v3937_v30, %v3755_v52  ;;  %v3757_v21 = vadd.f32 %v3756_v63, %v19425_v19  ;;  %v14521_v13 = vld [vmem:[%s18357_s1 + $0x124] ss:$8 sps:$4 sm:$0xff]   ;;  %v4044_v6 = vadd.f32 %v3932_v50, %v3864_v57  ;;  %v8932_v8 = vadd.f32 %v8931_v42, %v8930_v49  ;;  %v3760_v18 = vpop.f32.mrf.mxu0  ;;  %v19430_v22 = vld [vmem:[#allocation125_spill] sm:$0xff]  ;;  %v14565_v42 = vld [vmem:[%s18357_s1 + $0x120] ss:$8 sps:$4 sm:$0xff]  }
 0x2ae   :  { %8994 = vmatpush3.bf16.msra.mxu1 %v19422_v24  ;;  %6115 = vmatprep.subr.bf16.mxu0 %v19423_v2  ;;  %4155 = vst [vmem:[%s18358_s4 + $0x28] sm:$0xff] %v4043_v40  ;;  %v3938_v23 = vld [vmem:[%s18358_s4 + $0x60] sm:$0xff]  ;;  %v8933_v16 = vpop.f32.mrf.mxu1  ;;  %v3939_v47 = vld [vmem:[%s18358_s4 + $0x68] sm:$0xff]  ;;  %v19431_v60 = vld [vmem:[#allocation157_spill] sm:$0xff] }
 0x2af   :  { %8995 = vmatprep.subr.bf16.mxu1 %v19424_v33  ;;  %9160 = vset.pattern.permute.xlu0 %v9643_v28  ;;  %4161 = vst [vmem:[%s18358_s4 + $0x58] sm:$0xff] %v4049_v29  ;;  %v4050_v1 = vadd.f32 %v3938_v23, %v3757_v21  ;;  %v19426_v51 = vld [vmem:[#allocation10_spill] sm:$0xff]  ;;  %4156 = vst.msk [vmem:[%s18358_s4 + $0x30] sm:$0xff] %vm1760_vm1, %v4044_v6  ;;  %v3762_v11 = vpop.f32.mrf.mxu0  ;;  %v3945_v57 = vld [vmem:[%s18358_s4 + $0x98] sm:$0xff] }
 0x2b0   :  { %5928 = vmatmul.mubr.bf16.gmra.mxu0 %v14502_v58  ;;  %v3761_v48 = vadd.f32 %v3760_v18, %v19426_v51  ;;  %v19427_v35 = vld [vmem:[#allocation98_spill] sm:$0xff]  ;;  %v8934_v49 = vpop.f32.mrf.mxu1  ;;  %7319 = vperm.xlu0 %9160, %v13868_v36   ;;  %v19433_v63 = vld [vmem:[#allocation11_spill] sm:$0xff]  ;;  %v19434_v29 = vld [vmem:[#allocation8_spill] sm:$0xff] }
 0x2b1   :  { %6041 = vmatmul.mubr.bf16.gmra.mxu1 %v14502_v58  ;;  %6116 = vmatpush1.bf16.msra.mxu0 %v19427_v35  ;;  %v19428_v37 = vld [vmem:[#allocation6_spill] sm:$0xff]  ;;  %4162 = vst [vmem:[%s18358_s4 + $0x60] sm:$0xff] %v4050_v1  ;;  %v8935_v3 = vadd.f32 %v8934_v49, %v8933_v16  ;;  %v3764_v24 = vpop.f32.mrf.mxu0  ;;  %v19435_v36 = vld [vmem:[#allocation117_spill] sm:$0xff]  ;;  %v19436_v21 = vld [vmem:[#allocation43_spill] sm:$0xff] }
 0x2b2   :  { %v3867_v20 = vadd.f32 %v8932_v8, %v19428_v37  ;;  %8996 = vmatpush3.bf16.msra.mxu1 %v19429_v56  ;;  %6117 = vmatprep.subr.bf16.mxu0 %v19430_v22  ;;  %v4056_v40 = vadd.f32 %v3944_v17, %v3761_v48  ;;  %v19432_v39 = vld [vmem:[#allocation126_spill] sm:$0xff]  ;;  %v8936_v2 = vpop.f32.mrf.mxu1  ;;  %v3765_v50 = vadd.f32 %v3764_v24, %v19433_v63  ;;  %v3951_v6 = vld [vmem:[%s18358_s4 + $0xc8] sm:$0xff]  ;;  %v19437_v8 = vld [vmem:[#allocation128_spill] sm:$0xff] }
 0x2b3   :  { %8997 = vmatprep.subr.bf16.mxu1 %v19431_v60  ;;  %v3763_v52 = vadd.f32 %v3762_v11, %v19432_v39  ;;  %6050 = vmatprep.mubr.bf16.mxu1 %v14521_v13  ;;  %v3872_v19 = vadd.f32 %v19435_v36, %v8935_v3  ;;  %v3766_v23 = vpop.f32.mrf.mxu0  ;;  %v3946_v18 = vld [vmem:[%s18358_s4 + $0xa0] sm:$0xff]  ;;  %v19439_v51 = vld [vmem:[#allocation132_spill] sm:$0xff]  ;;  %v19441_v39 = vld [vmem:[#allocation9_spill] sm:$0xff] }
 0x2b4   :  { %v4051_v34 = vadd.f32 %v3939_v47, %v3867_v20  ;;  %5937 = vmatprep.mubr.bf16.mxu0 %v14521_v13  ;;  %4168 = vst [vmem:[%s18358_s4 + $0x90] sm:$0xff] %v4056_v40  ;;  %9159 = vset.pattern.permute.xlu1 %v9643_v28  ;;  %v19438_v28 = vld [vmem:[#allocation121_spill] sm:$0xff]  ;;  %v4063_v1 = vadd.f32 %v3951_v6, %v3765_v50  ;;  %v8937_v16 = vpop.f32.mrf.mxu1  ;;  %v9621_v37 = vld [vmem:[%s18359_s3] sm:$0xff]  ;;  %v3952_v17 = vld [vmem:[%s18358_s4 + $0xd0] sm:$0xff] }
 0x2b5   :  { %v4057_v30 = vadd.f32 %v3945_v57, %v3763_v52  ;;  %6118 = vmatpush1.bf16.msra.mxu0 %v19434_v29  ;;  %v3767_v48 = vadd.f32 %v3766_v23, %v19439_v51  ;;  %v14588_v35 = vld [vmem:[%s18357_s1 + $0x134] ss:$8 sps:$4 sm:$0xff]   ;;  %7315 = vperm.xlu1 %9159, %v9621_v37   ;;  %v4058_v20 = vadd.f32 %v3946_v18, %v3872_v19  ;;  %v3770_v22 = vpop.f32.mrf.mxu0  ;;  %v3958_v3 = vld [vmem:[%s18358_s4 + $0x100] sm:$0xff]  ;;  %v3959_v6 = vld [vmem:[%s18358_s4 + $0x108] sm:$0xff] }
 0x2b6   :  { %4163 = vst.msk [vmem:[%s18358_s4 + $0x68] sm:$0xff] %vm1760_vm1, %v4051_v34  ;;  %8998 = vmatpush3.bf16.msra.mxu1 %v19436_v21  ;;  %6119 = vmatprep.subr.bf16.mxu0 %v19437_v8  ;;  %v8938_v56 = vadd.f32 %v8937_v16, %v8936_v2  ;;  %4175 = vst [vmem:[%s18358_s4 + $0xc8] sm:$0xff] %v4063_v1  ;;  %v8939_v47 = vpop.f32.mrf.mxu1  ;;  %v19440_v40 = vld [vmem:[#allocation136_spill] sm:$0xff]  ;;  %v19442_v52 = vld [vmem:[#allocation73_spill] sm:$0xff] }
 0x2b7   :  { %4169 = vst [vmem:[%s18358_s4 + $0x98] sm:$0xff] %v4057_v30  ;;  %8999 = vmatprep.subr.bf16.mxu1 %v19438_v28  ;;  %7331 = vperm.xlu0 %9160, %v13998_v14   ;;  %v4064_v11 = vadd.f32 %v3952_v17, %v3767_v48  ;;  %v3771_v49 = vadd.f32 %v3770_v22, %v19440_v40  ;;  %4170 = vst.msk [vmem:[%s18358_s4 + $0xa0] sm:$0xff] %vm1760_vm1, %v4058_v20  ;;  %v19443_v14 = vld [vmem:[#allocation38_spill] sm:$0xff]  ;;  %v19444_v57 = vld [vmem:[#allocation57_spill] sm:$0xff]  ;;  %v3772_v24 = vpop.f32.mrf.mxu0 }
 0x2b8   :  { %5938 = vmatmul.mubr.bf16.gmra.mxu0 %v14565_v42  ;;  %v3875_v34 = vadd.f32 %v19442_v52, %v8938_v56  ;;  %v3953_v30 = vld [vmem:[%s18358_s4 + $0xd8] sm:$0xff]  ;;  %v19445_v2 = vld [vmem:[#allocation108_spill] sm:$0xff]  ;;  %v8940_v50 = vpop.f32.mrf.mxu1  ;;  %v19447_v1 = vld [vmem:[#allocation7_spill] sm:$0xff] }
 0x2b9   :  { %6051 = vmatmul.mubr.bf16.gmra.mxu1 %v14565_v42  ;;  %6120 = vmatpush1.bf16.msra.mxu0 %v19441_v39  ;;  %4176 = vst [vmem:[%s18358_s4 + $0xd0] sm:$0xff] %v4064_v11  ;;  %v4070_v63 = vadd.f32 %v3958_v3, %v3771_v49  ;;  %v19446_v29 = vld [vmem:[#allocation137_spill] sm:$0xff]  ;;  %v8941_v21 = vadd.f32 %v8940_v50, %v8939_v47  ;;  %v3774_v8 = vpop.f32.mrf.mxu0  ;;  %v19448_v51 = vld [vmem:[#allocation4_spill] sm:$0xff]  ;;  %v19452_v11 = vld [vmem:[#allocation66_spill] sm:$0xff] }
 0x2ba   :  { %9000 = vmatpush3.bf16.msra.mxu1 %v19443_v14  ;;  %6121 = vmatprep.subr.bf16.mxu0 %v19444_v57  ;;  %v3773_v36 = vadd.f32 %v3772_v24, %v19446_v29  ;;  %v4065_v19 = vadd.f32 %v3953_v30, %v3875_v34  ;;  %v8942_v18 = vpop.f32.mrf.mxu1  ;;  %v3775_v16 = vadd.f32 %v3774_v8, %v19447_v1  ;;  %v14636_v48 = vld [vmem:[%s18357_s1 + $0x130] ss:$8 sps:$4 sm:$0xff]   ;;  %v14660_v52 = vld [vmem:[%s18357_s1 + $0x144] ss:$8 sps:$4 sm:$0xff]  }
 0x2bb   :  { %9001 = vmatprep.subr.bf16.mxu1 %v19445_v2  ;;  %6060 = vmatprep.mubr.bf16.mxu1 %v14588_v35  ;;  %4182 = vst [vmem:[%s18358_s4 + $0x100] sm:$0xff] %v4070_v63  ;;  %v19450_v20 = vld [vmem:[#allocation37_spill] sm:$0xff]  ;;  %v19451_v17 = vld [vmem:[#allocation36_spill] sm:$0xff]  ;;  %v3776_v22 = vpop.f32.mrf.mxu0  ;;  %v3966_v3 = vld [vmem:[%s18358_s4 + $0x140] sm:$0xff] }
 0x2bc   :  { %5947 = vmatprep.mubr.bf16.mxu0 %v14588_v35  ;;  %7339 = vperm.xlu0 %9160, %v14088_v53   ;;  %v4071_v23 = vadd.f32 %v3959_v6, %v3773_v36  ;;  %4177 = vst.msk [vmem:[%s18358_s4 + $0xd8] sm:$0xff] %vm1760_vm1, %v4065_v19  ;;  %v19449_v53 = vld [vmem:[#allocation143_spill] sm:$0xff]  ;;  %v3965_v56 = vld [vmem:[%s18358_s4 + $0x138] sm:$0xff]  ;;  %v8943_v40 = vpop.f32.mrf.mxu1  ;;  %v19453_v49 = vld [vmem:[#allocation140_spill] sm:$0xff]  ;;  %v5778_v36 = vpop.permute.xlu0 %5777 }
 0x2bd   :  { %6122 = vmatpush1.bf16.msra.mxu0 %v19448_v51  ;;  %7323 = vperm.xlu1 %9159, %v13910_v31   ;;  %v3880_v37 = vadd.f32 %v8941_v21, %v19449_v53  ;;  %v3960_v31 = vld [vmem:[%s18358_s4 + $0x110] sm:$0xff]  ;;  %v4077_v47 = vadd.f32 %v3965_v56, %v3775_v16  ;;  %v3777_v39 = vadd.f32 %v3776_v22, %v19453_v49  ;;  %v3780_v57 = vpop.f32.mrf.mxu0  ;;  %v19455_v29 = vld [vmem:[#allocation130_spill] sm:$0xff]  ;;  %v19456_v19 = vld [vmem:[#allocation145_spill] sm:$0xff] }
 0x2be   :  { %9002 = vmatpush3.bf16.msra.mxu1 %v19450_v20  ;;  %6123 = vmatprep.subr.bf16.mxu0 %v19451_v17  ;;  %4183 = vst [vmem:[%s18358_s4 + $0x108] sm:$0xff] %v4071_v23  ;;  %v8944_v14 = vadd.f32 %v8943_v40, %v8942_v18  ;;  %v8945_v30 = vpop.f32.mrf.mxu1  ;;  %v19454_v63 = vld [vmem:[#allocation172_spill] sm:$0xff]  ;;  %v19457_v21 = vld [vmem:[#allocation33_spill] sm:$0xff]  ;;  %v3967_v18 = vld [vmem:[%s18358_s4 + $0x148] sm:$0xff]  ;;  %v5828_v20 = vsel %vm4816_vm2, %v5778_v36, %v14402_v25 }
 0x2bf   :  { %9003 = vmatprep.subr.bf16.mxu1 %v19452_v11  ;;  %v4072_v34 = vadd.f32 %v3960_v31, %v3880_v37  ;;  %4189 = vst [vmem:[%s18358_s4 + $0x138] sm:$0xff] %v4077_v47  ;;  %v4078_v24 = vadd.f32 %v3966_v3, %v3777_v39  ;;  %v3781_v50 = vadd.f32 %v3780_v57, %v19454_v63  ;;  %v3972_v6 = vld [vmem:[%s18358_s4 + $0x170] sm:$0xff]  ;;  %v19458_v8 = vld [vmem:[#allocation5_spill] sm:$0xff]  ;;  %v3782_v23 = vpop.f32.mrf.mxu0  ;;  %v19460_v53 = vld [vmem:[#allocation146_spill] sm:$0xff] }
 0x2c0   :  { %5948 = vmatmul.mubr.bf16.gmra.mxu0 %v14636_v48  ;;  %7347 = vperm.xlu0 %9160, %v14182_v7   ;;  %v3883_v7 = vadd.f32 %v8944_v14, %v19456_v19  ;;  %v19459_v1 = vld [vmem:[#allocation65_spill] sm:$0xff]  ;;  %v8946_v51 = vpop.f32.mrf.mxu1  ;;  %v3783_v37 = vadd.f32 %v3782_v23, %v19460_v53  ;;  %v19461_v49 = vld [vmem:[#allocation158_spill] sm:$0xff]  ;;  %v19464_v57 = vld [vmem:[#allocation28_spill] sm:$0xff] }
 0x2c1   :  { %6061 = vmatmul.mubr.bf16.gmra.mxu1 %v14636_v48  ;;  %6124 = vmatpush1.bf16.msra.mxu0 %v19455_v29  ;;  %4184 = vst.msk [vmem:[%s18358_s4 + $0x110] sm:$0xff] %vm1760_vm1, %v4072_v34  ;;  %4190 = vst [vmem:[%s18358_s4 + $0x140] sm:$0xff] %v4078_v24  ;;  %v4084_v16 = vadd.f32 %v3972_v6, %v3781_v50  ;;  %v8947_v17 = vadd.f32 %v8946_v51, %v8945_v30  ;;  %v3973_v22 = vld [vmem:[%s18358_s4 + $0x178] sm:$0xff]  ;;  %v3784_v31 = vpop.f32.mrf.mxu0  ;;  %v19462_v25 = vld [vmem:[#allocation142_spill] sm:$0xff] }
 0x2c2   :  { %9004 = vmatpush3.bf16.msra.mxu1 %v19457_v21  ;;  %6125 = vmatprep.subr.bf16.mxu0 %v19458_v8  ;;  %v4079_v56 = vadd.f32 %v3967_v18, %v3883_v7  ;;  %v4085_v47 = vadd.f32 %v3973_v22, %v3783_v37  ;;  %v8948_v40 = vpop.f32.mrf.mxu1  ;;  %v3785_v39 = vadd.f32 %v3784_v31, %v19461_v49  ;;  %v14707_v34 = vld [vmem:[%s18357_s1 + $0x140] ss:$8 sps:$4 sm:$0xff]   ;;  %v9622_v14 = vld [vmem:[%s18359_s3 + $0x18] sm:$0xff]  ;;  %v3980_v23 = vld [vmem:[%s18358_s4 + $0x1b0] sm:$0xff] }
 0x2c3   :  { %9005 = vmatprep.subr.bf16.mxu1 %v19459_v1  ;;  %6070 = vmatprep.mubr.bf16.mxu1 %v14660_v52  ;;  %4196 = vst [vmem:[%s18358_s4 + $0x170] sm:$0xff] %v4084_v16  ;;  %v3979_v24 = vld [vmem:[%s18358_s4 + $0x1a8] sm:$0xff]  ;;  %v3786_v30 = vpop.f32.mrf.mxu0  ;;  %v14724_v63 = vld [vmem:[%s18357_s1 + $0x154] ss:$8 sps:$4 sm:$0xff]   ;;  %v3974_v50 = vld [vmem:[%s18358_s4 + $0x180] sm:$0xff]  ;;  %v5827_v16 = vsel %vm4816_vm2, %v13992_v62, %v5778_v36 }
 0x2c4   :  { %5957 = vmatprep.mubr.bf16.mxu0 %v14660_v52  ;;  %7355 = vperm.xlu0 %9160, %v14276_v44   ;;  %4191 = vst.msk [vmem:[%s18358_s4 + $0x148] sm:$0xff] %vm1760_vm1, %v4079_v56  ;;  %v19463_v44 = vld [vmem:[#allocation138_spill] sm:$0xff]  ;;  %4197 = vst [vmem:[%s18358_s4 + $0x178] sm:$0xff] %v4085_v47  ;;  %v4091_v29 = vadd.f32 %v3979_v24, %v3785_v39  ;;  %v8949_v19 = vpop.f32.mrf.mxu1  ;;  %v19465_v7 = vld [vmem:[#allocation153_spill] sm:$0xff]  ;;  %v5822_v56 = vsel %vm4816_vm2, %v13805_v10, %v13887_v5 }
 0x2c5   :  { %6126 = vmatpush1.bf16.msra.mxu0 %v19462_v25  ;;  %7327 = vperm.xlu1 %9159, %v9622_v14   ;;  %v3888_v3 = vadd.f32 %v19463_v44, %v8947_v17  ;;  %v3787_v21 = vadd.f32 %v3786_v30, %v19465_v7  ;;  %v8950_v8 = vadd.f32 %v8949_v19, %v8948_v40  ;;  %v3790_v18 = vpop.f32.mrf.mxu0  ;;  %v19466_v37 = vld [vmem:[#allocation154_spill] sm:$0xff]  ;;  %v19467_v62 = vld [vmem:[#allocation149_spill] sm:$0xff]  ;;  %v19468_v47 = vld [vmem:[#allocation156_spill] sm:$0xff] }
 0x2c6   :  { %9006 = vmatpush3.bf16.msra.mxu1 %v19464_v57  ;;  %6127 = vmatprep.subr.bf16.mxu0 %v5828_v20  ;;  %4203 = vst [vmem:[%s18358_s4 + $0x1a8] sm:$0xff] %v4091_v29  ;;  %v8951_v53 = vpop.f32.mrf.mxu1  ;;  %v3791_v20 = vadd.f32 %v3790_v18, %v19466_v37  ;;  %v3986_v36 = vld [vmem:[%s18358_s4 + $0x1e0] sm:$0xff]  ;;  %v3981_v22 = vld [vmem:[%s18358_s4 + $0x1b8] sm:$0xff]  ;;  %v3987_v25 = vld [vmem:[%s18358_s4 + $0x1e8] sm:$0xff]  ;;  %v5821_v44 = vsel %vm4816_vm2, %v13823_v54, %v13805_v10 }
 0x2c7   :  { %v4086_v6 = vadd.f32 %v3974_v50, %v3888_v3  ;;  %v4092_v51 = vadd.f32 %v3980_v23, %v3787_v21  ;;  %v3792_v17 = vpop.f32.mrf.mxu0  ;;  %v14780_v30 = vld [vmem:[%s18357_s1 + $0x150] ss:$8 sps:$4 sm:$0xff]   ;;  %v19470_v50 = vld [vmem:[#allocation171_spill] sm:$0xff] }
 0x2c8   :  { %5958 = vmatmul.mubr.bf16.gmra.mxu0 %v14707_v34  ;;  %7363 = vperm.xlu0 %9160, %v14370_v4   ;;  %v3891_v4 = vadd.f32 %v19467_v62, %v8950_v8  ;;  %v4098_v5 = vadd.f32 %v3986_v36, %v3791_v20  ;;  %v8952_v31 = vpop.f32.mrf.mxu1  ;;  %v3793_v40 = vadd.f32 %v3792_v17, %v19468_v47  ;;  %v19471_v54 = vld [vmem:[#allocation95_spill] sm:$0xff]  ;;  %v3993_v29 = vld [vmem:[%s18358_s4 + $0x218] sm:$0xff]  ;;  %v19472_v8 = vld [vmem:[#allocation160_spill] sm:$0xff] }
 0x2c9   :  { %6071 = vmatmul.mubr.bf16.gmra.mxu1 %v14707_v34  ;;  %6128 = vmatpush2.bf16.msra.mxu0 %v5827_v16  ;;  %4198 = vst.msk [vmem:[%s18358_s4 + $0x180] sm:$0xff] %vm1760_vm1, %v4086_v6  ;;  %4204 = vst [vmem:[%s18358_s4 + $0x1b0] sm:$0xff] %v4092_v51  ;;  %v8953_v39 = vadd.f32 %v8952_v31, %v8951_v53  ;;  %v3794_v14 = vpop.f32.mrf.mxu0  ;;  %v5816_v10 = vsel %vm4816_vm2, %v19470_v50, %v19424_v33  ;;  %v14796_v7 = vld [vmem:[%s18357_s1 + $0x164] ss:$8 sps:$4 sm:$0xff]   ;;  %v3988_v33 = vld [vmem:[%s18358_s4 + $0x1f0] sm:$0xff] }
 0x2ca   :  { %6129 = vmatprep.subr.bf16.mxu0 %v5822_v56  ;;  %6080 = vmatprep.mubr.bf16.mxu1 %v14724_v63  ;;  %v4093_v49 = vadd.f32 %v3981_v22, %v3891_v4  ;;  %4210 = vst [vmem:[%s18358_s4 + $0x1e0] sm:$0xff] %v4098_v5  ;;  %v4099_v3 = vadd.f32 %v3987_v25, %v3793_v40  ;;  %v8954_v57 = vpop.f32.mrf.mxu1  ;;  %v3994_v51 = vld [vmem:[%s18358_s4 + $0x220] sm:$0xff]  ;;  %v19473_v56 = vld [vmem:[#allocation152_spill] sm:$0xff]  ;;  %v19474_v4 = vld [vmem:[#allocation151_spill] sm:$0xff] }
 0x2cb   :  { %5967 = vmatprep.mubr.bf16.mxu0 %v14724_v63  ;;  %7335 = vperm.xlu1 %9159, %v14043_v55   ;;  %v19469_v55 = vld [vmem:[#allocation163_spill] sm:$0xff]  ;;  %v3796_v19 = vpop.f32.mrf.mxu0  ;;  %v5815_v37 = vsel %vm4816_vm2, %v13706_v9, %v19470_v50  ;;  %v5810_v36 = vsel %vm4816_vm2, %v19474_v4, %v19431_v60  ;;  %v19475_v9 = vld [vmem:[#allocation165_spill] sm:$0xff]  ;;  %v4000_v22 = vld [vmem:[%s18358_s4 + $0x250] sm:$0xff] }
 0x2cc   :  { %7371 = vperm.xlu0 %9160, %v14470_v59   ;;  %v3795_v24 = vadd.f32 %v3794_v14, %v19469_v55  ;;  %4205 = vst.msk [vmem:[%s18358_s4 + $0x1b8] sm:$0xff] %vm1760_vm1, %v4093_v49  ;;  %v3896_v59 = vadd.f32 %v8953_v39, %v19471_v54  ;;  %4211 = vst [vmem:[%s18358_s4 + $0x1e8] sm:$0xff] %v4099_v3  ;;  %v8955_v6 = vpop.f32.mrf.mxu1  ;;  %v3797_v23 = vadd.f32 %v3796_v19, %v19472_v8  ;;  %v3995_v31 = vld [vmem:[%s18358_s4 + $0x228] sm:$0xff]  ;;  %v19476_v40 = vld [vmem:[#allocation162_spill] sm:$0xff] }
 0x2cd   :  { %6130 = vmatpush2.bf16.msra.mxu0 %v5821_v44  ;;  %v8956_v16 = vadd.f32 %v8955_v6, %v8954_v57  ;;  %v3800_v53 = vpop.f32.mrf.mxu0  ;;  %v4001_v14 = vld [vmem:[%s18358_s4 + $0x258] sm:$0xff]  ;;  %v5809_v3 = vsel %vm4816_vm2, %v19368_v46, %v19474_v4  ;;  %v19479_v46 = vld [vmem:[#allocation123_spill] sm:$0xff] }
 0x2ce   :  { %6131 = vmatprep.subr.bf16.mxu0 %v5816_v10  ;;  %v4105_v21 = vadd.f32 %v3993_v29, %v3795_v24  ;;  %v4100_v18 = vadd.f32 %v3988_v33, %v3896_v59  ;;  %v8957_v20 = vpop.f32.mrf.mxu1  ;;  %v3801_v62 = vadd.f32 %v3800_v53, %v19473_v56  ;;  %v19477_v24 = vld [vmem:[#allocation19_spill] sm:$0xff]  ;;  %v14868_v33 = vld [vmem:[%s18357_s1 + $0x174] ss:$8 sps:$4 sm:$0xff]  }
 0x2cf   :  { %7343 = vperm.xlu1 %9159, %v14134_v32   ;;  %v4106_v32 = vadd.f32 %v3994_v51, %v3797_v23  ;;  %v3899_v17 = vadd.f32 %v8956_v16, %v19475_v9  ;;  %v3802_v5 = vpop.f32.mrf.mxu0  ;;  %v19478_v10 = vld [vmem:[#allocation131_spill] sm:$0xff]  ;;  %v4008_v51 = vld [vmem:[%s18358_s4 + $0x290] sm:$0xff]  ;;  %v4014_v9 = vld [vmem:[%s18358_s4 + $0x2c0] sm:$0xff] }
 0x2d0   :  { %5968 = vmatmul.mubr.bf16.gmra.mxu0 %v14780_v30  ;;  %4217 = vst [vmem:[%s18358_s4 + $0x218] sm:$0xff] %v4105_v21  ;;  %4212 = vst.msk [vmem:[%s18358_s4 + $0x1f0] sm:$0xff] %vm1760_vm1, %v4100_v18  ;;  %v4112_v60 = vadd.f32 %v4000_v22, %v3801_v62  ;;  %v8958_v47 = vpop.f32.mrf.mxu1  ;;  %v3803_v49 = vadd.f32 %v3802_v5, %v19476_v40  ;;  %v5804_v54 = vsel %vm4816_vm2, %v19478_v10, %v19438_v28  ;;  %v4007_v29 = vld [vmem:[%s18358_s4 + $0x288] sm:$0xff]  ;;  %v4002_v28 = vld [vmem:[%s18358_s4 + $0x260] sm:$0xff] }
 0x2d1   :  { %6081 = vmatmul.mubr.bf16.gmra.mxu1 %v14780_v30  ;;  %6132 = vmatpush2.bf16.msra.mxu0 %v5815_v37  ;;  %4218 = vst [vmem:[%s18358_s4 + $0x220] sm:$0xff] %v4106_v32  ;;  %v4107_v39 = vadd.f32 %v3995_v31, %v3899_v17  ;;  %v8959_v25 = vadd.f32 %v8958_v47, %v8957_v20  ;;  %v3804_v44 = vpop.f32.mrf.mxu0  ;;  %v19480_v8 = vld [vmem:[#allocation159_spill] sm:$0xff]  ;;  %v4009_v22 = vld [vmem:[%s18358_s4 + $0x298] sm:$0xff] }
 0x2d2   :  { %6133 = vmatprep.subr.bf16.mxu0 %v5810_v36  ;;  %6090 = vmatprep.mubr.bf16.mxu1 %v14796_v7  ;;  %4224 = vst [vmem:[%s18358_s4 + $0x250] sm:$0xff] %v4112_v60  ;;  %v4113_v57 = vadd.f32 %v4001_v14, %v3803_v49  ;;  %v8960_v55 = vpop.f32.mrf.mxu1  ;;  %v3805_v50 = vadd.f32 %v3804_v44, %v19477_v24  ;;  %v19481_v20 = vld [vmem:[#allocation167_spill] sm:$0xff] }
 0x2d3   :  { %5977 = vmatprep.mubr.bf16.mxu0 %v14796_v7  ;;  %7351 = vperm.xlu1 %9159, %v14228_v15   ;;  %v14852_v15 = vld [vmem:[%s18357_s1 + $0x160] ss:$8 sps:$4 sm:$0xff]   ;;  %4219 = vst.msk [vmem:[%s18358_s4 + $0x228] sm:$0xff] %vm1760_vm1, %v4107_v39  ;;  %v3904_v59 = vadd.f32 %v19479_v46, %v8959_v25  ;;  %v3806_v19 = vpop.f32.mrf.mxu0  ;;  %v5803_v37 = vsel %vm4816_vm2, %v19377_v61, %v19478_v10  ;;  %v19483_v61 = vld [vmem:[#allocation164_spill] sm:$0xff]  ;;  %v4021_v10 = vld [vmem:[%s18358_s4 + $0x2f8] sm:$0xff] }
 0x2d4   :  { %4225 = vst [vmem:[%s18358_s4 + $0x258] sm:$0xff] %v4113_v57  ;;  %v4119_v21 = vadd.f32 %v4007_v29, %v3805_v50  ;;  %v8961_v6 = vpop.f32.mrf.mxu1  ;;  %v3807_v23 = vadd.f32 %v3806_v19, %v19480_v8  ;;  %v19482_v62 = vld [vmem:[#allocation99_spill] sm:$0xff]  ;;  %v4016_v46 = vld [vmem:[%s18358_s4 + $0x2d0] sm:$0xff]  ;;  %v19488_v29 = vld [vmem:[#allocation34_spill] sm:$0xff] }
 0x2d5   :  { %6134 = vmatpush2.bf16.msra.mxu0 %v5809_v3  ;;  %v4114_v18 = vadd.f32 %v4002_v28, %v3904_v59  ;;  %v8962_v16 = vadd.f32 %v8961_v6, %v8960_v55  ;;  %v3810_v53 = vpop.f32.mrf.mxu0  ;;  %v5798_v4 = vsel %vm4816_vm2, %v19482_v62, %v19445_v2  ;;  %v19484_v31 = vld [vmem:[#allocation55_spill] sm:$0xff]  ;;  %v5797_v25 = vsel %vm4816_vm2, %v19386_v0, %v19482_v62  ;;  %v19485_v3 = vld [vmem:[#allocation168_spill] sm:$0xff]  ;;  %v19486_v55 = vld [vmem:[#allocation85_spill] sm:$0xff] }
 0x2d6   :  { %6135 = vmatprep.subr.bf16.mxu0 %v5804_v54  ;;  %4231 = vst [vmem:[%s18358_s4 + $0x288] sm:$0xff] %v4119_v21  ;;  %v8963_v32 = vpop.f32.mrf.mxu1  ;;  %v3811_v56 = vadd.f32 %v3810_v53, %v19481_v20  ;;  %v4015_v49 = vld [vmem:[%s18358_s4 + $0x2c8] sm:$0xff]  ;;  %v5792_v24 = vsel %vm4816_vm2, %v19486_v55, %v19452_v11  ;;  %v19487_v0 = vld [vmem:[#allocation177_spill] sm:$0xff]  ;;  %v4022_v6 = vld [vmem:[%s18358_s4 + $0x300] sm:$0xff] }
 0x2d7   :  { %7359 = vperm.xlu1 %9159, %v14322_v45   ;;  %v4120_v45 = vadd.f32 %v4008_v51, %v3807_v23  ;;  %4226 = vst.msk [vmem:[%s18358_s4 + $0x260] sm:$0xff] %vm1760_vm1, %v4114_v18  ;;  %v3907_v36 = vadd.f32 %v19483_v61, %v8962_v16  ;;  %v3812_v17 = vpop.f32.mrf.mxu0  ;;  %v5791_v23 = vsel %vm4816_vm2, %v19395_v12, %v19486_v55  ;;  %v19489_v16 = vld [vmem:[#allocation174_spill] sm:$0xff]  ;;  %v19490_v53 = vld [vmem:[#allocation16_spill] sm:$0xff]  ;;  %v19491_v12 = vld [vmem:[#allocation21_spill] sm:$0xff] }
 0x2d8   :  { %5978 = vmatmul.mubr.bf16.gmra.mxu0 %v14852_v15  ;;  %v4126_v2 = vadd.f32 %v4014_v9, %v3811_v56  ;;  %v8964_v5 = vpop.f32.mrf.mxu1  ;;  %v3813_v60 = vadd.f32 %v3812_v17, %v19484_v31  ;;  %v9623_v56 = vld [vmem:[%s18357_s1 + $0x104] ss:$8 sps:$4 sm:$0xff]  }
 0x2d9   :  { %6091 = vmatmul.mubr.bf16.gmra.mxu1 %v14852_v15  ;;  %6136 = vmatpush2.bf16.msra.mxu0 %v5803_v37  ;;  %4232 = vst [vmem:[%s18358_s4 + $0x290] sm:$0xff] %v4120_v45  ;;  %v4121_v47 = vadd.f32 %v4009_v22, %v3907_v36  ;;  %v8965_v40 = vadd.f32 %v8964_v5, %v8963_v32  ;;  %v3814_v39 = vpop.f32.mrf.mxu0  ;;  %v4028_v32 = vld [vmem:[%s18358_s4 + $0x330] sm:$0xff]  ;;  %v19492_v61 = vld [vmem:[#allocation166_spill] sm:$0xff]  ;;  %v4029_v22 = vld [vmem:[%s18358_s4 + $0x338] sm:$0xff] }
 0x2da   :  { %6137 = vmatprep.subr.bf16.mxu0 %v5798_v4  ;;  %6100 = vmatprep.mubr.bf16.mxu1 %v14868_v33  ;;  %4238 = vst [vmem:[%s18358_s4 + $0x2c0] sm:$0xff] %v4126_v2  ;;  %v4127_v14 = vadd.f32 %v4015_v49, %v3813_v60  ;;  %v8966_v44 = vpop.f32.mrf.mxu1  ;;  %v3815_v57 = vadd.f32 %v3814_v39, %v19485_v3  ;;  %v19494_v49 = vld [vmem:[#allocation169_spill] sm:$0xff] }
 0x2db   :  { %5987 = vmatprep.mubr.bf16.mxu0 %v14868_v33  ;;  %7367 = vperm.xlu1 %9159, %v14393_v43   ;;  %v14924_v43 = vld [vmem:[%s18357_s1 + $0x170] ss:$8 sps:$4 sm:$0xff]   ;;  %4233 = vst.msk [vmem:[%s18358_s4 + $0x298] sm:$0xff] %vm1760_vm1, %v4121_v47  ;;  %v3912_v50 = vadd.f32 %v8965_v40, %v19487_v0  ;;  %v3816_v54 = vpop.f32.mrf.mxu0  ;;  %v5786_v37 = vsel %vm4816_vm2, %v19490_v53, %v19459_v1  ;;  %v4023_v1 = vld [vmem:[%s18358_s4 + $0x308] sm:$0xff] }
 0x2dc   :  { %4239 = vst [vmem:[%s18358_s4 + $0x2c8] sm:$0xff] %v4127_v14  ;;  %v4133_v11 = vadd.f32 %v4021_v10, %v3815_v57  ;;  %v8967_v59 = vpop.f32.mrf.mxu1  ;;  %v3817_v19 = vadd.f32 %v3816_v54, %v19488_v29  ;;  %v5785_v5 = vsel %vm4816_vm2, %v19404_v41, %v19490_v53  ;;  %v19493_v47 = vld [vmem:[#allocation173_spill] sm:$0xff]  ;;  %v4035_v41 = vld [vmem:[%s18358_s4 + $0x368] sm:$0xff]  ;;  %v4030_v14 = vld [vmem:[%s18358_s4 + $0x340] sm:$0xff] }
 0x2dd   :  { %6138 = vmatpush2.bf16.msra.mxu0 %v5797_v25  ;;  %v4128_v28 = vadd.f32 %v4016_v46, %v3912_v50  ;;  %v8968_v21 = vadd.f32 %v8967_v59, %v8966_v44  ;;  %v3820_v8 = vpop.f32.mrf.mxu0  ;;  %v19495_v57 = vld [vmem:[#allocation24_spill] sm:$0xff] }
 0x2de   :  { %6139 = vmatprep.subr.bf16.mxu0 %v5792_v24  ;;  %4245 = vst [vmem:[%s18358_s4 + $0x2f8] sm:$0xff] %v4133_v11  ;;  %v8969_v18 = vpop.f32.mrf.mxu1  ;;  %v3821_v51 = vadd.f32 %v3820_v8, %v19489_v16  ;;  %v4036_v50 = vld [vmem:[%s18358_s4 + $0x370] sm:$0xff]  ;;  %v19496_v11 = vld [vmem:[#allocation175_spill] sm:$0xff] }
 0x2df   :  { %7375 = vperm.xlu1 %9159, %v14447_v27   ;;  %v4134_v27 = vadd.f32 %v4022_v6, %v3817_v19  ;;  %4240 = vst.msk [vmem:[%s18358_s4 + $0x2d0] sm:$0xff] %vm1760_vm1, %v4128_v28  ;;  %v3915_v45 = vadd.f32 %v8968_v21, %v19491_v12  ;;  %v3822_v20 = vpop.f32.mrf.mxu0 }
 0x2e0   :  { %5988 = vmatmul.mubr.bf16.gmra.mxu0 %v14924_v43  ;;  %v4140_v62 = vadd.f32 %v4028_v32, %v3821_v51  ;;  %v8970_v4 = vpop.f32.mrf.mxu1  ;;  %v3823_v36 = vadd.f32 %v3822_v20, %v19492_v61 }
 0x2e1   :  { %6101 = vmatmul.mubr.bf16.gmra.mxu1 %v14924_v43  ;;  %6140 = vmatpush2.bf16.msra.mxu0 %v5791_v23  ;;  %4246 = vst [vmem:[%s18358_s4 + $0x300] sm:$0xff] %v4134_v27  ;;  %v4135_v9 = vadd.f32 %v4023_v1, %v3915_v45  ;;  %v8971_v17 = vadd.f32 %v8970_v4, %v8969_v18  ;;  %v3824_v2 = vpop.f32.mrf.mxu0 }
 0x2e2   :  { %6141 = vmatprep.subr.bf16.mxu0 %v5786_v37  ;;  %6256 = vmatprep.mubr.bf16.mxu1 %v9623_v56  ;;  %4252 = vst [vmem:[%s18358_s4 + $0x330] sm:$0xff] %v4140_v62  ;;  %v4141_v31 = vadd.f32 %v4029_v22, %v3823_v36  ;;  %v8972_v60 = vpop.f32.mrf.mxu1  ;;  %v3825_v40 = vadd.f32 %v3824_v2, %v19493_v47 }
 0x2e3   :  { %6143 = vmatprep.mubr.bf16.mxu0 %v9623_v56  ;;  %4247 = vst.msk [vmem:[%s18358_s4 + $0x308] sm:$0xff] %vm1760_vm1, %v4135_v9  ;;  %v3920_v39 = vadd.f32 %v19494_v49, %v8971_v17  ;;  %v3826_v25 = vpop.f32.mrf.mxu0 }
 0x2e4   :  { %4253 = vst [vmem:[%s18358_s4 + $0x338] sm:$0xff] %v4141_v31  ;;  %v4147_v44 = vadd.f32 %v4035_v41, %v3825_v40  ;;  %v8973_v3 = vpop.f32.mrf.mxu1  ;;  %v3827_v55 = vadd.f32 %v3826_v25, %v19495_v57 }
 0x2e5   :  { %6142 = vmatpush2.bf16.msra.mxu0 %v5785_v5  ;;  %v4142_v24 = vadd.f32 %v4030_v14, %v3920_v39  ;;  %v8974_v0 = vadd.f32 %v8973_v3, %v8972_v60  ;;  %v15006_v10 = vpop.f32.mrf.mxu0 }
 0x2e6   :  { %4259 = vst [vmem:[%s18358_s4 + $0x368] sm:$0xff] %v4147_v44  ;;  %v4148_v54 = vadd.f32 %v4036_v50, %v3827_v55  ;;  %v15013_v46 = vpop.f32.mrf.mxu1 }
 0x2e7   :  { %4254 = vst.msk [vmem:[%s18358_s4 + $0x340] sm:$0xff] %vm1760_vm1, %v4142_v24  ;;  %v3923_v59 = vadd.f32 %v19496_v11, %v8974_v0  ;;  %v15021_v29 = vpop.f32.mrf.mxu0 }
 0x2e8   :  { %6144 = vmatmul.mubr.bf16.vlgmr.msra.gmra.mxu0 %v14421_v38  ;;  %4260 = vst [vmem:[%s18358_s4 + $0x370] sm:$0xff] %v4148_v54  ;;  %v15030_v19 = vpop.f32.mrf.mxu1 }
 0x2e9   :  { %6257 = vmatmul.mubr.bf16.vlgmr.msra.gmra.mxu1 %v14421_v38  ;;  %6153 = vmatprep.mubr.bf16.mxu0 %v14442_v26  ;;  %v4037_v38 = vld [vmem:[%s18358_s4 + $0x378] sm:$0xff]  ;;  %v15032_v21 = vpop.f32.mrf.mxu0 }
 0x2ea   :  { %6264 = vmatprep.mubr.bf16.mxu1 %v14442_v26  ;;  %v4149_v28 = vadd.f32 %v4037_v38, %v3923_v59  ;;  %v15034_v6 = vpop.f32.mrf.mxu1 }
 0x2eb   :  { %v15040_v26 = vpop.f32.mrf.mxu0 }
 0x2ec   :  { %4261 = vst.msk [vmem:[%s18358_s4 + $0x378] sm:$0xff] %vm1760_vm1, %v4149_v28  ;;  %v15042_v8 = vpop.f32.mrf.mxu1 }
 0x2ed   :  { %v15044_v23 = vpop.f32.mrf.mxu0 }
 0x2ee   :  { %v15048_v27 = vpop.f32.mrf.mxu1 }
 0x2ef   :  { %v15051_v18 = vpop.f32.mrf.mxu0 }
 0x2f0   :  { %6154 = vmatmul.mubr.bf16.gmra.mxu0 %v14502_v58  ;;  %v15054_v16 = vpop.f32.mrf.mxu1 }
 0x2f1   :  { %6265 = vmatmul.mubr.bf16.gmra.mxu1 %v14502_v58  ;;  %6163 = vmatprep.mubr.bf16.mxu0 %v14521_v13  ;;  %v15056_v51 = vpop.f32.mrf.mxu0 }
 0x2f2   :  { %6272 = vmatprep.mubr.bf16.mxu1 %v14521_v13  ;;  %v15058_v53 = vpop.f32.mrf.mxu1 }
 0x2f3   :  { %v15060_v37 = vpop.f32.mrf.mxu0 }
 0x2f4   :  { %v15062_v12 = vpop.f32.mrf.mxu1 }
 0x2f5   :  { %v15064_v45 = vpop.f32.mrf.mxu0 }
 0x2f6   :  { %v15068_v58 = vpop.f32.mrf.mxu1 }
 0x2f7   :  { %v15071_v13 = vpop.f32.mrf.mxu0 }
 0x2f8   :  { %6164 = vmatmul.mubr.bf16.gmra.mxu0 %v14565_v42  ;;  %v15074_v32 = vpop.f32.mrf.mxu1 }
 0x2f9   :  { %6273 = vmatmul.mubr.bf16.gmra.mxu1 %v14565_v42  ;;  %6173 = vmatprep.mubr.bf16.mxu0 %v14588_v35  ;;  %v15076_v20 = vpop.f32.mrf.mxu0 }
 0x2fa   :  { %6280 = vmatprep.mubr.bf16.mxu1 %v14588_v35  ;;  %v15078_v56 = vpop.f32.mrf.mxu1 }
 0x2fb   :  { %v15080_v1 = vpop.f32.mrf.mxu0 }
 0x2fc   :  { %v15082_v62 = vpop.f32.mrf.mxu1 }
 0x2fd   :  { %v15084_v4 = vpop.f32.mrf.mxu0 }
 0x2fe   :  { %v15088_v42 = vpop.f32.mrf.mxu1 }
 0x2ff   :  { %v15091_v35 = vpop.f32.mrf.mxu0 }
 0x300   :  { %6174 = vmatmul.mubr.bf16.gmra.mxu0 %v14636_v48  ;;  %v15094_v61 = vpop.f32.mrf.mxu1 }
 0x301   :  { %6281 = vmatmul.mubr.bf16.gmra.mxu1 %v14636_v48  ;;  %6183 = vmatprep.mubr.bf16.mxu0 %v14660_v52  ;;  %v15096_v36 = vpop.f32.mrf.mxu0 }
 0x302   :  { %6288 = vmatprep.mubr.bf16.mxu1 %v14660_v52  ;;  %v15098_v9 = vpop.f32.mrf.mxu1 }
 0x303   :  { %v15100_v17 = vpop.f32.mrf.mxu0 }
 0x304   :  { %v15102_v22 = vpop.f32.mrf.mxu1 }
 0x305   :  { %v15104_v2 = vpop.f32.mrf.mxu0 }
 0x306   :  { %v15108_v48 = vpop.f32.mrf.mxu1 }
 0x307   :  { %v15111_v52 = vpop.f32.mrf.mxu0 }
 0x308   :  { %6184 = vmatmul.mubr.bf16.gmra.mxu0 %v14707_v34  ;;  %v15114_v5 = vpop.f32.mrf.mxu1 }
 0x309   :  { %6289 = vmatmul.mubr.bf16.gmra.mxu1 %v14707_v34  ;;  %6193 = vmatprep.mubr.bf16.mxu0 %v14724_v63  ;;  %v15116_v31 = vpop.f32.mrf.mxu0 }
 0x30a   :  { %6296 = vmatprep.mubr.bf16.mxu1 %v14724_v63  ;;  %v15118_v60 = vpop.f32.mrf.mxu1 }
 0x30b   :  { %v15120_v47 = vpop.f32.mrf.mxu0 }
 0x30c   :  { %v15122_v40 = vpop.f32.mrf.mxu1 }
 0x30d   :  { %v15124_v49 = vpop.f32.mrf.mxu0 }
 0x30e   :  { %v15128_v34 = vpop.f32.mrf.mxu1 }
 0x30f   :  { %v15131_v63 = vpop.f32.mrf.mxu0 }
 0x310   :  { %6194 = vmatmul.mubr.bf16.gmra.mxu0 %v14780_v30  ;;  %19497 = vst [vmem:[#allocation27_spill] sm:$0xff] %v15131_v63  ;;  %v15134_v39 = vpop.f32.mrf.mxu1 }
 0x311   :  { %6297 = vmatmul.mubr.bf16.gmra.mxu1 %v14780_v30  ;;  %6203 = vmatprep.mubr.bf16.mxu0 %v14796_v7  ;;  %v15136_v41 = vpop.f32.mrf.mxu0 }
 0x312   :  { %6304 = vmatprep.mubr.bf16.mxu1 %v14796_v7  ;;  %19498 = vst [vmem:[#allocation179_spill] sm:$0xff] %v15136_v41  ;;  %v15138_v25 = vpop.f32.mrf.mxu1 }
 0x313   :  { %v15140_v14 = vpop.f32.mrf.mxu0 }
 0x314   :  { %19499 = vst [vmem:[#allocation45_spill] sm:$0xff] %v15140_v14  ;;  %v15142_v44 = vpop.f32.mrf.mxu1 }
 0x315   :  { %v15144_v3 = vpop.f32.mrf.mxu0 }
 0x316   :  { %19500 = vst [vmem:[#allocation178_spill] sm:$0xff] %v15144_v3  ;;  %v15148_v30 = vpop.f32.mrf.mxu1 }
 0x317   :  { %19501 = vst [vmem:[#allocation48_spill] sm:$0xff] %v15148_v30  ;;  %v15151_v7 = vpop.f32.mrf.mxu0 }
 0x318   :  { %6204 = vmatmul.mubr.bf16.gmra.mxu0 %v14852_v15  ;;  %19502 = vst [vmem:[#allocation50_spill] sm:$0xff] %v15151_v7  ;;  %v15154_v57 = vpop.f32.mrf.mxu1 }
 0x319   :  { %6305 = vmatmul.mubr.bf16.gmra.mxu1 %v14852_v15  ;;  %6213 = vmatprep.mubr.bf16.mxu0 %v14868_v33  ;;  %19503 = vst [vmem:[#allocation52_spill] sm:$0xff] %v15154_v57  ;;  %v15156_v55 = vpop.f32.mrf.mxu0 }
 0x31a   :  { %6312 = vmatprep.mubr.bf16.mxu1 %v14868_v33  ;;  %19504 = vst [vmem:[#allocation51_spill] sm:$0xff] %v15156_v55  ;;  %v15158_v24 = vpop.f32.mrf.mxu1 }
 0x31b   :  { %19505 = vst [vmem:[#allocation46_spill] sm:$0xff] %v15158_v24  ;;  %v15160_v0 = vpop.f32.mrf.mxu0 }
 0x31c   :  { %19506 = vst [vmem:[#allocation41_spill] sm:$0xff] %v15160_v0  ;;  %v15162_v50 = vpop.f32.mrf.mxu1 }
 0x31d   :  { %19507 = vst [vmem:[#allocation39_spill] sm:$0xff] %v15162_v50  ;;  %v15164_v54 = vpop.f32.mrf.mxu0 }
 0x31e   :  { %19508 = vst [vmem:[#allocation35_spill] sm:$0xff] %v15164_v54  ;;  %v15168_v15 = vpop.f32.mrf.mxu1 }
 0x31f   :  { %19509 = vst [vmem:[#allocation31_spill] sm:$0xff] %v15168_v15  ;;  %v15170_v11 = vpop.f32.mrf.mxu0 }
 0x320   :  { %6214 = vmatmul.mubr.bf16.gmra.mxu0 %v14924_v43  ;;  %19510 = vst [vmem:[#allocation29_spill] sm:$0xff] %v15170_v11  ;;  %v15172_v33 = vpop.f32.mrf.mxu1 }
 0x321   :  { %6313 = vmatmul.mubr.bf16.gmra.mxu1 %v14924_v43  ;;  %19511 = vst [vmem:[#allocation3_spill] sm:$0xff] %v15172_v33  ;;  %v15174_v59 = vpop.f32.mrf.mxu0 }
 0x322   :  { %19512 = vst [vmem:[#allocation150_spill] sm:$0xff] %v15174_v59  ;;  %v15176_v38 = vpop.f32.mrf.mxu1 }
 0x323   :  { %19513 = vst [vmem:[#allocation64_spill] sm:$0xff] %v15176_v38  ;;  %v15178_v28 = vpop.f32.mrf.mxu0 }
 0x324   :  { %19514 = vst [vmem:[#allocation133_spill] sm:$0xff] %v15178_v28  ;;  %v15182_v55 = vpop.f32.mrf.mxu1 }
 0x325   :  { %v15180_v0 = vpop.f32.mrf.mxu0  ;;  %19516 = vst [vmem:[#allocation139_spill] sm:$0xff] %v15182_v55 }
 0x326   :  { %19515 = vst [vmem:[#allocation141_spill] sm:$0xff] %v15180_v0  ;;  %v15188_v43 = vpop.f32.mrf.mxu1 }
 0x327   :  { %v15184_v54 = vpop.f32.mrf.mxu0 }
 0x328   :  { %19517 = vst [vmem:[#allocation67_spill] sm:$0xff] %v15184_v54  ;;  %v15194_v33 = vpop.f32.mrf.mxu1 }
 0x329   :  { %v15186_v7 = vpop.f32.mrf.mxu0 }
 0x32a   :  { %19518 = vst [vmem:[#allocation69_spill] sm:$0xff] %v15186_v7  ;;  %v15200_v28 = vpop.f32.mrf.mxu1 }
 0x32b   :  { %v15190_v15 = vpop.f32.mrf.mxu0 }
 0x32c   :  { %19519 = vst [vmem:[#allocation129_spill] sm:$0xff] %v15190_v15  ;;  %v15206_v54 = vpop.f32.mrf.mxu1 }
 0x32d   :  { %v15192_v11 = vpop.f32.mrf.mxu0 }
 0x32e   :  { %19520 = vst [vmem:[#allocation112_spill] sm:$0xff] %v15192_v11 }
 0x32f   :  { %v15196_v59 = vpop.f32.mrf.mxu0 }
 0x330   :  { %19521 = vst [vmem:[#allocation107_spill] sm:$0xff] %v15196_v59  ;;  %v15210_v50 = vpop.f32.mrf.mxu1 }
 0x331   :  { %v15198_v38 = vpop.f32.mrf.mxu0  ;;  %19526 = vst [vmem:[#allocation74_spill] sm:$0xff] %v15210_v50 }
 0x332   :  { %19522 = vst [vmem:[#allocation71_spill] sm:$0xff] %v15198_v38  ;;  %v15216_v3 = vpop.f32.mrf.mxu1 }
 0x333   :  { %v15202_v0 = vpop.f32.mrf.mxu0 }
 0x334   :  { %19523 = vst [vmem:[#allocation115_spill] sm:$0xff] %v15202_v0  ;;  %v15222_v24 = vpop.f32.mrf.mxu1 }
 0x335   :  { %v15204_v55 = vpop.f32.mrf.mxu0  ;;  %19531 = vst [vmem:[#allocation78_spill] sm:$0xff] %v15222_v24 }
 0x336   :  { %19524 = vst [vmem:[#allocation72_spill] sm:$0xff] %v15204_v55  ;;  %v15228_v57 = vpop.f32.mrf.mxu1 }
 0x337   :  { %v15208_v7 = vpop.f32.mrf.mxu0  ;;  %19534 = vst [vmem:[#allocation62_spill] sm:$0xff] %v15228_v57 }
 0x338   :  { %19525 = vst [vmem:[#allocation103_spill] sm:$0xff] %v15208_v7 }
 0x339   :  { %v15212_v15 = vpop.f32.mrf.mxu0 }
 0x33a   :  { %19527 = vst [vmem:[#allocation75_spill] sm:$0xff] %v15212_v15  ;;  %v15234_v15 = vpop.f32.mrf.mxu1 }
 0x33b   :  { %v15214_v11 = vpop.f32.mrf.mxu0  ;;  %19537 = vst [vmem:[#allocation68_spill] sm:$0xff] %v15234_v15 }
 0x33c   :  { %19528 = vst [vmem:[#allocation83_spill] sm:$0xff] %v15214_v11 }
 0x33d   :  { %v15218_v59 = vpop.f32.mrf.mxu0 }
 0x33e   :  { %19529 = vst [vmem:[#allocation79_spill] sm:$0xff] %v15218_v59  ;;  %v15240_v59 = vpop.f32.mrf.mxu1 }
 0x33f   :  { %v15220_v38 = vpop.f32.mrf.mxu0  ;;  %19540 = vst [vmem:[#allocation86_spill] sm:$0xff] %v15240_v59 }
 0x340   :  { %19530 = vst [vmem:[#allocation76_spill] sm:$0xff] %v15220_v38 }
 0x341   :  { %v15224_v0 = vpop.f32.mrf.mxu0 }
 0x342   :  { %19532 = vst [vmem:[#allocation77_spill] sm:$0xff] %v15224_v0  ;;  %v15246_v0 = vpop.f32.mrf.mxu1 }
 0x343   :  { %v15226_v55 = vpop.f32.mrf.mxu0  ;;  %19543 = vst [vmem:[#allocation134_spill] sm:$0xff] %v15246_v0 }
 0x344   :  { %19533 = vst [vmem:[#allocation80_spill] sm:$0xff] %v15226_v55 }
 0x345   :  { %v15230_v7 = vpop.f32.mrf.mxu0 }
 0x346   :  { %19535 = vst [vmem:[#allocation15_spill] sm:$0xff] %v15230_v7  ;;  %v15252_v7 = vpop.f32.mrf.mxu1 }
 0x347   :  { %v15232_v30 = vpop.f32.mrf.mxu0  ;;  %19546 = vst [vmem:[#allocation155_spill] sm:$0xff] %v15252_v7 }
 0x348   :  { %19536 = vst [vmem:[#allocation82_spill] sm:$0xff] %v15232_v30 }
 0x349   :  { %v15236_v11 = vpop.f32.mrf.mxu0 }
 0x34a   :  { %19538 = vst [vmem:[#allocation84_spill] sm:$0xff] %v15236_v11  ;;  %v15258_v11 = vpop.f32.mrf.mxu1 }
 0x34b   :  { %v15238_v14 = vpop.f32.mrf.mxu0  ;;  %19549 = vst [vmem:[#allocation40_spill] sm:$0xff] %v15258_v11 }
 0x34c   :  { %19539 = vst [vmem:[#allocation59_spill] sm:$0xff] %v15238_v14 }
 0x34e   :  { %v15242_v38 = vpop.f32.mrf.mxu0 }
 0x34f   :  { %19541 = vst [vmem:[#allocation44_spill] sm:$0xff] %v15242_v38  ;;  %v15264_v38 = vpop.f32.mrf.mxu1 }
 0x350   :  { %v15244_v24 = vpop.f32.mrf.mxu0  ;;  %19552 = vst [vmem:[#allocation17_spill] sm:$0xff] %v15264_v38 }
 0x351   :  { %19542 = vst [vmem:[#allocation42_spill] sm:$0xff] %v15244_v24 }
 0x352   :  { %v15248_v55 = vpop.f32.mrf.mxu0 }
 0x353   :  { %19544 = vst [vmem:[#allocation54_spill] sm:$0xff] %v15248_v55  ;;  %v15270_v55 = vpop.f32.mrf.mxu1 }
 0x354   :  { %v15250_v50 = vpop.f32.mrf.mxu0  ;;  %19555 = vst [vmem:[#allocation120_spill] sm:$0xff] %v15270_v55 }
 0x355   :  { %19545 = vst [vmem:[#allocation47_spill] sm:$0xff] %v15250_v50 }
 0x357   :  { %v15254_v30 = vpop.f32.mrf.mxu0 }
 0x358   :  { %19547 = vst [vmem:[#allocation144_spill] sm:$0xff] %v15254_v30  ;;  %v15276_v30 = vpop.f32.mrf.mxu1 }
 0x359   :  { %v15256_v15 = vpop.f32.mrf.mxu0  ;;  %19558 = vst [vmem:[#allocation32_spill] sm:$0xff] %v15276_v30 }
 0x35a   :  { %19548 = vst [vmem:[#allocation91_spill] sm:$0xff] %v15256_v15 }
 0x35b   :  { %v15260_v14 = vpop.f32.mrf.mxu0 }
 0x35c   :  { %19550 = vst [vmem:[#allocation148_spill] sm:$0xff] %v15260_v14 }
 0x35d   :  { %v15262_v59 = vpop.f32.mrf.mxu0 }
 0x35e   :  { %19551 = vst [vmem:[#allocation92_spill] sm:$0xff] %v15262_v59  ;;  %v6323_v59 = vld [vmem:[%s18358_s4 + $0x10] sm:$0xff] }
 0x35f   :  { %v15266_v24 = vpop.f32.mrf.mxu0 }
 0x360   :  { %19553 = vst [vmem:[#allocation127_spill] sm:$0xff] %v15266_v24 }
 0x361   :  { %v15268_v0 = vpop.f32.mrf.mxu0 }
 0x362   :  { %19554 = vst [vmem:[#allocation26_spill] sm:$0xff] %v15268_v0 }
 0x363   :  { %v15272_v50 = vpop.f32.mrf.mxu0 }
 0x364   :  { %19556 = vst [vmem:[#allocation13_spill] sm:$0xff] %v15272_v50 }
 0x365   :  { %v15274_v7 = vpop.f32.mrf.mxu0 }
 0x366   :  { %19557 = vst [vmem:[#allocation93_spill] sm:$0xff] %v15274_v7 }
 0x368   :  { %v5919_v15 = vpop.f32.mrf.mxu0 }
 0x369   :  { %v6032_v11 = vpop.f32.mrf.mxu1 }
 0x36a   :  { %v6033_v14 = vadd.f32 %v6032_v11, %v15013_v46  ;;  %v5921_v41 = vpop.f32.mrf.mxu0  ;;  %v6324_v46 = vld [vmem:[%s18358_s4 + $0x18] sm:$0xff] }
 0x36b   :  { %v6034_v24 = vpop.f32.mrf.mxu1 }
 0x36c   :  { %v15282_v38 = vadd.f32 %v6323_v59, %v6033_v14  ;;  %v6035_v0 = vadd.f32 %v6034_v24, %v15030_v19  ;;  %v5923_v55 = vpop.f32.mrf.mxu0  ;;  %v6330_v14 = vld [vmem:[%s18358_s4 + $0x48] sm:$0xff]  ;;  %v5920_v19 = vadd.f32 %v5919_v15, %v15006_v10  ;;  %v6331_v10 = vld [vmem:[%s18358_s4 + $0x50] sm:$0xff] }
 0x36d   :  { %v6036_v50 = vpop.f32.mrf.mxu1 }
 0x36e   :  { %19559 = vst [vmem:[#allocation105_spill] sm:$0xff] %v15282_v38  ;;  %v6037_v7 = vadd.f32 %v6036_v50, %v15034_v6  ;;  %v5925_v63 = vpop.f32.mrf.mxu0  ;;  %6850 = vrot.lane.b32.xlu0 %v15282_v38, %s9644_s14  ;;  %v15294_v59 = vadd.f32 %v6324_v46, %v6035_v0  ;;  %v6321_v0 = vld [vmem:[%s18358_s4] sm:$0xff] }
 0x36f   :  { %v6038_v11 = vpop.f32.mrf.mxu1  ;;  %v15310_v15 = vadd.f32 %v6321_v0, %v5920_v19  ;;  %v6322_v19 = vld [vmem:[%s18358_s4 + $0x8] sm:$0xff]  ;;  %v5926_v0 = vadd.f32 %v5925_v63, %v15040_v26 }
 0x370   :  { %19560 = vst [vmem:[#allocation30_spill] sm:$0xff] %v15294_v59  ;;  %v15297_v24 = vadd.f32 %v6330_v14, %v6037_v7  ;;  %v6039_v6 = vadd.f32 %v6038_v11, %v15042_v8  ;;  %v5929_v50 = vpop.f32.mrf.mxu0  ;;  %v5922_v8 = vadd.f32 %v5921_v41, %v15021_v29  ;;  %v5924_v14 = vadd.f32 %v5923_v55, %v15032_v21  ;;  %v6328_v29 = vld [vmem:[%s18358_s4 + $0x38] sm:$0xff] }
 0x371   :  { %v6042_v30 = vpop.f32.mrf.mxu1  ;;  %19562 = vst [vmem:[#allocation94_spill] sm:$0xff] %v15310_v15 }
 0x372   :  { %19561 = vst [vmem:[#allocation88_spill] sm:$0xff] %v15297_v24  ;;  %v5931_v38 = vpop.f32.mrf.mxu0  ;;  %6852 = vrot.lane.b32.xlu1 %v15297_v24, %s9644_s14  ;;  %6882 = vrot.lane.b32.xlu0 %v15294_v59, %s9644_s14  ;;  %v15313_v46 = vadd.f32 %v6331_v10, %v6039_v6  ;;  %v15326_v6 = vadd.f32 %v6322_v19, %v5922_v8  ;;  %v6337_v8 = vld [vmem:[%s18358_s4 + $0x80] sm:$0xff] }
 0x373   :  { %v6044_v7 = vpop.f32.mrf.mxu1  ;;  %v15328_v21 = vadd.f32 %v6328_v29, %v5924_v14  ;;  %v6043_v55 = vadd.f32 %v6042_v30, %v15048_v27  ;;  %v6329_v27 = vld [vmem:[%s18358_s4 + $0x40] sm:$0xff] }
 0x374   :  { %19563 = vst [vmem:[#allocation96_spill] sm:$0xff] %v15313_v46  ;;  %v5933_v11 = vpop.f32.mrf.mxu0  ;;  %19564 = vst [vmem:[#allocation100_spill] sm:$0xff] %v15326_v6  ;;  %v15348_v30 = vadd.f32 %v6329_v27, %v5926_v0  ;;  %v6045_v14 = vadd.f32 %v6044_v7, %v15054_v16  ;;  %v6344_v16 = vld [vmem:[%s18358_s4 + $0xb8] sm:$0xff]  ;;  %v5930_v7 = vadd.f32 %v5929_v50, %v15044_v23  ;;  %v6335_v23 = vld [vmem:[%s18358_s4 + $0x70] sm:$0xff] }
 0x375   :  { %v6046_v24 = vpop.f32.mrf.mxu1  ;;  %19565 = vst [vmem:[#allocation25_spill] sm:$0xff] %v15328_v21  ;;  %v15346_v63 = vadd.f32 %v6337_v8, %v6043_v55  ;;  %v6338_v55 = vld [vmem:[%s18358_s4 + $0x88] sm:$0xff] }
 0x376   :  { %v5935_v59 = vpop.f32.mrf.mxu0  ;;  %6884 = vrot.lane.b32.xlu1 %v15313_v46, %s9644_s14  ;;  %6770 = vrot.lane.b32.xlu0 %v15310_v15, %s9644_s14  ;;  %19567 = vst [vmem:[#allocation97_spill] sm:$0xff] %v15348_v30  ;;  %v6047_v19 = vadd.f32 %v6046_v24, %v15058_v53  ;;  %v15366_v24 = vadd.f32 %v6338_v55, %v6045_v14 }
 0x377   :  { %v6048_v41 = vpop.f32.mrf.mxu1  ;;  %19566 = vst [vmem:[#allocation23_spill] sm:$0xff] %v15346_v63  ;;  %v5932_v14 = vadd.f32 %v5931_v38, %v15051_v18  ;;  %v5934_v55 = vadd.f32 %v5933_v11, %v15056_v51  ;;  %v6336_v18 = vld [vmem:[%s18358_s4 + $0x78] sm:$0xff]  ;;  %v6342_v51 = vld [vmem:[%s18358_s4 + $0xa8] sm:$0xff] }
 0x378   :  { %v15332_v10 = vpop.f32.mrf.mxu0  ;;  %19568 = vst [vmem:[#allocation89_spill] sm:$0xff] %v15366_v24  ;;  %v15369_v0 = vadd.f32 %v6344_v16, %v6047_v19  ;;  %v6049_v8 = vadd.f32 %v6048_v41, %v15062_v12  ;;  %v6345_v12 = vld [vmem:[%s18358_s4 + $0xc0] sm:$0xff]  ;;  %v15390_v41 = vadd.f32 %v6335_v23, %v5930_v7  ;;  %v5936_v23 = vadd.f32 %v5935_v59, %v15060_v37  ;;  %v6343_v37 = vld [vmem:[%s18358_s4 + $0xb0] sm:$0xff] }
 0x379   :  { %v6052_v46 = vpop.f32.mrf.mxu1  ;;  %v15414_v11 = vadd.f32 %v6336_v18, %v5932_v14  ;;  %v15416_v7 = vadd.f32 %v6342_v51, %v5934_v55  ;;  %v6351_v14 = vld [vmem:[%s18358_s4 + $0xf0] sm:$0xff] }
 0x37a   :  { %v15334_v15 = vpop.f32.mrf.mxu0  ;;  %6773 = vrot.lane.b32.xlu1 %v15328_v21, %s9644_s14  ;;  %6818 = vrot.lane.b32.xlu0 %v15326_v6, %s9644_s14  ;;  %19569 = vst [vmem:[#allocation14_spill] sm:$0xff] %v15369_v0  ;;  %19570 = vst [vmem:[#allocation70_spill] sm:$0xff] %v15390_v41  ;;  %v15393_v19 = vadd.f32 %v6345_v12, %v6049_v8  ;;  %v6053_v8 = vadd.f32 %v6052_v46, %v15068_v58 }
 0x37b   :  { %v6054_v26 = vpop.f32.mrf.mxu1  ;;  %19572 = vst [vmem:[#allocation176_spill] sm:$0xff] %v15414_v11  ;;  %19573 = vst [vmem:[#allocation87_spill] sm:$0xff] %v15416_v7  ;;  %v15440_v46 = vadd.f32 %v6343_v37, %v5936_v23 }
 0x37c   :  { %v15352_v29 = vpop.f32.mrf.mxu0  ;;  %19571 = vst [vmem:[#allocation118_spill] sm:$0xff] %v15393_v19  ;;  %v15438_v59 = vadd.f32 %v6351_v14, %v6053_v8  ;;  %v6055_v55 = vadd.f32 %v6054_v26, %v15074_v32  ;;  %v6352_v8 = vld [vmem:[%s18358_s4 + $0xf8] sm:$0xff]  ;;  %v6358_v32 = vld [vmem:[%s18358_s4 + $0x128] sm:$0xff]  ;;  %v5940_v26 = vadd.f32 %v15332_v10, %v15064_v45  ;;  %v6349_v45 = vld [vmem:[%s18358_s4 + $0xe0] sm:$0xff] }
 0x37d   :  { %v6056_v6 = vpop.f32.mrf.mxu1  ;;  %19575 = vst [vmem:[#allocation104_spill] sm:$0xff] %v15440_v46 }
 0x37e   :  { %v15354_v21 = vpop.f32.mrf.mxu0  ;;  %6820 = vrot.lane.b32.xlu1 %v15348_v30, %s9644_s14  ;;  %6854 = vrot.lane.b32.xlu0 %v15346_v63, %s9644_s14  ;;  %19574 = vst [vmem:[#allocation81_spill] sm:$0xff] %v15438_v59  ;;  %v6057_v18 = vadd.f32 %v6056_v6, %v15078_v56  ;;  %v15462_v6 = vadd.f32 %v6352_v8, %v6055_v55 }
 0x37f   :  { %v6058_v53 = vpop.f32.mrf.mxu1  ;;  %v15489_v55 = vadd.f32 %v6349_v45, %v5940_v26  ;;  %v5946_v45 = vadd.f32 %v15354_v21, %v15080_v1  ;;  %v6365_v1 = vld [vmem:[%s18358_s4 + $0x160] sm:$0xff] }
 0x380   :  { %v15372_v27 = vpop.f32.mrf.mxu0  ;;  %19576 = vst [vmem:[#allocation101_spill] sm:$0xff] %v15462_v6  ;;  %v15466_v23 = vadd.f32 %v6358_v32, %v6057_v18  ;;  %v6059_v14 = vadd.f32 %v6058_v53, %v15082_v62  ;;  %v6359_v62 = vld [vmem:[%s18358_s4 + $0x130] sm:$0xff]  ;;  %v15487_v53 = vpop.permute.xlu1 %7129  ;;  %v5942_v18 = vadd.f32 %v15334_v15, %v15071_v13  ;;  %v5944_v32 = vadd.f32 %v15352_v29, %v15076_v20  ;;  %v6350_v13 = vld [vmem:[%s18358_s4 + $0xe8] sm:$0xff]  ;;  %v6356_v20 = vld [vmem:[%s18358_s4 + $0x118] sm:$0xff] }
 0x381   :  { %v15374_v63 = vpop.f32.mrf.mxu1  ;;  %19579 = vst [vmem:[#allocation58_spill] sm:$0xff] %v15487_v53  ;;  %19580 = vst [vmem:[#allocation102_spill] sm:$0xff] %v15489_v55 }
 0x382   :  { %v15376_v30 = vpop.f32.mrf.mxu0  ;;  %6856 = vrot.lane.b32.xlu1 %v15369_v0, %s9644_s14  ;;  %6886 = vrot.lane.b32.xlu0 %v15366_v24, %s9644_s14  ;;  %19577 = vst [vmem:[#allocation135_spill] sm:$0xff] %v15466_v23  ;;  %v15493_v8 = vadd.f32 %v6359_v62, %v6059_v14  ;;  %v15517_v29 = vadd.f32 %v6350_v13, %v5942_v18 }
 0x383   :  { %v15388_v50 = vpop.f32.mrf.mxu1  ;;  %v15519_v26 = vadd.f32 %v6356_v20, %v5944_v32  ;;  %v6063_v14 = vadd.f32 %v15374_v63, %v15088_v42  ;;  %v6357_v42 = vld [vmem:[%s18358_s4 + $0x120] sm:$0xff] }
 0x384   :  { %v15396_v16 = vpop.f32.mrf.mxu0  ;;  %19581 = vst [vmem:[#allocation22_spill] sm:$0xff] %v15493_v8  ;;  %19583 = vst [vmem:[#allocation61_spill] sm:$0xff] %v15517_v29  ;;  %v15531_v53 = vpop.permute.xlu1 %7134  ;;  %v15549_v18 = vadd.f32 %v6357_v42, %v5946_v45  ;;  %v6065_v32 = vadd.f32 %v15388_v50, %v15094_v61  ;;  %v6366_v61 = vld [vmem:[%s18358_s4 + $0x168] sm:$0xff] }
 0x385   :  { %v15398_v0 = vpop.f32.mrf.mxu1  ;;  %19584 = vst [vmem:[#allocation161_spill] sm:$0xff] %v15519_v26  ;;  %19586 = vst [vmem:[#allocation2_spill] sm:$0xff] %v15531_v53  ;;  %v15547_v63 = vadd.f32 %v6365_v1, %v6063_v14  ;;  %v5950_v14 = vadd.f32 %v15372_v27, %v15084_v4  ;;  %v6363_v4 = vld [vmem:[%s18358_s4 + $0x150] sm:$0xff] }
 0x386   :  { %v15400_v24 = vpop.f32.mrf.mxu0  ;;  %6888 = vrot.lane.b32.xlu1 %v15393_v19, %s9644_s14  ;;  %6776 = vrot.lane.b32.xlu0 %v15390_v41, %s9644_s14  ;;  %19588 = vst [vmem:[#allocation116_spill] sm:$0xff] %v15549_v18  ;;  %v6067_v13 = vadd.f32 %v15398_v0, %v15098_v9  ;;  %v6372_v9 = vld [vmem:[%s18358_s4 + $0x198] sm:$0xff]  ;;  %v15577_v50 = vadd.f32 %v6366_v61, %v6065_v32 }
 0x387   :  { %v15412_v38 = vpop.f32.mrf.mxu1  ;;  %19587 = vst [vmem:[#allocation109_spill] sm:$0xff] %v15547_v63  ;;  %v5952_v32 = vadd.f32 %v15376_v30, %v15091_v35  ;;  %v5954_v61 = vadd.f32 %v15396_v16, %v15096_v36  ;;  %v6364_v35 = vld [vmem:[%s18358_s4 + $0x158] sm:$0xff]  ;;  %v6370_v36 = vld [vmem:[%s18358_s4 + $0x188] sm:$0xff] }
 0x388   :  { %v15420_v12 = vpop.f32.mrf.mxu0  ;;  %19591 = vst [vmem:[#allocation113_spill] sm:$0xff] %v15577_v50  ;;  %v15581_v45 = vadd.f32 %v6372_v9, %v6067_v13  ;;  %v6069_v1 = vadd.f32 %v15412_v38, %v15102_v22  ;;  %v6373_v22 = vld [vmem:[%s18358_s4 + $0x1a0] sm:$0xff]  ;;  %v15605_v38 = vadd.f32 %v6363_v4, %v5950_v14  ;;  %v5956_v4 = vadd.f32 %v15400_v24, %v15100_v17  ;;  %v6371_v17 = vld [vmem:[%s18358_s4 + $0x190] sm:$0xff] }
 0x389   :  { %v15422_v19 = vpop.f32.mrf.mxu1  ;;  %v15633_v16 = vadd.f32 %v6364_v35, %v5952_v32  ;;  %v15635_v14 = vadd.f32 %v6370_v36, %v5954_v61 }
 0x38a   :  { %v15424_v41 = vpop.f32.mrf.mxu0  ;;  %6779 = vrot.lane.b32.xlu1 %v15416_v7, %s9644_s14  ;;  %6822 = vrot.lane.b32.xlu0 %v15414_v11, %s9644_s14  ;;  %19592 = vst [vmem:[#allocation147_spill] sm:$0xff] %v15581_v45  ;;  %19595 = vst [vmem:[#allocation114_spill] sm:$0xff] %v15605_v38  ;;  %v15609_v13 = vadd.f32 %v6373_v22, %v6069_v1  ;;  %v6073_v1 = vadd.f32 %v15422_v19, %v15108_v48  ;;  %v6379_v48 = vld [vmem:[%s18358_s4 + $0x1d0] sm:$0xff] }
 0x38b   :  { %v15436_v58 = vpop.f32.mrf.mxu1  ;;  %19599 = vst [vmem:[#allocation122_spill] sm:$0xff] %v15633_v16  ;;  %19600 = vst [vmem:[#allocation53_spill] sm:$0xff] %v15635_v14  ;;  %v15661_v61 = vadd.f32 %v6371_v17, %v5956_v4 }
 0x38c   :  { %v15444_v51 = vpop.f32.mrf.mxu0  ;;  %19596 = vst [vmem:[#allocation18_spill] sm:$0xff] %v15609_v13  ;;  %v6075_v24 = vadd.f32 %v15436_v58, %v15114_v5  ;;  %v15659_v32 = vadd.f32 %v6379_v48, %v6073_v1  ;;  %v6386_v58 = vld [vmem:[%s18358_s4 + $0x208] sm:$0xff] }
 0x38d   :  { %v15446_v11 = vpop.f32.mrf.mxu1  ;;  %19604 = vst [vmem:[#allocation10_spill] sm:$0xff] %v15661_v61 }
 0x38e   :  { %v15448_v7 = vpop.f32.mrf.mxu0  ;;  %6824 = vrot.lane.b32.xlu1 %v15440_v46, %s9644_s14  ;;  %6858 = vrot.lane.b32.xlu0 %v15438_v59, %s9644_s14  ;;  %19603 = vst [vmem:[#allocation110_spill] sm:$0xff] %v15659_v32  ;;  %v6077_v35 = vadd.f32 %v15446_v11, %v15118_v60  ;;  %v5960_v11 = vadd.f32 %v15420_v12, %v15104_v2  ;;  %v6377_v2 = vld [vmem:[%s18358_s4 + $0x1c0] sm:$0xff] }
 0x38f   :  { %v15460_v56 = vpop.f32.mrf.mxu1 }
 0x390   :  { %v15469_v37 = vpop.f32.mrf.mxu0  ;;  %v6079_v1 = vadd.f32 %v15460_v56, %v15122_v40  ;;  %v15709_v40 = vadd.f32 %v6377_v2, %v5960_v11  ;;  %v5962_v56 = vadd.f32 %v15424_v41, %v15111_v52  ;;  %v5964_v11 = vadd.f32 %v15444_v51, %v15116_v31  ;;  %v6384_v51 = vld [vmem:[%s18358_s4 + $0x1f8] sm:$0xff] }
 0x391   :  { %v15471_v59 = vpop.f32.mrf.mxu1 }
 0x392   :  { %v15473_v46 = vpop.f32.mrf.mxu0  ;;  %6860 = vrot.lane.b32.xlu1 %v15466_v23, %s9644_s14  ;;  %6890 = vrot.lane.b32.xlu0 %v15462_v6, %s9644_s14  ;;  %v15499_v6 = vpop.permute.xlu0 %7124  ;;  %19610 = vst [vmem:[#allocation126_spill] sm:$0xff] %v15709_v40 }
 0x393   :  { %19578 = vst [vmem:[#allocation60_spill] sm:$0xff] %v15473_v46  ;;  %v15485_v10 = vpop.f32.mrf.mxu1  ;;  %19582 = vst [vmem:[#allocation63_spill] sm:$0xff] %v15499_v6 }
 0x394   :  { %v15497_v23 = vpop.f32.mrf.mxu0 }
 0x395   :  { %v15501_v46 = vpop.f32.mrf.mxu1 }
 0x396   :  { %v15503_v57 = vpop.f32.mrf.mxu0  ;;  %6892 = vrot.lane.b32.xlu1 %v15493_v8, %s9644_s14  ;;  %6782 = vrot.lane.b32.xlu0 %v15489_v55, %s9644_s14  ;;  %v15527_v8 = vpop.permute.xlu0 %7139 }
 0x397   :  { %v15515_v15 = vpop.f32.mrf.mxu1  ;;  %19585 = vst [vmem:[#allocation106_spill] sm:$0xff] %v15527_v8  ;;  %v15561_v8 = vpop.permute.xlu1 %7144 }
 0x398   :  { %v15525_v62 = vpop.f32.mrf.mxu0  ;;  %19590 = vst [vmem:[#allocation20_spill] sm:$0xff] %v15561_v8 }
 0x399   :  { %v15529_v55 = vpop.f32.mrf.mxu1 }
 0x39a   :  { %v15533_v6 = vpop.f32.mrf.mxu0  ;;  %6785 = vrot.lane.b32.xlu1 %v15519_v26, %s9644_s14  ;;  %6826 = vrot.lane.b32.xlu0 %v15517_v29, %s9644_s14  ;;  %v15557_v29 = vpop.permute.xlu0 %7149 }
 0x39b   :  { %v15545_v21 = vpop.f32.mrf.mxu1  ;;  %19589 = vst [vmem:[#allocation90_spill] sm:$0xff] %v15557_v29  ;;  %v15591_v29 = vpop.permute.xlu1 %7154 }
 0x39c   :  { %v15555_v20 = vpop.f32.mrf.mxu0  ;;  %19594 = vst [vmem:[#allocation56_spill] sm:$0xff] %v15591_v29 }
 0x39d   :  { %v15559_v26 = vpop.f32.mrf.mxu1 }
 0x39e   :  { %v15563_v53 = vpop.f32.mrf.mxu0  ;;  %6828 = vrot.lane.b32.xlu1 %v15549_v18, %s9644_s14  ;;  %6862 = vrot.lane.b32.xlu0 %v15547_v63, %s9644_s14  ;;  %v15587_v63 = vpop.permute.xlu0 %7159 }
 0x39f   :  { %v15575_v0 = vpop.f32.mrf.mxu1  ;;  %19593 = vst [vmem:[#allocation111_spill] sm:$0xff] %v15587_v63  ;;  %v15619_v63 = vpop.permute.xlu1 %7164 }
 0x3a0   :  { %v15585_v42 = vpop.f32.mrf.mxu0  ;;  %19598 = vst [vmem:[#allocation124_spill] sm:$0xff] %v15619_v63 }
 0x3a1   :  { %v15589_v18 = vpop.f32.mrf.mxu1 }
 0x3a2   :  { %6864 = vrot.lane.b32.xlu1 %v15581_v45, %s9644_s14  ;;  %6894 = vrot.lane.b32.xlu0 %v15577_v50, %s9644_s14  ;;  %v15613_v9 = vpop.f32.mrf.mxu0  ;;  %v15615_v45 = vpop.permute.xlu0 %7169 }
 0x3a3   :  { %v15603_v27 = vpop.f32.mrf.mxu1  ;;  %19597 = vst [vmem:[#allocation12_spill] sm:$0xff] %v15615_v45  ;;  %v15645_v63 = vpop.permute.xlu1 %7174 }
 0x3a4   :  { %v15641_v22 = vpop.f32.mrf.mxu0  ;;  %19602 = vst [vmem:[#allocation170_spill] sm:$0xff] %v15645_v63 }
 0x3a5   :  { %v15617_v50 = vpop.f32.mrf.mxu1 }
 0x3a6   :  { %6896 = vrot.lane.b32.xlu1 %v15609_v13, %s9644_s14  ;;  %6788 = vrot.lane.b32.xlu0 %v15605_v38, %s9644_s14  ;;  %v15643_v13 = vpop.permute.xlu0 %7179  ;;  %v15665_v36 = vpop.f32.mrf.mxu0 }
 0x3a7   :  { %v15631_v30 = vpop.f32.mrf.mxu1  ;;  %19601 = vst [vmem:[#allocation119_spill] sm:$0xff] %v15643_v13  ;;  %v15672_v29 = vpop.permute.xlu1 %7184 }
 0x3a8   :  { %19606 = vst [vmem:[#allocation6_spill] sm:$0xff] %v15672_v29 }
 0x3a9   :  { %v9007_v45 = vpop.f32.mrf.mxu1 }
 0x3aa   :  { %6791 = vrot.lane.b32.xlu1 %v15635_v14, %s9644_s14  ;;  %6830 = vrot.lane.b32.xlu0 %v15633_v16, %s9644_s14  ;;  %v15667_v13 = vpop.permute.xlu0 %7189  ;;  %v6380_v14 = vld [vmem:[%s18358_s4 + $0x1d8] sm:$0xff] }
 0x3ab   :  { %v9008_v19 = vpop.f32.mrf.mxu1  ;;  %19605 = vst [vmem:[#allocation98_spill] sm:$0xff] %v15667_v13  ;;  %v15679_v60 = vadd.f32 %v6380_v14, %v6075_v24  ;;  %v15693_v14 = vpop.f32.mrf.mxu0 }
 0x3ac   :  { %v9009_v16 = vadd.f32 %v9008_v19, %v9007_v45  ;;  %v6327_v45 = vld [vmem:[%s18358_s4 + $0x30] sm:$0xff]  ;;  %v15702_v12 = vpop.permute.xlu1 %7194 }
 0x3ad   :  { %v9010_v63 = vpop.f32.mrf.mxu1  ;;  %19607 = vst [vmem:[#allocation49_spill] sm:$0xff] %v15679_v60  ;;  %19609 = vst [vmem:[#allocation157_spill] sm:$0xff] %v15702_v12 }
 0x3ae   :  { %v6259_v5 = vadd.f32 %v9009_v16, %v15194_v33  ;;  %6832 = vrot.lane.b32.xlu1 %v15661_v61, %s9644_s14  ;;  %6866 = vrot.lane.b32.xlu0 %v15659_v32, %s9644_s14  ;;  %v15689_v16 = vadd.f32 %v6386_v58, %v6077_v35  ;;  %v15716_v19 = vpop.permute.xlu0 %7199  ;;  %v15725_v58 = vpop.f32.mrf.mxu0  ;;  %v6420_v32 = vld [vmem:[%s18358_s4 + $0x318] sm:$0xff] }
 0x3af   :  { %v9011_v33 = vpop.f32.mrf.mxu1  ;;  %19611 = vst [vmem:[#allocation11_spill] sm:$0xff] %v15716_v19 }
 0x3b0   :  { %19608 = vst [vmem:[#allocation125_spill] sm:$0xff] %v15689_v16  ;;  %v6439_v4 = vadd.f32 %v6327_v45, %v6259_v5  ;;  %v9012_v48 = vadd.f32 %v9011_v33, %v9010_v63  ;;  %v6387_v63 = vld [vmem:[%s18358_s4 + $0x210] sm:$0xff]  ;;  %v6378_v33 = vld [vmem:[%s18358_s4 + $0x1c8] sm:$0xff] }
 0x3b1   :  { %v9013_v17 = vpop.f32.mrf.mxu1  ;;  %v15721_v5 = vadd.f32 %v6387_v63, %v6079_v1  ;;  %v15741_v31 = vadd.f32 %v6378_v33, %v5962_v56  ;;  %v6083_v56 = vadd.f32 %v15471_v59, %v15128_v34  ;;  %v15757_v63 = vpop.f32.mrf.mxu0  ;;  %v6393_v34 = vld [vmem:[%s18358_s4 + $0x240] sm:$0xff] }
 0x3b2   :  { %6551 = vst.msk [vmem:[%s18358_s4 + $0x30] sm:$0xff] %vm1760_vm1, %v6439_v4  ;;  %v6262_v24 = vadd.f32 %v9012_v48, %v15206_v54  ;;  %6868 = vrot.lane.b32.xlu1 %v15689_v16, %s9644_s14  ;;  %6898 = vrot.lane.b32.xlu0 %v15679_v60, %s9644_s14  ;;  %v6334_v54 = vld [vmem:[%s18358_s4 + $0x68] sm:$0xff]  ;;  %v15735_v4 = vpop.permute.xlu1 %7315  ;;  %v5966_v48 = vadd.f32 %v15448_v7, %v15120_v47 }
 0x3b3   :  { %v9014_v35 = vpop.f32.mrf.mxu1  ;;  %19612 = vst [vmem:[#allocation8_spill] sm:$0xff] %v15721_v5  ;;  %19613 = vst [vmem:[#allocation117_spill] sm:$0xff] %v15741_v31  ;;  %v6385_v47 = vld [vmem:[%s18358_s4 + $0x200] sm:$0xff]  ;;  %v15783_v33 = vadd.f32 %v6393_v34, %v6083_v56  ;;  %v6400_v56 = vld [vmem:[%s18358_s4 + $0x278] sm:$0xff] }
 0x3b4   :  { %v6446_v45 = vadd.f32 %v6334_v54, %v6262_v24  ;;  %v9015_v52 = vadd.f32 %v9014_v35, %v9013_v17  ;;  %v15751_v17 = vpop.permute.xlu0 %7319  ;;  %v15753_v24 = vadd.f32 %v6384_v51, %v5964_v11  ;;  %v15776_v59 = vadd.f32 %v6385_v47, %v5966_v48  ;;  %v15787_v51 = vpop.f32.mrf.mxu0 }
 0x3b5   :  { %v9016_v41 = vpop.f32.mrf.mxu1  ;;  %19614 = vst [vmem:[#allocation43_spill] sm:$0xff] %v15751_v17  ;;  %19618 = vst [vmem:[#allocation136_spill] sm:$0xff] %v15783_v33  ;;  %v6089_v47 = vadd.f32 %v15515_v15, %v15142_v44  ;;  %v19623_v15 = vld [vmem:[#allocation27_spill] sm:$0xff] }
 0x3b6   :  { %6558 = vst.msk [vmem:[%s18358_s4 + $0x68] sm:$0xff] %vm1760_vm1, %v6446_v45  ;;  %v6267_v1 = vadd.f32 %v15188_v43, %v9015_v52  ;;  %6900 = vrot.lane.b32.xlu1 %v15721_v5, %s9644_s14  ;;  %6794 = vrot.lane.b32.xlu0 %v15709_v40, %s9644_s14  ;;  %v6341_v43 = vld [vmem:[%s18358_s4 + $0xa0] sm:$0xff]  ;;  %19615 = vst [vmem:[#allocation128_spill] sm:$0xff] %v15753_v24  ;;  %v15767_v11 = vpop.permute.xlu1 %7323  ;;  %v6085_v52 = vadd.f32 %v15485_v10, %v15134_v39 }
 0x3b7   :  { %v9017_v2 = vpop.f32.mrf.mxu1  ;;  %19616 = vst [vmem:[#allocation121_spill] sm:$0xff] %v15767_v11  ;;  %19617 = vst [vmem:[#allocation132_spill] sm:$0xff] %v15776_v59  ;;  %v6394_v39 = vld [vmem:[%s18358_s4 + $0x248] sm:$0xff] }
 0x3b8   :  { %v6453_v54 = vadd.f32 %v6341_v43, %v6267_v1  ;;  %v9018_v35 = vadd.f32 %v9017_v2, %v9016_v41  ;;  %v6087_v1 = vadd.f32 %v15501_v46, %v15138_v25  ;;  %v15803_v25 = vadd.f32 %v6394_v39, %v6085_v52 }
 0x3b9   :  { %v9019_v45 = vpop.f32.mrf.mxu1  ;;  %v5970_v46 = vadd.f32 %v15469_v37, %v15124_v49  ;;  %v6391_v37 = vld [vmem:[%s18358_s4 + $0x230] sm:$0xff] }
 0x3ba   :  { %6565 = vst.msk [vmem:[%s18358_s4 + $0xa0] sm:$0xff] %vm1760_vm1, %v6453_v54  ;;  %v6270_v7 = vadd.f32 %v15200_v28, %v9018_v35  ;;  %6797 = vrot.lane.b32.xlu1 %v15753_v24, %s9644_s14  ;;  %6834 = vrot.lane.b32.xlu0 %v15741_v31, %s9644_s14  ;;  %v6348_v28 = vld [vmem:[%s18358_s4 + $0xd8] sm:$0xff]  ;;  %v15789_v54 = vpop.permute.xlu0 %7331  ;;  %19619 = vst [vmem:[#allocation9_spill] sm:$0xff] %v15803_v25 }
 0x3bb   :  { %v9020_v41 = vpop.f32.mrf.mxu1  ;;  %v6355_v35 = vld [vmem:[%s18358_s4 + $0x110] sm:$0xff]  ;;  %v15833_v44 = vadd.f32 %v6391_v37, %v5970_v46 }
 0x3bc   :  { %v6460_v43 = vadd.f32 %v6348_v28, %v6270_v7  ;;  %v9021_v2 = vadd.f32 %v9020_v41, %v9019_v45  ;;  %v15813_v45 = vadd.f32 %v6400_v56, %v6087_v1  ;;  %v15817_v7 = vpop.f32.mrf.mxu0  ;;  %v15819_v28 = vpop.permute.xlu1 %7327  ;;  %v19621_v41 = vld [vmem:[#allocation62_spill] sm:$0xff] }
 0x3bd   :  { %v9022_v48 = vpop.f32.mrf.mxu1  ;;  %19622 = vst [vmem:[#allocation38_spill] sm:$0xff] %v15833_v44 }
 0x3be   :  { %6572 = vst.msk [vmem:[%s18358_s4 + $0xd8] sm:$0xff] %vm1760_vm1, %v6460_v43  ;;  %v6275_v10 = vadd.f32 %v9021_v2, %v15216_v3  ;;  %6836 = vrot.lane.b32.xlu1 %v15776_v59, %s9644_s14  ;;  %6870 = vrot.lane.b32.xlu0 %v15783_v33, %s9644_s14  ;;  %19620 = vst [vmem:[#allocation73_spill] sm:$0xff] %v15813_v45  ;;  %v19624_v43 = vld [vmem:[#allocation60_spill] sm:$0xff]  ;;  %v15840_v39 = vpop.permute.xlu0 %7339 }
 0x3bf   :  { %v9023_v3 = vpop.f32.mrf.mxu1  ;;  %v5972_v2 = vadd.f32 %v19624_v43, %v19623_v15  ;;  %v6392_v43 = vld [vmem:[%s18358_s4 + $0x238] sm:$0xff] }
 0x3c0   :  { %v6467_v34 = vadd.f32 %v6355_v35, %v6275_v10  ;;  %v9024_v52 = vadd.f32 %v9023_v3, %v9022_v48  ;;  %v6401_v48 = vld [vmem:[%s18358_s4 + $0x280] sm:$0xff]  ;;  %v6362_v10 = vld [vmem:[%s18358_s4 + $0x148] sm:$0xff] }
 0x3c1   :  { %v9025_v49 = vpop.f32.mrf.mxu1  ;;  %v15845_v35 = vadd.f32 %v6401_v48, %v6089_v47  ;;  %v19626_v3 = vld [vmem:[#allocation179_spill] sm:$0xff]  ;;  %v19627_v47 = vld [vmem:[#allocation74_spill] sm:$0xff] }
 0x3c2   :  { %6579 = vst.msk [vmem:[%s18358_s4 + $0x110] sm:$0xff] %vm1760_vm1, %v6467_v34  ;;  %v6278_v1 = vadd.f32 %v9024_v52, %v19621_v41  ;;  %6872 = vrot.lane.b32.xlu1 %v15813_v45, %s9644_s14  ;;  %6902 = vrot.lane.b32.xlu0 %v15803_v25, %s9644_s14  ;;  %v5974_v46 = vadd.f32 %v15497_v23, %v19626_v3  ;;  %v15849_v34 = vpop.f32.mrf.mxu0  ;;  %v15851_v41 = vpop.permute.xlu1 %7335 }
 0x3c3   :  { %v9026_v56 = vpop.f32.mrf.mxu1  ;;  %19625 = vst [vmem:[#allocation57_spill] sm:$0xff] %v15845_v35  ;;  %v15865_v23 = vadd.f32 %v6392_v43, %v5972_v2 }
 0x3c4   :  { %v6474_v52 = vadd.f32 %v6362_v10, %v6278_v1  ;;  %v9027_v37 = vadd.f32 %v9026_v56, %v9025_v49  ;;  %v6398_v49 = vld [vmem:[%s18358_s4 + $0x268] sm:$0xff]  ;;  %v19629_v1 = vld [vmem:[#allocation45_spill] sm:$0xff]  ;;  %v6369_v56 = vld [vmem:[%s18358_s4 + $0x180] sm:$0xff]  ;;  %v15879_v45 = vpop.f32.mrf.mxu0 }
 0x3c5   :  { %v9028_v15 = vpop.f32.mrf.mxu1  ;;  %19628 = vst [vmem:[#allocation108_spill] sm:$0xff] %v15865_v23  ;;  %v5976_v10 = vadd.f32 %v15503_v57, %v19629_v1  ;;  %v6399_v57 = vld [vmem:[%s18358_s4 + $0x270] sm:$0xff]  ;;  %v15886_v1 = vpop.permute.xlu0 %7347 }
 0x3c6   :  { %6586 = vst.msk [vmem:[%s18358_s4 + $0x148] sm:$0xff] %vm1760_vm1, %v6474_v52  ;;  %v6283_v48 = vadd.f32 %v19627_v47, %v9027_v37  ;;  %6904 = vrot.lane.b32.xlu1 %v15845_v35, %s9644_s14  ;;  %6800 = vrot.lane.b32.xlu0 %v15833_v44, %s9644_s14  ;;  %v15875_v52 = vadd.f32 %v6398_v49, %v5974_v46  ;;  %v19631_v37 = vld [vmem:[#allocation48_spill] sm:$0xff]  ;;  %v15881_v35 = vpop.permute.xlu1 %7343  ;;  %v19632_v46 = vld [vmem:[#allocation78_spill] sm:$0xff] }
 0x3c7   :  { %v9029_v3 = vpop.f32.mrf.mxu1  ;;  %v6093_v47 = vadd.f32 %v15529_v55, %v19631_v37  ;;  %v19634_v49 = vld [vmem:[#allocation52_spill] sm:$0xff] }
 0x3c8   :  { %19630 = vst [vmem:[#allocation137_spill] sm:$0xff] %v15875_v52  ;;  %v6481_v2 = vadd.f32 %v6369_v56, %v6283_v48  ;;  %v9030_v43 = vadd.f32 %v9029_v3, %v9028_v15  ;;  %v6407_v15 = vld [vmem:[%s18358_s4 + $0x2b0] sm:$0xff]  ;;  %v15900_v48 = vadd.f32 %v6399_v57, %v5976_v10  ;;  %v6095_v56 = vadd.f32 %v15545_v21, %v19634_v49  ;;  %v6376_v3 = vld [vmem:[%s18358_s4 + $0x1b8] sm:$0xff] }
 0x3c9   :  { %v9031_v33 = vpop.f32.mrf.mxu1  ;;  %v6408_v21 = vld [vmem:[%s18358_s4 + $0x2b8] sm:$0xff] }
 0x3ca   :  { %6593 = vst.msk [vmem:[%s18358_s4 + $0x180] sm:$0xff] %vm1760_vm1, %v6481_v2  ;;  %v6286_v55 = vadd.f32 %v19632_v46, %v9030_v43  ;;  %6803 = vrot.lane.b32.xlu1 %v15875_v52, %s9644_s14  ;;  %6838 = vrot.lane.b32.xlu0 %v15865_v23, %s9644_s14  ;;  %19633 = vst [vmem:[#allocation7_spill] sm:$0xff] %v15900_v48  ;;  %v15907_v2 = vadd.f32 %v6407_v15, %v6093_v47  ;;  %v19636_v43 = vld [vmem:[#allocation46_spill] sm:$0xff]  ;;  %v15911_v23 = vpop.f32.mrf.mxu0  ;;  %v15913_v59 = vpop.permute.xlu1 %7351  ;;  %v6414_v15 = vld [vmem:[%s18358_s4 + $0x2e8] sm:$0xff] }
 0x3cb   :  { %v9032_v37 = vpop.f32.mrf.mxu1  ;;  %v6097_v46 = vadd.f32 %v15559_v26, %v19636_v43  ;;  %v19637_v47 = vld [vmem:[#allocation86_spill] sm:$0xff]  ;;  %v15927_v26 = vadd.f32 %v6408_v21, %v6095_v56  ;;  %v15943_v56 = vpop.permute.xlu0 %7355 }
 0x3cc   :  { %19635 = vst [vmem:[#allocation4_spill] sm:$0xff] %v15907_v2  ;;  %v6488_v25 = vadd.f32 %v6376_v3, %v6286_v55  ;;  %v9033_v16 = vadd.f32 %v9032_v37, %v9031_v33  ;;  %v19639_v33 = vld [vmem:[#allocation178_spill] sm:$0xff]  ;;  %v19641_v3 = vld [vmem:[#allocation39_spill] sm:$0xff]  ;;  %v15941_v43 = vpop.f32.mrf.mxu0 }
 0x3cd   :  { %v9034_v10 = vpop.f32.mrf.mxu1  ;;  %19638 = vst [vmem:[#allocation143_spill] sm:$0xff] %v15927_v26  ;;  %v5980_v55 = vadd.f32 %v15525_v62, %v19639_v33  ;;  %v15937_v49 = vadd.f32 %v6414_v15, %v6097_v46  ;;  %v6099_v37 = vadd.f32 %v15575_v0, %v19641_v3  ;;  %v6405_v33 = vld [vmem:[%s18358_s4 + $0x2a0] sm:$0xff]  ;;  %v19642_v46 = vld [vmem:[#allocation155_spill] sm:$0xff] }
 0x3ce   :  { %6600 = vst.msk [vmem:[%s18358_s4 + $0x1b8] sm:$0xff] %vm1760_vm1, %v6488_v25  ;;  %v6291_v57 = vadd.f32 %v9033_v16, %v19637_v47  ;;  %6840 = vrot.lane.b32.xlu1 %v15900_v48, %s9644_s14  ;;  %6874 = vrot.lane.b32.xlu0 %v15907_v2, %s9644_s14  ;;  %v6383_v25 = vld [vmem:[%s18358_s4 + $0x1f0] sm:$0xff]  ;;  %v15957_v0 = vpop.permute.xlu1 %7359  ;;  %v15973_v2 = vpop.f32.mrf.mxu0 }
 0x3cf   :  { %v9035_v16 = vpop.f32.mrf.mxu1  ;;  %19640 = vst [vmem:[#allocation37_spill] sm:$0xff] %v15937_v49  ;;  %v6390_v3 = vld [vmem:[%s18358_s4 + $0x228] sm:$0xff] }
 0x3d0   :  { %v6495_v21 = vadd.f32 %v6383_v25, %v6291_v57  ;;  %v9036_v62 = vadd.f32 %v9035_v16, %v9034_v10  ;;  %v15959_v10 = vadd.f32 %v6405_v33, %v5980_v55  ;;  %v19644_v57 = vld [vmem:[#allocation50_spill] sm:$0xff]  ;;  %v6415_v16 = vld [vmem:[%s18358_s4 + $0x2f0] sm:$0xff] }
 0x3d1   :  { %v9037_v47 = vpop.f32.mrf.mxu1  ;;  %v5982_v25 = vadd.f32 %v15533_v6, %v19644_v57  ;;  %v6406_v6 = vld [vmem:[%s18358_s4 + $0x2a8] sm:$0xff]  ;;  %v15978_v57 = vpop.permute.xlu0 %7363 }
 0x3d2   :  { %6607 = vst.msk [vmem:[%s18358_s4 + $0x1f0] sm:$0xff] %vm1760_vm1, %v6495_v21  ;;  %v6294_v15 = vadd.f32 %v9036_v62, %v19642_v46  ;;  %6876 = vrot.lane.b32.xlu1 %v15937_v49, %s9644_s14  ;;  %6906 = vrot.lane.b32.xlu0 %v15927_v26, %s9644_s14  ;;  %19643 = vst [vmem:[#allocation36_spill] sm:$0xff] %v15959_v10  ;;  %v15969_v62 = vadd.f32 %v6415_v16, %v6099_v37  ;;  %v19646_v46 = vld [vmem:[#allocation51_spill] sm:$0xff]  ;;  %v19647_v37 = vld [vmem:[#allocation68_spill] sm:$0xff]  ;;  %v16005_v48 = vpop.permute.xlu1 %7367 }
 0x3d3   :  { %v9038_v21 = vpop.f32.mrf.mxu1  ;;  %v5984_v49 = vadd.f32 %v15555_v20, %v19646_v46  ;;  %v15989_v20 = vadd.f32 %v6406_v6, %v5982_v25  ;;  %19652 = vst [vmem:[#allocation130_spill] sm:$0xff] %v16005_v48 }
 0x3d4   :  { %19645 = vst [vmem:[#allocation66_spill] sm:$0xff] %v15969_v62  ;;  %v6502_v55 = vadd.f32 %v6390_v3, %v6294_v15  ;;  %v9039_v33 = vadd.f32 %v9038_v21, %v9037_v47  ;;  %v6412_v47 = vld [vmem:[%s18358_s4 + $0x2d8] sm:$0xff]  ;;  %v6397_v21 = vld [vmem:[%s18358_s4 + $0x260] sm:$0xff] }
 0x3d5   :  { %v9040_v26 = vpop.f32.mrf.mxu1  ;;  %19648 = vst [vmem:[#allocation140_spill] sm:$0xff] %v15989_v20  ;;  %v19649_v15 = vld [vmem:[#allocation41_spill] sm:$0xff] }
 0x3d6   :  { %6614 = vst.msk [vmem:[%s18358_s4 + $0x228] sm:$0xff] %vm1760_vm1, %v6502_v55  ;;  %v6299_v16 = vadd.f32 %v19647_v37, %v9039_v33  ;;  %6908 = vrot.lane.b32.xlu1 %v15969_v62, %s9644_s14  ;;  %6806 = vrot.lane.b32.xlu0 %v15959_v10, %s9644_s14  ;;  %v5986_v3 = vadd.f32 %v15563_v53, %v19649_v15  ;;  %v19651_v33 = vld [vmem:[#allocation31_spill] sm:$0xff]  ;;  %v16003_v62 = vpop.f32.mrf.mxu0  ;;  %v6413_v53 = vld [vmem:[%s18358_s4 + $0x2e0] sm:$0xff] }
 0x3d7   :  { %v9041_v46 = vpop.f32.mrf.mxu1  ;;  %v15999_v55 = vadd.f32 %v6412_v47, %v5984_v49  ;;  %v6103_v37 = vadd.f32 %v15589_v18, %v19651_v33  ;;  %v19653_v49 = vld [vmem:[#allocation134_spill] sm:$0xff] }
 0x3d8   :  { %v6509_v25 = vadd.f32 %v6397_v21, %v6299_v16  ;;  %v9042_v6 = vadd.f32 %v9041_v46, %v9040_v26  ;;  %v6421_v18 = vld [vmem:[%s18358_s4 + $0x320] sm:$0xff]  ;;  %v16022_v26 = vadd.f32 %v6413_v53, %v5986_v3  ;;  %v19655_v16 = vld [vmem:[#allocation3_spill] sm:$0xff]  ;;  %v6404_v21 = vld [vmem:[%s18358_s4 + $0x298] sm:$0xff] }
 0x3d9   :  { %19650 = vst [vmem:[#allocation172_spill] sm:$0xff] %v15999_v55  ;;  %v9043_v5 = vpop.f32.mrf.mxu1  ;;  %v6105_v15 = vadd.f32 %v15603_v27, %v19655_v16  ;;  %v16029_v33 = vadd.f32 %v6421_v18, %v6103_v37  ;;  %v6422_v27 = vld [vmem:[%s18358_s4 + $0x328] sm:$0xff]  ;;  %v19658_v37 = vld [vmem:[#allocation17_spill] sm:$0xff] }
 0x3da   :  { %6621 = vst.msk [vmem:[%s18358_s4 + $0x260] sm:$0xff] %vm1760_vm1, %v6509_v25  ;;  %v6302_v47 = vadd.f32 %v19653_v49, %v9042_v6  ;;  %6809 = vrot.lane.b32.xlu1 %v15999_v55, %s9644_s14  ;;  %6842 = vrot.lane.b32.xlu0 %v15989_v20, %s9644_s14  ;;  %19654 = vst [vmem:[#allocation145_spill] sm:$0xff] %v16022_v26  ;;  %v19657_v25 = vld [vmem:[#allocation64_spill] sm:$0xff]  ;;  %v16033_v49 = vpop.f32.mrf.mxu0  ;;  %v16035_v20 = vpop.permute.xlu0 %7371 }
 0x3db   :  { %v9044_v46 = vpop.f32.mrf.mxu1  ;;  %19656 = vst [vmem:[#allocation33_spill] sm:$0xff] %v16029_v33  ;;  %v6107_v6 = vadd.f32 %v15617_v50, %v19657_v25  ;;  %v16049_v50 = vpop.permute.xlu1 %7375 }
 0x3dc   :  { %v6516_v19 = vadd.f32 %v6404_v21, %v6302_v47  ;;  %v9045_v3 = vadd.f32 %v9044_v46, %v9043_v5  ;;  %19659 = vst [vmem:[#allocation5_spill] sm:$0xff] %v16049_v50  ;;  %v16051_v5 = vadd.f32 %v6422_v27, %v6105_v15  ;;  %v19661_v47 = vld [vmem:[#allocation35_spill] sm:$0xff]  ;;  %v6428_v21 = vld [vmem:[%s18358_s4 + $0x358] sm:$0xff] }
 0x3dd   :  { %v9046_v53 = vpop.f32.mrf.mxu1  ;;  %v5990_v16 = vadd.f32 %v15585_v42, %v19661_v47  ;;  %v16061_v25 = vadd.f32 %v6428_v21, %v6107_v6  ;;  %v6419_v47 = vld [vmem:[%s18358_s4 + $0x310] sm:$0xff] }
 0x3de   :  { %6628 = vst.msk [vmem:[%s18358_s4 + $0x298] sm:$0xff] %vm1760_vm1, %v6516_v19  ;;  %v6307_v18 = vadd.f32 %v9045_v3, %v19658_v37  ;;  %6844 = vrot.lane.b32.xlu1 %v16022_v26, %s9644_s14  ;;  %6878 = vrot.lane.b32.xlu0 %v16029_v33, %s9644_s14  ;;  %19660 = vst [vmem:[#allocation65_spill] sm:$0xff] %v16051_v5  ;;  %v6411_v19 = vld [vmem:[%s18358_s4 + $0x2d0] sm:$0xff]  ;;  %v19663_v3 = vld [vmem:[#allocation139_spill] sm:$0xff]  ;;  %v16065_v33 = vpop.f32.mrf.mxu0 }
 0x3df   :  { %v9047_v46 = vpop.f32.mrf.mxu1  ;;  %19662 = vst [vmem:[#allocation146_spill] sm:$0xff] %v16061_v25  ;;  %v6109_v37 = vadd.f32 %v15631_v30, %v19663_v3  ;;  %v19664_v6 = vld [vmem:[#allocation32_spill] sm:$0xff]  ;;  %v16081_v30 = vadd.f32 %v6419_v47, %v5990_v16 }
 0x3e0   :  { %v6523_v15 = vadd.f32 %v6411_v19, %v6307_v18  ;;  %v9048_v27 = vadd.f32 %v9047_v46, %v9046_v53  ;;  %v16067_v26 = vpop.permute.xlu0 %6850  ;;  %v19666_v53 = vld [vmem:[#allocation29_spill] sm:$0xff]  ;;  %v6429_v19 = vld [vmem:[%s18358_s4 + $0x360] sm:$0xff]  ;;  %v6418_v46 = vld [vmem:[%s18358_s4 + $0x308] sm:$0xff] }
 0x3e1   :  { %v9049_v42 = vpop.f32.mrf.mxu1  ;;  %19665 = vst [vmem:[#allocation158_spill] sm:$0xff] %v16081_v30  ;;  %v5992_v18 = vadd.f32 %v15613_v9, %v19666_v53 }
 0x3e2   :  { %6635 = vst.msk [vmem:[%s18358_s4 + $0x2d0] sm:$0xff] %vm1760_vm1, %v6523_v15  ;;  %v6310_v21 = vadd.f32 %v9048_v27, %v19664_v6  ;;  %6880 = vrot.lane.b32.xlu1 %v16061_v25, %s9644_s14  ;;  %6910 = vrot.lane.b32.xlu0 %v16051_v5, %s9644_s14  ;;  %v16091_v15 = vadd.f32 %v6429_v19, %v6109_v37  ;;  %v19668_v27 = vld [vmem:[#allocation150_spill] sm:$0xff]  ;;  %v16095_v25 = vpop.f32.mrf.mxu0  ;;  %v19670_v37 = vld [vmem:[#allocation40_spill] sm:$0xff]  ;;  %v19672_v19 = vld [vmem:[#allocation133_spill] sm:$0xff] }
 0x3e3   :  { %v9050_v3 = vpop.f32.mrf.mxu1  ;;  %v5994_v6 = vadd.f32 %v15641_v22, %v19668_v27 }
 0x3e4   :  { %19667 = vst [vmem:[#allocation142_spill] sm:$0xff] %v16091_v15  ;;  %v6530_v16 = vadd.f32 %v6418_v46, %v6310_v21  ;;  %v9051_v47 = vadd.f32 %v9050_v3, %v9049_v42  ;;  %v16097_v5 = vpop.permute.xlu1 %6852  ;;  %v16099_v53 = vpop.permute.xlu0 %6882  ;;  %v16113_v42 = vadd.f32 %v6420_v32, %v5992_v18  ;;  %v6426_v21 = vld [vmem:[%s18358_s4 + $0x348] sm:$0xff]  ;;  %v5996_v46 = vadd.f32 %v15665_v36, %v19672_v19  ;;  %v6425_v3 = vld [vmem:[%s18358_s4 + $0x340] sm:$0xff]  ;;  %v6427_v36 = vld [vmem:[%s18358_s4 + $0x350] sm:$0xff] }
 0x3e5   :  { %v9052_v9 = vpop.f32.mrf.mxu1  ;;  %19669 = vst [vmem:[#allocation138_spill] sm:$0xff] %v16099_v53  ;;  %v16129_v31 = vpop.f32.mrf.mxu0 }
 0x3e6   :  { %6642 = vst.msk [vmem:[%s18358_s4 + $0x308] sm:$0xff] %vm1760_vm1, %v6530_v16  ;;  %v6315_v22 = vadd.f32 %v19670_v37, %v9051_v47  ;;  %6912 = vrot.lane.b32.xlu1 %v16091_v15, %s9644_s14  ;;  %6812 = vrot.lane.b32.xlu0 %v16081_v30, %s9644_s14  ;;  %19671 = vst [vmem:[#allocation28_spill] sm:$0xff] %v16113_v42  ;;  %v16123_v16 = vadd.f32 %v6426_v21, %v5994_v6  ;;  %v19674_v47 = vld [vmem:[#allocation141_spill] sm:$0xff]  ;;  %v19676_v6 = vld [vmem:[#allocation120_spill] sm:$0xff] }
 0x3e7   :  { %v9053_v27 = vpop.f32.mrf.mxu1  ;;  %v6146_v37 = vadd.f32 %v15693_v14, %v19674_v47  ;;  %v16145_v14 = vadd.f32 %v6427_v36, %v5996_v46  ;;  %v16161_v46 = vpop.f32.mrf.mxu0 }
 0x3e8   :  { %19673 = vst [vmem:[#allocation153_spill] sm:$0xff] %v16123_v16  ;;  %v6537_v15 = vadd.f32 %v6425_v3, %v6315_v22  ;;  %v9054_v32 = vadd.f32 %v9053_v27, %v9052_v9  ;;  %v16127_v18 = vpop.permute.xlu1 %6884  ;;  %v16131_v60 = vpop.permute.xlu0 %6770  ;;  %v6325_v9 = vld [vmem:[%s18358_s4 + $0x20] sm:$0xff]  ;;  %v6432_v22 = vld [vmem:[%s18358_s4 + $0x378] sm:$0xff] }
 0x3e9   :  { %19675 = vst [vmem:[#allocation154_spill] sm:$0xff] %v16127_v18  ;;  %19677 = vst [vmem:[#allocation149_spill] sm:$0xff] %v16145_v14  ;;  %v16153_v19 = vadd.f32 %v6325_v9, %v6146_v37  ;;  %v19680_v27 = vld [vmem:[#allocation69_spill] sm:$0xff] }
 0x3ea   :  { %6649 = vst.msk [vmem:[%s18358_s4 + $0x340] sm:$0xff] %vm1760_vm1, %v6537_v15  ;;  %v6318_v21 = vadd.f32 %v19676_v6, %v9054_v32  ;;  %6815 = vrot.lane.b32.xlu1 %v16123_v16, %s9644_s14  ;;  %6846 = vrot.lane.b32.xlu0 %v16113_v42, %s9644_s14  ;;  %v19679_v15 = vld [vmem:[#allocation67_spill] sm:$0xff]  ;;  %v6150_v47 = vadd.f32 %v15757_v63, %v19680_v27  ;;  %v6332_v63 = vld [vmem:[%s18358_s4 + $0x58] sm:$0xff]  ;;  %v16187_v27 = vpop.f32.mrf.mxu0 }
 0x3eb   :  { %19678 = vst [vmem:[#allocation156_spill] sm:$0xff] %v16153_v19  ;;  %v6148_v3 = vadd.f32 %v15725_v58, %v19679_v15  ;;  %v6326_v58 = vld [vmem:[%s18358_s4 + $0x28] sm:$0xff]  ;;  %v19683_v9 = vld [vmem:[#allocation129_spill] sm:$0xff] }
 0x3ec   :  { %v6544_v32 = vadd.f32 %v6432_v22, %v6318_v21  ;;  %v16159_v6 = vpop.permute.xlu1 %6773  ;;  %v16163_v36 = vpop.permute.xlu0 %6818  ;;  %v16181_v21 = vadd.f32 %v6332_v63, %v6150_v47  ;;  %v6152_v22 = vadd.f32 %v15787_v51, %v19683_v9  ;;  %v19686_v63 = vld [vmem:[#allocation71_spill] sm:$0xff] }
 0x3ed   :  { %v16179_v37 = vadd.f32 %v6326_v58, %v6148_v3  ;;  %v6333_v3 = vld [vmem:[%s18358_s4 + $0x60] sm:$0xff]  ;;  %v19685_v58 = vld [vmem:[#allocation112_spill] sm:$0xff]  ;;  %v6160_v9 = vadd.f32 %v15879_v45, %v19686_v63  ;;  %v6346_v45 = vld [vmem:[%s18358_s4 + $0xc8] sm:$0xff] }
 0x3ee   :  { %6656 = vst.msk [vmem:[%s18358_s4 + $0x378] sm:$0xff] %vm1760_vm1, %v6544_v32  ;;  %6848 = vrot.lane.b32.xlu1 %v16145_v14, %s9644_s14  ;;  %6914 = vrot.lane.b32.xlu0 %v16153_v19, %s9644_s14  ;;  %19682 = vst [vmem:[#allocation171_spill] sm:$0xff] %v16181_v21  ;;  %v16198_v47 = vadd.f32 %v6333_v3, %v6152_v22  ;;  %v6156_v51 = vadd.f32 %v15817_v7, %v19685_v58  ;;  %v6339_v7 = vld [vmem:[%s18358_s4 + $0x90] sm:$0xff]  ;;  %v19690_v58 = vld [vmem:[#allocation115_spill] sm:$0xff] }
 0x3ef   :  { %19681 = vst [vmem:[#allocation163_spill] sm:$0xff] %v16179_v37  ;;  %v7378_v42 = vmul.f32 %v15735_v4, %v16179_v37  ;;  %v16223_v3 = vadd.f32 %v6346_v45, %v6160_v9  ;;  %v6162_v63 = vadd.f32 %v15911_v23, %v19690_v58  ;;  %v19694_v23 = vld [vmem:[#allocation75_spill] sm:$0xff] }
 0x3f0   :  { %v16185_v15 = vpop.permute.xlu1 %6820  ;;  %v16189_v32 = vpop.permute.xlu0 %6854  ;;  %19684 = vst [vmem:[#allocation95_spill] sm:$0xff] %v16198_v47  ;;  %v16221_v22 = vadd.f32 %v6339_v7, %v6156_v51  ;;  %v19692_v51 = vld [vmem:[#allocation107_spill] sm:$0xff]  ;;  %v6170_v45 = vadd.f32 %v16003_v62, %v19694_v23  ;;  %v6360_v62 = vld [vmem:[%s18358_s4 + $0x138] sm:$0xff] }
 0x3f1   :  { %19689 = vst [vmem:[#allocation151_spill] sm:$0xff] %v16223_v3  ;;  %v6158_v9 = vadd.f32 %v15849_v34, %v19692_v51  ;;  %v6340_v34 = vld [vmem:[%s18358_s4 + $0x98] sm:$0xff]  ;;  %v19697_v51 = vld [vmem:[#allocation83_spill] sm:$0xff] }
 0x3f2   :  { %6916 = vrot.lane.b32.xlu1 %v16181_v21, %s9644_s14  ;;  %6946 = vrot.lane.b32.xlu0 %v16179_v37, %s9644_s14  ;;  %v16208_v21 = vpop.f32.mrf.mxu0  ;;  %19688 = vst [vmem:[#allocation152_spill] sm:$0xff] %v16221_v22  ;;  %v6172_v23 = vadd.f32 %v16033_v49, %v19697_v51 }
 0x3f4   :  { %v16204_v14 = vpop.permute.xlu1 %6856  ;;  %v16210_v19 = vpop.permute.xlu0 %6886 }
 0x3f5   :  { %19687 = vst [vmem:[#allocation160_spill] sm:$0xff] %v16210_v19  ;;  %v6189_v16 = vpop.f32.mrf.mxu0 }
 0x3f6   :  { %6948 = vrot.lane.b32.xlu1 %v16198_v47, %s9644_s14  ;;  %7634 = vrot.lane.b32.xlu0 %v7378_v42, %s9645_s9  ;;  %v6347_v42 = vld [vmem:[%s18358_s4 + $0xd0] sm:$0xff] }
 0x3f7   :  { %v16240_v7 = vadd.f32 %v6347_v42, %v6162_v63  ;;  %v6191_v12 = vpop.f32.mrf.mxu0  ;;  %v16259_v63 = vadd.f32 %v6340_v34, %v6158_v9  ;;  %v16261_v42 = vadd.f32 %v6360_v62, %v6170_v45  ;;  %v6361_v9 = vld [vmem:[%s18358_s4 + $0x140] sm:$0xff]  ;;  %v19698_v45 = vld [vmem:[#allocation72_spill] sm:$0xff]  ;;  %v19700_v62 = vld [vmem:[#allocation77_spill] sm:$0xff] }
 0x3f8   :  { %v16227_v37 = vpop.permute.xlu1 %6888  ;;  %v16229_v61 = vpop.permute.xlu0 %6776  ;;  %v6166_v34 = vadd.f32 %v15941_v43, %v19698_v45  ;;  %v16280_v49 = vadd.f32 %v6361_v9, %v6172_v23  ;;  %v6180_v51 = vadd.f32 %v16129_v31, %v19700_v62  ;;  %v6353_v43 = vld [vmem:[%s18358_s4 + $0x100] sm:$0xff]  ;;  %v6374_v31 = vld [vmem:[%s18358_s4 + $0x1a8] sm:$0xff]  ;;  %v19704_v45 = vld [vmem:[#allocation80_spill] sm:$0xff] }
 0x3f9   :  { %19691 = vst [vmem:[#allocation165_spill] sm:$0xff] %v16227_v37  ;;  %19693 = vst [vmem:[#allocation162_spill] sm:$0xff] %v16240_v7  ;;  %v6182_v62 = vadd.f32 %v16161_v46, %v19704_v45  ;;  %v19708_v46 = vld [vmem:[#allocation84_spill] sm:$0xff]  ;;  %v7402_v44 = vmul.f32 %v15819_v28, %v16240_v7 }
 0x3fa   :  { %6920 = vrot.lane.b32.xlu1 %v16223_v3, %s9644_s14  ;;  %6918 = vrot.lane.b32.xlu0 %v16221_v22, %s9644_s14  ;;  %v7386_v3 = vmul.f32 %v15751_v17, %v16198_v47  ;;  %19695 = vst [vmem:[#allocation19_spill] sm:$0xff] %v16259_v63  ;;  %19696 = vst [vmem:[#allocation131_spill] sm:$0xff] %v16261_v42  ;;  %v16267_v22 = vpop.f32.mrf.mxu0  ;;  %v16301_v23 = vadd.f32 %v6353_v43, %v6166_v34  ;;  %v19706_v34 = vld [vmem:[#allocation103_spill] sm:$0xff] }
 0x3fb   :  { %19699 = vst [vmem:[#allocation123_spill] sm:$0xff] %v16280_v49  ;;  %v16303_v9 = vadd.f32 %v6374_v31, %v6180_v51  ;;  %v6168_v51 = vadd.f32 %v15973_v2, %v19706_v34  ;;  %v6190_v31 = vadd.f32 %v6189_v16, %v19708_v46  ;;  %v6354_v2 = vld [vmem:[%s18358_s4 + $0x108] sm:$0xff]  ;;  %v6388_v16 = vld [vmem:[%s18358_s4 + $0x218] sm:$0xff] }
 0x3fc   :  { %v16244_v58 = vpop.permute.xlu1 %6779  ;;  %v16248_v30 = vpop.permute.xlu0 %6822  ;;  %19702 = vst [vmem:[#allocation167_spill] sm:$0xff] %v16301_v23  ;;  %v19711_v34 = vld [vmem:[#allocation59_spill] sm:$0xff] }
 0x3fd   :  { %v16288_v55 = vpop.f32.mrf.mxu0  ;;  %19703 = vst [vmem:[#allocation99_spill] sm:$0xff] %v16303_v9  ;;  %v6192_v46 = vadd.f32 %v6191_v12, %v19711_v34 }
 0x3fe   :  { %6952 = vrot.lane.b32.xlu1 %v16240_v7, %s9644_s14  ;;  %7650 = vrot.lane.b32.xlu0 %v7386_v3, %s9645_s9 }
 0x3ff   :  { %v6199_v10 = vpop.f32.mrf.mxu0 }
 0x400   :  { %v16265_v47 = vpop.permute.xlu1 %6824  ;;  %v16269_v3 = vpop.permute.xlu0 %6858 }
 0x402   :  { %6924 = vrot.lane.b32.xlu1 %v16261_v42, %s9644_s14  ;;  %6950 = vrot.lane.b32.xlu0 %v16259_v63, %s9644_s14  ;;  %v7394_v42 = vmul.f32 %v15767_v11, %v16259_v63 }
 0x404   :  { %v16284_v13 = vpop.permute.xlu1 %6860  ;;  %v16290_v29 = vpop.permute.xlu0 %6890 }
 0x405   :  { %19701 = vst [vmem:[#allocation159_spill] sm:$0xff] %v16290_v29 }
 0x406   :  { %6956 = vrot.lane.b32.xlu1 %v16280_v49, %s9644_s14  ;;  %7666 = vrot.lane.b32.xlu0 %v7394_v42, %s9645_s9  ;;  %v6375_v42 = vld [vmem:[%s18358_s4 + $0x1b0] sm:$0xff] }
 0x407   :  { %v16320_v43 = vadd.f32 %v6375_v42, %v6182_v62  ;;  %v16338_v62 = vadd.f32 %v6354_v2, %v6168_v51  ;;  %v16340_v42 = vadd.f32 %v6388_v16, %v6190_v31  ;;  %v19712_v51 = vld [vmem:[#allocation79_spill] sm:$0xff]  ;;  %v19714_v2 = vld [vmem:[#allocation54_spill] sm:$0xff] }
 0x408   :  { %v16307_v63 = vpop.permute.xlu1 %6892  ;;  %v16309_v52 = vpop.permute.xlu0 %6782  ;;  %v6176_v31 = vadd.f32 %v16065_v33, %v19712_v51  ;;  %v6200_v16 = vadd.f32 %v6199_v10, %v19714_v2  ;;  %v6367_v33 = vld [vmem:[%s18358_s4 + $0x170] sm:$0xff]  ;;  %v6402_v10 = vld [vmem:[%s18358_s4 + $0x288] sm:$0xff] }
 0x409   :  { %19705 = vst [vmem:[#allocation164_spill] sm:$0xff] %v16307_v63  ;;  %19707 = vst [vmem:[#allocation55_spill] sm:$0xff] %v16320_v43  ;;  %v7410_v38 = vmul.f32 %v15789_v54, %v16338_v62  ;;  %v19718_v51 = vld [vmem:[#allocation47_spill] sm:$0xff] }
 0x40a   :  { %6928 = vrot.lane.b32.xlu1 %v16303_v9, %s9644_s14  ;;  %6922 = vrot.lane.b32.xlu0 %v16301_v23, %s9644_s14  ;;  %v6201_v9 = vpop.f32.mrf.mxu0  ;;  %19709 = vst [vmem:[#allocation168_spill] sm:$0xff] %v16338_v62  ;;  %19710 = vst [vmem:[#allocation85_spill] sm:$0xff] %v16340_v42 }
 0x40b   :  { %v6202_v2 = vadd.f32 %v6201_v9, %v19718_v51  ;;  %v19722_v9 = vld [vmem:[#allocation148_spill] sm:$0xff] }
 0x40c   :  { %v16323_v45 = vpop.permute.xlu1 %6785  ;;  %v16327_v24 = vpop.permute.xlu0 %6826 }
 0x40d   :  { %v16345_v23 = vpop.f32.mrf.mxu0 }
 0x40e   :  { %6960 = vrot.lane.b32.xlu1 %v16320_v43, %s9644_s14  ;;  %7682 = vrot.lane.b32.xlu0 %v7402_v44, %s9645_s9  ;;  %v6389_v44 = vld [vmem:[%s18358_s4 + $0x220] sm:$0xff] }
 0x40f   :  { %v16358_v12 = vadd.f32 %v6389_v44, %v6192_v46  ;;  %v16378_v46 = vadd.f32 %v6367_v33, %v6176_v31  ;;  %v16380_v44 = vadd.f32 %v6402_v10, %v6200_v16  ;;  %v19720_v31 = vld [vmem:[#allocation76_spill] sm:$0xff] }
 0x410   :  { %v16343_v7 = vpop.permute.xlu1 %6828  ;;  %v16347_v40 = vpop.permute.xlu0 %6862  ;;  %v6178_v16 = vadd.f32 %v16095_v25, %v19720_v31  ;;  %v6368_v25 = vld [vmem:[%s18358_s4 + $0x178] sm:$0xff]  ;;  %v19725_v31 = vld [vmem:[#allocation92_spill] sm:$0xff] }
 0x411   :  { %19713 = vst [vmem:[#allocation177_spill] sm:$0xff] %v16358_v12  ;;  %19716 = vst [vmem:[#allocation174_spill] sm:$0xff] %v16378_v46 }
 0x412   :  { %6932 = vrot.lane.b32.xlu1 %v16340_v42, %s9644_s14  ;;  %6954 = vrot.lane.b32.xlu0 %v16338_v62, %s9644_s14  ;;  %v16365_v42 = vpop.f32.mrf.mxu0  ;;  %19717 = vst [vmem:[#allocation16_spill] sm:$0xff] %v16380_v44 }
 0x414   :  { %v16361_v34 = vpop.permute.xlu1 %6864  ;;  %v16367_v8 = vpop.permute.xlu0 %6894 }
 0x415   :  { %19715 = vst [vmem:[#allocation34_spill] sm:$0xff] %v16367_v8  ;;  %v6209_v8 = vpop.f32.mrf.mxu0 }
 0x416   :  { %6964 = vrot.lane.b32.xlu1 %v16358_v12, %s9644_s14  ;;  %7698 = vrot.lane.b32.xlu0 %v7410_v38, %s9645_s9  ;;  %v6403_v38 = vld [vmem:[%s18358_s4 + $0x290] sm:$0xff]  ;;  %v6210_v10 = vadd.f32 %v6209_v8, %v19722_v9  ;;  %v6416_v8 = vld [vmem:[%s18358_s4 + $0x2f8] sm:$0xff] }
 0x417   :  { %v16396_v33 = vadd.f32 %v6403_v38, %v6202_v2  ;;  %v16414_v2 = vadd.f32 %v6368_v25, %v6178_v16  ;;  %v19727_v16 = vld [vmem:[#allocation15_spill] sm:$0xff] }
 0x418   :  { %v16383_v62 = vpop.permute.xlu1 %6896  ;;  %v16385_v63 = vpop.permute.xlu0 %6788  ;;  %v16416_v38 = vadd.f32 %v6416_v8, %v6210_v10  ;;  %v6186_v10 = vadd.f32 %v16187_v27, %v19727_v16  ;;  %v6381_v27 = vld [vmem:[%s18358_s4 + $0x1e0] sm:$0xff] }
 0x419   :  { %19719 = vst [vmem:[#allocation21_spill] sm:$0xff] %v16383_v62  ;;  %19721 = vst [vmem:[#allocation166_spill] sm:$0xff] %v16396_v33  ;;  %v7418_v62 = vmul.f32 %v15851_v41, %v16280_v49 }
 0x41a   :  { %6936 = vrot.lane.b32.xlu1 %v16380_v44, %s9644_s14  ;;  %6926 = vrot.lane.b32.xlu0 %v16378_v46, %s9644_s14  ;;  %v6211_v44 = vpop.f32.mrf.mxu0  ;;  %19723 = vst [vmem:[#allocation173_spill] sm:$0xff] %v16414_v2  ;;  %19724 = vst [vmem:[#allocation169_spill] sm:$0xff] %v16416_v38 }
 0x41b   :  { %v6212_v9 = vadd.f32 %v6211_v44, %v19725_v31  ;;  %v6663_v44 = vld [vmem:[%s18358_s4 + $0x30] sm:$0xff]  ;;  %v7426_v31 = vmul.f32 %v15840_v39, %v16414_v2 }
 0x41c   :  { %v16399_v51 = vpop.permute.xlu1 %6791  ;;  %v16403_v29 = vpop.permute.xlu0 %6830 }
 0x41e   :  { %6968 = vrot.lane.b32.xlu1 %v16396_v33, %s9644_s14  ;;  %7714 = vrot.lane.b32.xlu0 %v7418_v62, %s9645_s9  ;;  %v6417_v62 = vld [vmem:[%s18358_s4 + $0x300] sm:$0xff] }
 0x41f   :  { %v16432_v25 = vadd.f32 %v6417_v62, %v6212_v9  ;;  %v16453_v9 = vadd.f32 %v6381_v27, %v6186_v10  ;;  %v7434_v10 = vmul.f32 %v15881_v35, %v16320_v43  ;;  %v6670_v27 = vld [vmem:[%s18358_s4 + $0x68] sm:$0xff] }
 0x420   :  { %v16419_v49 = vpop.permute.xlu1 %6832  ;;  %v16421_v46 = vpop.permute.xlu0 %6866 }
 0x421   :  { %19726 = vst [vmem:[#allocation24_spill] sm:$0xff] %v16421_v46  ;;  %19728 = vst [vmem:[#allocation175_spill] sm:$0xff] %v16432_v25 }
 0x422   :  { %6940 = vrot.lane.b32.xlu1 %v16416_v38, %s9644_s14  ;;  %6958 = vrot.lane.b32.xlu0 %v16414_v2, %s9644_s14  ;;  %v16443_v38 = vsel %vm6769_vm3, %v16131_v60, %v6663_v44  ;;  %19731 = vst [vmem:[#allocation60_spill] sm:$0xff] %v16453_v9  ;;  %v16459_v44 = vpop.f32.mrf.mxu0 }
 0x423   :  { %v7379_v62 = vmul.f32 %v15735_v4, %v16443_v38 }
 0x424   :  { %v16437_v8 = vpop.permute.xlu1 %6868  ;;  %v16445_v37 = vpop.permute.xlu0 %6898 }
 0x425   :  { %19729 = vst [vmem:[#allocation62_spill] sm:$0xff] %v16437_v8  ;;  %19730 = vst [vmem:[#allocation27_spill] sm:$0xff] %v16445_v37 }
 0x426   :  { %6972 = vrot.lane.b32.xlu1 %v16432_v25, %s9644_s14  ;;  %7730 = vrot.lane.b32.xlu0 %v7426_v31, %s9645_s9  ;;  %v19734_v31 = vld [vmem:[#allocation82_spill] sm:$0xff] }
 0x427   :  { %v6188_v37 = vadd.f32 %v16208_v21, %v19734_v31  ;;  %v6775_v21 = vsel %vm6769_vm3, %v16159_v6, %v6670_v27 }
 0x428   :  { %v16457_v16 = vpop.permute.xlu1 %6900  ;;  %v16461_v2 = vpop.permute.xlu0 %6794 }
 0x429   :  { %19732 = vst [vmem:[#allocation179_spill] sm:$0xff] %v16457_v16  ;;  %19733 = vst [vmem:[#allocation74_spill] sm:$0xff] %v16461_v2  ;;  %v16475_v16 = vpop.f32.mrf.mxu0 }
 0x42a   :  { %6930 = vrot.lane.b32.xlu0 %v16453_v9, %s9644_s14  ;;  %7636 = vrot.lane.b32.xlu1 %v7379_v62, %s9645_s9  ;;  %v7026_v9 = vsel %vm6769_vm3, %v16067_v26, %v16163_v36  ;;  %v6382_v62 = vld [vmem:[%s18358_s4 + $0x1e8] sm:$0xff] }
 0x42b   :  { %v16489_v31 = vadd.f32 %v6382_v62, %v6188_v37  ;;  %v7381_v43 = vmul.f32 %v15735_v4, %v7026_v9  ;;  %v6219_v46 = vpop.f32.mrf.mxu0  ;;  %v7387_v37 = vmul.f32 %v15751_v17, %v6775_v21 }
 0x42c   :  { %v16468_v8 = vpop.permute.xlu1 %6797  ;;  %v16480_v50 = vpop.permute.xlu0 %6834 }
 0x42d   :  { %19735 = vst [vmem:[#allocation45_spill] sm:$0xff] %v16468_v8  ;;  %19736 = vst [vmem:[#allocation48_spill] sm:$0xff] %v16480_v50  ;;  %v19740_v50 = vld [vmem:[#allocation13_spill] sm:$0xff]  ;;  %v7442_v9 = vmul.f32 %v15886_v1, %v16489_v31 }
 0x42e   :  { %7746 = vrot.lane.b32.xlu0 %v7434_v10, %s9645_s9  ;;  %6980 = vrot.lane.b32.xlu1 %v6775_v21, %s9644_s14  ;;  %19737 = vst [vmem:[#allocation78_spill] sm:$0xff] %v16489_v31  ;;  %v19739_v10 = vld [vmem:[#allocation44_spill] sm:$0xff]  ;;  %v6220_v19 = vadd.f32 %v6219_v46, %v19740_v50  ;;  %v6430_v50 = vld [vmem:[%s18358_s4 + $0x368] sm:$0xff] }
 0x42f   :  { %v6196_v27 = vadd.f32 %v16267_v22, %v19739_v10  ;;  %v6221_v10 = vpop.f32.mrf.mxu0 }
 0x430   :  { %v16492_v8 = vpop.permute.xlu1 %6836  ;;  %v16494_v2 = vpop.permute.xlu0 %6870  ;;  %v16519_v46 = vadd.f32 %v6430_v50, %v6220_v19  ;;  %v19747_v19 = vld [vmem:[#allocation93_spill] sm:$0xff] }
 0x431   :  { %19738 = vst [vmem:[#allocation52_spill] sm:$0xff] %v16492_v8 }
 0x432   :  { %6962 = vrot.lane.b32.xlu0 %v16489_v31, %s9644_s14  ;;  %7640 = vrot.lane.b32.xlu1 %v7381_v43, %s9645_s9  ;;  %v6395_v43 = vld [vmem:[%s18358_s4 + $0x250] sm:$0xff]  ;;  %19744 = vst [vmem:[#allocation39_spill] sm:$0xff] %v16519_v46  ;;  %v19746_v31 = vld [vmem:[#allocation42_spill] sm:$0xff] }
 0x433   :  { %v16517_v22 = vadd.f32 %v6395_v43, %v6196_v27  ;;  %v6198_v27 = vadd.f32 %v16288_v55, %v19746_v31  ;;  %v6222_v43 = vadd.f32 %v6221_v10, %v19747_v19  ;;  %v6431_v55 = vld [vmem:[%s18358_s4 + $0x370] sm:$0xff] }
 0x434   :  { %v16503_v62 = vpop.permute.xlu1 %6872  ;;  %v16507_v8 = vpop.permute.xlu0 %6902 }
 0x435   :  { %19741 = vst [vmem:[#allocation46_spill] sm:$0xff] %v16503_v62  ;;  %19742 = vst [vmem:[#allocation86_spill] sm:$0xff] %v16507_v8  ;;  %v7450_v8 = vmul.f32 %v15913_v59, %v16358_v12  ;;  %v16552_v10 = vadd.f32 %v6431_v55, %v6222_v43 }
 0x436   :  { %7762 = vrot.lane.b32.xlu0 %v7442_v9, %s9645_s9  ;;  %7652 = vrot.lane.b32.xlu1 %v7387_v37, %s9645_s9  ;;  %19743 = vst [vmem:[#allocation178_spill] sm:$0xff] %v16517_v22  ;;  %v7027_v9 = vsel %vm6769_vm3, %v16097_v5, %v16185_v15 }
 0x437   :  { %v7389_v50 = vmul.f32 %v15751_v17, %v7027_v9  ;;  %19750 = vst [vmem:[#allocation68_spill] sm:$0xff] %v16552_v10  ;;  %v6677_v9 = vld [vmem:[%s18358_s4 + $0xa0] sm:$0xff] }
 0x438   :  { %v16521_v21 = vpop.permute.xlu1 %6904  ;;  %v16526_v37 = vpop.permute.xlu0 %6800 }
 0x439   :  { %19745 = vst [vmem:[#allocation155_spill] sm:$0xff] %v16521_v21 }
 0x43a   :  { %6934 = vrot.lane.b32.xlu0 %v16517_v22, %s9644_s14  ;;  %6944 = vrot.lane.b32.xlu1 %v16519_v46, %s9644_s14  ;;  %v6396_v46 = vld [vmem:[%s18358_s4 + $0x258] sm:$0xff]  ;;  %v6409_v22 = vld [vmem:[%s18358_s4 + $0x2c0] sm:$0xff] }
 0x43b   :  { %v16550_v31 = vadd.f32 %v6396_v46, %v6198_v27  ;;  %v19753_v46 = vld [vmem:[#allocation144_spill] sm:$0xff] }
 0x43c   :  { %v16536_v21 = vpop.permute.xlu1 %6803  ;;  %v16540_v62 = vpop.permute.xlu0 %6838  ;;  %v6206_v27 = vadd.f32 %v16345_v23, %v19753_v46  ;;  %v6684_v46 = vld [vmem:[%s18358_s4 + $0xd8] sm:$0xff] }
 0x43d   :  { %19748 = vst [vmem:[#allocation50_spill] sm:$0xff] %v16536_v21  ;;  %19749 = vst [vmem:[#allocation51_spill] sm:$0xff] %v16550_v31 }
 0x43e   :  { %7656 = vrot.lane.b32.xlu1 %v7389_v50, %s9645_s9  ;;  %7778 = vrot.lane.b32.xlu0 %v7450_v8, %s9645_s9  ;;  %v16561_v8 = vsel %vm6769_vm3, %v16229_v61, %v6677_v9  ;;  %v7458_v9 = vmul.f32 %v15943_v56, %v16550_v31 }
 0x43f   :  { %v7395_v43 = vmul.f32 %v15767_v11, %v16561_v8 }
 0x440   :  { %v16557_v19 = vpop.permute.xlu1 %6840  ;;  %v16563_v50 = vpop.permute.xlu0 %6874 }
 0x441   :  { %19751 = vst [vmem:[#allocation41_spill] sm:$0xff] %v16557_v19  ;;  %19752 = vst [vmem:[#allocation31_spill] sm:$0xff] %v16563_v50  ;;  %v16584_v50 = vadd.f32 %v6409_v22, %v6206_v27  ;;  %v19758_v22 = vld [vmem:[#allocation91_spill] sm:$0xff] }
 0x442   :  { %6976 = vrot.lane.b32.xlu1 %v16552_v10, %s9644_s14  ;;  %6966 = vrot.lane.b32.xlu0 %v16550_v31, %s9644_s14  ;;  %v7028_v31 = vsel %vm6769_vm3, %v16189_v32, %v16248_v30  ;;  %v6208_v27 = vadd.f32 %v16365_v42, %v19758_v22  ;;  %v7029_v22 = vsel %vm6769_vm3, %v16204_v14, %v16265_v47 }
 0x443   :  { %19756 = vst [vmem:[#allocation64_spill] sm:$0xff] %v16584_v50 }
 0x444   :  { %v16573_v55 = vpop.permute.xlu1 %6876  ;;  %v16577_v12 = vpop.permute.xlu0 %6906 }
 0x445   :  { %19754 = vst [vmem:[#allocation134_spill] sm:$0xff] %v16573_v55  ;;  %19755 = vst [vmem:[#allocation3_spill] sm:$0xff] %v16577_v12  ;;  %v7466_v55 = vmul.f32 %v15957_v0, %v16396_v33 }
 0x446   :  { %7794 = vrot.lane.b32.xlu0 %v7458_v9, %s9645_s9  ;;  %7668 = vrot.lane.b32.xlu1 %v7395_v43, %s9645_s9  ;;  %v6781_v43 = vsel %vm6769_vm3, %v16244_v58, %v6684_v46  ;;  %v7397_v9 = vmul.f32 %v15767_v11, %v7028_v31  ;;  %v6410_v46 = vld [vmem:[%s18358_s4 + $0x2c8] sm:$0xff] }
 0x447   :  { %v7403_v42 = vmul.f32 %v15819_v28, %v6781_v43 }
 0x448   :  { %v16586_v23 = vpop.permute.xlu1 %6908  ;;  %v16594_v12 = vpop.permute.xlu0 %6806 }
 0x449   :  { %19757 = vst [vmem:[#allocation17_spill] sm:$0xff] %v16586_v23 }
 0x44a   :  { %6984 = vrot.lane.b32.xlu1 %v6781_v43, %s9644_s14  ;;  %6938 = vrot.lane.b32.xlu0 %v16584_v50, %s9644_s14  ;;  %v16615_v50 = vadd.f32 %v6410_v46, %v6208_v27  ;;  %v6691_v27 = vld [vmem:[%s18358_s4 + $0x110] sm:$0xff] }
 0x44c   :  { %v16604_v23 = vpop.permute.xlu1 %6809  ;;  %v16608_v19 = vpop.permute.xlu0 %6842  ;;  %19760 = vst [vmem:[#allocation139_spill] sm:$0xff] %v16615_v50 }
 0x44d   :  { %19759 = vst [vmem:[#allocation35_spill] sm:$0xff] %v16604_v23 }
 0x44e   :  { %7672 = vrot.lane.b32.xlu1 %v7397_v9, %s9645_s9  ;;  %7810 = vrot.lane.b32.xlu0 %v7466_v55, %s9645_s9  ;;  %v7405_v55 = vmul.f32 %v15819_v28, %v7029_v22  ;;  %v16636_v9 = vsel %vm6769_vm3, %v16309_v52, %v6691_v27  ;;  %v7042_v27 = vsel %vm6769_vm3, %v16099_v53, %v16067_v26 }
 0x44f   :  { %v7030_v26 = vsel %vm6769_vm3, %v16269_v3, %v16327_v24  ;;  %v7010_v53 = vsel %vm6769_vm3, %v16163_v36, %v16131_v60 }
 0x450   :  { %v16618_v31 = vpop.permute.xlu1 %6844  ;;  %v16623_v33 = vpop.permute.xlu0 %6878 }
 0x451   :  { %19761 = vst [vmem:[#allocation32_spill] sm:$0xff] %v16618_v31  ;;  %19762 = vst [vmem:[#allocation29_spill] sm:$0xff] %v16623_v33  ;;  %v7474_v33 = vmul.f32 %v15978_v57, %v16615_v50 }
 0x452   :  { %7684 = vrot.lane.b32.xlu1 %v7403_v42, %s9645_s9  ;;  %6970 = vrot.lane.b32.xlu0 %v16615_v50, %s9644_s14  ;;  %v7411_v42 = vmul.f32 %v15789_v54, %v16636_v9  ;;  %v6698_v50 = vld [vmem:[%s18358_s4 + $0x148] sm:$0xff] }
 0x454   :  { %v16632_v43 = vpop.permute.xlu1 %6880  ;;  %v16638_v46 = vpop.permute.xlu0 %6910 }
 0x455   :  { %19763 = vst [vmem:[#allocation150_spill] sm:$0xff] %v16632_v43  ;;  %19764 = vst [vmem:[#allocation40_spill] sm:$0xff] %v16638_v46  ;;  %v7382_v46 = vmul.f32 %v15735_v4, %v7042_v27  ;;  %v7413_v27 = vmul.f32 %v15789_v54, %v7030_v26  ;;  %v7031_v26 = vsel %vm6769_vm3, %v16284_v13, %v16343_v7 }
 0x456   :  { %7688 = vrot.lane.b32.xlu1 %v7405_v55, %s9645_s9  ;;  %6978 = vrot.lane.b32.xlu0 %v16443_v38, %s9644_s14  ;;  %v19767_v55 = vld [vmem:[#allocation127_spill] sm:$0xff]  ;;  %v7421_v60 = vmul.f32 %v15851_v41, %v7031_v26  ;;  %v19775_v26 = vld [vmem:[#allocation26_spill] sm:$0xff] }
 0x457   :  { %v6216_v38 = vadd.f32 %v16459_v44, %v19767_v55  ;;  %v6423_v44 = vld [vmem:[%s18358_s4 + $0x330] sm:$0xff] }
 0x458   :  { %v16645_v22 = vpop.permute.xlu1 %6912  ;;  %v16652_v43 = vpop.permute.xlu0 %6812 }
 0x459   :  { %19765 = vst [vmem:[#allocation133_spill] sm:$0xff] %v16645_v22  ;;  %19766 = vst [vmem:[#allocation141_spill] sm:$0xff] %v16652_v43 }
 0x45a   :  { %7700 = vrot.lane.b32.xlu1 %v7411_v42, %s9645_s9  ;;  %7826 = vrot.lane.b32.xlu0 %v7474_v33, %s9645_s9  ;;  %v6787_v33 = vsel %vm6769_vm3, %v16323_v45, %v6698_v50  ;;  %v16676_v42 = vadd.f32 %v6423_v44, %v6216_v38  ;;  %v7380_v50 = vmul.f32 %v15735_v4, %v7010_v53  ;;  %v6705_v53 = vld [vmem:[%s18358_s4 + $0x180] sm:$0xff] }
 0x45c   :  { %v16659_v31 = vpop.permute.xlu1 %6815  ;;  %v16667_v22 = vpop.permute.xlu0 %6846  ;;  %19770 = vst [vmem:[#allocation69_spill] sm:$0xff] %v16676_v42 }
 0x45d   :  { %19768 = vst [vmem:[#allocation120_spill] sm:$0xff] %v16659_v31  ;;  %19769 = vst [vmem:[#allocation67_spill] sm:$0xff] %v16667_v22 }
 0x45e   :  { %6988 = vrot.lane.b32.xlu1 %v6787_v33, %s9644_s14  ;;  %7642 = vrot.lane.b32.xlu0 %v7382_v46, %s9645_s9  ;;  %v7419_v46 = vmul.f32 %v15851_v41, %v6787_v33  ;;  %v7482_v33 = vmul.f32 %v16005_v48, %v16432_v25 }
 0x460   :  { %v16679_v55 = vpop.permute.xlu1 %6848  ;;  %v16684_v31 = vpop.permute.xlu0 %6914 }
 0x461   :  { %19771 = vst [vmem:[#allocation129_spill] sm:$0xff] %v16679_v55 }
 0x462   :  { %7704 = vrot.lane.b32.xlu1 %v7413_v27, %s9645_s9  ;;  %6942 = vrot.lane.b32.xlu0 %v16676_v42, %s9644_s14  ;;  %v7043_v27 = vsel %vm6769_vm3, %v16127_v18, %v16097_v5  ;;  %v6218_v42 = vadd.f32 %v16475_v16, %v19775_v26 }
 0x464   :  { %v16691_v38 = vpop.permute.xlu1 %6916  ;;  %v16696_v44 = vpop.permute.xlu0 %6946 }
 0x465   :  { %19772 = vst [vmem:[#allocation112_spill] sm:$0xff] %v16691_v38  ;;  %19773 = vst [vmem:[#allocation71_spill] sm:$0xff] %v16696_v44 }
 0x466   :  { %7716 = vrot.lane.b32.xlu1 %v7419_v46, %s9645_s9  ;;  %7638 = vrot.lane.b32.xlu0 %v7380_v50, %s9645_s9  ;;  %v16713_v46 = vsel %vm6769_vm3, %v16385_v63, %v6705_v53 }
 0x467   :  { %v7427_v25 = vmul.f32 %v15840_v39, %v16713_v46 }
 0x468   :  { %v16704_v36 = vpop.permute.xlu1 %6948  ;;  %v16715_v50 = vpop.permute.xlu0 %7634 }
 0x469   :  { %19774 = vst [vmem:[#allocation115_spill] sm:$0xff] %v16704_v36  ;;  %v7390_v36 = vmul.f32 %v15751_v17, %v7043_v27  ;;  %v7032_v27 = vsel %vm6769_vm3, %v16347_v40, %v16403_v29 }
 0x46a   :  { %7720 = vrot.lane.b32.xlu1 %v7421_v60, %s9645_s9  ;;  %7842 = vrot.lane.b32.xlu0 %v7482_v33, %s9645_s9  ;;  %v6424_v60 = vld [vmem:[%s18358_s4 + $0x338] sm:$0xff] }
 0x46b   :  { %v16733_v53 = vadd.f32 %v6424_v60, %v6218_v42  ;;  %v6712_v33 = vld [vmem:[%s18358_s4 + $0x1b8] sm:$0xff]  ;;  %v7429_v42 = vmul.f32 %v15840_v39, %v7032_v27  ;;  %v7011_v60 = vsel %vm6769_vm3, %v16185_v15, %v16159_v6  ;;  %v7033_v27 = vsel %vm6769_vm3, %v16361_v34, %v16419_v49  ;;  %v6719_v15 = vld [vmem:[%s18358_s4 + $0x1f0] sm:$0xff] }
 0x46c   :  { %v16724_v44 = vpop.permute.xlu1 %6920  ;;  %v16726_v5 = vpop.permute.xlu0 %6918  ;;  %v7437_v6 = vmul.f32 %v15881_v35, %v7033_v27 }
 0x46d   :  { %19776 = vst [vmem:[#allocation107_spill] sm:$0xff] %v16724_v44  ;;  %19777 = vst [vmem:[#allocation75_spill] sm:$0xff] %v16726_v5 }
 0x46e   :  { %7732 = vrot.lane.b32.xlu1 %v7427_v25, %s9645_s9  ;;  %7658 = vrot.lane.b32.xlu0 %v7390_v36, %s9645_s9  ;;  %19778 = vst [vmem:[#allocation83_spill] sm:$0xff] %v16733_v53  ;;  %v6793_v25 = vsel %vm6769_vm3, %v16399_v51, %v6712_v33  ;;  %v7388_v33 = vmul.f32 %v15751_v17, %v7011_v60 }
 0x46f   :  { %v7435_v44 = vmul.f32 %v15881_v35, %v6793_v25 }
 0x470   :  { %v16735_v16 = vpop.permute.xlu1 %6952  ;;  %v16743_v26 = vpop.permute.xlu0 %7650 }
 0x471   :  { %19779 = vst [vmem:[#allocation72_spill] sm:$0xff] %v16735_v16 }
 0x472   :  { %6992 = vrot.lane.b32.xlu1 %v6793_v25, %s9644_s14  ;;  %6974 = vrot.lane.b32.xlu0 %v16733_v53, %s9644_s14  ;;  %v7490_v25 = vmul.f32 %v16035_v20, %v16733_v53 }
 0x474   :  { %v16751_v36 = vpop.permute.xlu1 %6924  ;;  %v16756_v16 = vpop.permute.xlu0 %6950 }
 0x475   :  { %19780 = vst [vmem:[#allocation77_spill] sm:$0xff] %v16751_v36  ;;  %19781 = vst [vmem:[#allocation80_spill] sm:$0xff] %v16756_v16 }
 0x476   :  { %7736 = vrot.lane.b32.xlu1 %v7429_v42, %s9645_s9  ;;  %6982 = vrot.lane.b32.xlu0 %v16561_v8, %s9644_s14  ;;  %v19784_v42 = vld [vmem:[#allocation160_spill] sm:$0xff] }
 0x477   :  { %v7044_v60 = vsel %vm6769_vm3, %v19784_v42, %v16189_v32  ;;  %v7012_v32 = vsel %vm6769_vm3, %v16248_v30, %v16229_v61  ;;  %v19792_v61 = vld [vmem:[#allocation45_spill] sm:$0xff] }
 0x478   :  { %v16763_v5 = vpop.permute.xlu1 %6956  ;;  %v16768_v36 = vpop.permute.xlu0 %7666  ;;  %v7398_v27 = vmul.f32 %v15767_v11, %v7044_v60  ;;  %v19789_v60 = vld [vmem:[#allocation48_spill] sm:$0xff] }
 0x479   :  { %19782 = vst [vmem:[#allocation103_spill] sm:$0xff] %v16763_v5  ;;  %v19785_v5 = vld [vmem:[#allocation74_spill] sm:$0xff] }
 0x47a   :  { %7748 = vrot.lane.b32.xlu1 %v7435_v44, %s9645_s9  ;;  %7654 = vrot.lane.b32.xlu0 %v7388_v33, %s9645_s9  ;;  %v16785_v44 = vsel %vm6769_vm3, %v19785_v5, %v6719_v15 }
 0x47b   :  { %v7443_v16 = vmul.f32 %v15886_v1, %v16785_v44 }
 0x47c   :  { %v16776_v8 = vpop.permute.xlu1 %6928  ;;  %v16787_v33 = vpop.permute.xlu0 %6922 }
 0x47d   :  { %19783 = vst [vmem:[#allocation84_spill] sm:$0xff] %v16776_v8  ;;  %19786 = vst [vmem:[#allocation59_spill] sm:$0xff] %v16787_v33 }
 0x47e   :  { %7752 = vrot.lane.b32.xlu1 %v7437_v6, %s9645_s9  ;;  %7858 = vrot.lane.b32.xlu0 %v7490_v25, %s9645_s9  ;;  %v7396_v6 = vmul.f32 %v15767_v11, %v7012_v32  ;;  %v6726_v25 = vld [vmem:[%s18358_s4 + $0x228] sm:$0xff]  ;;  %v19794_v32 = vld [vmem:[#allocation5_spill] sm:$0xff] }
 0x47f   :  { %v6799_v30 = vsel %vm6769_vm3, %v19792_v61, %v6726_v25  ;;  %v19795_v11 = vld [vmem:[#allocation165_spill] sm:$0xff] }
 0x480   :  { %v16794_v53 = vpop.permute.xlu1 %6960  ;;  %v16799_v8 = vpop.permute.xlu0 %7682  ;;  %v7045_v17 = vsel %vm6769_vm3, %v19795_v11, %v16204_v14 }
 0x481   :  { %19787 = vst [vmem:[#allocation79_spill] sm:$0xff] %v16794_v53  ;;  %v19790_v53 = vld [vmem:[#allocation24_spill] sm:$0xff]  ;;  %v7406_v25 = vmul.f32 %v15819_v28, %v7045_v17  ;;  %v6733_v17 = vld [vmem:[%s18358_s4 + $0x260] sm:$0xff] }
 0x482   :  { %7764 = vrot.lane.b32.xlu1 %v7443_v16, %s9645_s9  ;;  %7674 = vrot.lane.b32.xlu0 %v7398_v27, %s9645_s9  ;;  %v7034_v33 = vsel %vm6769_vm3, %v19790_v53, %v19789_v60 }
 0x483   :  { %v7445_v16 = vmul.f32 %v15886_v1, %v7034_v33 }
 0x484   :  { %v16804_v15 = vpop.permute.xlu1 %6932  ;;  %v16812_v42 = vpop.permute.xlu0 %6954 }
 0x485   :  { %19788 = vst [vmem:[#allocation54_spill] sm:$0xff] %v16804_v15  ;;  %19791 = vst [vmem:[#allocation47_spill] sm:$0xff] %v16812_v42  ;;  %v7498_v15 = vmul.f32 %v19794_v32, %v16552_v10  ;;  %v19798_v42 = vld [vmem:[#allocation62_spill] sm:$0xff] }
 0x486   :  { %6996 = vrot.lane.b32.xlu1 %v6799_v30, %s9644_s14  ;;  %7670 = vrot.lane.b32.xlu0 %v7396_v6, %s9645_s9  ;;  %v7451_v6 = vmul.f32 %v15913_v59, %v6799_v30  ;;  %v7013_v30 = vsel %vm6769_vm3, %v16265_v47, %v16244_v58  ;;  %v19802_v47 = vld [vmem:[#allocation159_spill] sm:$0xff] }
 0x487   :  { %v7046_v58 = vsel %vm6769_vm3, %v19802_v47, %v16269_v3  ;;  %v7036_v3 = vsel %vm6769_vm3, %v16494_v2, %v16540_v62 }
 0x488   :  { %v16819_v27 = vpop.permute.xlu1 %6964  ;;  %v16826_v38 = vpop.permute.xlu0 %7698 }
 0x489   :  { %19793 = vst [vmem:[#allocation76_spill] sm:$0xff] %v16819_v27  ;;  %v19797_v27 = vld [vmem:[#allocation52_spill] sm:$0xff] }
 0x48a   :  { %7768 = vrot.lane.b32.xlu1 %v7445_v16, %s9645_s9  ;;  %7874 = vrot.lane.b32.xlu0 %v7498_v15, %s9645_s9  ;;  %v7035_v10 = vsel %vm6769_vm3, %v19798_v42, %v19797_v27  ;;  %v16852_v16 = vsel %vm6769_vm3, %v16526_v37, %v6733_v17 }
 0x48b   :  { %v7453_v14 = vmul.f32 %v15913_v59, %v7035_v10  ;;  %v7404_v10 = vmul.f32 %v15819_v28, %v7013_v30  ;;  %v6740_v30 = vld [vmem:[%s18358_s4 + $0x298] sm:$0xff] }
 0x48c   :  { %v16832_v33 = vpop.permute.xlu1 %6936  ;;  %v16837_v18 = vpop.permute.xlu0 %6926 }
 0x48d   :  { %19796 = vst [vmem:[#allocation148_spill] sm:$0xff] %v16832_v33  ;;  %19799 = vst [vmem:[#allocation92_spill] sm:$0xff] %v16837_v18  ;;  %v19808_v18 = vld [vmem:[#allocation164_spill] sm:$0xff] }
 0x48e   :  { %7780 = vrot.lane.b32.xlu1 %v7451_v6, %s9645_s9  ;;  %7690 = vrot.lane.b32.xlu0 %v7406_v25, %s9645_s9  ;;  %v7459_v25 = vmul.f32 %v15943_v56, %v16852_v16 }
 0x490   :  { %v16845_v15 = vpop.permute.xlu1 %6968  ;;  %v16854_v33 = vpop.permute.xlu0 %7714 }
 0x491   :  { %19800 = vst [vmem:[#allocation15_spill] sm:$0xff] %v16845_v15  ;;  %v7014_v15 = vsel %vm6769_vm3, %v16327_v24, %v16309_v52  ;;  %v7461_v24 = vmul.f32 %v15943_v56, %v7036_v3 }
 0x492   :  { %7784 = vrot.lane.b32.xlu1 %v7453_v14, %s9645_s9  ;;  %6986 = vrot.lane.b32.xlu0 %v16636_v9, %s9644_s14  ;;  %v7414_v14 = vmul.f32 %v15789_v54, %v7046_v58  ;;  %v19807_v58 = vld [vmem:[#allocation63_spill] sm:$0xff] }
 0x494   :  { %v16862_v6 = vpop.permute.xlu1 %6940  ;;  %v16867_v17 = vpop.permute.xlu0 %6958 }
 0x495   :  { %19801 = vst [vmem:[#allocation82_spill] sm:$0xff] %v16862_v6  ;;  %19803 = vst [vmem:[#allocation44_spill] sm:$0xff] %v16867_v17  ;;  %v7412_v6 = vmul.f32 %v15789_v54, %v7014_v15 }
 0x496   :  { %7796 = vrot.lane.b32.xlu1 %v7459_v25, %s9645_s9  ;;  %7686 = vrot.lane.b32.xlu0 %v7404_v10, %s9645_s9  ;;  %v6805_v10 = vsel %vm6769_vm3, %v16536_v21, %v6740_v30  ;;  %v19806_v25 = vld [vmem:[#allocation94_spill] sm:$0xff] }
 0x497   :  { %v7467_v3 = vmul.f32 %v15957_v0, %v6805_v10 }
 0x498   :  { %v16872_v9 = vpop.permute.xlu1 %6972  ;;  %v16883_v17 = vpop.permute.xlu0 %7730 }
 0x499   :  { %19804 = vst [vmem:[#allocation13_spill] sm:$0xff] %v16872_v9  ;;  %19805 = vst [vmem:[#allocation42_spill] sm:$0xff] %v16883_v17  ;;  %v7202_v9 = vmul.f32 %v19807_v58, %v19806_v25  ;;  %v7047_v17 = vsel %vm6769_vm3, %v19808_v18, %v16284_v13  ;;  %v19811_v25 = vld [vmem:[#allocation41_spill] sm:$0xff]  ;;  %v19812_v18 = vld [vmem:[#allocation46_spill] sm:$0xff] }
 0x49a   :  { %7000 = vrot.lane.b32.xlu1 %v6805_v10, %s9644_s14  ;;  %7706 = vrot.lane.b32.xlu0 %v7414_v14, %s9645_s9  ;;  %v7422_v15 = vmul.f32 %v15851_v41, %v7047_v17  ;;  %v6747_v17 = vld [vmem:[%s18358_s4 + $0x2d0] sm:$0xff]  ;;  %v7015_v10 = vsel %vm6769_vm3, %v16343_v7, %v16323_v45  ;;  %v19817_v45 = vld [vmem:[#allocation34_spill] sm:$0xff] }
 0x49c   :  { %v16893_v52 = vpop.permute.xlu1 %7636  ;;  %v16901_v21 = vpop.permute.xlu0 %6930 }
 0x49d   :  { %v7891_v30 = vsel %vm7890_vm4, %v16715_v50, %v16893_v52  ;;  %19809 = vst [vmem:[#allocation93_spill] sm:$0xff] %v16901_v21  ;;  %v7037_v50 = vsel %vm6769_vm3, %v19812_v18, %v19811_v25 }
 0x49e   :  { %v8115_v14 = vadd.f32 %v7891_v30, %v7202_v9  ;;  %7800 = vrot.lane.b32.xlu1 %v7461_v24, %s9645_s9  ;;  %7702 = vrot.lane.b32.xlu0 %v7412_v6, %s9645_s9  ;;  %v7469_v6 = vmul.f32 %v15957_v0, %v7037_v50  ;;  %v16930_v24 = vsel %vm6769_vm3, %v16594_v12, %v6747_v17 }
 0x49f   :  { %v7420_v50 = vmul.f32 %v15851_v41, %v7015_v10  ;;  %v7048_v17 = vsel %vm6769_vm3, %v19817_v45, %v16347_v40  ;;  %v6754_v40 = vld [vmem:[%s18358_s4 + $0x308] sm:$0xff] }
 0x4a0   :  { %8227 = vst [vmem:[%s18358_s4] sm:$0xff] %v8115_v14  ;;  %v16910_v13 = vpop.permute.xlu1 %6980  ;;  %v16915_v21 = vpop.permute.xlu0 %7746  ;;  %v19814_v14 = vld [vmem:[#allocation25_spill] sm:$0xff]  ;;  %v7430_v10 = vmul.f32 %v15840_v39, %v7048_v17  ;;  %v6811_v17 = vsel %vm6769_vm3, %v16604_v23, %v6754_v40 }
 0x4a1   :  { %19810 = vst [vmem:[#allocation144_spill] sm:$0xff] %v16910_v13  ;;  %v7475_v13 = vmul.f32 %v15978_v57, %v16930_v24 }
 0x4a2   :  { %7812 = vrot.lane.b32.xlu1 %v7467_v3, %s9645_s9  ;;  %7722 = vrot.lane.b32.xlu0 %v7422_v15, %s9645_s9  ;;  %v19815_v15 = vld [vmem:[#allocation58_spill] sm:$0xff] }
 0x4a3   :  { %v7209_v3 = vmul.f32 %v19815_v15, %v19814_v14 }
 0x4a4   :  { %v16923_v9 = vpop.permute.xlu1 %7640  ;;  %v16932_v30 = vpop.permute.xlu0 %6962 }
 0x4a5   :  { %19813 = vst [vmem:[#allocation91_spill] sm:$0xff] %v16932_v30 }
 0x4a6   :  { %7816 = vrot.lane.b32.xlu1 %v7469_v6, %s9645_s9  ;;  %6990 = vrot.lane.b32.xlu0 %v16713_v46, %s9644_s14 }
 0x4a8   :  { %v16942_v7 = vpop.permute.xlu1 %7652  ;;  %v16950_v30 = vpop.permute.xlu0 %7762 }
 0x4a9   :  { %19816 = vst [vmem:[#allocation127_spill] sm:$0xff] %v16942_v7  ;;  %v7898_v6 = vsel %vm7890_vm4, %v16743_v26, %v16942_v7  ;;  %19818 = vst [vmem:[#allocation26_spill] sm:$0xff] %v16950_v30  ;;  %v7016_v26 = vsel %vm6769_vm3, %v16403_v29, %v16385_v63  ;;  %v19822_v29 = vld [vmem:[#allocation21_spill] sm:$0xff] }
 0x4aa   :  { %v8122_v46 = vadd.f32 %v7898_v6, %v7209_v3  ;;  %7828 = vrot.lane.b32.xlu1 %v7475_v13, %s9645_s9  ;;  %7718 = vrot.lane.b32.xlu0 %v7420_v50, %s9645_s9  ;;  %v19820_v13 = vld [vmem:[#allocation31_spill] sm:$0xff]  ;;  %v7428_v6 = vmul.f32 %v15840_v39, %v7016_v26  ;;  %v7049_v63 = vsel %vm6769_vm3, %v19822_v29, %v16361_v34  ;;  %v19825_v26 = vld [vmem:[#allocation32_spill] sm:$0xff]  ;;  %v19828_v34 = vld [vmem:[#allocation70_spill] sm:$0xff] }
 0x4ab   :  { %v7038_v3 = vsel %vm6769_vm3, %v19820_v13, %v16608_v19  ;;  %v7438_v40 = vmul.f32 %v15881_v35, %v7049_v63 }
 0x4ac   :  { %8234 = vst [vmem:[%s18358_s4 + $0x38] sm:$0xff] %v8122_v46  ;;  %v16958_v14 = vpop.permute.xlu1 %6944  ;;  %v16969_v50 = vpop.permute.xlu0 %6934  ;;  %v7477_v46 = vmul.f32 %v15978_v57, %v7038_v3  ;;  %v19826_v3 = vld [vmem:[#allocation134_spill] sm:$0xff] }
 0x4ad   :  { %19819 = vst [vmem:[#allocation74_spill] sm:$0xff] %v16958_v14  ;;  %19821 = vst [vmem:[#allocation48_spill] sm:$0xff] %v16969_v50  ;;  %v7039_v23 = vsel %vm6769_vm3, %v19826_v3, %v19825_v26 }
 0x4ae   :  { %7004 = vrot.lane.b32.xlu1 %v6811_v17, %s9644_s14  ;;  %7738 = vrot.lane.b32.xlu0 %v7430_v10, %s9645_s9  ;;  %v7483_v10 = vmul.f32 %v16005_v48, %v6811_v17  ;;  %v6761_v17 = vld [vmem:[%s18358_s4 + $0x340] sm:$0xff] }
 0x4b0   :  { %v16977_v14 = vpop.permute.xlu1 %7656  ;;  %v16982_v30 = vpop.permute.xlu0 %7778 }
 0x4b1   :  { %19823 = vst [vmem:[#allocation24_spill] sm:$0xff] %v16982_v30 }
 0x4b2   :  { %7832 = vrot.lane.b32.xlu1 %v7477_v46, %s9645_s9  ;;  %7734 = vrot.lane.b32.xlu0 %v7428_v6, %s9645_s9  ;;  %v19829_v46 = vld [vmem:[#allocation2_spill] sm:$0xff]  ;;  %v7485_v6 = vmul.f32 %v16005_v48, %v7039_v23 }
 0x4b3   :  { %v7216_v30 = vmul.f32 %v19829_v46, %v19828_v34 }
 0x4b4   :  { %v16988_v50 = vpop.permute.xlu1 %6976  ;;  %v16993_v7 = vpop.permute.xlu0 %6966 }
 0x4b5   :  { %19824 = vst [vmem:[#allocation45_spill] sm:$0xff] %v16988_v50  ;;  %19827 = vst [vmem:[#allocation5_spill] sm:$0xff] %v16993_v7  ;;  %v7017_v50 = vsel %vm6769_vm3, %v16419_v49, %v16399_v51 }
 0x4b6   :  { %7844 = vrot.lane.b32.xlu1 %v7483_v10, %s9645_s9  ;;  %7754 = vrot.lane.b32.xlu0 %v7438_v40, %s9645_s9  ;;  %v17010_v10 = vsel %vm6769_vm3, %v16652_v43, %v6761_v17  ;;  %v7436_v7 = vmul.f32 %v15881_v35, %v7017_v50 }
 0x4b7   :  { %v7491_v49 = vmul.f32 %v16035_v20, %v17010_v10 }
 0x4b8   :  { %v17003_v63 = vpop.permute.xlu1 %7668  ;;  %v17015_v34 = vpop.permute.xlu0 %7794 }
 0x4b9   :  { %v7905_v40 = vsel %vm7890_vm4, %v16768_v36, %v17003_v63  ;;  %19830 = vst [vmem:[#allocation165_spill] sm:$0xff] %v17015_v34  ;;  %v19832_v36 = vld [vmem:[#allocation27_spill] sm:$0xff]  ;;  %v19838_v34 = vld [vmem:[#allocation106_spill] sm:$0xff] }
 0x4ba   :  { %v8129_v23 = vadd.f32 %v7905_v40, %v7216_v30  ;;  %7848 = vrot.lane.b32.xlu1 %v7485_v6, %s9645_s9  ;;  %6994 = vrot.lane.b32.xlu0 %v16785_v44, %s9644_s14  ;;  %v7050_v30 = vsel %vm6769_vm3, %v19832_v36, %v19790_v53  ;;  %v6768_v6 = vld [vmem:[%s18358_s4 + $0x378] sm:$0xff]  ;;  %v7018_v40 = vsel %vm6769_vm3, %v19789_v60, %v19785_v5 }
 0x4bb   :  { %v7446_v44 = vmul.f32 %v15886_v1, %v7050_v30  ;;  %v19834_v53 = vld [vmem:[#allocation29_spill] sm:$0xff]  ;;  %v19837_v30 = vld [vmem:[#allocation87_spill] sm:$0xff]  ;;  %v7444_v43 = vmul.f32 %v15886_v1, %v7018_v40 }
 0x4bc   :  { %8241 = vst [vmem:[%s18358_s4 + $0x70] sm:$0xff] %v8129_v23  ;;  %v17026_v51 = vpop.permute.xlu1 %6984  ;;  %v17031_v17 = vpop.permute.xlu0 %6938  ;;  %v7040_v23 = vsel %vm6769_vm3, %v19834_v53, %v16667_v22  ;;  %v19840_v22 = vld [vmem:[#allocation179_spill] sm:$0xff] }
 0x4bd   :  { %19831 = vst [vmem:[#allocation52_spill] sm:$0xff] %v17026_v51  ;;  %19833 = vst [vmem:[#allocation62_spill] sm:$0xff] %v17031_v17  ;;  %v7223_v17 = vmul.f32 %v19838_v34, %v19837_v30  ;;  %v7493_v5 = vmul.f32 %v16035_v20, %v7040_v23  ;;  %v19842_v30 = vld [vmem:[#allocation150_spill] sm:$0xff] }
 0x4be   :  { %7860 = vrot.lane.b32.xlu1 %v7491_v49, %s9645_s9  ;;  %7750 = vrot.lane.b32.xlu0 %v7436_v7, %s9645_s9  ;;  %v19836_v49 = vld [vmem:[#allocation120_spill] sm:$0xff] }
 0x4bf   :  { %v6817_v7 = vsel %vm6769_vm3, %v19836_v49, %v6768_v6 }
 0x4c0   :  { %v17036_v50 = vpop.permute.xlu1 %7672  ;;  %v17047_v51 = vpop.permute.xlu0 %7810  ;;  %v7499_v23 = vmul.f32 %v19794_v32, %v6817_v7 }
 0x4c1   :  { %19835 = vst [vmem:[#allocation159_spill] sm:$0xff] %v17047_v51  ;;  %v7051_v51 = vsel %vm6769_vm3, %v19840_v22, %v19798_v42 }
 0x4c2   :  { %7008 = vrot.lane.b32.xlu1 %v6817_v7, %s9644_s14  ;;  %7770 = vrot.lane.b32.xlu0 %v7446_v44, %s9645_s9  ;;  %v7454_v40 = vmul.f32 %v15913_v59, %v7051_v51  ;;  %v19844_v51 = vld [vmem:[#allocation20_spill] sm:$0xff] }
 0x4c4   :  { %v17057_v60 = vpop.permute.xlu1 %7684  ;;  %v17065_v49 = vpop.permute.xlu0 %6970 }
 0x4c5   :  { %19839 = vst [vmem:[#allocation94_spill] sm:$0xff] %v17057_v60  ;;  %v7912_v6 = vsel %vm7890_vm4, %v16799_v8, %v17057_v60  ;;  %19841 = vst [vmem:[#allocation41_spill] sm:$0xff] %v17065_v49  ;;  %v7041_v8 = vsel %vm6769_vm3, %v19842_v30, %v16679_v55 }
 0x4c6   :  { %v8136_v44 = vadd.f32 %v7912_v6, %v7223_v17  ;;  %7864 = vrot.lane.b32.xlu1 %v7493_v5, %s9645_s9  ;;  %7766 = vrot.lane.b32.xlu0 %v7444_v43, %s9645_s9  ;;  %v19843_v43 = vld [vmem:[#allocation102_spill] sm:$0xff]  ;;  %v7501_v7 = vmul.f32 %v19794_v32, %v7041_v8  ;;  %v7019_v6 = vsel %vm6769_vm3, %v19797_v27, %v19792_v61 }
 0x4c7   :  { %v7230_v17 = vmul.f32 %v19844_v51, %v19843_v43  ;;  %v7452_v8 = vmul.f32 %v15913_v59, %v7019_v6  ;;  %v19849_v43 = vld [vmem:[#allocation30_spill] sm:$0xff]  ;;  %v19857_v51 = vld [vmem:[#allocation75_spill] sm:$0xff] }
 0x4c8   :  { %8248 = vst [vmem:[%s18358_s4 + $0xa8] sm:$0xff] %v8136_v44  ;;  %v17074_v42 = vpop.permute.xlu1 %7688  ;;  %v17079_v49 = vpop.permute.xlu0 %6978  ;;  %v19846_v44 = vld [vmem:[#allocation138_spill] sm:$0xff] }
 0x4c9   :  { %v7058_v60 = vsel %vm6769_vm3, %v16684_v31, %v19846_v44  ;;  %v19851_v44 = vld [vmem:[#allocation154_spill] sm:$0xff] }
 0x4ca   :  { %7876 = vrot.lane.b32.xlu1 %v7499_v23, %s9645_s9  ;;  %7786 = vrot.lane.b32.xlu0 %v7454_v40, %s9645_s9  ;;  %v7383_v61 = vmul.f32 %v15735_v4, %v7058_v60 }
 0x4cc   :  { %v17086_v5 = vpop.permute.xlu1 %7700  ;;  %v17097_v40 = vpop.permute.xlu0 %7826 }
 0x4cd   :  { %19845 = vst [vmem:[#allocation46_spill] sm:$0xff] %v17086_v5  ;;  %v7919_v23 = vsel %vm7890_vm4, %v16826_v38, %v17086_v5  ;;  %19847 = vst [vmem:[#allocation25_spill] sm:$0xff] %v17097_v40  ;;  %v7205_v38 = vmul.f32 %v19807_v58, %v19849_v43  ;;  %v19856_v5 = vld [vmem:[#allocation160_spill] sm:$0xff] }
 0x4ce   :  { %v8143_v55 = vadd.f32 %v7919_v23, %v7230_v17  ;;  %7880 = vrot.lane.b32.xlu1 %v7501_v7, %s9645_s9  ;;  %6998 = vrot.lane.b32.xlu0 %v16852_v16, %s9644_s14  ;;  %v19850_v17 = vld [vmem:[#allocation86_spill] sm:$0xff]  ;;  %v19852_v23 = vld [vmem:[#allocation112_spill] sm:$0xff] }
 0x4cf   :  { %v7052_v7 = vsel %vm6769_vm3, %v19850_v17, %v16494_v2  ;;  %v7059_v16 = vsel %vm6769_vm3, %v19852_v23, %v19851_v44  ;;  %v7020_v44 = vsel %vm6769_vm3, %v16540_v62, %v16526_v37  ;;  %v7060_v23 = vsel %vm6769_vm3, %v19857_v51, %v19856_v5  ;;  %v19862_v51 = vld [vmem:[#allocation100_spill] sm:$0xff] }
 0x4d0   :  { %8255 = vst [vmem:[%s18358_s4 + $0xe0] sm:$0xff] %v8143_v55  ;;  %v17107_v27 = vpop.permute.xlu1 %6988  ;;  %v17117_v6 = vpop.permute.xlu0 %7642  ;;  %v7462_v43 = vmul.f32 %v15943_v56, %v7052_v7  ;;  %v19859_v7 = vld [vmem:[#allocation161_spill] sm:$0xff]  ;;  %v7460_v37 = vmul.f32 %v15943_v56, %v7020_v44 }
 0x4d1   :  { %19848 = vst [vmem:[#allocation34_spill] sm:$0xff] %v17107_v27  ;;  %19853 = vst [vmem:[#allocation31_spill] sm:$0xff] %v17117_v6  ;;  %v7894_v60 = vsel %vm7890_vm4, %v16923_v9, %v17117_v6  ;;  %v19854_v27 = vld [vmem:[#allocation43_spill] sm:$0xff] }
 0x4d2   :  { %7644 = vrot.lane.b32.xlu1 %v7383_v61, %s9645_s9  ;;  %7782 = vrot.lane.b32.xlu0 %v7452_v8, %s9645_s9  ;;  %v8118_v55 = vadd.f32 %v7894_v60, %v7205_v38  ;;  %v7391_v40 = vmul.f32 %v19854_v27, %v7059_v16  ;;  %v19858_v61 = vld [vmem:[#allocation105_spill] sm:$0xff]  ;;  %v19860_v16 = vld [vmem:[#allocation90_spill] sm:$0xff] }
 0x4d3   :  { %v7204_v38 = vmul.f32 %v19807_v58, %v19858_v61  ;;  %v7237_v62 = vmul.f32 %v19860_v16, %v19859_v7  ;;  %v19861_v60 = vld [vmem:[#allocation121_spill] sm:$0xff] }
 0x4d4   :  { %v17126_v2 = vpop.permute.xlu1 %7704  ;;  %8230 = vst [vmem:[%s18358_s4 + $0x18] sm:$0xff] %v8118_v55  ;;  %v17137_v8 = vpop.permute.xlu0 %6942  ;;  %v7399_v5 = vmul.f32 %v19861_v60, %v7060_v23  ;;  %v7203_v55 = vmul.f32 %v19807_v58, %v19862_v51 }
 0x4d5   :  { %19855 = vst [vmem:[#allocation21_spill] sm:$0xff] %v17126_v2  ;;  %v19863_v2 = vld [vmem:[#allocation155_spill] sm:$0xff] }
 0x4d6   :  { %7660 = vrot.lane.b32.xlu1 %v7391_v40, %s9645_s9  ;;  %7802 = vrot.lane.b32.xlu0 %v7462_v43, %s9645_s9  ;;  %v7053_v40 = vsel %vm6769_vm3, %v19863_v2, %v19812_v18  ;;  %v19864_v43 = vld [vmem:[#allocation107_spill] sm:$0xff] }
 0x4d7   :  { %v7061_v61 = vsel %vm6769_vm3, %v19864_v43, %v19795_v11  ;;  %v7470_v11 = vmul.f32 %v15957_v0, %v7053_v40 }
 0x4d8   :  { %v17147_v6 = vpop.permute.xlu1 %7716  ;;  %v7639_v44 = vpop.permute.xlu0 %7638  ;;  %v7407_v43 = vmul.f32 %v15819_v28, %v7061_v61  ;;  %v19870_v61 = vld [vmem:[#allocation50_spill] sm:$0xff] }
 0x4d9   :  { %v7926_v7 = vsel %vm7890_vm4, %v16854_v33, %v17147_v6  ;;  %v7892_v23 = vsel %vm7890_vm4, %v16893_v52, %v7639_v44  ;;  %v7893_v51 = vsel %vm7890_vm4, %v7639_v44, %v16923_v9  ;;  %v19865_v52 = vld [vmem:[#allocation59_spill] sm:$0xff]  ;;  %v19872_v44 = vld [vmem:[#allocation77_spill] sm:$0xff] }
 0x4da   :  { %v8150_v16 = vadd.f32 %v7926_v7, %v7237_v62  ;;  %7676 = vrot.lane.b32.xlu1 %v7399_v5, %s9645_s9  ;;  %7798 = vrot.lane.b32.xlu0 %v7460_v37, %s9645_s9  ;;  %v8116_v18 = vadd.f32 %v7892_v23, %v7203_v55  ;;  %v8117_v58 = vadd.f32 %v7893_v51, %v7204_v38  ;;  %v19868_v62 = vld [vmem:[#allocation56_spill] sm:$0xff]  ;;  %v19873_v23 = vld [vmem:[#allocation42_spill] sm:$0xff] }
 0x4db   :  { %v7062_v9 = vsel %vm6769_vm3, %v19865_v52, %v19802_v47  ;;  %v19869_v55 = vld [vmem:[#allocation96_spill] sm:$0xff] }
 0x4dc   :  { %8262 = vst [vmem:[%s18358_s4 + $0x118] sm:$0xff] %v8150_v16  ;;  %v17171_v33 = vpop.permute.xlu1 %7720  ;;  %8228 = vst [vmem:[%s18358_s4 + $0x8] sm:$0xff] %v8116_v18  ;;  %v17182_v38 = vpop.permute.xlu0 %7842  ;;  %v19867_v16 = vld [vmem:[#allocation114_spill] sm:$0xff]  ;;  %v7415_v5 = vmul.f32 %v15789_v54, %v7062_v9  ;;  %v7212_v40 = vmul.f32 %v19815_v15, %v19869_v55  ;;  %v19871_v7 = vld [vmem:[#allocation164_spill] sm:$0xff] }
 0x4dd   :  { %8229 = vst [vmem:[%s18358_s4 + $0x10] sm:$0xff] %v8117_v58  ;;  %19866 = vst [vmem:[#allocation32_spill] sm:$0xff] %v17182_v38  ;;  %v7244_v37 = vmul.f32 %v19868_v62, %v19867_v16  ;;  %v7021_v58 = vsel %vm6769_vm3, %v19811_v25, %v19870_v61 }
 0x4de   :  { %7692 = vrot.lane.b32.xlu1 %v7407_v43, %s9645_s9  ;;  %7818 = vrot.lane.b32.xlu0 %v7470_v11, %s9645_s9  ;;  %v7063_v43 = vsel %vm6769_vm3, %v19872_v44, %v19871_v7  ;;  %v7468_v16 = vmul.f32 %v15957_v0, %v7021_v58 }
 0x4df   :  { %v7423_v55 = vmul.f32 %v15851_v41, %v7063_v43 }
 0x4e0   :  { %v17189_v47 = vpop.permute.xlu1 %7732  ;;  %v17202_v18 = vpop.permute.xlu0 %7658 }
 0x4e1   :  { %v7933_v51 = vsel %vm7890_vm4, %v19873_v23, %v17189_v47  ;;  %19874 = vst [vmem:[#allocation134_spill] sm:$0xff] %v17202_v18  ;;  %v7901_v9 = vsel %vm7890_vm4, %v16977_v14, %v17202_v18  ;;  %v19883_v18 = vld [vmem:[#allocation97_spill] sm:$0xff] }
 0x4e2   :  { %v8157_v11 = vadd.f32 %v7933_v51, %v7244_v37  ;;  %7708 = vrot.lane.b32.xlu1 %v7415_v5, %s9645_s9  ;;  %7002 = vrot.lane.b32.xlu0 %v16930_v24, %s9644_s14  ;;  %v8125_v25 = vadd.f32 %v7901_v9, %v7212_v40  ;;  %v19876_v37 = vld [vmem:[#allocation3_spill] sm:$0xff]  ;;  %v19877_v5 = vld [vmem:[#allocation92_spill] sm:$0xff] }
 0x4e3   :  { %v7054_v7 = vsel %vm6769_vm3, %v19876_v37, %v19820_v13  ;;  %v7064_v23 = vsel %vm6769_vm3, %v19877_v5, %v19817_v45  ;;  %v7022_v45 = vsel %vm6769_vm3, %v16608_v19, %v16594_v12  ;;  %v19879_v13 = vld [vmem:[#allocation84_spill] sm:$0xff] }
 0x4e4   :  { %8269 = vst [vmem:[%s18358_s4 + $0x150] sm:$0xff] %v8157_v11  ;;  %v17215_v61 = vpop.permute.xlu1 %6992  ;;  %8237 = vst [vmem:[%s18358_s4 + $0x50] sm:$0xff] %v8125_v25  ;;  %v17226_v24 = vpop.permute.xlu0 %6974  ;;  %v7478_v40 = vmul.f32 %v15978_v57, %v7054_v7  ;;  %v7431_v58 = vmul.f32 %v15840_v39, %v7064_v23  ;;  %v7065_v51 = vsel %vm6769_vm3, %v19879_v13, %v19822_v29  ;;  %v19880_v9 = vld [vmem:[#allocation88_spill] sm:$0xff] }
 0x4e5   :  { %19875 = vst [vmem:[#allocation70_spill] sm:$0xff] %v17215_v61  ;;  %19878 = vst [vmem:[#allocation27_spill] sm:$0xff] %v17226_v24  ;;  %v7211_v25 = vmul.f32 %v19815_v15, %v19880_v9  ;;  %v7476_v23 = vmul.f32 %v15978_v57, %v7022_v45  ;;  %v7439_v12 = vmul.f32 %v15881_v35, %v7065_v51  ;;  %v19884_v24 = vld [vmem:[#allocation17_spill] sm:$0xff]  ;;  %v19886_v51 = vld [vmem:[#allocation127_spill] sm:$0xff] }
 0x4e6   :  { %7724 = vrot.lane.b32.xlu1 %v7423_v55, %s9645_s9  ;;  %7814 = vrot.lane.b32.xlu0 %v7468_v16, %s9645_s9  ;;  %v19881_v16 = vld [vmem:[#allocation53_spill] sm:$0xff]  ;;  %v19882_v55 = vld [vmem:[#allocation111_spill] sm:$0xff]  ;;  %v7210_v29 = vmul.f32 %v19815_v15, %v19883_v18 }
 0x4e7   :  { %v7251_v7 = vmul.f32 %v19882_v55, %v19881_v16 }
 0x4e8   :  { %v17232_v43 = vpop.permute.xlu1 %7736  ;;  %v17240_v11 = vpop.permute.xlu0 %6982 }
 0x4ea   :  { %7740 = vrot.lane.b32.xlu1 %v7431_v58, %s9645_s9  ;;  %7834 = vrot.lane.b32.xlu0 %v7478_v40, %s9645_s9  ;;  %v7055_v58 = vsel %vm6769_vm3, %v19884_v24, %v19826_v3  ;;  %v19885_v40 = vld [vmem:[#allocation93_spill] sm:$0xff] }
 0x4eb   :  { %v7066_v9 = vsel %vm6769_vm3, %v19885_v40, %v19832_v36  ;;  %v7486_v36 = vmul.f32 %v16005_v48, %v7055_v58 }
 0x4ec   :  { %v17250_v19 = vpop.permute.xlu1 %7748  ;;  %v7655_v45 = vpop.permute.xlu0 %7654  ;;  %v7447_v61 = vmul.f32 %v15886_v1, %v7066_v9  ;;  %v19891_v9 = vld [vmem:[#allocation35_spill] sm:$0xff] }
 0x4ed   :  { %v7940_v16 = vsel %vm7890_vm4, %v16915_v21, %v17250_v19  ;;  %v7899_v38 = vsel %vm7890_vm4, %v19886_v51, %v7655_v45  ;;  %v7900_v18 = vsel %vm7890_vm4, %v7655_v45, %v16977_v14  ;;  %v19893_v45 = vld [vmem:[#allocation26_spill] sm:$0xff] }
 0x4ee   :  { %v8164_v55 = vadd.f32 %v7940_v16, %v7251_v7  ;;  %7756 = vrot.lane.b32.xlu1 %v7439_v12, %s9645_s9  ;;  %7830 = vrot.lane.b32.xlu0 %v7476_v23, %s9645_s9  ;;  %v8123_v3 = vadd.f32 %v7899_v38, %v7210_v29  ;;  %v8124_v15 = vadd.f32 %v7900_v18, %v7211_v25  ;;  %v19887_v7 = vld [vmem:[#allocation54_spill] sm:$0xff]  ;;  %v19890_v29 = vld [vmem:[#allocation89_spill] sm:$0xff]  ;;  %v19892_v16 = vld [vmem:[#allocation48_spill] sm:$0xff] }
 0x4ef   :  { %v7067_v14 = vsel %vm6769_vm3, %v19887_v7, %v19840_v22  ;;  %v19888_v25 = vld [vmem:[#allocation126_spill] sm:$0xff]  ;;  %v7219_v58 = vmul.f32 %v19829_v46, %v19890_v29 }
 0x4f0   :  { %8276 = vst [vmem:[%s18358_s4 + $0x188] sm:$0xff] %v8164_v55  ;;  %v17274_v21 = vpop.permute.xlu1 %7752  ;;  %8235 = vst [vmem:[%s18358_s4 + $0x40] sm:$0xff] %v8123_v3  ;;  %v17285_v38 = vpop.permute.xlu0 %7858  ;;  %v19889_v55 = vld [vmem:[#allocation124_spill] sm:$0xff]  ;;  %v7455_v12 = vmul.f32 %v15913_v59, %v7067_v14 }
 0x4f1   :  { %8236 = vst [vmem:[%s18358_s4 + $0x48] sm:$0xff] %v8124_v15  ;;  %v7258_v23 = vmul.f32 %v19889_v55, %v19888_v25  ;;  %v7023_v15 = vsel %vm6769_vm3, %v19825_v26, %v19891_v9  ;;  %v19896_v9 = vld [vmem:[#allocation176_spill] sm:$0xff] }
 0x4f2   :  { %7772 = vrot.lane.b32.xlu1 %v7447_v61, %s9645_s9  ;;  %7850 = vrot.lane.b32.xlu0 %v7486_v36, %s9645_s9  ;;  %v7068_v61 = vsel %vm6769_vm3, %v19892_v16, %v19850_v17  ;;  %v7484_v14 = vmul.f32 %v16005_v48, %v7023_v15 }
 0x4f3   :  { %v7463_v17 = vmul.f32 %v15943_v56, %v7068_v61 }
 0x4f4   :  { %v17292_v22 = vpop.permute.xlu1 %7764  ;;  %v17305_v18 = vpop.permute.xlu0 %7674 }
 0x4f5   :  { %v7947_v51 = vsel %vm7890_vm4, %v19893_v45, %v17292_v22  ;;  %19894 = vst [vmem:[#allocation29_spill] sm:$0xff] %v17305_v18  ;;  %v7908_v36 = vsel %vm7890_vm4, %v17036_v50, %v17305_v18  ;;  %v19897_v45 = vld [vmem:[#allocation40_spill] sm:$0xff]  ;;  %v19900_v18 = vld [vmem:[#allocation67_spill] sm:$0xff] }
 0x4f6   :  { %v8171_v3 = vadd.f32 %v7947_v51, %v7258_v23  ;;  %7788 = vrot.lane.b32.xlu1 %v7455_v12, %s9645_s9  ;;  %7006 = vrot.lane.b32.xlu0 %v17010_v10, %s9644_s14  ;;  %v8132_v26 = vadd.f32 %v7908_v36, %v7219_v58  ;;  %v19895_v23 = vld [vmem:[#allocation23_spill] sm:$0xff]  ;;  %v7217_v12 = vmul.f32 %v19829_v46, %v19896_v9  ;;  %v19898_v58 = vld [vmem:[#allocation148_spill] sm:$0xff] }
 0x4f7   :  { %v7218_v29 = vmul.f32 %v19829_v46, %v19895_v23  ;;  %v7056_v10 = vsel %vm6769_vm3, %v19897_v45, %v19834_v53  ;;  %v7069_v15 = vsel %vm6769_vm3, %v19898_v58, %v19863_v2 }
 0x4f8   :  { %8283 = vst [vmem:[%s18358_s4 + $0x1c0] sm:$0xff] %v8171_v3  ;;  %v17318_v25 = vpop.permute.xlu1 %6996  ;;  %8244 = vst [vmem:[%s18358_s4 + $0x88] sm:$0xff] %v8132_v26  ;;  %v7671_v61 = vpop.permute.xlu0 %7670  ;;  %v7494_v23 = vmul.f32 %v16035_v20, %v7056_v10  ;;  %v7471_v2 = vmul.f32 %v15957_v0, %v7069_v15  ;;  %v19899_v26 = vld [vmem:[#allocation141_spill] sm:$0xff] }
 0x4f9   :  { %v7906_v51 = vsel %vm7890_vm4, %v17003_v63, %v7671_v61  ;;  %v7907_v3 = vsel %vm7890_vm4, %v7671_v61, %v17036_v50  ;;  %v7024_v46 = vsel %vm6769_vm3, %v19900_v18, %v19899_v26  ;;  %v19901_v63 = vld [vmem:[#allocation62_spill] sm:$0xff]  ;;  %v19906_v15 = vld [vmem:[#allocation133_spill] sm:$0xff] }
 0x4fa   :  { %7846 = vrot.lane.b32.xlu0 %v7484_v14, %s9645_s9  ;;  %7804 = vrot.lane.b32.xlu1 %v7463_v17, %s9645_s9  ;;  %v8130_v53 = vadd.f32 %v7906_v51, %v7217_v12  ;;  %v8131_v36 = vadd.f32 %v7907_v3, %v7218_v29  ;;  %v7070_v50 = vsel %vm6769_vm3, %v19901_v63, %v19876_v37  ;;  %v19903_v29 = vld [vmem:[#allocation128_spill] sm:$0xff]  ;;  %v19907_v51 = vld [vmem:[#allocation71_spill] sm:$0xff] }
 0x4fb   :  { %v7492_v18 = vmul.f32 %v16035_v20, %v7024_v46  ;;  %v7479_v17 = vmul.f32 %v15978_v57, %v7070_v50  ;;  %v19904_v37 = vld [vmem:[#allocation12_spill] sm:$0xff]  ;;  %v7057_v61 = vsel %vm6769_vm3, %v19906_v15, %v19842_v30  ;;  %v7090_v3 = vsel %vm6769_vm3, %v17079_v49, %v19907_v51  ;;  %v19909_v46 = vld [vmem:[#allocation118_spill] sm:$0xff] }
 0x4fc   :  { %v17341_v9 = vpop.permute.xlu1 %7768  ;;  %8242 = vst [vmem:[%s18358_s4 + $0x78] sm:$0xff] %v8130_v53  ;;  %8243 = vst [vmem:[%s18358_s4 + $0x80] sm:$0xff] %v8131_v36  ;;  %v17355_v14 = vpop.permute.xlu0 %7874  ;;  %v7265_v12 = vmul.f32 %v19904_v37, %v19903_v29  ;;  %v19908_v53 = vld [vmem:[#allocation24_spill] sm:$0xff]  ;;  %v7502_v49 = vmul.f32 %v19794_v32, %v7057_v61  ;;  %v7385_v29 = vmul.f32 %v15735_v4, %v7090_v3  ;;  %v19922_v37 = vld [vmem:[#allocation94_spill] sm:$0xff] }
 0x4fd   :  { %19902 = vst [vmem:[#allocation87_spill] sm:$0xff] %v17355_v14 }
 0x4fe   :  { %7820 = vrot.lane.b32.xlu1 %v7471_v2, %s9645_s9  ;;  %7866 = vrot.lane.b32.xlu0 %v7494_v23, %s9645_s9  ;;  %v7226_v23 = vmul.f32 %v19838_v34, %v19909_v46 }
 0x500   :  { %v17363_v10 = vpop.permute.xlu1 %7780  ;;  %v17376_v2 = vpop.permute.xlu0 %7690 }
 0x501   :  { %19905 = vst [vmem:[#allocation106_spill] sm:$0xff] %v17363_v10  ;;  %v7954_v36 = vsel %vm7890_vm4, %v19908_v53, %v17363_v10  ;;  %19910 = vst [vmem:[#allocation179_spill] sm:$0xff] %v17376_v2  ;;  %v7915_v50 = vsel %vm7890_vm4, %v17074_v42, %v17376_v2  ;;  %v19914_v2 = vld [vmem:[#allocation82_spill] sm:$0xff]  ;;  %v19918_v10 = vld [vmem:[#allocation115_spill] sm:$0xff] }
 0x502   :  { %v8178_v26 = vadd.f32 %v7954_v36, %v7265_v12  ;;  %7862 = vrot.lane.b32.xlu0 %v7492_v18, %s9645_s9  ;;  %7836 = vrot.lane.b32.xlu1 %v7479_v17, %s9645_s9  ;;  %v8139_v30 = vadd.f32 %v7915_v50, %v7226_v23  ;;  %v19912_v12 = vld [vmem:[#allocation120_spill] sm:$0xff]  ;;  %v19913_v36 = vld [vmem:[#allocation129_spill] sm:$0xff]  ;;  %v7071_v18 = vsel %vm6769_vm3, %v19914_v2, %v19884_v24  ;;  %v19915_v23 = vld [vmem:[#allocation38_spill] sm:$0xff] }
 0x503   :  { %v7025_v46 = vsel %vm6769_vm3, %v19913_v36, %v19912_v12  ;;  %v7487_v3 = vmul.f32 %v16005_v48, %v7071_v18  ;;  %v19917_v24 = vld [vmem:[#allocation14_spill] sm:$0xff]  ;;  %v19921_v48 = vld [vmem:[#allocation104_spill] sm:$0xff] }
 0x504   :  { %8290 = vst [vmem:[%s18358_s4 + $0x1f8] sm:$0xff] %v8178_v26  ;;  %v17388_v53 = vpop.permute.xlu1 %7784  ;;  %8251 = vst [vmem:[%s18358_s4 + $0xc0] sm:$0xff] %v8139_v30  ;;  %v17399_v17 = vpop.permute.xlu0 %6986  ;;  %v7500_v61 = vmul.f32 %v19794_v32, %v7025_v46  ;;  %v19916_v26 = vld [vmem:[#allocation170_spill] sm:$0xff]  ;;  %v7225_v36 = vmul.f32 %v19838_v34, %v19917_v24  ;;  %v7074_v30 = vsel %vm6769_vm3, %v19907_v51, %v16684_v31  ;;  %v19920_v46 = vld [vmem:[#allocation165_spill] sm:$0xff] }
 0x505   :  { %19911 = vst [vmem:[#allocation150_spill] sm:$0xff] %v17388_v53  ;;  %v7272_v50 = vmul.f32 %v19916_v26, %v19915_v23  ;;  %v7224_v23 = vmul.f32 %v19838_v34, %v19921_v48 }
 0x506   :  { %7882 = vrot.lane.b32.xlu0 %v7502_v49, %s9645_s9  ;;  %7648 = vrot.lane.b32.xlu1 %v7385_v29, %s9645_s9  ;;  %v19919_v49 = vld [vmem:[#allocation144_spill] sm:$0xff] }
 0x507   :  { %v7091_v29 = vsel %vm6769_vm3, %v19919_v49, %v19918_v10  ;;  %v7384_v49 = vmul.f32 %v15735_v4, %v7074_v30  ;;  %v19924_v4 = vld [vmem:[#allocation101_spill] sm:$0xff] }
 0x508   :  { %v17407_v12 = vpop.permute.xlu1 %7796  ;;  %v7687_v26 = vpop.permute.xlu0 %7686 }
 0x509   :  { %v7961_v18 = vsel %vm7890_vm4, %v19920_v46, %v17407_v12  ;;  %v7913_v24 = vsel %vm7890_vm4, %v19922_v37, %v7687_v26  ;;  %v7914_v14 = vsel %vm7890_vm4, %v7687_v26, %v17074_v42  ;;  %v7393_v46 = vmul.f32 %v19854_v27, %v7091_v29  ;;  %v19923_v37 = vld [vmem:[#allocation112_spill] sm:$0xff]  ;;  %v19927_v26 = vld [vmem:[#allocation21_spill] sm:$0xff]  ;;  %v19928_v29 = vld [vmem:[#allocation75_spill] sm:$0xff] }
 0x50a   :  { %v8185_v53 = vadd.f32 %v7961_v18, %v7272_v50  ;;  %7878 = vrot.lane.b32.xlu0 %v7500_v61, %s9645_s9  ;;  %7852 = vrot.lane.b32.xlu1 %v7487_v3, %s9645_s9  ;;  %v8137_v31 = vadd.f32 %v7913_v24, %v7224_v23  ;;  %v8138_v51 = vadd.f32 %v7914_v14, %v7225_v36  ;;  %v19925_v14 = vld [vmem:[#allocation20_spill] sm:$0xff] }
 0x50b   :  { %v7075_v42 = vsel %vm6769_vm3, %v19918_v10, %v19923_v37  ;;  %v7072_v61 = vsel %vm6769_vm3, %v17137_v8, %v19897_v45  ;;  %v19929_v18 = vld [vmem:[#allocation80_spill] sm:$0xff]  ;;  %v19932_v37 = vld [vmem:[#allocation46_spill] sm:$0xff] }
 0x50c   :  { %8297 = vst [vmem:[%s18358_s4 + $0x230] sm:$0xff] %v8185_v53  ;;  %v17433_v48 = vpop.permute.xlu1 %7000  ;;  %8249 = vst [vmem:[%s18358_s4 + $0xb0] sm:$0xff] %v8137_v31  ;;  %v7233_v53 = vmul.f32 %v19925_v14, %v19924_v4  ;;  %v17449_v3 = vpop.permute.xlu0 %7706  ;;  %v7392_v50 = vmul.f32 %v19854_v27, %v7075_v42  ;;  %v7495_v36 = vmul.f32 %v16035_v20, %v7072_v61  ;;  %v19930_v31 = vld [vmem:[#allocation61_spill] sm:$0xff] }
 0x50d   :  { %8250 = vst [vmem:[%s18358_s4 + $0xb8] sm:$0xff] %v8138_v51  ;;  %19926 = vst [vmem:[#allocation102_spill] sm:$0xff] %v17449_v3  ;;  %v7922_v10 = vsel %vm7890_vm4, %v19927_v26, %v17449_v3  ;;  %v7076_v23 = vsel %vm6769_vm3, %v19929_v18, %v19928_v29  ;;  %v7092_v24 = vsel %vm6769_vm3, %v17240_v11, %v19929_v18  ;;  %v19931_v27 = vld [vmem:[#allocation81_spill] sm:$0xff]  ;;  %v19934_v29 = vld [vmem:[#allocation119_spill] sm:$0xff] }
 0x50e   :  { %7646 = vrot.lane.b32.xlu0 %v7384_v49, %s9645_s9  ;;  %7664 = vrot.lane.b32.xlu1 %v7393_v46, %s9645_s9  ;;  %v8146_v45 = vadd.f32 %v7922_v10, %v7233_v53  ;;  %v7231_v51 = vmul.f32 %v19925_v14, %v19930_v31  ;;  %v7232_v49 = vmul.f32 %v19925_v14, %v19931_v27  ;;  %v19935_v27 = vld [vmem:[#allocation107_spill] sm:$0xff] }
 0x50f   :  { %v7400_v53 = vmul.f32 %v19861_v60, %v7076_v23  ;;  %v7401_v10 = vmul.f32 %v19861_v60, %v7092_v24  ;;  %v19938_v60 = vld [vmem:[#allocation159_spill] sm:$0xff]  ;;  %v19939_v23 = vld [vmem:[#allocation22_spill] sm:$0xff] }
 0x510   :  { %v17458_v30 = vpop.permute.xlu1 %7800  ;;  %8258 = vst [vmem:[%s18358_s4 + $0xf8] sm:$0xff] %v8146_v45  ;;  %v7703_v46 = vpop.permute.xlu0 %7702  ;;  %v19933_v45 = vld [vmem:[#allocation137_spill] sm:$0xff]  ;;  %v19940_v24 = vld [vmem:[#allocation90_spill] sm:$0xff] }
 0x511   :  { %v7920_v42 = vsel %vm7890_vm4, %v19932_v37, %v7703_v46  ;;  %v7921_v61 = vsel %vm7890_vm4, %v7703_v46, %v19927_v26  ;;  %v7279_v18 = vmul.f32 %v19934_v29, %v19933_v45  ;;  %v19936_v37 = vld [vmem:[#allocation72_spill] sm:$0xff]  ;;  %v19937_v26 = vld [vmem:[#allocation74_spill] sm:$0xff]  ;;  %v19941_v45 = vld [vmem:[#allocation47_spill] sm:$0xff] }
 0x512   :  { %7662 = vrot.lane.b32.xlu0 %v7392_v50, %s9645_s9  ;;  %7868 = vrot.lane.b32.xlu1 %v7495_v36, %s9645_s9  ;;  %v8144_v11 = vadd.f32 %v7920_v42, %v7231_v51  ;;  %v8145_v4 = vadd.f32 %v7921_v61, %v7232_v49  ;;  %v7077_v3 = vsel %vm6769_vm3, %v19936_v37, %v19935_v27  ;;  %v19942_v27 = vld [vmem:[#allocation52_spill] sm:$0xff] }
 0x513   :  { %v7073_v50 = vsel %vm6769_vm3, %v19937_v26, %v19906_v15  ;;  %v7240_v51 = vmul.f32 %v19940_v24, %v19939_v23  ;;  %v7408_v61 = vmul.f32 %v15819_v28, %v7077_v3 }
 0x514   :  { %v17483_v31 = vpop.permute.xlu1 %7812  ;;  %8256 = vst [vmem:[%s18358_s4 + $0xe8] sm:$0xff] %v8144_v11  ;;  %8257 = vst [vmem:[%s18358_s4 + $0xf0] sm:$0xff] %v8145_v4  ;;  %v17502_v49 = vpop.permute.xlu0 %7722  ;;  %v7503_v11 = vmul.f32 %v19794_v32, %v7073_v50 }
 0x515   :  { %v7968_v36 = vsel %vm7890_vm4, %v19938_v60, %v17483_v31  ;;  %v7929_v15 = vsel %vm7890_vm4, %v17171_v33, %v17502_v49  ;;  %v19943_v60 = vld [vmem:[#allocation36_spill] sm:$0xff] }
 0x516   :  { %v8192_v46 = vadd.f32 %v7968_v36, %v7279_v18  ;;  %7678 = vrot.lane.b32.xlu0 %v7400_v53, %s9645_s9  ;;  %7680 = vrot.lane.b32.xlu1 %v7401_v10, %s9645_s9  ;;  %v8153_v42 = vadd.f32 %v7929_v15, %v7240_v51  ;;  %v7078_v18 = vsel %vm6769_vm3, %v19941_v45, %v19865_v52  ;;  %v19944_v36 = vld [vmem:[#allocation6_spill] sm:$0xff]  ;;  %v19945_v51 = vld [vmem:[#allocation135_spill] sm:$0xff] }
 0x517   :  { %v7093_v53 = vsel %vm6769_vm3, %v19942_v27, %v19936_v37  ;;  %v7416_v10 = vmul.f32 %v15789_v54, %v7078_v18  ;;  %v7286_v52 = vmul.f32 %v19944_v36, %v19943_v60  ;;  %v7239_v37 = vmul.f32 %v19940_v24, %v19945_v51 }
 0x518   :  { %8304 = vst [vmem:[%s18358_s4 + $0x268] sm:$0xff] %v8192_v46  ;;  %v17514_v4 = vpop.permute.xlu1 %7816  ;;  %8265 = vst [vmem:[%s18358_s4 + $0x130] sm:$0xff] %v8153_v42  ;;  %v6991_v3 = vpop.permute.xlu0 %6990  ;;  %v7409_v50 = vmul.f32 %v15819_v28, %v7093_v53  ;;  %v19946_v46 = vld [vmem:[#allocation103_spill] sm:$0xff]  ;;  %v7094_v42 = vsel %vm6769_vm3, %v17399_v17, %v19941_v45 }
 0x519   :  { %v7079_v15 = vsel %vm6769_vm3, %v19946_v46, %v19872_v44 }
 0x51a   :  { %7694 = vrot.lane.b32.xlu0 %v7408_v61, %s9645_s9  ;;  %7884 = vrot.lane.b32.xlu1 %v7503_v11, %s9645_s9  ;;  %v19947_v61 = vld [vmem:[#allocation25_spill] sm:$0xff]  ;;  %v19948_v11 = vld [vmem:[#allocation116_spill] sm:$0xff]  ;;  %v7424_v45 = vmul.f32 %v15851_v41, %v7079_v15 }
 0x51b   :  { %v7238_v18 = vmul.f32 %v19940_v24, %v19948_v11 }
 0x51c   :  { %v17531_v23 = vpop.permute.xlu1 %7828  ;;  %v7719_v27 = vpop.permute.xlu0 %7718 }
 0x51d   :  { %v7975_v28 = vsel %vm7890_vm4, %v19947_v61, %v17531_v23  ;;  %v7927_v60 = vsel %vm7890_vm4, %v17147_v6, %v7719_v27  ;;  %v7928_v51 = vsel %vm7890_vm4, %v7719_v27, %v17171_v33  ;;  %v7417_v61 = vmul.f32 %v15789_v54, %v7094_v42  ;;  %v19949_v6 = vld [vmem:[#allocation44_spill] sm:$0xff]  ;;  %v19951_v54 = vld [vmem:[#allocation113_spill] sm:$0xff] }
 0x51e   :  { %v8199_v53 = vadd.f32 %v7975_v28, %v7286_v52  ;;  %7710 = vrot.lane.b32.xlu0 %v7416_v10, %s9645_s9  ;;  %7696 = vrot.lane.b32.xlu1 %v7409_v50, %s9645_s9  ;;  %v8151_v44 = vadd.f32 %v7927_v60, %v7238_v18  ;;  %v8152_v17 = vadd.f32 %v7928_v51, %v7239_v37  ;;  %v19950_v10 = vld [vmem:[#allocation34_spill] sm:$0xff]  ;;  %v19952_v18 = vld [vmem:[#allocation79_spill] sm:$0xff] }
 0x51f   :  { %v7080_v33 = vsel %vm6769_vm3, %v19949_v6, %v19877_v5  ;;  %v7095_v50 = vsel %vm6769_vm3, %v19950_v10, %v19946_v46  ;;  %v7247_v37 = vmul.f32 %v19868_v62, %v19951_v54  ;;  %v7081_v27 = vsel %vm6769_vm3, %v19952_v18, %v19879_v13  ;;  %v19953_v60 = vld [vmem:[#allocation122_spill] sm:$0xff]  ;;  %v19955_v10 = vld [vmem:[#allocation172_spill] sm:$0xff] }
 0x520   :  { %8311 = vst [vmem:[%s18358_s4 + $0x2a0] sm:$0xff] %v8199_v53  ;;  %v17557_v52 = vpop.permute.xlu1 %7004  ;;  %8263 = vst [vmem:[%s18358_s4 + $0x120] sm:$0xff] %v8151_v44  ;;  %v17573_v15 = vpop.permute.xlu0 %7738  ;;  %v7432_v42 = vmul.f32 %v15840_v39, %v7080_v33  ;;  %v7425_v28 = vmul.f32 %v15851_v41, %v7095_v50  ;;  %v7096_v53 = vsel %vm6769_vm3, %v6991_v3, %v19949_v6  ;;  %v19954_v44 = vld [vmem:[#allocation109_spill] sm:$0xff]  ;;  %v19956_v50 = vld [vmem:[#allocation98_spill] sm:$0xff] }
 0x521   :  { %8264 = vst [vmem:[%s18358_s4 + $0x128] sm:$0xff] %v8152_v17  ;;  %v7936_v5 = vsel %vm7890_vm4, %v17232_v43, %v17573_v15  ;;  %v7245_v51 = vmul.f32 %v19868_v62, %v19953_v60  ;;  %v7246_v17 = vmul.f32 %v19868_v62, %v19954_v44  ;;  %v7440_v6 = vmul.f32 %v15881_v35, %v7081_v27  ;;  %v19961_v27 = vld [vmem:[#allocation111_spill] sm:$0xff] }
 0x522   :  { %7726 = vrot.lane.b32.xlu0 %v7424_v45, %s9645_s9  ;;  %7712 = vrot.lane.b32.xlu1 %v7417_v61, %s9645_s9  ;;  %v8160_v46 = vadd.f32 %v7936_v5, %v7247_v37  ;;  %v7433_v33 = vmul.f32 %v15840_v39, %v7096_v53  ;;  %v7293_v54 = vmul.f32 %v19956_v50, %v19955_v10  ;;  %v19959_v39 = vld [vmem:[#allocation32_spill] sm:$0xff]  ;;  %v19964_v10 = vld [vmem:[#allocation157_spill] sm:$0xff] }
 0x524   :  { %v17582_v11 = vpop.permute.xlu1 %7832  ;;  %8272 = vst [vmem:[%s18358_s4 + $0x168] sm:$0xff] %v8160_v46  ;;  %v7735_v41 = vpop.permute.xlu0 %7734 }
 0x525   :  { %v7934_v45 = vsel %vm7890_vm4, %v17189_v47, %v7735_v41  ;;  %v7935_v13 = vsel %vm7890_vm4, %v7735_v41, %v17232_v43  ;;  %v19957_v47 = vld [vmem:[#allocation91_spill] sm:$0xff]  ;;  %v19958_v43 = vld [vmem:[#allocation70_spill] sm:$0xff] }
 0x526   :  { %7742 = vrot.lane.b32.xlu0 %v7432_v42, %s9645_s9  ;;  %7728 = vrot.lane.b32.xlu1 %v7425_v28, %s9645_s9  ;;  %v8158_v3 = vadd.f32 %v7934_v45, %v7245_v51  ;;  %v8159_v61 = vadd.f32 %v7935_v13, %v7246_v17  ;;  %v7082_v5 = vsel %vm6769_vm3, %v19957_v47, %v19885_v40  ;;  %v19960_v28 = vld [vmem:[#allocation18_spill] sm:$0xff]  ;;  %v19962_v45 = vld [vmem:[#allocation76_spill] sm:$0xff] }
 0x527   :  { %v7097_v46 = vsel %vm6769_vm3, %v19958_v43, %v19952_v18  ;;  %v7254_v53 = vmul.f32 %v19961_v27, %v19960_v28  ;;  %v7448_v44 = vmul.f32 %v15886_v1, %v7082_v5  ;;  %v7083_v13 = vsel %vm6769_vm3, %v19962_v45, %v19887_v7  ;;  %v19965_v5 = vld [vmem:[#allocation147_spill] sm:$0xff] }
 0x528   :  { %v17606_v37 = vpop.permute.xlu1 %7844  ;;  %8270 = vst [vmem:[%s18358_s4 + $0x158] sm:$0xff] %v8158_v3  ;;  %8271 = vst [vmem:[%s18358_s4 + $0x160] sm:$0xff] %v8159_v61  ;;  %v17625_v40 = vpop.permute.xlu0 %7754  ;;  %v7441_v17 = vmul.f32 %v15881_v35, %v7097_v46  ;;  %v7456_v35 = vmul.f32 %v15913_v59, %v7083_v13  ;;  %v7253_v43 = vmul.f32 %v19961_v27, %v19965_v5  ;;  %v19966_v46 = vld [vmem:[#allocation5_spill] sm:$0xff] }
 0x529   :  { %v7982_v42 = vsel %vm7890_vm4, %v19959_v39, %v17606_v37  ;;  %v7943_v18 = vsel %vm7890_vm4, %v17274_v21, %v17625_v40  ;;  %v7099_v39 = vsel %vm6769_vm3, %v17318_v25, %v19962_v45  ;;  %v19969_v45 = vld [vmem:[#allocation49_spill] sm:$0xff] }
 0x52a   :  { %v8206_v60 = vadd.f32 %v7982_v42, %v7293_v54  ;;  %7758 = vrot.lane.b32.xlu0 %v7440_v6, %s9645_s9  ;;  %7744 = vrot.lane.b32.xlu1 %v7433_v33, %s9645_s9  ;;  %v8167_v51 = vadd.f32 %v7943_v18, %v7254_v53  ;;  %v19963_v33 = vld [vmem:[#allocation158_spill] sm:$0xff] }
 0x52b   :  { %v7300_v54 = vmul.f32 %v19964_v10, %v19963_v33  ;;  %v19967_v42 = vld [vmem:[#allocation10_spill] sm:$0xff] }
 0x52c   :  { %8318 = vst [vmem:[%s18358_s4 + $0x2d8] sm:$0xff] %v8206_v60  ;;  %v17637_v41 = vpop.permute.xlu1 %7848  ;;  %8279 = vst [vmem:[%s18358_s4 + $0x1a0] sm:$0xff] %v8167_v51  ;;  %v6995_v3 = vpop.permute.xlu0 %6994  ;;  %v7252_v28 = vmul.f32 %v19961_v27, %v19967_v42 }
 0x52d   :  { %v7098_v61 = vsel %vm6769_vm3, %v6995_v3, %v19957_v47  ;;  %v7084_v47 = vsel %vm6769_vm3, %v19966_v46, %v19892_v16 }
 0x52e   :  { %7774 = vrot.lane.b32.xlu0 %v7448_v44, %s9645_s9  ;;  %7760 = vrot.lane.b32.xlu1 %v7441_v17, %s9645_s9  ;;  %v7449_v6 = vmul.f32 %v15886_v1, %v7098_v61  ;;  %v7464_v44 = vmul.f32 %v15943_v56, %v7084_v47 }
 0x530   :  { %v17653_v7 = vpop.permute.xlu1 %7860  ;;  %v7751_v53 = vpop.permute.xlu0 %7750 }
 0x531   :  { %v7989_v1 = vsel %vm7890_vm4, %v17285_v38, %v17653_v7  ;;  %v7941_v18 = vsel %vm7890_vm4, %v17250_v19, %v7751_v53  ;;  %v7942_v51 = vsel %vm7890_vm4, %v7751_v53, %v17274_v21  ;;  %v7457_v38 = vmul.f32 %v15913_v59, %v7099_v39  ;;  %v19968_v19 = vld [vmem:[#allocation15_spill] sm:$0xff] }
 0x532   :  { %v8213_v60 = vadd.f32 %v7989_v1, %v7300_v54  ;;  %7790 = vrot.lane.b32.xlu0 %v7456_v35, %s9645_s9  ;;  %7776 = vrot.lane.b32.xlu1 %v7449_v6, %s9645_s9  ;;  %v8165_v16 = vadd.f32 %v7941_v18, %v7252_v28  ;;  %v8166_v25 = vadd.f32 %v7942_v51, %v7253_v43  ;;  %v19970_v6 = vld [vmem:[#allocation41_spill] sm:$0xff]  ;;  %v19972_v43 = vld [vmem:[#allocation110_spill] sm:$0xff]  ;;  %v19974_v18 = vld [vmem:[#allocation11_spill] sm:$0xff] }
 0x533   :  { %v7085_v21 = vsel %vm6769_vm3, %v19968_v19, %v19898_v58  ;;  %v7261_v59 = vmul.f32 %v19889_v55, %v19969_v45  ;;  %v7086_v33 = vsel %vm6769_vm3, %v19970_v6, %v19901_v63  ;;  %v19971_v54 = vld [vmem:[#allocation117_spill] sm:$0xff]  ;;  %v7260_v47 = vmul.f32 %v19889_v55, %v19972_v43  ;;  %v19981_v43 = vld [vmem:[#allocation27_spill] sm:$0xff] }
 0x534   :  { %8325 = vst [vmem:[%s18358_s4 + $0x310] sm:$0xff] %v8213_v60  ;;  %v17679_v17 = vpop.permute.xlu1 %7008  ;;  %8277 = vst [vmem:[%s18358_s4 + $0x190] sm:$0xff] %v8165_v16  ;;  %v17692_v13 = vpop.permute.xlu0 %7770  ;;  %v7472_v61 = vmul.f32 %v15957_v0, %v7085_v21  ;;  %v7259_v5 = vmul.f32 %v19889_v55, %v19971_v54  ;;  %v7480_v53 = vmul.f32 %v15978_v57, %v7086_v33  ;;  %v19973_v60 = vld [vmem:[#allocation153_spill] sm:$0xff]  ;;  %v19978_v21 = vld [vmem:[#allocation12_spill] sm:$0xff] }
 0x535   :  { %8278 = vst [vmem:[%s18358_s4 + $0x198] sm:$0xff] %v8166_v25  ;;  %v7950_v3 = vsel %vm7890_vm4, %v17341_v9, %v17692_v13  ;;  %v7307_v51 = vmul.f32 %v19974_v18, %v19973_v60  ;;  %v19975_v25 = vld [vmem:[#allocation13_spill] sm:$0xff]  ;;  %v19980_v33 = vld [vmem:[#allocation130_spill] sm:$0xff] }
 0x536   :  { %7806 = vrot.lane.b32.xlu0 %v7464_v44, %s9645_s9  ;;  %7792 = vrot.lane.b32.xlu1 %v7457_v38, %s9645_s9  ;;  %v8174_v58 = vadd.f32 %v7950_v3, %v7261_v59  ;;  %v7087_v44 = vsel %vm6769_vm3, %v19975_v25, %v19914_v2  ;;  %v19977_v38 = vld [vmem:[#allocation8_spill] sm:$0xff]  ;;  %v19979_v2 = vld [vmem:[#allocation150_spill] sm:$0xff] }
 0x537   :  { %v7268_v45 = vmul.f32 %v19978_v21, %v19977_v38  ;;  %v7488_v54 = vmul.f32 %v19980_v33, %v7087_v44  ;;  %v19984_v44 = vld [vmem:[#allocation45_spill] sm:$0xff] }
 0x538   :  { %v17700_v35 = vpop.permute.xlu1 %7864  ;;  %8286 = vst [vmem:[%s18358_s4 + $0x1d8] sm:$0xff] %v8174_v58  ;;  %v7767_v39 = vpop.permute.xlu0 %7766 }
 0x539   :  { %v7948_v1 = vsel %vm7890_vm4, %v17292_v22, %v7767_v39  ;;  %v7949_v42 = vsel %vm7890_vm4, %v7767_v39, %v17341_v9  ;;  %v19976_v22 = vld [vmem:[#allocation87_spill] sm:$0xff] }
 0x53a   :  { %7822 = vrot.lane.b32.xlu0 %v7472_v61, %s9645_s9  ;;  %v8172_v63 = vadd.f32 %v7948_v1, %v7259_v5  ;;  %v8173_v28 = vadd.f32 %v7949_v42, %v7260_v47  ;;  %v7088_v47 = vsel %vm6769_vm3, %v19981_v43, %v17137_v8  ;;  %v19983_v8 = vld [vmem:[#allocation63_spill] sm:$0xff] }
 0x53c   :  { %v17720_v16 = vpop.permute.xlu1 %7876  ;;  %8284 = vst [vmem:[%s18358_s4 + $0x1c8] sm:$0xff] %v8172_v63  ;;  %8285 = vst [vmem:[%s18358_s4 + $0x1d0] sm:$0xff] %v8173_v28  ;;  %v17736_v59 = vpop.permute.xlu0 %7786  ;;  %v7496_v63 = vmul.f32 %v16035_v20, %v7088_v47  ;;  %v7101_v28 = vsel %vm6769_vm3, %v17433_v48, %v19968_v19 }
 0x53d   :  { %v7996_v9 = vsel %vm7890_vm4, %v19976_v22, %v17720_v16  ;;  %v7957_v58 = vsel %vm7890_vm4, %v19979_v2, %v17736_v59  ;;  %v7089_v22 = vsel %vm6769_vm3, %v19984_v44, %v19937_v26 }
 0x53e   :  { %v8220_v3 = vadd.f32 %v7996_v9, %v7307_v51  ;;  %7838 = vrot.lane.b32.xlu0 %v7480_v53, %s9645_s9  ;;  %v8181_v61 = vadd.f32 %v7957_v58, %v7268_v45  ;;  %v19982_v53 = vld [vmem:[#allocation156_spill] sm:$0xff]  ;;  %v19987_v45 = vld [vmem:[#allocation125_spill] sm:$0xff]  ;;  %v19988_v58 = vld [vmem:[#allocation106_spill] sm:$0xff] }
 0x53f   :  { %v7206_v60 = vmul.f32 %v19983_v8, %v19982_v53  ;;  %v7267_v48 = vmul.f32 %v19978_v21, %v19987_v45  ;;  %v19990_v53 = vld [vmem:[#allocation58_spill] sm:$0xff] }
 0x540   :  { %8332 = vst [vmem:[%s18358_s4 + $0x348] sm:$0xff] %v8220_v3  ;;  %v17746_v5 = vpop.permute.xlu1 %7880  ;;  %8293 = vst [vmem:[%s18358_s4 + $0x210] sm:$0xff] %v8181_v61  ;;  %v6999_v39 = vpop.permute.xlu0 %6998 }
 0x541   :  { %v7100_v1 = vsel %vm6769_vm3, %v6999_v39, %v19966_v46  ;;  %v19985_v46 = vld [vmem:[#allocation31_spill] sm:$0xff] }
 0x542   :  { %7854 = vrot.lane.b32.xlu0 %v7488_v54, %s9645_s9  ;;  %v7465_v42 = vmul.f32 %v15943_v56, %v7100_v1  ;;  %v19986_v56 = vld [vmem:[#allocation132_spill] sm:$0xff]  ;;  %v7473_v54 = vmul.f32 %v15957_v0, %v7101_v28  ;;  %v7504_v1 = vmul.f32 %v19794_v32, %v7089_v22  ;;  %v19991_v0 = vld [vmem:[#allocation134_spill] sm:$0xff] }
 0x543   :  { %v7266_v38 = vmul.f32 %v19978_v21, %v19986_v56  ;;  %v19993_v28 = vld [vmem:[#allocation170_spill] sm:$0xff] }
 0x544   :  { %v17764_v51 = vpop.permute.xlu1 %7644  ;;  %7808 = vrot.lane.b32.xlu1 %v7465_v42, %s9645_s9  ;;  %v7783_v19 = vpop.permute.xlu0 %7782  ;;  %v19989_v42 = vld [vmem:[#allocation171_spill] sm:$0xff] }
 0x545   :  { %v7895_v9 = vsel %vm7890_vm4, %v19985_v46, %v17764_v51  ;;  %v7955_v61 = vsel %vm7890_vm4, %v19988_v58, %v7783_v19  ;;  %v7956_v26 = vsel %vm7890_vm4, %v7783_v19, %v19979_v2  ;;  %v19995_v19 = vld [vmem:[#allocation2_spill] sm:$0xff] }
 0x546   :  { %v8119_v3 = vadd.f32 %v7895_v9, %v7206_v60  ;;  %7870 = vrot.lane.b32.xlu0 %v7496_v63, %s9645_s9  ;;  %v8179_v47 = vadd.f32 %v7955_v61, %v7266_v38  ;;  %v8180_v39 = vadd.f32 %v7956_v26, %v7267_v48  ;;  %v7213_v60 = vmul.f32 %v19990_v53, %v19989_v42  ;;  %v19992_v63 = vld [vmem:[#allocation9_spill] sm:$0xff]  ;;  %v19994_v48 = vld [vmem:[#allocation152_spill] sm:$0xff] }
 0x547   :  { %v7275_v22 = vmul.f32 %v19993_v28, %v19992_v63  ;;  %v19996_v61 = vld [vmem:[#allocation29_spill] sm:$0xff] }
 0x548   :  { %8231 = vst [vmem:[%s18358_s4 + $0x20] sm:$0xff] %v8119_v3  ;;  %v17789_v46 = vpop.permute.xlu1 %7660  ;;  %8291 = vst [vmem:[%s18358_s4 + $0x200] sm:$0xff] %v8179_v47  ;;  %7824 = vrot.lane.b32.xlu1 %v7473_v54, %s9645_s9  ;;  %v17803_v9 = vpop.permute.xlu0 %7802  ;;  %v7220_v3 = vmul.f32 %v19995_v19, %v19994_v48  ;;  %v19997_v54 = vld [vmem:[#allocation108_spill] sm:$0xff]  ;;  %v20001_v48 = vld [vmem:[#allocation57_spill] sm:$0xff] }
 0x549   :  { %8292 = vst [vmem:[%s18358_s4 + $0x208] sm:$0xff] %v8180_v39  ;;  %v7902_v2 = vsel %vm7890_vm4, %v19991_v0, %v17789_v46  ;;  %v7964_v38 = vsel %vm7890_vm4, %v17458_v30, %v17803_v9  ;;  %v7273_v47 = vmul.f32 %v19993_v28, %v19997_v54  ;;  %v19998_v39 = vld [vmem:[#allocation136_spill] sm:$0xff] }
 0x54a   :  { %v8126_v56 = vadd.f32 %v7902_v2, %v7213_v60  ;;  %7886 = vrot.lane.b32.xlu0 %v7504_v1, %s9645_s9  ;;  %v8188_v45 = vadd.f32 %v7964_v38, %v7275_v22  ;;  %v7274_v1 = vmul.f32 %v19993_v28, %v19998_v39  ;;  %v20002_v39 = vld [vmem:[#allocation167_spill] sm:$0xff] }
 0x54c   :  { %8238 = vst [vmem:[%s18358_s4 + $0x58] sm:$0xff] %v8126_v56  ;;  %v17814_v58 = vpop.permute.xlu1 %7676  ;;  %8300 = vst [vmem:[%s18358_s4 + $0x248] sm:$0xff] %v8188_v45  ;;  %v7799_v42 = vpop.permute.xlu0 %7798  ;;  %v19999_v56 = vld [vmem:[#allocation151_spill] sm:$0xff] }
 0x54d   :  { %v7909_v26 = vsel %vm7890_vm4, %v19996_v61, %v17814_v58  ;;  %v7962_v0 = vsel %vm7890_vm4, %v17407_v12, %v7799_v42  ;;  %v7963_v2 = vsel %vm7890_vm4, %v7799_v42, %v17458_v30  ;;  %v7227_v38 = vmul.f32 %v19838_v34, %v19999_v56  ;;  %v20000_v12 = vld [vmem:[#allocation179_spill] sm:$0xff] }
 0x54e   :  { %v8133_v60 = vadd.f32 %v7909_v26, %v7220_v3  ;;  %v8186_v63 = vadd.f32 %v7962_v0, %v7273_v47  ;;  %v8187_v22 = vadd.f32 %v7963_v2, %v7274_v1  ;;  %v7282_v3 = vmul.f32 %v19934_v29, %v20001_v48 }
 0x54f   :  { %v7234_v1 = vmul.f32 %v19925_v14, %v20002_v39 }
 0x550   :  { %8245 = vst [vmem:[%s18358_s4 + $0x90] sm:$0xff] %v8133_v60  ;;  %v17835_v45 = vpop.permute.xlu1 %7692  ;;  %8298 = vst [vmem:[%s18358_s4 + $0x238] sm:$0xff] %v8186_v63  ;;  %v17848_v61 = vpop.permute.xlu0 %7818  ;;  %v20003_v60 = vld [vmem:[#allocation102_spill] sm:$0xff] }
 0x551   :  { %8299 = vst [vmem:[%s18358_s4 + $0x240] sm:$0xff] %v8187_v22  ;;  %v7916_v30 = vsel %vm7890_vm4, %v20000_v12, %v17835_v45  ;;  %v7971_v54 = vsel %vm7890_vm4, %v17514_v4, %v17848_v61  ;;  %v20004_v12 = vld [vmem:[#allocation131_spill] sm:$0xff] }
 0x552   :  { %v8140_v26 = vadd.f32 %v7916_v30, %v7227_v38  ;;  %v8195_v47 = vadd.f32 %v7971_v54, %v7282_v3  ;;  %v7103_v38 = vsel %vm6769_vm3, %v17557_v52, %v19975_v25  ;;  %v7241_v30 = vmul.f32 %v19940_v24, %v20004_v12 }
 0x554   :  { %8252 = vst [vmem:[%s18358_s4 + $0xc8] sm:$0xff] %v8140_v26  ;;  %v17858_v42 = vpop.permute.xlu1 %7708  ;;  %8307 = vst [vmem:[%s18358_s4 + $0x280] sm:$0xff] %v8195_v47  ;;  %v7003_v2 = vpop.permute.xlu0 %7002  ;;  %v20006_v26 = vld [vmem:[#allocation73_spill] sm:$0xff] }
 0x555   :  { %v7923_v0 = vsel %vm7890_vm4, %v20003_v60, %v17858_v42  ;;  %v7102_v22 = vsel %vm6769_vm3, %v7003_v2, %v19970_v6  ;;  %v7281_v52 = vmul.f32 %v19934_v29, %v20006_v26 }
 0x556   :  { %v8147_v63 = vadd.f32 %v7923_v0, %v7234_v1  ;;  %v7481_v56 = vmul.f32 %v15978_v57, %v7102_v22  ;;  %v20005_v57 = vld [vmem:[#allocation7_spill] sm:$0xff]  ;;  %v7489_v1 = vmul.f32 %v19980_v33, %v7103_v38  ;;  %v20007_v0 = vld [vmem:[#allocation174_spill] sm:$0xff] }
 0x557   :  { %v7280_v6 = vmul.f32 %v19934_v29, %v20005_v57  ;;  %v7248_v2 = vmul.f32 %v19868_v62, %v20007_v0 }
 0x558   :  { %8259 = vst [vmem:[%s18358_s4 + $0x100] sm:$0xff] %v8147_v63  ;;  %v17877_v48 = vpop.permute.xlu1 %7724  ;;  %7840 = vrot.lane.b32.xlu1 %v7481_v56, %s9645_s9  ;;  %v7815_v25 = vpop.permute.xlu0 %7814 }
 0x559   :  { %v7930_v3 = vsel %vm7890_vm4, %v17502_v49, %v17877_v48  ;;  %v7969_v47 = vsel %vm7890_vm4, %v17483_v31, %v7815_v25  ;;  %v7970_v39 = vsel %vm7890_vm4, %v7815_v25, %v17514_v4  ;;  %v20008_v4 = vld [vmem:[#allocation143_spill] sm:$0xff] }
 0x55a   :  { %v8154_v54 = vadd.f32 %v7930_v3, %v7241_v30  ;;  %v8193_v60 = vadd.f32 %v7969_v47, %v7280_v6  ;;  %v8194_v49 = vadd.f32 %v7970_v39, %v7281_v52  ;;  %v7289_v33 = vmul.f32 %v19944_v36, %v20008_v4  ;;  %v20009_v30 = vld [vmem:[#allocation99_spill] sm:$0xff]  ;;  %v20010_v6 = vld [vmem:[#allocation140_spill] sm:$0xff] }
 0x55b   :  { %v7287_v26 = vmul.f32 %v19944_v36, %v20010_v6  ;;  %v20011_v52 = vld [vmem:[#allocation4_spill] sm:$0xff] }
 0x55c   :  { %8266 = vst [vmem:[%s18358_s4 + $0x138] sm:$0xff] %v8154_v54  ;;  %v17897_v63 = vpop.permute.xlu1 %7740  ;;  %8305 = vst [vmem:[%s18358_s4 + $0x270] sm:$0xff] %v8193_v60  ;;  %7856 = vrot.lane.b32.xlu1 %v7489_v1, %s9645_s9  ;;  %v17911_v22 = vpop.permute.xlu0 %7834  ;;  %v7288_v25 = vmul.f32 %v19944_v36, %v20011_v52 }
 0x55d   :  { %8306 = vst [vmem:[%s18358_s4 + $0x278] sm:$0xff] %v8194_v49  ;;  %v7937_v31 = vsel %vm7890_vm4, %v17573_v15, %v17897_v63  ;;  %v7978_v38 = vsel %vm7890_vm4, %v17582_v11, %v17911_v22  ;;  %v7255_v15 = vmul.f32 %v19961_v27, %v20009_v30 }
 0x55e   :  { %v8161_v56 = vadd.f32 %v7937_v31, %v7248_v2  ;;  %v8202_v12 = vadd.f32 %v7978_v38, %v7289_v33 }
 0x560   :  { %8273 = vst [vmem:[%s18358_s4 + $0x170] sm:$0xff] %v8161_v56  ;;  %v17921_v3 = vpop.permute.xlu1 %7756  ;;  %8314 = vst [vmem:[%s18358_s4 + $0x2b8] sm:$0xff] %v8202_v12  ;;  %v7831_v54 = vpop.permute.xlu0 %7830  ;;  %v20014_v12 = vld [vmem:[#allocation85_spill] sm:$0xff] }
 0x561   :  { %v7944_v57 = vsel %vm7890_vm4, %v17625_v40, %v17921_v3  ;;  %v7976_v39 = vsel %vm7890_vm4, %v17531_v23, %v7831_v54  ;;  %v7977_v1 = vsel %vm7890_vm4, %v7831_v54, %v17582_v11  ;;  %v20012_v40 = vld [vmem:[#allocation60_spill] sm:$0xff]  ;;  %v20013_v11 = vld [vmem:[#allocation66_spill] sm:$0xff]  ;;  %v7269_v30 = vmul.f32 %v19978_v21, %v20014_v12 }
 0x562   :  { %v8168_v47 = vadd.f32 %v7944_v57, %v7255_v15  ;;  %v8200_v60 = vadd.f32 %v7976_v39, %v7287_v26  ;;  %v8201_v49 = vadd.f32 %v7977_v1, %v7288_v25  ;;  %v7262_v0 = vmul.f32 %v19889_v55, %v20012_v40  ;;  %v20015_v54 = vld [vmem:[#allocation178_spill] sm:$0xff]  ;;  %v20017_v1 = vld [vmem:[#allocation37_spill] sm:$0xff] }
 0x563   :  { %v7296_v31 = vmul.f32 %v19956_v50, %v20013_v11  ;;  %v7105_v25 = vsel %vm6769_vm3, %v17679_v17, %v19984_v44  ;;  %v7295_v17 = vmul.f32 %v19956_v50, %v20017_v1  ;;  %v20018_v11 = vld [vmem:[#allocation16_spill] sm:$0xff] }
 0x564   :  { %8280 = vst [vmem:[%s18358_s4 + $0x1a8] sm:$0xff] %v8168_v47  ;;  %v17942_v2 = vpop.permute.xlu1 %7772  ;;  %8312 = vst [vmem:[%s18358_s4 + $0x2a8] sm:$0xff] %v8200_v60  ;;  %v17955_v4 = vpop.permute.xlu0 %7850  ;;  %v7276_v47 = vmul.f32 %v19993_v28, %v20015_v54 }
 0x565   :  { %8313 = vst [vmem:[%s18358_s4 + $0x2b0] sm:$0xff] %v8201_v49  ;;  %v7951_v23 = vsel %vm7890_vm4, %v17692_v13, %v17942_v2  ;;  %v7985_v56 = vsel %vm7890_vm4, %v17637_v41, %v17955_v4 }
 0x566   :  { %v8175_v33 = vadd.f32 %v7951_v23, %v7262_v0  ;;  %v8209_v38 = vadd.f32 %v7985_v56, %v7296_v31  ;;  %v7505_v0 = vmul.f32 %v19794_v32, %v7105_v25  ;;  %v7283_v31 = vmul.f32 %v19934_v29, %v20018_v11  ;;  %v20022_v25 = vld [vmem:[#allocation33_spill] sm:$0xff] }
 0x567   :  { %v7302_v54 = vmul.f32 %v19964_v10, %v20022_v25  ;;  %v20025_v11 = vld [vmem:[#allocation149_spill] sm:$0xff] }
 0x568   :  { %8287 = vst [vmem:[%s18358_s4 + $0x1e0] sm:$0xff] %v8175_v33  ;;  %v17965_v15 = vpop.permute.xlu1 %7788  ;;  %8321 = vst [vmem:[%s18358_s4 + $0x2f0] sm:$0xff] %v8209_v38  ;;  %v7007_v57 = vpop.permute.xlu0 %7006 }
 0x569   :  { %v7958_v13 = vsel %vm7890_vm4, %v17736_v59, %v17965_v15  ;;  %v7104_v26 = vsel %vm6769_vm3, %v7007_v57, %v19981_v43 }
 0x56a   :  { %v8182_v6 = vadd.f32 %v7958_v13, %v7269_v30  ;;  %v7497_v52 = vmul.f32 %v16035_v20, %v7104_v26  ;;  %v20016_v20 = vld [vmem:[#allocation145_spill] sm:$0xff]  ;;  %v20020_v13 = vld [vmem:[#allocation64_spill] sm:$0xff] }
 0x56b   :  { %v7294_v43 = vmul.f32 %v19956_v50, %v20016_v20  ;;  %v7290_v57 = vmul.f32 %v19944_v36, %v20020_v13  ;;  %v20021_v26 = vld [vmem:[#allocation28_spill] sm:$0xff] }
 0x56c   :  { %8294 = vst [vmem:[%s18358_s4 + $0x218] sm:$0xff] %v8182_v6  ;;  %v17984_v39 = vpop.permute.xlu1 %7804  ;;  %7872 = vrot.lane.b32.xlu1 %v7497_v52, %s9645_s9  ;;  %v7847_v44 = vpop.permute.xlu0 %7846  ;;  %v7301_v52 = vmul.f32 %v19964_v10, %v20021_v26 }
 0x56d   :  { %v7965_v59 = vsel %vm7890_vm4, %v17803_v9, %v17984_v39  ;;  %v7983_v49 = vsel %vm7890_vm4, %v17606_v37, %v7847_v44  ;;  %v7984_v40 = vsel %vm7890_vm4, %v7847_v44, %v17637_v41  ;;  %v20019_v37 = vld [vmem:[#allocation65_spill] sm:$0xff]  ;;  %v20023_v44 = vld [vmem:[#allocation142_spill] sm:$0xff] }
 0x56e   :  { %v8189_v60 = vadd.f32 %v7965_v59, %v7276_v47  ;;  %v8207_v23 = vadd.f32 %v7983_v49, %v7294_v43  ;;  %v8208_v9 = vadd.f32 %v7984_v40, %v7295_v17  ;;  %v7303_v41 = vmul.f32 %v19964_v10, %v20019_v37  ;;  %v20024_v40 = vld [vmem:[#allocation169_spill] sm:$0xff] }
 0x570   :  { %8301 = vst [vmem:[%s18358_s4 + $0x250] sm:$0xff] %v8189_v60  ;;  %v18004_v33 = vpop.permute.xlu1 %7820  ;;  %8319 = vst [vmem:[%s18358_s4 + $0x2e0] sm:$0xff] %v8207_v23  ;;  %7888 = vrot.lane.b32.xlu1 %v7505_v0, %s9645_s9  ;;  %v7867_v56 = vpop.permute.xlu0 %7866  ;;  %v7297_v0 = vmul.f32 %v19956_v50, %v20024_v40 }
 0x571   :  { %8320 = vst [vmem:[%s18358_s4 + $0x2e8] sm:$0xff] %v8208_v9  ;;  %v7972_v32 = vsel %vm7890_vm4, %v17848_v61, %v18004_v33  ;;  %v7992_v12 = vsel %vm7890_vm4, %v17700_v35, %v7867_v56 }
 0x572   :  { %v8196_v38 = vadd.f32 %v7972_v32, %v7283_v31  ;;  %v8216_v30 = vadd.f32 %v7992_v12, %v7303_v41  ;;  %v7308_v31 = vmul.f32 %v19974_v18, %v20025_v11  ;;  %v20026_v32 = vld [vmem:[#allocation146_spill] sm:$0xff] }
 0x573   :  { %v7309_v37 = vmul.f32 %v19974_v18, %v20026_v32  ;;  %v9626_v11 = vld [vmem:[%s18358_s4 + $0xa0] sm:$0xff] }
 0x574   :  { %8308 = vst [vmem:[%s18358_s4 + $0x288] sm:$0xff] %v8196_v38  ;;  %v18025_v6 = vpop.permute.xlu1 %7836  ;;  %8328 = vst [vmem:[%s18358_s4 + $0x328] sm:$0xff] %v8216_v30  ;;  %v7863_v47 = vpop.permute.xlu0 %7862 }
 0x575   :  { %v7979_v61 = vsel %vm7890_vm4, %v17911_v22, %v18025_v6  ;;  %v7990_v20 = vsel %vm7890_vm4, %v17653_v7, %v7863_v47  ;;  %v7991_v43 = vsel %vm7890_vm4, %v7863_v47, %v17700_v35  ;;  %v7310_v7 = vmul.f32 %v19974_v18, %v20023_v44 }
 0x576   :  { %v8203_v59 = vadd.f32 %v7979_v61, %v7290_v57  ;;  %v8214_v1 = vadd.f32 %v7990_v20, %v7301_v52  ;;  %v8215_v17 = vadd.f32 %v7991_v43, %v7302_v54  ;;  %v20027_v61 = vld [vmem:[#allocation163_spill] sm:$0xff]  ;;  %v20028_v20 = vld [vmem:[#allocation69_spill] sm:$0xff] }
 0x577   :  { %v7304_v43 = vmul.f32 %v19964_v10, %v20028_v20 }
 0x578   :  { %8315 = vst [vmem:[%s18358_s4 + $0x2c0] sm:$0xff] %v8203_v59  ;;  %v7649_v22 = vpop.permute.xlu1 %7648  ;;  %8326 = vst [vmem:[%s18358_s4 + $0x318] sm:$0xff] %v8214_v1  ;;  %v7883_v60 = vpop.permute.xlu0 %7882 }
 0x579   :  { %8327 = vst [vmem:[%s18358_s4 + $0x320] sm:$0xff] %v8215_v17  ;;  %v7999_v35 = vsel %vm7890_vm4, %v17746_v5, %v7883_v60 }
 0x57a   :  { %v8223_v49 = vadd.f32 %v7999_v35, %v7310_v7 }
 0x57c   :  { %v18056_v23 = vpop.permute.xlu1 %7852  ;;  %8335 = vst [vmem:[%s18358_s4 + $0x360] sm:$0xff] %v8223_v49  ;;  %v7879_v41 = vpop.permute.xlu0 %7878 }
 0x57d   :  { %v7986_v9 = vsel %vm7890_vm4, %v17955_v4, %v18056_v23  ;;  %v7997_v12 = vsel %vm7890_vm4, %v17720_v16, %v7879_v41  ;;  %v7998_v30 = vsel %vm7890_vm4, %v7879_v41, %v17746_v5  ;;  %v7207_v16 = vmul.f32 %v19983_v8, %v20027_v61  ;;  %v9624_v5 = vld [vmem:[%s18358_s4 + $0x30] sm:$0xff] }
 0x57e   :  { %v8210_v38 = vadd.f32 %v7986_v9, %v7297_v0  ;;  %v8221_v13 = vadd.f32 %v7997_v12, %v7308_v31  ;;  %v8222_v57 = vadd.f32 %v7998_v30, %v7309_v37  ;;  %v7208_v26 = vmul.f32 %v9624_v5, %v19983_v8  ;;  %v20031_v30 = vld [vmem:[#allocation39_spill] sm:$0xff] }
 0x57f   :  { %v7222_v31 = vmul.f32 %v9626_v11, %v19995_v19 }
 0x580   :  { %8322 = vst [vmem:[%s18358_s4 + $0x2f8] sm:$0xff] %v8210_v38  ;;  %v7665_v4 = vpop.permute.xlu1 %7664  ;;  %8333 = vst [vmem:[%s18358_s4 + $0x350] sm:$0xff] %v8221_v13  ;;  %v7647_v52 = vpop.permute.xlu0 %7646  ;;  %v7311_v13 = vmul.f32 %v19974_v18, %v20031_v30 }
 0x581   :  { %8334 = vst [vmem:[%s18358_s4 + $0x358] sm:$0xff] %v8222_v57  ;;  %v7896_v25 = vsel %vm7890_vm4, %v17764_v51, %v7647_v52  ;;  %v7897_v54 = vsel %vm7890_vm4, %v7647_v52, %v7649_v22  ;;  %v20029_v51 = vld [vmem:[#allocation95_spill] sm:$0xff]  ;;  %v9627_v52 = vld [vmem:[%s18358_s4 + $0xd8] sm:$0xff] }
 0x582   :  { %v8120_v47 = vadd.f32 %v7896_v25, %v7207_v16  ;;  %v8121_v59 = vadd.f32 %v7897_v54, %v7208_v26  ;;  %v7214_v17 = vmul.f32 %v19990_v53, %v20029_v51  ;;  %v9625_v22 = vld [vmem:[%s18358_s4 + $0x68] sm:$0xff]  ;;  %v7229_v25 = vmul.f32 %v9627_v52, %v19838_v34 }
 0x583   :  { %v7215_v44 = vmul.f32 %v9625_v22, %v19990_v53  ;;  %v20030_v53 = vld [vmem:[#allocation19_spill] sm:$0xff] }
 0x584   :  { %v18092_v1 = vpop.permute.xlu1 %7868  ;;  %8232 = vst [vmem:[%s18358_s4 + $0x28] sm:$0xff] %v8120_v47  ;;  %8233 = vst.msk [vmem:[%s18358_s4 + $0x30] sm:$0xff] %vm1760_vm1, %v8121_v59  ;;  %v7663_v7 = vpop.permute.xlu0 %7662  ;;  %v20033_v47 = vld [vmem:[#allocation168_spill] sm:$0xff] }
 0x585   :  { %v7993_v8 = vsel %vm7890_vm4, %v7867_v56, %v18092_v1  ;;  %v7903_v49 = vsel %vm7890_vm4, %v17789_v46, %v7663_v7  ;;  %v7904_v40 = vsel %vm7890_vm4, %v7663_v7, %v7665_v4  ;;  %v7221_v46 = vmul.f32 %v19995_v19, %v20030_v53 }
 0x586   :  { %v8217_v35 = vadd.f32 %v7993_v8, %v7304_v43  ;;  %v8127_v0 = vadd.f32 %v7903_v49, %v7214_v17  ;;  %v8128_v9 = vadd.f32 %v7904_v40, %v7215_v44 }
 0x588   :  { %8329 = vst [vmem:[%s18358_s4 + $0x330] sm:$0xff] %v8217_v35  ;;  %v7681_v56 = vpop.permute.xlu1 %7680  ;;  %8239 = vst [vmem:[%s18358_s4 + $0x60] sm:$0xff] %v8127_v0  ;;  %v7679_v32 = vpop.permute.xlu0 %7678 }
 0x589   :  { %8240 = vst.msk [vmem:[%s18358_s4 + $0x68] sm:$0xff] %vm1760_vm1, %v8128_v9  ;;  %v7910_v37 = vsel %vm7890_vm4, %v17814_v58, %v7679_v32  ;;  %v7911_v41 = vsel %vm7890_vm4, %v7679_v32, %v7681_v56  ;;  %v20032_v58 = vld [vmem:[#allocation162_spill] sm:$0xff] }
 0x58a   :  { %v8134_v38 = vadd.f32 %v7910_v37, %v7221_v46  ;;  %v8135_v12 = vadd.f32 %v7911_v41, %v7222_v31  ;;  %v7228_v4 = vmul.f32 %v19838_v34, %v20032_v58  ;;  %v9628_v34 = vld [vmem:[%s18358_s4 + $0x110] sm:$0xff] }
 0x58b   :  { %v7236_v51 = vmul.f32 %v9628_v34, %v19925_v14 }
 0x58c   :  { %v18133_v57 = vpop.permute.xlu1 %7884  ;;  %8246 = vst [vmem:[%s18358_s4 + $0x98] sm:$0xff] %v8134_v38  ;;  %8247 = vst.msk [vmem:[%s18358_s4 + $0xa0] sm:$0xff] %vm1760_vm1, %v8135_v12  ;;  %v7695_v61 = vpop.permute.xlu0 %7694 }
 0x58d   :  { %v8000_v19 = vsel %vm7890_vm4, %v7883_v60, %v18133_v57  ;;  %v7917_v5 = vsel %vm7890_vm4, %v17835_v45, %v7695_v61  ;;  %v7235_v45 = vmul.f32 %v19925_v14, %v20033_v47  ;;  %v9629_v14 = vld [vmem:[%s18358_s4 + $0x148] sm:$0xff] }
 0x58e   :  { %v8224_v16 = vadd.f32 %v8000_v19, %v7311_v13  ;;  %v8141_v26 = vadd.f32 %v7917_v5, %v7228_v4  ;;  %v7243_v0 = vmul.f32 %v9629_v14, %v19940_v24 }
 0x590   :  { %8336 = vst [vmem:[%s18358_s4 + $0x368] sm:$0xff] %v8224_v16  ;;  %v7697_v60 = vpop.permute.xlu1 %7696  ;;  %8253 = vst [vmem:[%s18358_s4 + $0xd0] sm:$0xff] %v8141_v26  ;;  %v7711_v59 = vpop.permute.xlu0 %7710 }
 0x591   :  { %v7918_v54 = vsel %vm7890_vm4, %v7695_v61, %v7697_v60  ;;  %v7924_v43 = vsel %vm7890_vm4, %v17858_v42, %v7711_v59  ;;  %v20034_v42 = vld [vmem:[#allocation123_spill] sm:$0xff] }
 0x592   :  { %v8142_v20 = vadd.f32 %v7918_v54, %v7229_v25  ;;  %v8148_v8 = vadd.f32 %v7924_v43, %v7235_v45  ;;  %v7242_v44 = vmul.f32 %v19940_v24, %v20034_v42  ;;  %v9630_v24 = vld [vmem:[%s18358_s4 + $0x180] sm:$0xff] }
 0x593   :  { %v7250_v37 = vmul.f32 %v9630_v24, %v19868_v62 }
 0x594   :  { %8254 = vst.msk [vmem:[%s18358_s4 + $0xd8] sm:$0xff] %vm1760_vm1, %v8142_v20  ;;  %v7713_v17 = vpop.permute.xlu1 %7712  ;;  %8260 = vst [vmem:[%s18358_s4 + $0x108] sm:$0xff] %v8148_v8  ;;  %v7727_v7 = vpop.permute.xlu0 %7726 }
 0x595   :  { %v7925_v22 = vsel %vm7890_vm4, %v7711_v59, %v7713_v17  ;;  %v7931_v49 = vsel %vm7890_vm4, %v17877_v48, %v7727_v7  ;;  %v20035_v48 = vld [vmem:[#allocation173_spill] sm:$0xff] }
 0x596   :  { %v8149_v35 = vadd.f32 %v7925_v22, %v7236_v51  ;;  %v8155_v40 = vadd.f32 %v7931_v49, %v7242_v44  ;;  %v7249_v53 = vmul.f32 %v19868_v62, %v20035_v48  ;;  %v9631_v62 = vld [vmem:[%s18358_s4 + $0x1b8] sm:$0xff] }
 0x597   :  { %v7257_v4 = vmul.f32 %v9631_v62, %v19961_v27 }
 0x598   :  { %8261 = vst.msk [vmem:[%s18358_s4 + $0x110] sm:$0xff] %vm1760_vm1, %v8149_v35  ;;  %v7729_v9 = vpop.permute.xlu1 %7728  ;;  %8267 = vst [vmem:[%s18358_s4 + $0x140] sm:$0xff] %v8155_v40  ;;  %v7743_v46 = vpop.permute.xlu0 %7742 }
 0x599   :  { %v7932_v56 = vsel %vm7890_vm4, %v7727_v7, %v7729_v9  ;;  %v7938_v31 = vsel %vm7890_vm4, %v17897_v63, %v7743_v46  ;;  %v20036_v63 = vld [vmem:[#allocation55_spill] sm:$0xff] }
 0x59a   :  { %v8156_v11 = vadd.f32 %v7932_v56, %v7243_v0  ;;  %v8162_v32 = vadd.f32 %v7938_v31, %v7249_v53  ;;  %v7256_v12 = vmul.f32 %v19961_v27, %v20036_v63  ;;  %v9632_v27 = vld [vmem:[%s18358_s4 + $0x1f0] sm:$0xff] }
 0x59b   :  { %v7264_v54 = vmul.f32 %v9632_v27, %v19889_v55  ;;  %v9637_v27 = vld [vmem:[%s18358_s4 + $0x308] sm:$0xff] }
 0x59c   :  { %8268 = vst.msk [vmem:[%s18358_s4 + $0x148] sm:$0xff] %vm1760_vm1, %v8156_v11  ;;  %v7745_v41 = vpop.permute.xlu1 %7744  ;;  %8274 = vst [vmem:[%s18358_s4 + $0x178] sm:$0xff] %v8162_v32  ;;  %v7759_v30 = vpop.permute.xlu0 %7758  ;;  %v20042_v11 = vld [vmem:[#allocation175_spill] sm:$0xff] }
 0x59d   :  { %v7939_v38 = vsel %vm7890_vm4, %v7743_v46, %v7745_v41  ;;  %v7945_v19 = vsel %vm7890_vm4, %v17921_v3, %v7759_v30  ;;  %v20037_v3 = vld [vmem:[#allocation78_spill] sm:$0xff] }
 0x59e   :  { %v8163_v13 = vadd.f32 %v7939_v38, %v7250_v37  ;;  %v8169_v58 = vadd.f32 %v7945_v19, %v7256_v12  ;;  %v7263_v5 = vmul.f32 %v19889_v55, %v20037_v3  ;;  %v9633_v55 = vld [vmem:[%s18358_s4 + $0x228] sm:$0xff]  ;;  %v9634_v37 = vld [vmem:[%s18358_s4 + $0x260] sm:$0xff]  ;;  %v9635_v19 = vld [vmem:[%s18358_s4 + $0x298] sm:$0xff] }
 0x59f   :  { %v7271_v51 = vmul.f32 %v9633_v55, %v19978_v21  ;;  %v7278_v41 = vmul.f32 %v9634_v37, %v19993_v28  ;;  %v20043_v12 = vld [vmem:[#allocation83_spill] sm:$0xff] }
 0x5a0   :  { %8275 = vst.msk [vmem:[%s18358_s4 + $0x180] sm:$0xff] %vm1760_vm1, %v8163_v13  ;;  %v7761_v61 = vpop.permute.xlu1 %7760  ;;  %8281 = vst [vmem:[%s18358_s4 + $0x1b0] sm:$0xff] %v8169_v58  ;;  %v7775_v26 = vpop.permute.xlu0 %7774  ;;  %v7285_v58 = vmul.f32 %v9635_v19, %v19934_v29 }
 0x5a1   :  { %v7946_v16 = vsel %vm7890_vm4, %v7759_v30, %v7761_v61  ;;  %v7952_v25 = vsel %vm7890_vm4, %v17942_v2, %v7775_v26  ;;  %v20038_v2 = vld [vmem:[#allocation177_spill] sm:$0xff]  ;;  %v7305_v30 = vmul.f32 %v19964_v10, %v20043_v12  ;;  %v20044_v61 = vld [vmem:[#allocation68_spill] sm:$0xff] }
 0x5a2   :  { %v8170_v52 = vadd.f32 %v7946_v16, %v7257_v4  ;;  %v8176_v60 = vadd.f32 %v7952_v25, %v7263_v5  ;;  %v7270_v59 = vmul.f32 %v19978_v21, %v20038_v2  ;;  %v20040_v21 = vld [vmem:[#allocation166_spill] sm:$0xff]  ;;  %v7312_v16 = vmul.f32 %v19974_v18, %v20044_v61 }
 0x5a3   :  { %v7284_v40 = vmul.f32 %v19934_v29, %v20040_v21 }
 0x5a4   :  { %8282 = vst.msk [vmem:[%s18358_s4 + $0x1b8] sm:$0xff] %vm1760_vm1, %v8170_v52  ;;  %v7777_v47 = vpop.permute.xlu1 %7776  ;;  %8288 = vst [vmem:[%s18358_s4 + $0x1e8] sm:$0xff] %v8176_v60  ;;  %v7791_v20 = vpop.permute.xlu0 %7790 }
 0x5a5   :  { %v7953_v45 = vsel %vm7890_vm4, %v7775_v26, %v7777_v47  ;;  %v7959_v8 = vsel %vm7890_vm4, %v17965_v15, %v7791_v20  ;;  %v20039_v15 = vld [vmem:[#allocation51_spill] sm:$0xff]  ;;  %v9636_v26 = vld [vmem:[%s18358_s4 + $0x2d0] sm:$0xff] }
 0x5a6   :  { %v8177_v43 = vadd.f32 %v7953_v45, %v7264_v54  ;;  %v8183_v34 = vadd.f32 %v7959_v8, %v7270_v59  ;;  %v7277_v42 = vmul.f32 %v19993_v28, %v20039_v15  ;;  %v7292_v52 = vmul.f32 %v9636_v26, %v19944_v36 }
 0x5a7   :  { %v7299_v54 = vmul.f32 %v9637_v27, %v19956_v50 }
 0x5a8   :  { %8289 = vst.msk [vmem:[%s18358_s4 + $0x1f0] sm:$0xff] %vm1760_vm1, %v8177_v43  ;;  %v7793_v17 = vpop.permute.xlu1 %7792  ;;  %8295 = vst [vmem:[%s18358_s4 + $0x220] sm:$0xff] %v8183_v34  ;;  %v7807_v44 = vpop.permute.xlu0 %7806 }
 0x5a9   :  { %v7960_v22 = vsel %vm7890_vm4, %v7791_v20, %v7793_v17  ;;  %v7966_v35 = vsel %vm7890_vm4, %v17984_v39, %v7807_v44  ;;  %v20041_v39 = vld [vmem:[#allocation139_spill] sm:$0xff] }
 0x5aa   :  { %v8184_v7 = vadd.f32 %v7960_v22, %v7271_v51  ;;  %v8190_v49 = vadd.f32 %v7966_v35, %v7277_v42  ;;  %v7291_v56 = vmul.f32 %v19944_v36, %v20041_v39  ;;  %v9638_v36 = vld [vmem:[%s18358_s4 + $0x340] sm:$0xff] }
 0x5ab   :  { %v7306_v59 = vmul.f32 %v9638_v36, %v19964_v10 }
 0x5ac   :  { %8296 = vst.msk [vmem:[%s18358_s4 + $0x228] sm:$0xff] %vm1760_vm1, %v8184_v7  ;;  %8302 = vst [vmem:[%s18358_s4 + $0x258] sm:$0xff] %v8190_v49  ;;  %v7823_v14 = vpop.permute.xlu0 %7822 }
 0x5ad   :  { %v7973_v0 = vsel %vm7890_vm4, %v18004_v33, %v7823_v14  ;;  %v7298_v33 = vmul.f32 %v19956_v50, %v20042_v11  ;;  %v9639_v50 = vld [vmem:[%s18358_s4 + $0x378] sm:$0xff] }
 0x5ae   :  { %v8197_v9 = vadd.f32 %v7973_v0, %v7284_v40  ;;  %v7313_v34 = vmul.f32 %v9639_v50, %v19974_v18 }
 0x5b0   :  { %8309 = vst [vmem:[%s18358_s4 + $0x290] sm:$0xff] %v8197_v9  ;;  %v7839_v48 = vpop.permute.xlu0 %7838 }
 0x5b1   :  { %v7980_v53 = vsel %vm7890_vm4, %v18025_v6, %v7839_v48 }
 0x5b2   :  { %v8204_v46 = vadd.f32 %v7980_v53, %v7291_v56 }
 0x5b4   :  { %8316 = vst [vmem:[%s18358_s4 + $0x2c8] sm:$0xff] %v8204_v46  ;;  %v7855_v31 = vpop.permute.xlu0 %7854 }
 0x5b5   :  { %v7987_v32 = vsel %vm7890_vm4, %v18056_v23, %v7855_v31 }
 0x5b6   :  { %v8211_v24 = vadd.f32 %v7987_v32, %v7298_v33  ;;  %v7809_v6 = vpop.permute.xlu1 %7808 }
 0x5b7   :  { %v7967_v38 = vsel %vm7890_vm4, %v7807_v44, %v7809_v6 }
 0x5b8   :  { %8323 = vst [vmem:[%s18358_s4 + $0x300] sm:$0xff] %v8211_v24  ;;  %v8191_v63 = vadd.f32 %v7967_v38, %v7278_v41  ;;  %v7871_v13 = vpop.permute.xlu0 %7870 }
 0x5b9   :  { %v7994_v23 = vsel %vm7890_vm4, %v18092_v1, %v7871_v13 }
 0x5ba   :  { %8303 = vst.msk [vmem:[%s18358_s4 + $0x260] sm:$0xff] %vm1760_vm1, %v8191_v63  ;;  %v8218_v28 = vadd.f32 %v7994_v23, %v7305_v30  ;;  %v7825_v62 = vpop.permute.xlu1 %7824 }
 0x5bb   :  { %v7974_v4 = vsel %vm7890_vm4, %v7823_v14, %v7825_v62 }
 0x5bc   :  { %8330 = vst [vmem:[%s18358_s4 + $0x338] sm:$0xff] %v8218_v28  ;;  %v8198_v1 = vadd.f32 %v7974_v4, %v7285_v58  ;;  %v7887_v3 = vpop.permute.xlu0 %7886 }
 0x5bd   :  { %v8001_v5 = vsel %vm7890_vm4, %v18133_v57, %v7887_v3 }
 0x5be   :  { %8310 = vst.msk [vmem:[%s18358_s4 + $0x298] sm:$0xff] %vm1760_vm1, %v8198_v1  ;;  %v8225_v29 = vadd.f32 %v8001_v5, %v7312_v16 }
 0x5c0   :  { %8337 = vst [vmem:[%s18358_s4 + $0x370] sm:$0xff] %v8225_v29 }
 0x5ca   :  { %v7841_v25 = vpop.permute.xlu1 %7840 }
 0x5cb   :  { %v7981_v60 = vsel %vm7890_vm4, %v7839_v48, %v7841_v25 }
 0x5cc   :  { %v8205_v57 = vadd.f32 %v7981_v60, %v7292_v52 }
 0x5ce   :  { %8317 = vst.msk [vmem:[%s18358_s4 + $0x2d0] sm:$0xff] %vm1760_vm1, %v8205_v57  ;;  %v7857_v47 = vpop.permute.xlu1 %7856 }
 0x5cf   :  { %v7988_v45 = vsel %vm7890_vm4, %v7855_v31, %v7857_v47 }
 0x5d0   :  { %v8212_v2 = vadd.f32 %v7988_v45, %v7299_v54 }
 0x5d2   :  { %8324 = vst.msk [vmem:[%s18358_s4 + $0x308] sm:$0xff] %vm1760_vm1, %v8212_v2 }
 0x5de   :  { %v7873_v20 = vpop.permute.xlu1 %7872 }
 0x5df   :  { %v7995_v43 = vsel %vm7890_vm4, %v7871_v13, %v7873_v20 }
 0x5e0   :  { %v8219_v8 = vadd.f32 %v7995_v43, %v7306_v59 }
 0x5e2   :  { %8331 = vst.msk [vmem:[%s18358_s4 + $0x340] sm:$0xff] %vm1760_vm1, %v8219_v8  ;;  %v7889_v55 = vpop.permute.xlu1 %7888 }
 0x5e3   :  { %v8002_v51 = vsel %vm7890_vm4, %v7887_v3, %v7889_v55 }
 0x5e4   :  { %v8226_v17 = vadd.f32 %v8002_v51, %v7313_v34 }
 0x5e6   :  { %8338 = vst.msk [vmem:[%s18358_s4 + $0x378] sm:$0xff] %vm1760_vm1, %v8226_v17 }

</bundles_post_ra>
